<compile_context>
chip_gen: v7x
topology: tpu7x:2x2x1
jax: 0.10.0
libtpu: 0.0.40
codegen_flags: <defaults>
</compile_context>

<pallas_src>
import functools
import math

import jax
import jax.numpy as jnp
from jax.experimental import pallas as pl
from jax.experimental.pallas import tpu as pltpu

EPS = 1e-5
LANES = 128                      # channel padding target (vreg lane width)
TILE_M = 512                     # row tile for GEMM / BN-apply passes
VMEM_LIMIT = 32 * 1024 * 1024    # explicit scoped-VMEM budget (safe on v5e/v6e/v7x)


def _round_up(x, m):
    return (x + m - 1) // m * m


def _pick_tile(m):
    tm = min(TILE_M, _round_up(m, 8))
    return tm, _round_up(m, tm)


def _row_spec(tm, c, col_block=0):
    """Row-tiled spec; col_block selects a 128-lane column block of a wider array."""
    return pl.BlockSpec((tm, c), lambda i, cb=col_block: (i, cb))


def _ss_spec(c):
    """Per-layer (scale, shift) rows, resident across the grid."""
    return pl.BlockSpec((2, c), lambda i: (0, 0))


# ----------------------------------------------------------------------------
# Pallas kernels
# ----------------------------------------------------------------------------
def _gemm_stats_kernel(cols_ref, w_ref, y_ref, stats_ref):
    """One M row tile: y = cols @ w (bf16 x bf16 -> f32 on the MXU), stored bf16.
    Per-tile partial per-channel sum / sum-of-squares are written to this tile's own
    stats block, so the grid axis carries no cross-iteration state ("parallel")."""
    y = jnp.dot(cols_ref[...], w_ref[...], preferred_element_type=jnp.float32)
    y_ref[...] = y.astype(y_ref.dtype)
    stats_ref[0:1, :] = jnp.sum(y, axis=0, keepdims=True)
    stats_ref[1:2, :] = jnp.sum(y * y, axis=0, keepdims=True)


def _bn_relu_kernel(y_ref, ss_ref, o_ref):
    v = y_ref[...].astype(jnp.float32) * ss_ref[0:1, :] + ss_ref[1:2, :]
    o_ref[...] = jnp.maximum(v, 0.0).astype(o_ref.dtype)


def _bn_add_relu_kernel(y_ref, ss_ref, res_ref, o_ref):
    v = (y_ref[...].astype(jnp.float32) * ss_ref[0:1, :] + ss_ref[1:2, :]
         + res_ref[...].astype(jnp.float32))
    o_ref[...] = jnp.maximum(v, 0.0).astype(o_ref.dtype)


def _bn2_add_relu_kernel(y_ref, ss_ref, yd_ref, ssd_ref, o_ref):
    """Block tail with downsample: relu(BN(conv2) + BN(downsample))."""
    v = (y_ref[...].astype(jnp.float32) * ss_ref[0:1, :] + ss_ref[1:2, :]
         + yd_ref[...].astype(jnp.float32) * ssd_ref[0:1, :] + ssd_ref[1:2, :])
    o_ref[...] = jnp.maximum(v, 0.0).astype(o_ref.dtype)


def _avgpool_fc_kernel(x_ref, w_ref, b_ref, o_ref, acc_ref, *, inv_hw):
    @pl.when(pl.program_id(0) == 0)
    def _():
        acc_ref[...] = jnp.zeros_like(acc_ref)

    acc_ref[...] += jnp.sum(x_ref[...].astype(jnp.float32), axis=1)

    @pl.when(pl.program_id(0) == pl.num_programs(0) - 1)
    def _():
        pooled = acc_ref[...] * inv_hw
        o_ref[...] = jnp.dot(pooled, w_ref[...],
                             preferred_element_type=jnp.float32) + b_ref[...]


# ----------------------------------------------------------------------------
# Glue: im2col (patch extraction).  Padding/strided slicing only.
# ----------------------------------------------------------------------------
# TODO(synk): move this into the GEMM kernel as kh*kw shifted matmuls on NHWC tiles.
def _im2col(x, kh, kw, stride, padding, dilation):
    n, h, w, c = x.shape
    xp = jnp.pad(x, ((0, 0), (padding, padding), (padding, padding), (0, 0)))
    ho = (h + 2 * padding - dilation * (kh - 1) - 1) // stride + 1
    wo = (w + 2 * padding - dilation * (kw - 1) - 1) // stride + 1
    cols = []
    for i in range(kh):
        for j in range(kw):
            r0, c0 = i * dilation, j * dilation
            cols.append(xp[:, r0:r0 + stride * (ho - 1) + 1:stride,
                              c0:c0 + stride * (wo - 1) + 1:stride, :])
    cols = jnp.concatenate(cols, axis=-1)
    return cols.reshape(n * ho * wo, kh * kw * c), (n, ho, wo)


# ----------------------------------------------------------------------------
# pallas_call wrappers
# ----------------------------------------------------------------------------
def conv_gemm_stats(x_act, w_flat, *, kh, kw, stride, padding, dilation):
    """Pass 1: conv as a row-tiled GEMM + per-tile partial channel statistics."""
    cols, (n, ho, wo) = _im2col(x_act, kh, kw, stride, padding, dilation)
    m, k = cols.shape
    kpad, cpad = w_flat.shape
    tm, mp = _pick_tile(m)
    if mp > m or kpad > k:
        cols = jnp.pad(cols, ((0, mp - m), (0, kpad - k)))
    num_tiles = mp // tm

    y, partials = pl.pallas_call(
        _gemm_stats_kernel,
        grid=(num_tiles,),
        in_specs=[
            pl.BlockSpec((tm, kpad), lambda i: (i, 0)),      # im2col columns (bf16)
            pl.BlockSpec((kpad, cpad), lambda i: (0, 0)),    # weights, resident
        ],
        out_specs=(
            pl.BlockSpec((tm, cpad), lambda i: (i, 0)),          # conv output (bf16)
            pl.BlockSpec((None, 2, cpad), lambda i: (i, 0, 0)),  # per-tile stats (f32)
        ),
        out_shape=(
            jax.ShapeDtypeStruct((mp, cpad), jnp.bfloat16),
            jax.ShapeDtypeStruct((num_tiles, 2, cpad), jnp.float32),
        ),
        compiler_params=pltpu.CompilerParams(
            dimension_semantics=("parallel",),      # no cross-tile state -> megacore OK
            vmem_limit_bytes=VMEM_LIMIT,
        ),
    )(cols, w_flat)
    stats = jnp.sum(partials, axis=0)               # tiny (2, cpad) reduction in XLA
    return y, stats, (n, ho, wo, m, mp, tm, cpad)


def _fold_bn(stats, gb, count):
    """Fold batch stats + (gamma, beta) into per-channel (scale, shift); once per layer."""
    inv = 1.0 / count
    mean = stats[0] * inv
    # TODO(synk): E[y^2]-mean^2 can cancel in f32 for large |mean|; switch to centered
    # partial sums if BN precision ever becomes an issue.
    var = jnp.maximum(stats[1] * inv - mean * mean, 0.0)
    scale = gb[0] * jax.lax.rsqrt(var + EPS)
    shift = gb[1] - mean * scale
    return jnp.stack([scale, shift]).astype(jnp.float32)    # (2, C)


def _apply_call(kernel_fn, inputs, meta):
    """Pass 2: tiled BN-apply epilogue.  inputs: list of (array, BlockSpec)."""
    n, ho, wo, m, mp, tm, _ = meta
    args = [a for a, _ in inputs]
    in_specs = [s for _, s in inputs]
    out = pl.pallas_call(
        kernel_fn,
        grid=(mp // tm,),
        in_specs=in_specs,
        out_specs=pl.BlockSpec((tm, LANES), lambda i: (i, 0)),
        out_shape=jax.ShapeDtypeStruct((mp, LANES), jnp.bfloat16),
        compiler_params=pltpu.CompilerParams(
            dimension_semantics=("parallel",),
            vmem_limit_bytes=VMEM_LIMIT,
        ),
    )(*args)
    if mp > m:
        out = out[:m]
    return out.reshape(n, ho, wo, LANES)


def bn_relu(y, ss, meta, col_block=0):
    tm = meta[5]
    return _apply_call(
        _bn_relu_kernel,
        [(y, _row_spec(tm, LANES, col_block)), (ss, _ss_spec(LANES))],
        meta)


def bn_add_relu(y, ss, res_act, meta):
    n, ho, wo, m, mp, tm, _ = meta
    res = res_act.reshape(m, LANES)
    if mp > m:
        res = jnp.pad(res, ((0, mp - m), (0, 0)))
    return _apply_call(
        _bn_add_relu_kernel,
        [(y, _row_spec(tm, LANES, 0)), (ss, _ss_spec(LANES)),
         (res, _row_spec(tm, LANES, 0))],
        meta)


def bn2_add_relu(y2, ss2, y_fused, ssd, meta):
    """Downsample block tail: y_fused's column block 1 holds the 1x1 downsample conv."""
    tm = meta[5]
    return _apply_call(
        _bn2_add_relu_kernel,
        [(y2, _row_spec(tm, LANES, 0)), (ss2, _ss_spec(LANES)),
         (y_fused, _row_spec(tm, LANES, 1)), (ssd, _ss_spec(LANES))],
        meta)


def avgpool_fc(x_act, fc_w, fc_b, num_classes):
    n, h, w, c = x_act.shape
    hw = h * w
    t_hw = hw if hw <= 512 else 512
    hwp = _round_up(hw, t_hw)
    x3 = x_act.reshape(n, hw, c)
    if hwp > hw:
        x3 = jnp.pad(x3, ((0, 0), (0, hwp - hw), (0, 0)))
    cls_pad = fc_w.shape[1]
    out = pl.pallas_call(
        functools.partial(_avgpool_fc_kernel, inv_hw=1.0 / hw),
        grid=(hwp // t_hw,),
        in_specs=[
            pl.BlockSpec((n, t_hw, c), lambda i: (0, i, 0)),
            pl.BlockSpec(fc_w.shape, lambda i: (0, 0)),
            pl.BlockSpec(fc_b.shape, lambda i: (0, 0)),
        ],
        out_specs=pl.BlockSpec((n, cls_pad), lambda i: (0, 0)),
        out_shape=jax.ShapeDtypeStruct((n, cls_pad), jnp.float32),
        scratch_shapes=[pltpu.VMEM((n, c), jnp.float32)],
        compiler_params=pltpu.CompilerParams(
            dimension_semantics=("arbitrary",),     # resident accumulator over HW tiles
            vmem_limit_bytes=VMEM_LIMIT,
        ),
    )(x3, fc_w, fc_b)
    return out[:, :num_classes]


# ----------------------------------------------------------------------------
# Deterministic parameter construction mirroring DRN.__init__ (arch='D')
# ----------------------------------------------------------------------------
class _KeyGen:
    def __init__(self, key):
        self._key = key

    def next(self):
        self._key, sub = jax.random.split(self._key)
        return sub


def _make_conv_param(gen, kh, kw, cin_real, cout_real, cin_store):
    """Flattened, channel-padded (lane-dense), bf16 HWIO weight + (gamma, beta) rows."""
    std = math.sqrt(2.0 / (kh * kw * cout_real))        # PyTorch: normal(0, sqrt(2/n))
    w = std * jax.random.normal(gen.next(), (kh, kw, cin_real, cout_real), jnp.float32)
    cpad = LANES
    w_full = jnp.zeros((kh, kw, cin_store, cpad), jnp.float32)
    w_full = w_full.at[:, :, :cin_real, :cout_real].set(w)
    k = kh * kw * cin_store
    kpad = _round_up(k, LANES)
    w_flat = jnp.pad(w_full.reshape(k, cpad), ((0, kpad - k), (0, 0))).astype(jnp.bfloat16)
    gb = jnp.zeros((2, cpad), jnp.float32).at[0, :cout_real].set(1.0)   # gamma=1, beta=0
    return {"w": w_flat, "gb": gb, "kh": kh, "kw": kw}


def _make_fused_conv1_ds(gen, cin_real, cout_real, cin_store):
    """conv1 (3x3) and the 1x1 downsample fused into one GEMM weight of 256 lanes.
    The centre tap of a pad=dil, dilation=dil 3x3 conv samples x[oh*s, ow*s], which is
    exactly what the pad=0, stride=s 1x1 downsample reads, so the 1x1 weight is placed
    at the centre-tap K rows, output lanes [128, 256)."""
    std1 = math.sqrt(2.0 / (3 * 3 * cout_real))
    w1 = std1 * jax.random.normal(gen.next(), (3, 3, cin_real, cout_real), jnp.float32)
    stdd = math.sqrt(2.0 / (1 * 1 * cout_real))
    wd = stdd * jax.random.normal(gen.next(), (cin_real, cout_real), jnp.float32)
    cpad2 = 2 * LANES
    w_full = jnp.zeros((3, 3, cin_store, cpad2), jnp.float32)
    w_full = w_full.at[:, :, :cin_real, :cout_real].set(w1)
    w_full = w_full.at[1, 1, :cin_real, LANES:LANES + cout_real].set(wd)
    k = 9 * cin_store
    kpad = _round_up(k, LANES)
    w_flat = jnp.pad(w_full.reshape(k, cpad2), ((0, kpad - k), (0, 0))).astype(jnp.bfloat16)
    gb = jnp.zeros((2, cpad2), jnp.float32)
    gb = gb.at[0, :cout_real].set(1.0)                   # BN1 gamma
    gb = gb.at[0, LANES:LANES + cout_real].set(1.0)      # downsample-BN gamma
    return {"w": w_flat, "gb": gb, "kh": 3, "kw": 3}


def build_drn_d(key, channels, layers, num_classes):
    assert max(channels) <= LANES, "this kernel packs channels into 128 lanes"
    gen = _KeyGen(key)
    inplanes = channels[0]
    stages = []

    # layer0: 7x7 conv on the raw 3-channel image, BN, ReLU
    stages.append(("conv", [{"p": _make_conv_param(gen, 7, 7, 3, channels[0], 3),
                             "stride": 1, "pad": 3, "dil": 1}]))

    def make_conv_layers(cout, convs, stride=1, dilation=1):
        nonlocal inplanes
        blocks = []
        for i in range(convs):
            blocks.append({"p": _make_conv_param(gen, 3, 3, inplanes, cout, LANES),
                           "stride": stride if i == 0 else 1,
                           "pad": dilation, "dil": dilation})
            inplanes = cout
        return ("conv", blocks)

    def make_layer(planes, nblocks, stride=1, dilation=1, new_level=True, residual=True):
        nonlocal inplanes
        blocks = []
        first_dil = (1, 1) if dilation == 1 else \
            ((dilation // 2 if new_level else dilation), dilation)
        for i in range(nblocks):
            if i == 0:
                s, dil = stride, first_dil
                need_ds = residual and (stride != 1 or inplanes != planes)
            else:
                s, dil, need_ds = 1, (dilation, dilation), False
            if need_ds:
                fused, conv1 = _make_fused_conv1_ds(gen, inplanes, planes, LANES), None
            else:
                fused, conv1 = None, _make_conv_param(gen, 3, 3, inplanes, planes, LANES)
            blocks.append({"conv1": conv1, "fused": fused,
                           "conv2": _make_conv_param(gen, 3, 3, planes, planes, LANES),
                           "stride": s, "dil": dil, "residual": residual})
            inplanes = planes
        return ("res", blocks)

    stages.append(make_conv_layers(channels[0], layers[0], stride=1))               # layer1
    stages.append(make_conv_layers(channels[1], layers[1], stride=2))               # layer2
    stages.append(make_layer(channels[2], layers[2], stride=2))                     # layer3
    stages.append(make_layer(channels[3], layers[3], stride=2))                     # layer4
    stages.append(make_layer(channels[4], layers[4], dilation=2, new_level=False))  # layer5
    if layers[5] > 0:
        stages.append(make_layer(channels[5], layers[5], dilation=4, new_level=False))  # layer6
    if layers[6] > 0:
        stages.append(make_conv_layers(channels[6], layers[6], dilation=2))         # layer7
    if layers[7] > 0:
        stages.append(make_conv_layers(channels[7], layers[7], dilation=1))         # layer8

    out_dim = channels[-1]
    cls_pad = _round_up(num_classes, LANES)
    std = math.sqrt(2.0 / (1 * 1 * num_classes))
    fc_w_real = std * jax.random.normal(gen.next(), (out_dim, num_classes), jnp.float32)
    kb = 1.0 / math.sqrt(out_dim)                    # PyTorch Conv2d default bias init
    fc_b_real = jax.random.uniform(gen.next(), (num_classes,), jnp.float32, -kb, kb)
    fc_w = jnp.zeros((LANES, cls_pad), jnp.float32).at[:out_dim, :num_classes].set(fc_w_real)
    fc_b = jnp.zeros((1, cls_pad), jnp.float32).at[0, :num_classes].set(fc_b_real)
    return stages, {"w": fc_w, "b": fc_b, "num_classes": num_classes}


# ----------------------------------------------------------------------------
# Forward pass
# ----------------------------------------------------------------------------
def drn_forward(x_nchw, stages, fc):
    x = jnp.transpose(x_nchw, (0, 2, 3, 1)).astype(jnp.bfloat16)     # NCHW -> NHWC (bf16)
    for kind, blocks in stages:
        if kind == "conv":
            for blk in blocks:
                p = blk["p"]
                y, st, meta = conv_gemm_stats(x, p["w"], kh=p["kh"], kw=p["kw"],
                                              stride=blk["stride"], padding=blk["pad"],
                                              dilation=blk["dil"])
                ss = _fold_bn(st, p["gb"], meta[3])
                x = bn_relu(y, ss, meta)
        else:  # residual BasicBlock stage
            for blk in blocks:
                d1, d2 = blk["dil"]
                c2 = blk["conv2"]
                if blk["fused"] is not None:
                    cf = blk["fused"]
                    yf, stf, mf = conv_gemm_stats(x, cf["w"], kh=3, kw=3,
                                                  stride=blk["stride"],
                                                  padding=d1, dilation=d1)
                    ss1 = _fold_bn(stf[:, :LANES], cf["gb"][:, :LANES], mf[3])
                    ssd = _fold_bn(stf[:, LANES:], cf["gb"][:, LANES:], mf[3])
                    a1 = bn_relu(yf, ss1, mf, col_block=0)
                    y2, st2, m2 = conv_gemm_stats(a1, c2["w"], kh=3, kw=3, stride=1,
                                                  padding=d2, dilation=d2)
                    ss2 = _fold_bn(st2, c2["gb"], m2[3])
                    x = bn2_add_relu(y2, ss2, yf, ssd, m2)
                else:
                    c1 = blk["conv1"]
                    y1, st1, m1 = conv_gemm_stats(x, c1["w"], kh=3, kw=3,
                                                  stride=blk["stride"],
                                                  padding=d1, dilation=d1)
                    ss1 = _fold_bn(st1, c1["gb"], m1[3])
                    a1 = bn_relu(y1, ss1, m1)
                    y2, st2, m2 = conv_gemm_stats(a1, c2["w"], kh=3, kw=3, stride=1,
                                                  padding=d2, dilation=d2)
                    ss2 = _fold_bn(st2, c2["gb"], m2[3])
                    if blk["residual"]:
                        x = bn_add_relu(y2, ss2, x, m2)
                    else:
                        x = bn_relu(y2, ss2, m2)
    # out_map=False, out_middle=False path: avgpool(pool_size) -> fc -> flatten
    return avgpool_fc(x, fc["w"], fc["b"], fc["num_classes"])


# ----------------------------------------------------------------------------
# Main
# ----------------------------------------------------------------------------
if __name__ == "__main__":
    # Small DRN-D config: channels=(4,8,8,16,32,32,32,32), layers=(1,)*8,
    # num_classes=10, input 16x16 -> final feature map 2x2 (pool_size=2).
    channels = (4, 8, 8, 16, 32, 32, 32, 32)
    layers = (1, 1, 1, 1, 1, 1, 1, 1)
    num_classes = 10

    key = jax.random.PRNGKey(0)
    kx, kp = jax.random.split(key)
    x = jax.random.normal(kx, (2, 3, 16, 16), dtype=jnp.float32)     # NCHW like PyTorch

    stages, fc = build_drn_d(kp, channels, layers, num_classes)
    fwd = jax.jit(lambda inp: drn_forward(inp, stages, fc))
    out = jax.block_until_ready(fwd(x))

    assert out.shape == (2, num_classes), out.shape
    assert bool(jnp.all(jnp.isfinite(out)))
    print("KERNEL_OK")
</pallas_src>

<mosaic_0001>
module attributes {stable_mosaic.version = 11 : i64} {
  func.func @_bn_relu_kernel(%arg0: i32, %arg1: memref<512x128xbf16, #tpu.memory_space<vmem>>, %arg2: memref<2x128xf32, #tpu.memory_space<vmem>>, %arg3: memref<512x128xbf16, #tpu.memory_space<vmem>>) attributes {dimension_semantics = [#tpu.dimension_semantics<parallel>], iteration_bounds = array<i64: 1>, scalar_prefetch = 0 : i64, scratch_operands = 0 : i64, tpu.core_type = #tpu.core_type<tc>, window_params = [{transform_indices = @transform_0, window_bounds = array<i64: 512, 128>}, {pipeline_mode = #tpu.pipeline_mode<synchronous>, transform_indices = @transform_1, window_bounds = array<i64: 2, 128>}, {transform_indices = @transform_2, window_bounds = array<i64: 512, 128>}]} {
    %c0 = arith.constant 0 : index
    %c0_0 = arith.constant 0 : index
    %0 = vector.load %arg1[%c0, %c0_0] : memref<512x128xbf16, #tpu.memory_space<vmem>>, vector<512x128xbf16>
    %1 = arith.extf %0 : vector<512x128xbf16> to vector<512x128xf32>
    %c0_1 = arith.constant 0 : index
    %c0_2 = arith.constant 0 : index
    %2 = vector.load %arg2[%c0_1, %c0_2] : memref<2x128xf32, #tpu.memory_space<vmem>>, vector<1x128xf32>
    %3 = vector.broadcast %2 : vector<1x128xf32> to vector<512x128xf32>
    %4 = arith.mulf %1, %3 : vector<512x128xf32>
    %c1 = arith.constant 1 : index
    %c0_3 = arith.constant 0 : index
    %5 = vector.load %arg2[%c1, %c0_3] : memref<2x128xf32, #tpu.memory_space<vmem>>, vector<1x128xf32>
    %6 = vector.broadcast %5 : vector<1x128xf32> to vector<512x128xf32>
    %7 = arith.addf %4, %6 : vector<512x128xf32>
    %cst = arith.constant 0.000000e+00 : f32
    %8 = vector.broadcast %cst : f32 to vector<512x128xf32>
    %9 = arith.maximumf %7, %8 : vector<512x128xf32>
    %10 = arith.truncf %9 : vector<512x128xf32> to vector<512x128xbf16>
    %c0_4 = arith.constant 0 : index
    %c0_5 = arith.constant 0 : index
    %11 = vector.load %arg3[%c0_4, %c0_5] : memref<512x128xbf16, #tpu.memory_space<vmem>>, vector<512x128xbf16>
    tpu.vector_store %arg3[%c0_4, %c0_5], %10 {strides = array<i32>} : memref<512x128xbf16, #tpu.memory_space<vmem>>, vector<512x128xbf16>,
    return
  }
  func.func @transform_0(%arg0: i32) -> (i32, i32) {
    %c0_i32 = arith.constant 0 : i32
    %c0_i32_0 = arith.constant 0 : i32
    return %arg0, %c0_i32 : i32, i32
  }
  func.func @transform_1(%arg0: i32) -> (i32, i32) {
    %c0_i32 = arith.constant 0 : i32
    %c0_i32_0 = arith.constant 0 : i32
    %c0_i32_1 = arith.constant 0 : i32
    return %c0_i32, %c0_i32_0 : i32, i32
  }
  func.func @transform_2(%arg0: i32) -> (i32, i32) {
    %c0_i32 = arith.constant 0 : i32
    %c0_i32_0 = arith.constant 0 : i32
    return %arg0, %c0_i32 : i32, i32
  }
}

module attributes {stable_mosaic.version = 11 : i64} {
  func.func @_gemm_stats_kernel(%arg0: i32, %arg1: memref<512x256xbf16, #tpu.memory_space<vmem>>, %arg2: memref<256x128xbf16, #tpu.memory_space<vmem>>, %arg3: memref<512x128xbf16, #tpu.memory_space<vmem>>, %arg4: memref<1x2x128xf32, #tpu.memory_space<vmem>>) attributes {dimension_semantics = [#tpu.dimension_semantics<parallel>], iteration_bounds = array<i64: 1>, scalar_prefetch = 0 : i64, scratch_operands = 0 : i64, tpu.core_type = #tpu.core_type<tc>, window_params = [{transform_indices = @transform_0, window_bounds = array<i64: 512, 256>}, {pipeline_mode = #tpu.pipeline_mode<synchronous>, transform_indices = @transform_1, window_bounds = array<i64: 256, 128>}, {transform_indices = @transform_2, window_bounds = array<i64: 512, 128>}, {transform_indices = @transform_3, window_bounds = array<i64: 1, 2, 128>}]} {
    %c0 = arith.constant 0 : index
    %c0_0 = arith.constant 0 : index
    %0 = vector.load %arg1[%c0, %c0_0] : memref<512x256xbf16, #tpu.memory_space<vmem>>, vector<512x256xbf16>
    %c0_1 = arith.constant 0 : index
    %c0_2 = arith.constant 0 : index
    %1 = vector.load %arg2[%c0_1, %c0_2] : memref<256x128xbf16, #tpu.memory_space<vmem>>, vector<256x128xbf16>
    %cst = arith.constant dense<0.000000e+00> : vector<512x128xf32>
    %2 = tpu.matmul %0, %1, %cst {dimension_numbers = #tpu.dot_dimension_numbers<[1], [0], [0], [1], [0, 0, 1, 1], [], []>} : vector<512x256xbf16>, vector<256x128xbf16>, vector<512x128xf32> -> vector<512x128xf32>
    %3 = arith.truncf %2 : vector<512x128xf32> to vector<512x128xbf16>
    %c0_3 = arith.constant 0 : index
    %c0_4 = arith.constant 0 : index
    %4 = vector.load %arg3[%c0_3, %c0_4] : memref<512x128xbf16, #tpu.memory_space<vmem>>, vector<512x128xbf16>
    tpu.vector_store %arg3[%c0_3, %c0_4], %3 {strides = array<i32>} : memref<512x128xbf16, #tpu.memory_space<vmem>>, vector<512x128xbf16>,
    %cst_5 = arith.constant dense<0.000000e+00> : vector<128xf32>
    %5 = vector.multi_reduction <add>, %2, %cst_5 [0] : vector<512x128xf32> to vector<128xf32>
    %6 = vector.shape_cast %5 : vector<128xf32> to vector<1x128xf32>
    %c0_6 = arith.constant 0 : index
    %c0_7 = arith.constant 0 : index
    %c0_8 = arith.constant 0 : index
    %7 = vector.load %arg4[%c0_6, %c0_7, %c0_8] : memref<1x2x128xf32, #tpu.memory_space<vmem>>, vector<1x1x128xf32>
    %8 = vector.shape_cast %7 : vector<1x1x128xf32> to vector<1x128xf32>
    %9 = vector.shape_cast %6 : vector<1x128xf32> to vector<1x1x128xf32>
    tpu.vector_store %arg4[%c0_6, %c0_7, %c0_8], %9 {strides = array<i32>} : memref<1x2x128xf32, #tpu.memory_space<vmem>>, vector<1x1x128xf32>,
    %10 = arith.mulf %2, %2 : vector<512x128xf32>
    %cst_9 = arith.constant dense<0.000000e+00> : vector<128xf32>
    %11 = vector.multi_reduction <add>, %10, %cst_9 [0] : vector<512x128xf32> to vector<128xf32>
    %12 = vector.shape_cast %11 : vector<128xf32> to vector<1x128xf32>
    %c0_10 = arith.constant 0 : index
    %c1 = arith.constant 1 : index
    %c0_11 = arith.constant 0 : index
    %13 = vector.load %arg4[%c0_10, %c1, %c0_11] : memref<1x2x128xf32, #tpu.memory_space<vmem>>, vector<1x1x128xf32>
    %14 = vector.shape_cast %13 : vector<1x1x128xf32> to vector<1x128xf32>
    %15 = vector.shape_cast %12 : vector<1x128xf32> to vector<1x1x128xf32>
    tpu.vector_store %arg4[%c0_10, %c1, %c0_11], %15 {strides = array<i32>} : memref<1x2x128xf32, #tpu.memory_space<vmem>>, vector<1x1x128xf32>,
    return
  }
  func.func @transform_0(%arg0: i32) -> (i32, i32) {
    %c0_i32 = arith.constant 0 : i32
    %c0_i32_0 = arith.constant 0 : i32
    return %arg0, %c0_i32 : i32, i32
  }
  func.func @transform_1(%arg0: i32) -> (i32, i32) {
    %c0_i32 = arith.constant 0 : i32
    %c0_i32_0 = arith.constant 0 : i32
    %c0_i32_1 = arith.constant 0 : i32
    return %c0_i32, %c0_i32_0 : i32, i32
  }
  func.func @transform_2(%arg0: i32) -> (i32, i32) {
    %c0_i32 = arith.constant 0 : i32
    %c0_i32_0 = arith.constant 0 : i32
    return %arg0, %c0_i32 : i32, i32
  }
  func.func @transform_3(%arg0: i32) -> (i32, i32, i32) {
    %c0_i32 = arith.constant 0 : i32
    %c0_i32_0 = arith.constant 0 : i32
    %c0_i32_1 = arith.constant 0 : i32
    return %arg0, %c0_i32, %c0_i32_0 : i32, i32, i32
  }
}

module attributes {stable_mosaic.version = 11 : i64} {
  func.func @_gemm_stats_kernel(%arg0: i32, %arg1: memref<512x1152xbf16, #tpu.memory_space<vmem>>, %arg2: memref<1152x128xbf16, #tpu.memory_space<vmem>>, %arg3: memref<512x128xbf16, #tpu.memory_space<vmem>>, %arg4: memref<1x2x128xf32, #tpu.memory_space<vmem>>) attributes {dimension_semantics = [#tpu.dimension_semantics<parallel>], iteration_bounds = array<i64: 1>, scalar_prefetch = 0 : i64, scratch_operands = 0 : i64, tpu.core_type = #tpu.core_type<tc>, window_params = [{transform_indices = @transform_0, window_bounds = array<i64: 512, 1152>}, {pipeline_mode = #tpu.pipeline_mode<synchronous>, transform_indices = @transform_1, window_bounds = array<i64: 1152, 128>}, {transform_indices = @transform_2, window_bounds = array<i64: 512, 128>}, {transform_indices = @transform_3, window_bounds = array<i64: 1, 2, 128>}]} {
    %c0 = arith.constant 0 : index
    %c0_0 = arith.constant 0 : index
    %0 = vector.load %arg1[%c0, %c0_0] : memref<512x1152xbf16, #tpu.memory_space<vmem>>, vector<512x1152xbf16>
    %c0_1 = arith.constant 0 : index
    %c0_2 = arith.constant 0 : index
    %1 = vector.load %arg2[%c0_1, %c0_2] : memref<1152x128xbf16, #tpu.memory_space<vmem>>, vector<1152x128xbf16>
    %cst = arith.constant dense<0.000000e+00> : vector<512x128xf32>
    %2 = tpu.matmul %0, %1, %cst {dimension_numbers = #tpu.dot_dimension_numbers<[1], [0], [0], [1], [0, 0, 1, 1], [], []>} : vector<512x1152xbf16>, vector<1152x128xbf16>, vector<512x128xf32> -> vector<512x128xf32>
    %3 = arith.truncf %2 : vector<512x128xf32> to vector<512x128xbf16>
    %c0_3 = arith.constant 0 : index
    %c0_4 = arith.constant 0 : index
    %4 = vector.load %arg3[%c0_3, %c0_4] : memref<512x128xbf16, #tpu.memory_space<vmem>>, vector<512x128xbf16>
    tpu.vector_store %arg3[%c0_3, %c0_4], %3 {strides = array<i32>} : memref<512x128xbf16, #tpu.memory_space<vmem>>, vector<512x128xbf16>,
    %cst_5 = arith.constant dense<0.000000e+00> : vector<128xf32>
    %5 = vector.multi_reduction <add>, %2, %cst_5 [0] : vector<512x128xf32> to vector<128xf32>
    %6 = vector.shape_cast %5 : vector<128xf32> to vector<1x128xf32>
    %c0_6 = arith.constant 0 : index
    %c0_7 = arith.constant 0 : index
    %c0_8 = arith.constant 0 : index
    %7 = vector.load %arg4[%c0_6, %c0_7, %c0_8] : memref<1x2x128xf32, #tpu.memory_space<vmem>>, vector<1x1x128xf32>
    %8 = vector.shape_cast %7 : vector<1x1x128xf32> to vector<1x128xf32>
    %9 = vector.shape_cast %6 : vector<1x128xf32> to vector<1x1x128xf32>
    tpu.vector_store %arg4[%c0_6, %c0_7, %c0_8], %9 {strides = array<i32>} : memref<1x2x128xf32, #tpu.memory_space<vmem>>, vector<1x1x128xf32>,
    %10 = arith.mulf %2, %2 : vector<512x128xf32>
    %cst_9 = arith.constant dense<0.000000e+00> : vector<128xf32>
    %11 = vector.multi_reduction <add>, %10, %cst_9 [0] : vector<512x128xf32> to vector<128xf32>
    %12 = vector.shape_cast %11 : vector<128xf32> to vector<1x128xf32>
    %c0_10 = arith.constant 0 : index
    %c1 = arith.constant 1 : index
    %c0_11 = arith.constant 0 : index
    %13 = vector.load %arg4[%c0_10, %c1, %c0_11] : memref<1x2x128xf32, #tpu.memory_space<vmem>>, vector<1x1x128xf32>
    %14 = vector.shape_cast %13 : vector<1x1x128xf32> to vector<1x128xf32>
    %15 = vector.shape_cast %12 : vector<1x128xf32> to vector<1x1x128xf32>
    tpu.vector_store %arg4[%c0_10, %c1, %c0_11], %15 {strides = array<i32>} : memref<1x2x128xf32, #tpu.memory_space<vmem>>, vector<1x1x128xf32>,
    return
  }
  func.func @transform_0(%arg0: i32) -> (i32, i32) {
    %c0_i32 = arith.constant 0 : i32
    %c0_i32_0 = arith.constant 0 : i32
    return %arg0, %c0_i32 : i32, i32
  }
  func.func @transform_1(%arg0: i32) -> (i32, i32) {
    %c0_i32 = arith.constant 0 : i32
    %c0_i32_0 = arith.constant 0 : i32
    %c0_i32_1 = arith.constant 0 : i32
    return %c0_i32, %c0_i32_0 : i32, i32
  }
  func.func @transform_2(%arg0: i32) -> (i32, i32) {
    %c0_i32 = arith.constant 0 : i32
    %c0_i32_0 = arith.constant 0 : i32
    return %arg0, %c0_i32 : i32, i32
  }
  func.func @transform_3(%arg0: i32) -> (i32, i32, i32) {
    %c0_i32 = arith.constant 0 : i32
    %c0_i32_0 = arith.constant 0 : i32
    %c0_i32_1 = arith.constant 0 : i32
    return %arg0, %c0_i32, %c0_i32_0 : i32, i32, i32
  }
}

module attributes {stable_mosaic.version = 11 : i64} {
  func.func @_bn_relu_kernel(%arg0: i32, %arg1: memref<128x128xbf16, #tpu.memory_space<vmem>>, %arg2: memref<2x128xf32, #tpu.memory_space<vmem>>, %arg3: memref<128x128xbf16, #tpu.memory_space<vmem>>) attributes {dimension_semantics = [#tpu.dimension_semantics<parallel>], iteration_bounds = array<i64: 1>, scalar_prefetch = 0 : i64, scratch_operands = 0 : i64, tpu.core_type = #tpu.core_type<tc>, window_params = [{transform_indices = @transform_0, window_bounds = array<i64: 128, 128>}, {pipeline_mode = #tpu.pipeline_mode<synchronous>, transform_indices = @transform_1, window_bounds = array<i64: 2, 128>}, {transform_indices = @transform_2, window_bounds = array<i64: 128, 128>}]} {
    %c0 = arith.constant 0 : index
    %c0_0 = arith.constant 0 : index
    %0 = vector.load %arg1[%c0, %c0_0] : memref<128x128xbf16, #tpu.memory_space<vmem>>, vector<128x128xbf16>
    %1 = arith.extf %0 : vector<128x128xbf16> to vector<128x128xf32>
    %c0_1 = arith.constant 0 : index
    %c0_2 = arith.constant 0 : index
    %2 = vector.load %arg2[%c0_1, %c0_2] : memref<2x128xf32, #tpu.memory_space<vmem>>, vector<1x128xf32>
    %3 = vector.broadcast %2 : vector<1x128xf32> to vector<128x128xf32>
    %4 = arith.mulf %1, %3 : vector<128x128xf32>
    %c1 = arith.constant 1 : index
    %c0_3 = arith.constant 0 : index
    %5 = vector.load %arg2[%c1, %c0_3] : memref<2x128xf32, #tpu.memory_space<vmem>>, vector<1x128xf32>
    %6 = vector.broadcast %5 : vector<1x128xf32> to vector<128x128xf32>
    %7 = arith.addf %4, %6 : vector<128x128xf32>
    %cst = arith.constant 0.000000e+00 : f32
    %8 = vector.broadcast %cst : f32 to vector<128x128xf32>
    %9 = arith.maximumf %7, %8 : vector<128x128xf32>
    %10 = arith.truncf %9 : vector<128x128xf32> to vector<128x128xbf16>
    %c0_4 = arith.constant 0 : index
    %c0_5 = arith.constant 0 : index
    %11 = vector.load %arg3[%c0_4, %c0_5] : memref<128x128xbf16, #tpu.memory_space<vmem>>, vector<128x128xbf16>
    tpu.vector_store %arg3[%c0_4, %c0_5], %10 {strides = array<i32>} : memref<128x128xbf16, #tpu.memory_space<vmem>>, vector<128x128xbf16>,
    return
  }
  func.func @transform_0(%arg0: i32) -> (i32, i32) {
    %c0_i32 = arith.constant 0 : i32
    %c0_i32_0 = arith.constant 0 : i32
    return %arg0, %c0_i32 : i32, i32
  }
  func.func @transform_1(%arg0: i32) -> (i32, i32) {
    %c0_i32 = arith.constant 0 : i32
    %c0_i32_0 = arith.constant 0 : i32
    %c0_i32_1 = arith.constant 0 : i32
    return %c0_i32, %c0_i32_0 : i32, i32
  }
  func.func @transform_2(%arg0: i32) -> (i32, i32) {
    %c0_i32 = arith.constant 0 : i32
    %c0_i32_0 = arith.constant 0 : i32
    return %arg0, %c0_i32 : i32, i32
  }
}

module attributes {stable_mosaic.version = 11 : i64} {
  func.func @_gemm_stats_kernel(%arg0: i32, %arg1: memref<128x1152xbf16, #tpu.memory_space<vmem>>, %arg2: memref<1152x128xbf16, #tpu.memory_space<vmem>>, %arg3: memref<128x128xbf16, #tpu.memory_space<vmem>>, %arg4: memref<1x2x128xf32, #tpu.memory_space<vmem>>) attributes {dimension_semantics = [#tpu.dimension_semantics<parallel>], iteration_bounds = array<i64: 1>, scalar_prefetch = 0 : i64, scratch_operands = 0 : i64, tpu.core_type = #tpu.core_type<tc>, window_params = [{transform_indices = @transform_0, window_bounds = array<i64: 128, 1152>}, {pipeline_mode = #tpu.pipeline_mode<synchronous>, transform_indices = @transform_1, window_bounds = array<i64: 1152, 128>}, {transform_indices = @transform_2, window_bounds = array<i64: 128, 128>}, {transform_indices = @transform_3, window_bounds = array<i64: 1, 2, 128>}]} {
    %c0 = arith.constant 0 : index
    %c0_0 = arith.constant 0 : index
    %0 = vector.load %arg1[%c0, %c0_0] : memref<128x1152xbf16, #tpu.memory_space<vmem>>, vector<128x1152xbf16>
    %c0_1 = arith.constant 0 : index
    %c0_2 = arith.constant 0 : index
    %1 = vector.load %arg2[%c0_1, %c0_2] : memref<1152x128xbf16, #tpu.memory_space<vmem>>, vector<1152x128xbf16>
    %cst = arith.constant dense<0.000000e+00> : vector<128x128xf32>
    %2 = tpu.matmul %0, %1, %cst {dimension_numbers = #tpu.dot_dimension_numbers<[1], [0], [0], [1], [0, 0, 1, 1], [], []>} : vector<128x1152xbf16>, vector<1152x128xbf16>, vector<128x128xf32> -> vector<128x128xf32>
    %3 = arith.truncf %2 : vector<128x128xf32> to vector<128x128xbf16>
    %c0_3 = arith.constant 0 : index
    %c0_4 = arith.constant 0 : index
    %4 = vector.load %arg3[%c0_3, %c0_4] : memref<128x128xbf16, #tpu.memory_space<vmem>>, vector<128x128xbf16>
    tpu.vector_store %arg3[%c0_3, %c0_4], %3 {strides = array<i32>} : memref<128x128xbf16, #tpu.memory_space<vmem>>, vector<128x128xbf16>,
    %cst_5 = arith.constant dense<0.000000e+00> : vector<128xf32>
    %5 = vector.multi_reduction <add>, %2, %cst_5 [0] : vector<128x128xf32> to vector<128xf32>
    %6 = vector.shape_cast %5 : vector<128xf32> to vector<1x128xf32>
    %c0_6 = arith.constant 0 : index
    %c0_7 = arith.constant 0 : index
    %c0_8 = arith.constant 0 : index
    %7 = vector.load %arg4[%c0_6, %c0_7, %c0_8] : memref<1x2x128xf32, #tpu.memory_space<vmem>>, vector<1x1x128xf32>
    %8 = vector.shape_cast %7 : vector<1x1x128xf32> to vector<1x128xf32>
    %9 = vector.shape_cast %6 : vector<1x128xf32> to vector<1x1x128xf32>
    tpu.vector_store %arg4[%c0_6, %c0_7, %c0_8], %9 {strides = array<i32>} : memref<1x2x128xf32, #tpu.memory_space<vmem>>, vector<1x1x128xf32>,
    %10 = arith.mulf %2, %2 : vector<128x128xf32>
    %cst_9 = arith.constant dense<0.000000e+00> : vector<128xf32>
    %11 = vector.multi_reduction <add>, %10, %cst_9 [0] : vector<128x128xf32> to vector<128xf32>
    %12 = vector.shape_cast %11 : vector<128xf32> to vector<1x128xf32>
    %c0_10 = arith.constant 0 : index
    %c1 = arith.constant 1 : index
    %c0_11 = arith.constant 0 : index
    %13 = vector.load %arg4[%c0_10, %c1, %c0_11] : memref<1x2x128xf32, #tpu.memory_space<vmem>>, vector<1x1x128xf32>
    %14 = vector.shape_cast %13 : vector<1x1x128xf32> to vector<1x128xf32>
    %15 = vector.shape_cast %12 : vector<1x128xf32> to vector<1x1x128xf32>
    tpu.vector_store %arg4[%c0_10, %c1, %c0_11], %15 {strides = array<i32>} : memref<1x2x128xf32, #tpu.memory_space<vmem>>, vector<1x1x128xf32>,
    return
  }
  func.func @transform_0(%arg0: i32) -> (i32, i32) {
    %c0_i32 = arith.constant 0 : i32
    %c0_i32_0 = arith.constant 0 : i32
    return %arg0, %c0_i32 : i32, i32
  }
  func.func @transform_1(%arg0: i32) -> (i32, i32) {
    %c0_i32 = arith.constant 0 : i32
    %c0_i32_0 = arith.constant 0 : i32
    %c0_i32_1 = arith.constant 0 : i32
    return %c0_i32, %c0_i32_0 : i32, i32
  }
  func.func @transform_2(%arg0: i32) -> (i32, i32) {
    %c0_i32 = arith.constant 0 : i32
    %c0_i32_0 = arith.constant 0 : i32
    return %arg0, %c0_i32 : i32, i32
  }
  func.func @transform_3(%arg0: i32) -> (i32, i32, i32) {
    %c0_i32 = arith.constant 0 : i32
    %c0_i32_0 = arith.constant 0 : i32
    %c0_i32_1 = arith.constant 0 : i32
    return %arg0, %c0_i32, %c0_i32_0 : i32, i32, i32
  }
}

module attributes {stable_mosaic.version = 11 : i64} {
  func.func @_gemm_stats_kernel(%arg0: i32, %arg1: memref<32x1152xbf16, #tpu.memory_space<vmem>>, %arg2: memref<1152x256xbf16, #tpu.memory_space<vmem>>, %arg3: memref<32x256xbf16, #tpu.memory_space<vmem>>, %arg4: memref<1x2x256xf32, #tpu.memory_space<vmem>>) attributes {dimension_semantics = [#tpu.dimension_semantics<parallel>], iteration_bounds = array<i64: 1>, scalar_prefetch = 0 : i64, scratch_operands = 0 : i64, tpu.core_type = #tpu.core_type<tc>, window_params = [{transform_indices = @transform_0, window_bounds = array<i64: 32, 1152>}, {pipeline_mode = #tpu.pipeline_mode<synchronous>, transform_indices = @transform_1, window_bounds = array<i64: 1152, 256>}, {transform_indices = @transform_2, window_bounds = array<i64: 32, 256>}, {transform_indices = @transform_3, window_bounds = array<i64: 1, 2, 256>}]} {
    %c0 = arith.constant 0 : index
    %c0_0 = arith.constant 0 : index
    %0 = vector.load %arg1[%c0, %c0_0] : memref<32x1152xbf16, #tpu.memory_space<vmem>>, vector<32x1152xbf16>
    %c0_1 = arith.constant 0 : index
    %c0_2 = arith.constant 0 : index
    %1 = vector.load %arg2[%c0_1, %c0_2] : memref<1152x256xbf16, #tpu.memory_space<vmem>>, vector<1152x256xbf16>
    %cst = arith.constant dense<0.000000e+00> : vector<32x256xf32>
    %2 = tpu.matmul %0, %1, %cst {dimension_numbers = #tpu.dot_dimension_numbers<[1], [0], [0], [1], [0, 0, 1, 1], [], []>} : vector<32x1152xbf16>, vector<1152x256xbf16>, vector<32x256xf32> -> vector<32x256xf32>
    %3 = arith.truncf %2 : vector<32x256xf32> to vector<32x256xbf16>
    %c0_3 = arith.constant 0 : index
    %c0_4 = arith.constant 0 : index
    %4 = vector.load %arg3[%c0_3, %c0_4] : memref<32x256xbf16, #tpu.memory_space<vmem>>, vector<32x256xbf16>
    tpu.vector_store %arg3[%c0_3, %c0_4], %3 {strides = array<i32>} : memref<32x256xbf16, #tpu.memory_space<vmem>>, vector<32x256xbf16>,
    %cst_5 = arith.constant dense<0.000000e+00> : vector<256xf32>
    %5 = vector.multi_reduction <add>, %2, %cst_5 [0] : vector<32x256xf32> to vector<256xf32>
    %6 = vector.shape_cast %5 : vector<256xf32> to vector<1x256xf32>
    %c0_6 = arith.constant 0 : index
    %c0_7 = arith.constant 0 : index
    %c0_8 = arith.constant 0 : index
    %7 = vector.load %arg4[%c0_6, %c0_7, %c0_8] : memref<1x2x256xf32, #tpu.memory_space<vmem>>, vector<1x1x256xf32>
    %8 = vector.shape_cast %7 : vector<1x1x256xf32> to vector<1x256xf32>
    %9 = vector.shape_cast %6 : vector<1x256xf32> to vector<1x1x256xf32>
    tpu.vector_store %arg4[%c0_6, %c0_7, %c0_8], %9 {strides = array<i32>} : memref<1x2x256xf32, #tpu.memory_space<vmem>>, vector<1x1x256xf32>,
    %10 = arith.mulf %2, %2 : vector<32x256xf32>
    %cst_9 = arith.constant dense<0.000000e+00> : vector<256xf32>
    %11 = vector.multi_reduction <add>, %10, %cst_9 [0] : vector<32x256xf32> to vector<256xf32>
    %12 = vector.shape_cast %11 : vector<256xf32> to vector<1x256xf32>
    %c0_10 = arith.constant 0 : index
    %c1 = arith.constant 1 : index
    %c0_11 = arith.constant 0 : index
    %13 = vector.load %arg4[%c0_10, %c1, %c0_11] : memref<1x2x256xf32, #tpu.memory_space<vmem>>, vector<1x1x256xf32>
    %14 = vector.shape_cast %13 : vector<1x1x256xf32> to vector<1x256xf32>
    %15 = vector.shape_cast %12 : vector<1x256xf32> to vector<1x1x256xf32>
    tpu.vector_store %arg4[%c0_10, %c1, %c0_11], %15 {strides = array<i32>} : memref<1x2x256xf32, #tpu.memory_space<vmem>>, vector<1x1x256xf32>,
    return
  }
  func.func @transform_0(%arg0: i32) -> (i32, i32) {
    %c0_i32 = arith.constant 0 : i32
    %c0_i32_0 = arith.constant 0 : i32
    return %arg0, %c0_i32 : i32, i32
  }
  func.func @transform_1(%arg0: i32) -> (i32, i32) {
    %c0_i32 = arith.constant 0 : i32
    %c0_i32_0 = arith.constant 0 : i32
    %c0_i32_1 = arith.constant 0 : i32
    return %c0_i32, %c0_i32_0 : i32, i32
  }
  func.func @transform_2(%arg0: i32) -> (i32, i32) {
    %c0_i32 = arith.constant 0 : i32
    %c0_i32_0 = arith.constant 0 : i32
    return %arg0, %c0_i32 : i32, i32
  }
  func.func @transform_3(%arg0: i32) -> (i32, i32, i32) {
    %c0_i32 = arith.constant 0 : i32
    %c0_i32_0 = arith.constant 0 : i32
    %c0_i32_1 = arith.constant 0 : i32
    return %arg0, %c0_i32, %c0_i32_0 : i32, i32, i32
  }
}

module attributes {stable_mosaic.version = 11 : i64} {
  func.func @_bn_relu_kernel(%arg0: i32, %arg1: memref<32x128xbf16, #tpu.memory_space<vmem>>, %arg2: memref<2x128xf32, #tpu.memory_space<vmem>>, %arg3: memref<32x128xbf16, #tpu.memory_space<vmem>>) attributes {dimension_semantics = [#tpu.dimension_semantics<parallel>], iteration_bounds = array<i64: 1>, scalar_prefetch = 0 : i64, scratch_operands = 0 : i64, tpu.core_type = #tpu.core_type<tc>, window_params = [{transform_indices = @transform_0, window_bounds = array<i64: 32, 128>}, {pipeline_mode = #tpu.pipeline_mode<synchronous>, transform_indices = @transform_1, window_bounds = array<i64: 2, 128>}, {transform_indices = @transform_2, window_bounds = array<i64: 32, 128>}]} {
    %c0 = arith.constant 0 : index
    %c0_0 = arith.constant 0 : index
    %0 = vector.load %arg1[%c0, %c0_0] : memref<32x128xbf16, #tpu.memory_space<vmem>>, vector<32x128xbf16>
    %1 = arith.extf %0 : vector<32x128xbf16> to vector<32x128xf32>
    %c0_1 = arith.constant 0 : index
    %c0_2 = arith.constant 0 : index
    %2 = vector.load %arg2[%c0_1, %c0_2] : memref<2x128xf32, #tpu.memory_space<vmem>>, vector<1x128xf32>
    %3 = vector.broadcast %2 : vector<1x128xf32> to vector<32x128xf32>
    %4 = arith.mulf %1, %3 : vector<32x128xf32>
    %c1 = arith.constant 1 : index
    %c0_3 = arith.constant 0 : index
    %5 = vector.load %arg2[%c1, %c0_3] : memref<2x128xf32, #tpu.memory_space<vmem>>, vector<1x128xf32>
    %6 = vector.broadcast %5 : vector<1x128xf32> to vector<32x128xf32>
    %7 = arith.addf %4, %6 : vector<32x128xf32>
    %cst = arith.constant 0.000000e+00 : f32
    %8 = vector.broadcast %cst : f32 to vector<32x128xf32>
    %9 = arith.maximumf %7, %8 : vector<32x128xf32>
    %10 = arith.truncf %9 : vector<32x128xf32> to vector<32x128xbf16>
    %c0_4 = arith.constant 0 : index
    %c0_5 = arith.constant 0 : index
    %11 = vector.load %arg3[%c0_4, %c0_5] : memref<32x128xbf16, #tpu.memory_space<vmem>>, vector<32x128xbf16>
    tpu.vector_store %arg3[%c0_4, %c0_5], %10 {strides = array<i32>} : memref<32x128xbf16, #tpu.memory_space<vmem>>, vector<32x128xbf16>,
    return
  }
  func.func @transform_0(%arg0: i32) -> (i32, i32) {
    %c0_i32 = arith.constant 0 : i32
    %c0_i32_0 = arith.constant 0 : i32
    return %arg0, %c0_i32 : i32, i32
  }
  func.func @transform_1(%arg0: i32) -> (i32, i32) {
    %c0_i32 = arith.constant 0 : i32
    %c0_i32_0 = arith.constant 0 : i32
    %c0_i32_1 = arith.constant 0 : i32
    return %c0_i32, %c0_i32_0 : i32, i32
  }
  func.func @transform_2(%arg0: i32) -> (i32, i32) {
    %c0_i32 = arith.constant 0 : i32
    %c0_i32_0 = arith.constant 0 : i32
    return %arg0, %c0_i32 : i32, i32
  }
}

module attributes {stable_mosaic.version = 11 : i64} {
  func.func @_gemm_stats_kernel(%arg0: i32, %arg1: memref<32x1152xbf16, #tpu.memory_space<vmem>>, %arg2: memref<1152x128xbf16, #tpu.memory_space<vmem>>, %arg3: memref<32x128xbf16, #tpu.memory_space<vmem>>, %arg4: memref<1x2x128xf32, #tpu.memory_space<vmem>>) attributes {dimension_semantics = [#tpu.dimension_semantics<parallel>], iteration_bounds = array<i64: 1>, scalar_prefetch = 0 : i64, scratch_operands = 0 : i64, tpu.core_type = #tpu.core_type<tc>, window_params = [{transform_indices = @transform_0, window_bounds = array<i64: 32, 1152>}, {pipeline_mode = #tpu.pipeline_mode<synchronous>, transform_indices = @transform_1, window_bounds = array<i64: 1152, 128>}, {transform_indices = @transform_2, window_bounds = array<i64: 32, 128>}, {transform_indices = @transform_3, window_bounds = array<i64: 1, 2, 128>}]} {
    %c0 = arith.constant 0 : index
    %c0_0 = arith.constant 0 : index
    %0 = vector.load %arg1[%c0, %c0_0] : memref<32x1152xbf16, #tpu.memory_space<vmem>>, vector<32x1152xbf16>
    %c0_1 = arith.constant 0 : index
    %c0_2 = arith.constant 0 : index
    %1 = vector.load %arg2[%c0_1, %c0_2] : memref<1152x128xbf16, #tpu.memory_space<vmem>>, vector<1152x128xbf16>
    %cst = arith.constant dense<0.000000e+00> : vector<32x128xf32>
    %2 = tpu.matmul %0, %1, %cst {dimension_numbers = #tpu.dot_dimension_numbers<[1], [0], [0], [1], [0, 0, 1, 1], [], []>} : vector<32x1152xbf16>, vector<1152x128xbf16>, vector<32x128xf32> -> vector<32x128xf32>
    %3 = arith.truncf %2 : vector<32x128xf32> to vector<32x128xbf16>
    %c0_3 = arith.constant 0 : index
    %c0_4 = arith.constant 0 : index
    %4 = vector.load %arg3[%c0_3, %c0_4] : memref<32x128xbf16, #tpu.memory_space<vmem>>, vector<32x128xbf16>
    tpu.vector_store %arg3[%c0_3, %c0_4], %3 {strides = array<i32>} : memref<32x128xbf16, #tpu.memory_space<vmem>>, vector<32x128xbf16>,
    %cst_5 = arith.constant dense<0.000000e+00> : vector<128xf32>
    %5 = vector.multi_reduction <add>, %2, %cst_5 [0] : vector<32x128xf32> to vector<128xf32>
    %6 = vector.shape_cast %5 : vector<128xf32> to vector<1x128xf32>
    %c0_6 = arith.constant 0 : index
    %c0_7 = arith.constant 0 : index
    %c0_8 = arith.constant 0 : index
    %7 = vector.load %arg4[%c0_6, %c0_7, %c0_8] : memref<1x2x128xf32, #tpu.memory_space<vmem>>, vector<1x1x128xf32>
    %8 = vector.shape_cast %7 : vector<1x1x128xf32> to vector<1x128xf32>
    %9 = vector.shape_cast %6 : vector<1x128xf32> to vector<1x1x128xf32>
    tpu.vector_store %arg4[%c0_6, %c0_7, %c0_8], %9 {strides = array<i32>} : memref<1x2x128xf32, #tpu.memory_space<vmem>>, vector<1x1x128xf32>,
    %10 = arith.mulf %2, %2 : vector<32x128xf32>
    %cst_9 = arith.constant dense<0.000000e+00> : vector<128xf32>
    %11 = vector.multi_reduction <add>, %10, %cst_9 [0] : vector<32x128xf32> to vector<128xf32>
    %12 = vector.shape_cast %11 : vector<128xf32> to vector<1x128xf32>
    %c0_10 = arith.constant 0 : index
    %c1 = arith.constant 1 : index
    %c0_11 = arith.constant 0 : index
    %13 = vector.load %arg4[%c0_10, %c1, %c0_11] : memref<1x2x128xf32, #tpu.memory_space<vmem>>, vector<1x1x128xf32>
    %14 = vector.shape_cast %13 : vector<1x1x128xf32> to vector<1x128xf32>
    %15 = vector.shape_cast %12 : vector<1x128xf32> to vector<1x1x128xf32>
    tpu.vector_store %arg4[%c0_10, %c1, %c0_11], %15 {strides = array<i32>} : memref<1x2x128xf32, #tpu.memory_space<vmem>>, vector<1x1x128xf32>,
    return
  }
  func.func @transform_0(%arg0: i32) -> (i32, i32) {
    %c0_i32 = arith.constant 0 : i32
    %c0_i32_0 = arith.constant 0 : i32
    return %arg0, %c0_i32 : i32, i32
  }
  func.func @transform_1(%arg0: i32) -> (i32, i32) {
    %c0_i32 = arith.constant 0 : i32
    %c0_i32_0 = arith.constant 0 : i32
    %c0_i32_1 = arith.constant 0 : i32
    return %c0_i32, %c0_i32_0 : i32, i32
  }
  func.func @transform_2(%arg0: i32) -> (i32, i32) {
    %c0_i32 = arith.constant 0 : i32
    %c0_i32_0 = arith.constant 0 : i32
    return %arg0, %c0_i32 : i32, i32
  }
  func.func @transform_3(%arg0: i32) -> (i32, i32, i32) {
    %c0_i32 = arith.constant 0 : i32
    %c0_i32_0 = arith.constant 0 : i32
    %c0_i32_1 = arith.constant 0 : i32
    return %arg0, %c0_i32, %c0_i32_0 : i32, i32, i32
  }
}

module attributes {stable_mosaic.version = 11 : i64} {
  func.func @_bn2_add_relu_kernel(%arg0: i32, %arg1: memref<32x128xbf16, #tpu.memory_space<vmem>>, %arg2: memref<2x128xf32, #tpu.memory_space<vmem>>, %arg3: memref<32x128xbf16, #tpu.memory_space<vmem>>, %arg4: memref<2x128xf32, #tpu.memory_space<vmem>>, %arg5: memref<32x128xbf16, #tpu.memory_space<vmem>>) attributes {dimension_semantics = [#tpu.dimension_semantics<parallel>], iteration_bounds = array<i64: 1>, scalar_prefetch = 0 : i64, scratch_operands = 0 : i64, tpu.core_type = #tpu.core_type<tc>, window_params = [{transform_indices = @transform_0, window_bounds = array<i64: 32, 128>}, {pipeline_mode = #tpu.pipeline_mode<synchronous>, transform_indices = @transform_1, window_bounds = array<i64: 2, 128>}, {transform_indices = @transform_2, window_bounds = array<i64: 32, 128>}, {pipeline_mode = #tpu.pipeline_mode<synchronous>, transform_indices = @transform_3, window_bounds = array<i64: 2, 128>}, {transform_indices = @transform_4, window_bounds = array<i64: 32, 128>}]} {
    %c0 = arith.constant 0 : index
    %c0_0 = arith.constant 0 : index
    %0 = vector.load %arg1[%c0, %c0_0] : memref<32x128xbf16, #tpu.memory_space<vmem>>, vector<32x128xbf16>
    %1 = arith.extf %0 : vector<32x128xbf16> to vector<32x128xf32>
    %c0_1 = arith.constant 0 : index
    %c0_2 = arith.constant 0 : index
    %2 = vector.load %arg2[%c0_1, %c0_2] : memref<2x128xf32, #tpu.memory_space<vmem>>, vector<1x128xf32>
    %3 = vector.broadcast %2 : vector<1x128xf32> to vector<32x128xf32>
    %4 = arith.mulf %1, %3 : vector<32x128xf32>
    %c1 = arith.constant 1 : index
    %c0_3 = arith.constant 0 : index
    %5 = vector.load %arg2[%c1, %c0_3] : memref<2x128xf32, #tpu.memory_space<vmem>>, vector<1x128xf32>
    %6 = vector.broadcast %5 : vector<1x128xf32> to vector<32x128xf32>
    %7 = arith.addf %4, %6 : vector<32x128xf32>
    %c0_4 = arith.constant 0 : index
    %c0_5 = arith.constant 0 : index
    %8 = vector.load %arg3[%c0_4, %c0_5] : memref<32x128xbf16, #tpu.memory_space<vmem>>, vector<32x128xbf16>
    %9 = arith.extf %8 : vector<32x128xbf16> to vector<32x128xf32>
    %c0_6 = arith.constant 0 : index
    %c0_7 = arith.constant 0 : index
    %10 = vector.load %arg4[%c0_6, %c0_7] : memref<2x128xf32, #tpu.memory_space<vmem>>, vector<1x128xf32>
    %11 = vector.broadcast %10 : vector<1x128xf32> to vector<32x128xf32>
    %12 = arith.mulf %9, %11 : vector<32x128xf32>
    %13 = arith.addf %7, %12 : vector<32x128xf32>
    %c1_8 = arith.constant 1 : index
    %c0_9 = arith.constant 0 : index
    %14 = vector.load %arg4[%c1_8, %c0_9] : memref<2x128xf32, #tpu.memory_space<vmem>>, vector<1x128xf32>
    %15 = vector.broadcast %14 : vector<1x128xf32> to vector<32x128xf32>
    %16 = arith.addf %13, %15 : vector<32x128xf32>
    %cst = arith.constant 0.000000e+00 : f32
    %17 = vector.broadcast %cst : f32 to vector<32x128xf32>
    %18 = arith.maximumf %16, %17 : vector<32x128xf32>
    %19 = arith.truncf %18 : vector<32x128xf32> to vector<32x128xbf16>
    %c0_10 = arith.constant 0 : index
    %c0_11 = arith.constant 0 : index
    %20 = vector.load %arg5[%c0_10, %c0_11] : memref<32x128xbf16, #tpu.memory_space<vmem>>, vector<32x128xbf16>
    tpu.vector_store %arg5[%c0_10, %c0_11], %19 {strides = array<i32>} : memref<32x128xbf16, #tpu.memory_space<vmem>>, vector<32x128xbf16>,
    return
  }
  func.func @transform_0(%arg0: i32) -> (i32, i32) {
    %c0_i32 = arith.constant 0 : i32
    %c0_i32_0 = arith.constant 0 : i32
    return %arg0, %c0_i32 : i32, i32
  }
  func.func @transform_1(%arg0: i32) -> (i32, i32) {
    %c0_i32 = arith.constant 0 : i32
    %c0_i32_0 = arith.constant 0 : i32
    %c0_i32_1 = arith.constant 0 : i32
    return %c0_i32, %c0_i32_0 : i32, i32
  }
  func.func @transform_2(%arg0: i32) -> (i32, i32) {
    %c1_i32 = arith.constant 1 : i32
    %c0_i32 = arith.constant 0 : i32
    return %arg0, %c1_i32 : i32, i32
  }
  func.func @transform_3(%arg0: i32) -> (i32, i32) {
    %c0_i32 = arith.constant 0 : i32
    %c0_i32_0 = arith.constant 0 : i32
    %c0_i32_1 = arith.constant 0 : i32
    return %c0_i32, %c0_i32_0 : i32, i32
  }
  func.func @transform_4(%arg0: i32) -> (i32, i32) {
    %c0_i32 = arith.constant 0 : i32
    %c0_i32_0 = arith.constant 0 : i32
    return %arg0, %c0_i32 : i32, i32
  }
}

module attributes {stable_mosaic.version = 11 : i64} {
  func.func @_gemm_stats_kernel(%arg0: i32, %arg1: memref<8x1152xbf16, #tpu.memory_space<vmem>>, %arg2: memref<1152x256xbf16, #tpu.memory_space<vmem>>, %arg3: memref<8x256xbf16, #tpu.memory_space<vmem>>, %arg4: memref<1x2x256xf32, #tpu.memory_space<vmem>>) attributes {dimension_semantics = [#tpu.dimension_semantics<parallel>], iteration_bounds = array<i64: 1>, scalar_prefetch = 0 : i64, scratch_operands = 0 : i64, tpu.core_type = #tpu.core_type<tc>, window_params = [{transform_indices = @transform_0, window_bounds = array<i64: 8, 1152>}, {pipeline_mode = #tpu.pipeline_mode<synchronous>, transform_indices = @transform_1, window_bounds = array<i64: 1152, 256>}, {transform_indices = @transform_2, window_bounds = array<i64: 8, 256>}, {transform_indices = @transform_3, window_bounds = array<i64: 1, 2, 256>}]} {
    %c0 = arith.constant 0 : index
    %c0_0 = arith.constant 0 : index
    %0 = vector.load %arg1[%c0, %c0_0] : memref<8x1152xbf16, #tpu.memory_space<vmem>>, vector<8x1152xbf16>
    %c0_1 = arith.constant 0 : index
    %c0_2 = arith.constant 0 : index
    %1 = vector.load %arg2[%c0_1, %c0_2] : memref<1152x256xbf16, #tpu.memory_space<vmem>>, vector<1152x256xbf16>
    %cst = arith.constant dense<0.000000e+00> : vector<8x256xf32>
    %2 = tpu.matmul %0, %1, %cst {dimension_numbers = #tpu.dot_dimension_numbers<[1], [0], [0], [1], [0, 0, 1, 1], [], []>} : vector<8x1152xbf16>, vector<1152x256xbf16>, vector<8x256xf32> -> vector<8x256xf32>
    %3 = arith.truncf %2 : vector<8x256xf32> to vector<8x256xbf16>
    %c0_3 = arith.constant 0 : index
    %c0_4 = arith.constant 0 : index
    %4 = vector.load %arg3[%c0_3, %c0_4] : memref<8x256xbf16, #tpu.memory_space<vmem>>, vector<8x256xbf16>
    tpu.vector_store %arg3[%c0_3, %c0_4], %3 {strides = array<i32>} : memref<8x256xbf16, #tpu.memory_space<vmem>>, vector<8x256xbf16>,
    %cst_5 = arith.constant dense<0.000000e+00> : vector<256xf32>
    %5 = vector.multi_reduction <add>, %2, %cst_5 [0] : vector<8x256xf32> to vector<256xf32>
    %6 = vector.shape_cast %5 : vector<256xf32> to vector<1x256xf32>
    %c0_6 = arith.constant 0 : index
    %c0_7 = arith.constant 0 : index
    %c0_8 = arith.constant 0 : index
    %7 = vector.load %arg4[%c0_6, %c0_7, %c0_8] : memref<1x2x256xf32, #tpu.memory_space<vmem>>, vector<1x1x256xf32>
    %8 = vector.shape_cast %7 : vector<1x1x256xf32> to vector<1x256xf32>
    %9 = vector.shape_cast %6 : vector<1x256xf32> to vector<1x1x256xf32>
    tpu.vector_store %arg4[%c0_6, %c0_7, %c0_8], %9 {strides = array<i32>} : memref<1x2x256xf32, #tpu.memory_space<vmem>>, vector<1x1x256xf32>,
    %10 = arith.mulf %2, %2 : vector<8x256xf32>
    %cst_9 = arith.constant dense<0.000000e+00> : vector<256xf32>
    %11 = vector.multi_reduction <add>, %10, %cst_9 [0] : vector<8x256xf32> to vector<256xf32>
    %12 = vector.shape_cast %11 : vector<256xf32> to vector<1x256xf32>
    %c0_10 = arith.constant 0 : index
    %c1 = arith.constant 1 : index
    %c0_11 = arith.constant 0 : index
    %13 = vector.load %arg4[%c0_10, %c1, %c0_11] : memref<1x2x256xf32, #tpu.memory_space<vmem>>, vector<1x1x256xf32>
    %14 = vector.shape_cast %13 : vector<1x1x256xf32> to vector<1x256xf32>
    %15 = vector.shape_cast %12 : vector<1x256xf32> to vector<1x1x256xf32>
    tpu.vector_store %arg4[%c0_10, %c1, %c0_11], %15 {strides = array<i32>} : memref<1x2x256xf32, #tpu.memory_space<vmem>>, vector<1x1x256xf32>,
    return
  }
  func.func @transform_0(%arg0: i32) -> (i32, i32) {
    %c0_i32 = arith.constant 0 : i32
    %c0_i32_0 = arith.constant 0 : i32
    return %arg0, %c0_i32 : i32, i32
  }
  func.func @transform_1(%arg0: i32) -> (i32, i32) {
    %c0_i32 = arith.constant 0 : i32
    %c0_i32_0 = arith.constant 0 : i32
    %c0_i32_1 = arith.constant 0 : i32
    return %c0_i32, %c0_i32_0 : i32, i32
  }
  func.func @transform_2(%arg0: i32) -> (i32, i32) {
    %c0_i32 = arith.constant 0 : i32
    %c0_i32_0 = arith.constant 0 : i32
    return %arg0, %c0_i32 : i32, i32
  }
  func.func @transform_3(%arg0: i32) -> (i32, i32, i32) {
    %c0_i32 = arith.constant 0 : i32
    %c0_i32_0 = arith.constant 0 : i32
    %c0_i32_1 = arith.constant 0 : i32
    return %arg0, %c0_i32, %c0_i32_0 : i32, i32, i32
  }
}

module attributes {stable_mosaic.version = 11 : i64} {
  func.func @_bn_relu_kernel(%arg0: i32, %arg1: memref<8x128xbf16, #tpu.memory_space<vmem>>, %arg2: memref<2x128xf32, #tpu.memory_space<vmem>>, %arg3: memref<8x128xbf16, #tpu.memory_space<vmem>>) attributes {dimension_semantics = [#tpu.dimension_semantics<parallel>], iteration_bounds = array<i64: 1>, scalar_prefetch = 0 : i64, scratch_operands = 0 : i64, tpu.core_type = #tpu.core_type<tc>, window_params = [{transform_indices = @transform_0, window_bounds = array<i64: 8, 128>}, {pipeline_mode = #tpu.pipeline_mode<synchronous>, transform_indices = @transform_1, window_bounds = array<i64: 2, 128>}, {transform_indices = @transform_2, window_bounds = array<i64: 8, 128>}]} {
    %c0 = arith.constant 0 : index
    %c0_0 = arith.constant 0 : index
    %0 = vector.load %arg1[%c0, %c0_0] : memref<8x128xbf16, #tpu.memory_space<vmem>>, vector<8x128xbf16>
    %1 = arith.extf %0 : vector<8x128xbf16> to vector<8x128xf32>
    %c0_1 = arith.constant 0 : index
    %c0_2 = arith.constant 0 : index
    %2 = vector.load %arg2[%c0_1, %c0_2] : memref<2x128xf32, #tpu.memory_space<vmem>>, vector<1x128xf32>
    %3 = vector.broadcast %2 : vector<1x128xf32> to vector<8x128xf32>
    %4 = arith.mulf %1, %3 : vector<8x128xf32>
    %c1 = arith.constant 1 : index
    %c0_3 = arith.constant 0 : index
    %5 = vector.load %arg2[%c1, %c0_3] : memref<2x128xf32, #tpu.memory_space<vmem>>, vector<1x128xf32>
    %6 = vector.broadcast %5 : vector<1x128xf32> to vector<8x128xf32>
    %7 = arith.addf %4, %6 : vector<8x128xf32>
    %cst = arith.constant 0.000000e+00 : f32
    %8 = vector.broadcast %cst : f32 to vector<8x128xf32>
    %9 = arith.maximumf %7, %8 : vector<8x128xf32>
    %10 = arith.truncf %9 : vector<8x128xf32> to vector<8x128xbf16>
    %c0_4 = arith.constant 0 : index
    %c0_5 = arith.constant 0 : index
    %11 = vector.load %arg3[%c0_4, %c0_5] : memref<8x128xbf16, #tpu.memory_space<vmem>>, vector<8x128xbf16>
    tpu.vector_store %arg3[%c0_4, %c0_5], %10 {strides = array<i32>} : memref<8x128xbf16, #tpu.memory_space<vmem>>, vector<8x128xbf16>,
    return
  }
  func.func @transform_0(%arg0: i32) -> (i32, i32) {
    %c0_i32 = arith.constant 0 : i32
    %c0_i32_0 = arith.constant 0 : i32
    return %arg0, %c0_i32 : i32, i32
  }
  func.func @transform_1(%arg0: i32) -> (i32, i32) {
    %c0_i32 = arith.constant 0 : i32
    %c0_i32_0 = arith.constant 0 : i32
    %c0_i32_1 = arith.constant 0 : i32
    return %c0_i32, %c0_i32_0 : i32, i32
  }
  func.func @transform_2(%arg0: i32) -> (i32, i32) {
    %c0_i32 = arith.constant 0 : i32
    %c0_i32_0 = arith.constant 0 : i32
    return %arg0, %c0_i32 : i32, i32
  }
}

module attributes {stable_mosaic.version = 11 : i64} {
  func.func @_bn2_add_relu_kernel(%arg0: i32, %arg1: memref<8x128xbf16, #tpu.memory_space<vmem>>, %arg2: memref<2x128xf32, #tpu.memory_space<vmem>>, %arg3: memref<8x128xbf16, #tpu.memory_space<vmem>>, %arg4: memref<2x128xf32, #tpu.memory_space<vmem>>, %arg5: memref<8x128xbf16, #tpu.memory_space<vmem>>) attributes {dimension_semantics = [#tpu.dimension_semantics<parallel>], iteration_bounds = array<i64: 1>, scalar_prefetch = 0 : i64, scratch_operands = 0 : i64, tpu.core_type = #tpu.core_type<tc>, window_params = [{transform_indices = @transform_0, window_bounds = array<i64: 8, 128>}, {pipeline_mode = #tpu.pipeline_mode<synchronous>, transform_indices = @transform_1, window_bounds = array<i64: 2, 128>}, {transform_indices = @transform_2, window_bounds = array<i64: 8, 128>}, {pipeline_mode = #tpu.pipeline_mode<synchronous>, transform_indices = @transform_3, window_bounds = array<i64: 2, 128>}, {transform_indices = @transform_4, window_bounds = array<i64: 8, 128>}]} {
    %c0 = arith.constant 0 : index
    %c0_0 = arith.constant 0 : index
    %0 = vector.load %arg1[%c0, %c0_0] : memref<8x128xbf16, #tpu.memory_space<vmem>>, vector<8x128xbf16>
    %1 = arith.extf %0 : vector<8x128xbf16> to vector<8x128xf32>
    %c0_1 = arith.constant 0 : index
    %c0_2 = arith.constant 0 : index
    %2 = vector.load %arg2[%c0_1, %c0_2] : memref<2x128xf32, #tpu.memory_space<vmem>>, vector<1x128xf32>
    %3 = vector.broadcast %2 : vector<1x128xf32> to vector<8x128xf32>
    %4 = arith.mulf %1, %3 : vector<8x128xf32>
    %c1 = arith.constant 1 : index
    %c0_3 = arith.constant 0 : index
    %5 = vector.load %arg2[%c1, %c0_3] : memref<2x128xf32, #tpu.memory_space<vmem>>, vector<1x128xf32>
    %6 = vector.broadcast %5 : vector<1x128xf32> to vector<8x128xf32>
    %7 = arith.addf %4, %6 : vector<8x128xf32>
    %c0_4 = arith.constant 0 : index
    %c0_5 = arith.constant 0 : index
    %8 = vector.load %arg3[%c0_4, %c0_5] : memref<8x128xbf16, #tpu.memory_space<vmem>>, vector<8x128xbf16>
    %9 = arith.extf %8 : vector<8x128xbf16> to vector<8x128xf32>
    %c0_6 = arith.constant 0 : index
    %c0_7 = arith.constant 0 : index
    %10 = vector.load %arg4[%c0_6, %c0_7] : memref<2x128xf32, #tpu.memory_space<vmem>>, vector<1x128xf32>
    %11 = vector.broadcast %10 : vector<1x128xf32> to vector<8x128xf32>
    %12 = arith.mulf %9, %11 : vector<8x128xf32>
    %13 = arith.addf %7, %12 : vector<8x128xf32>
    %c1_8 = arith.constant 1 : index
    %c0_9 = arith.constant 0 : index
    %14 = vector.load %arg4[%c1_8, %c0_9] : memref<2x128xf32, #tpu.memory_space<vmem>>, vector<1x128xf32>
    %15 = vector.broadcast %14 : vector<1x128xf32> to vector<8x128xf32>
    %16 = arith.addf %13, %15 : vector<8x128xf32>
    %cst = arith.constant 0.000000e+00 : f32
    %17 = vector.broadcast %cst : f32 to vector<8x128xf32>
    %18 = arith.maximumf %16, %17 : vector<8x128xf32>
    %19 = arith.truncf %18 : vector<8x128xf32> to vector<8x128xbf16>
    %c0_10 = arith.constant 0 : index
    %c0_11 = arith.constant 0 : index
    %20 = vector.load %arg5[%c0_10, %c0_11] : memref<8x128xbf16, #tpu.memory_space<vmem>>, vector<8x128xbf16>
    tpu.vector_store %arg5[%c0_10, %c0_11], %19 {strides = array<i32>} : memref<8x128xbf16, #tpu.memory_space<vmem>>, vector<8x128xbf16>,
    return
  }
  func.func @transform_0(%arg0: i32) -> (i32, i32) {
    %c0_i32 = arith.constant 0 : i32
    %c0_i32_0 = arith.constant 0 : i32
    return %arg0, %c0_i32 : i32, i32
  }
  func.func @transform_1(%arg0: i32) -> (i32, i32) {
    %c0_i32 = arith.constant 0 : i32
    %c0_i32_0 = arith.constant 0 : i32
    %c0_i32_1 = arith.constant 0 : i32
    return %c0_i32, %c0_i32_0 : i32, i32
  }
  func.func @transform_2(%arg0: i32) -> (i32, i32) {
    %c1_i32 = arith.constant 1 : i32
    %c0_i32 = arith.constant 0 : i32
    return %arg0, %c1_i32 : i32, i32
  }
  func.func @transform_3(%arg0: i32) -> (i32, i32) {
    %c0_i32 = arith.constant 0 : i32
    %c0_i32_0 = arith.constant 0 : i32
    %c0_i32_1 = arith.constant 0 : i32
    return %c0_i32, %c0_i32_0 : i32, i32
  }
  func.func @transform_4(%arg0: i32) -> (i32, i32) {
    %c0_i32 = arith.constant 0 : i32
    %c0_i32_0 = arith.constant 0 : i32
    return %arg0, %c0_i32 : i32, i32
  }
}

module attributes {stable_mosaic.version = 11 : i64} {
  func.func @_gemm_stats_kernel(%arg0: i32, %arg1: memref<8x1152xbf16, #tpu.memory_space<vmem>>, %arg2: memref<1152x128xbf16, #tpu.memory_space<vmem>>, %arg3: memref<8x128xbf16, #tpu.memory_space<vmem>>, %arg4: memref<1x2x128xf32, #tpu.memory_space<vmem>>) attributes {dimension_semantics = [#tpu.dimension_semantics<parallel>], iteration_bounds = array<i64: 1>, scalar_prefetch = 0 : i64, scratch_operands = 0 : i64, tpu.core_type = #tpu.core_type<tc>, window_params = [{transform_indices = @transform_0, window_bounds = array<i64: 8, 1152>}, {pipeline_mode = #tpu.pipeline_mode<synchronous>, transform_indices = @transform_1, window_bounds = array<i64: 1152, 128>}, {transform_indices = @transform_2, window_bounds = array<i64: 8, 128>}, {transform_indices = @transform_3, window_bounds = array<i64: 1, 2, 128>}]} {
    %c0 = arith.constant 0 : index
    %c0_0 = arith.constant 0 : index
    %0 = vector.load %arg1[%c0, %c0_0] : memref<8x1152xbf16, #tpu.memory_space<vmem>>, vector<8x1152xbf16>
    %c0_1 = arith.constant 0 : index
    %c0_2 = arith.constant 0 : index
    %1 = vector.load %arg2[%c0_1, %c0_2] : memref<1152x128xbf16, #tpu.memory_space<vmem>>, vector<1152x128xbf16>
    %cst = arith.constant dense<0.000000e+00> : vector<8x128xf32>
    %2 = tpu.matmul %0, %1, %cst {dimension_numbers = #tpu.dot_dimension_numbers<[1], [0], [0], [1], [0, 0, 1, 1], [], []>} : vector<8x1152xbf16>, vector<1152x128xbf16>, vector<8x128xf32> -> vector<8x128xf32>
    %3 = arith.truncf %2 : vector<8x128xf32> to vector<8x128xbf16>
    %c0_3 = arith.constant 0 : index
    %c0_4 = arith.constant 0 : index
    %4 = vector.load %arg3[%c0_3, %c0_4] : memref<8x128xbf16, #tpu.memory_space<vmem>>, vector<8x128xbf16>
    tpu.vector_store %arg3[%c0_3, %c0_4], %3 {strides = array<i32>} : memref<8x128xbf16, #tpu.memory_space<vmem>>, vector<8x128xbf16>,
    %cst_5 = arith.constant dense<0.000000e+00> : vector<128xf32>
    %5 = vector.multi_reduction <add>, %2, %cst_5 [0] : vector<8x128xf32> to vector<128xf32>
    %6 = vector.shape_cast %5 : vector<128xf32> to vector<1x128xf32>
    %c0_6 = arith.constant 0 : index
    %c0_7 = arith.constant 0 : index
    %c0_8 = arith.constant 0 : index
    %7 = vector.load %arg4[%c0_6, %c0_7, %c0_8] : memref<1x2x128xf32, #tpu.memory_space<vmem>>, vector<1x1x128xf32>
    %8 = vector.shape_cast %7 : vector<1x1x128xf32> to vector<1x128xf32>
    %9 = vector.shape_cast %6 : vector<1x128xf32> to vector<1x1x128xf32>
    tpu.vector_store %arg4[%c0_6, %c0_7, %c0_8], %9 {strides = array<i32>} : memref<1x2x128xf32, #tpu.memory_space<vmem>>, vector<1x1x128xf32>,
    %10 = arith.mulf %2, %2 : vector<8x128xf32>
    %cst_9 = arith.constant dense<0.000000e+00> : vector<128xf32>
    %11 = vector.multi_reduction <add>, %10, %cst_9 [0] : vector<8x128xf32> to vector<128xf32>
    %12 = vector.shape_cast %11 : vector<128xf32> to vector<1x128xf32>
    %c0_10 = arith.constant 0 : index
    %c1 = arith.constant 1 : index
    %c0_11 = arith.constant 0 : index
    %13 = vector.load %arg4[%c0_10, %c1, %c0_11] : memref<1x2x128xf32, #tpu.memory_space<vmem>>, vector<1x1x128xf32>
    %14 = vector.shape_cast %13 : vector<1x1x128xf32> to vector<1x128xf32>
    %15 = vector.shape_cast %12 : vector<1x128xf32> to vector<1x1x128xf32>
    tpu.vector_store %arg4[%c0_10, %c1, %c0_11], %15 {strides = array<i32>} : memref<1x2x128xf32, #tpu.memory_space<vmem>>, vector<1x1x128xf32>,
    return
  }
  func.func @transform_0(%arg0: i32) -> (i32, i32) {
    %c0_i32 = arith.constant 0 : i32
    %c0_i32_0 = arith.constant 0 : i32
    return %arg0, %c0_i32 : i32, i32
  }
  func.func @transform_1(%arg0: i32) -> (i32, i32) {
    %c0_i32 = arith.constant 0 : i32
    %c0_i32_0 = arith.constant 0 : i32
    %c0_i32_1 = arith.constant 0 : i32
    return %c0_i32, %c0_i32_0 : i32, i32
  }
  func.func @transform_2(%arg0: i32) -> (i32, i32) {
    %c0_i32 = arith.constant 0 : i32
    %c0_i32_0 = arith.constant 0 : i32
    return %arg0, %c0_i32 : i32, i32
  }
  func.func @transform_3(%arg0: i32) -> (i32, i32, i32) {
    %c0_i32 = arith.constant 0 : i32
    %c0_i32_0 = arith.constant 0 : i32
    %c0_i32_1 = arith.constant 0 : i32
    return %arg0, %c0_i32, %c0_i32_0 : i32, i32, i32
  }
}

module attributes {stable_mosaic.version = 11 : i64} {
  func.func @_bn_relu_kernel(%arg0: i32, %arg1: memref<8x128xbf16, #tpu.memory_space<vmem>>, %arg2: memref<2x128xf32, #tpu.memory_space<vmem>>, %arg3: memref<8x128xbf16, #tpu.memory_space<vmem>>) attributes {dimension_semantics = [#tpu.dimension_semantics<parallel>], iteration_bounds = array<i64: 1>, scalar_prefetch = 0 : i64, scratch_operands = 0 : i64, tpu.core_type = #tpu.core_type<tc>, window_params = [{transform_indices = @transform_0, window_bounds = array<i64: 8, 128>}, {pipeline_mode = #tpu.pipeline_mode<synchronous>, transform_indices = @transform_1, window_bounds = array<i64: 2, 128>}, {transform_indices = @transform_2, window_bounds = array<i64: 8, 128>}]} {
    %c0 = arith.constant 0 : index
    %c0_0 = arith.constant 0 : index
    %0 = vector.load %arg1[%c0, %c0_0] : memref<8x128xbf16, #tpu.memory_space<vmem>>, vector<8x128xbf16>
    %1 = arith.extf %0 : vector<8x128xbf16> to vector<8x128xf32>
    %c0_1 = arith.constant 0 : index
    %c0_2 = arith.constant 0 : index
    %2 = vector.load %arg2[%c0_1, %c0_2] : memref<2x128xf32, #tpu.memory_space<vmem>>, vector<1x128xf32>
    %3 = vector.broadcast %2 : vector<1x128xf32> to vector<8x128xf32>
    %4 = arith.mulf %1, %3 : vector<8x128xf32>
    %c1 = arith.constant 1 : index
    %c0_3 = arith.constant 0 : index
    %5 = vector.load %arg2[%c1, %c0_3] : memref<2x128xf32, #tpu.memory_space<vmem>>, vector<1x128xf32>
    %6 = vector.broadcast %5 : vector<1x128xf32> to vector<8x128xf32>
    %7 = arith.addf %4, %6 : vector<8x128xf32>
    %cst = arith.constant 0.000000e+00 : f32
    %8 = vector.broadcast %cst : f32 to vector<8x128xf32>
    %9 = arith.maximumf %7, %8 : vector<8x128xf32>
    %10 = arith.truncf %9 : vector<8x128xf32> to vector<8x128xbf16>
    %c0_4 = arith.constant 0 : index
    %c0_5 = arith.constant 0 : index
    %11 = vector.load %arg3[%c0_4, %c0_5] : memref<8x128xbf16, #tpu.memory_space<vmem>>, vector<8x128xbf16>
    tpu.vector_store %arg3[%c0_4, %c0_5], %10 {strides = array<i32>} : memref<8x128xbf16, #tpu.memory_space<vmem>>, vector<8x128xbf16>,
    return
  }
  func.func @transform_0(%arg0: i32) -> (i32, i32) {
    %c0_i32 = arith.constant 0 : i32
    %c0_i32_0 = arith.constant 0 : i32
    return %arg0, %c0_i32 : i32, i32
  }
  func.func @transform_1(%arg0: i32) -> (i32, i32) {
    %c0_i32 = arith.constant 0 : i32
    %c0_i32_0 = arith.constant 0 : i32
    %c0_i32_1 = arith.constant 0 : i32
    return %c0_i32, %c0_i32_0 : i32, i32
  }
  func.func @transform_2(%arg0: i32) -> (i32, i32) {
    %c0_i32 = arith.constant 0 : i32
    %c0_i32_0 = arith.constant 0 : i32
    return %arg0, %c0_i32 : i32, i32
  }
}

module attributes {stable_mosaic.version = 11 : i64} {
  func.func @_bn_add_relu_kernel(%arg0: i32, %arg1: memref<8x128xbf16, #tpu.memory_space<vmem>>, %arg2: memref<2x128xf32, #tpu.memory_space<vmem>>, %arg3: memref<8x128xbf16, #tpu.memory_space<vmem>>, %arg4: memref<8x128xbf16, #tpu.memory_space<vmem>>) attributes {dimension_semantics = [#tpu.dimension_semantics<parallel>], iteration_bounds = array<i64: 1>, scalar_prefetch = 0 : i64, scratch_operands = 0 : i64, tpu.core_type = #tpu.core_type<tc>, window_params = [{transform_indices = @transform_0, window_bounds = array<i64: 8, 128>}, {pipeline_mode = #tpu.pipeline_mode<synchronous>, transform_indices = @transform_1, window_bounds = array<i64: 2, 128>}, {transform_indices = @transform_2, window_bounds = array<i64: 8, 128>}, {transform_indices = @transform_3, window_bounds = array<i64: 8, 128>}]} {
    %c0 = arith.constant 0 : index
    %c0_0 = arith.constant 0 : index
    %0 = vector.load %arg1[%c0, %c0_0] : memref<8x128xbf16, #tpu.memory_space<vmem>>, vector<8x128xbf16>
    %1 = arith.extf %0 : vector<8x128xbf16> to vector<8x128xf32>
    %c0_1 = arith.constant 0 : index
    %c0_2 = arith.constant 0 : index
    %2 = vector.load %arg2[%c0_1, %c0_2] : memref<2x128xf32, #tpu.memory_space<vmem>>, vector<1x128xf32>
    %3 = vector.broadcast %2 : vector<1x128xf32> to vector<8x128xf32>
    %4 = arith.mulf %1, %3 : vector<8x128xf32>
    %c1 = arith.constant 1 : index
    %c0_3 = arith.constant 0 : index
    %5 = vector.load %arg2[%c1, %c0_3] : memref<2x128xf32, #tpu.memory_space<vmem>>, vector<1x128xf32>
    %6 = vector.broadcast %5 : vector<1x128xf32> to vector<8x128xf32>
    %7 = arith.addf %4, %6 : vector<8x128xf32>
    %c0_4 = arith.constant 0 : index
    %c0_5 = arith.constant 0 : index
    %8 = vector.load %arg3[%c0_4, %c0_5] : memref<8x128xbf16, #tpu.memory_space<vmem>>, vector<8x128xbf16>
    %9 = arith.extf %8 : vector<8x128xbf16> to vector<8x128xf32>
    %10 = arith.addf %7, %9 : vector<8x128xf32>
    %cst = arith.constant 0.000000e+00 : f32
    %11 = vector.broadcast %cst : f32 to vector<8x128xf32>
    %12 = arith.maximumf %10, %11 : vector<8x128xf32>
    %13 = arith.truncf %12 : vector<8x128xf32> to vector<8x128xbf16>
    %c0_6 = arith.constant 0 : index
    %c0_7 = arith.constant 0 : index
    %14 = vector.load %arg4[%c0_6, %c0_7] : memref<8x128xbf16, #tpu.memory_space<vmem>>, vector<8x128xbf16>
    tpu.vector_store %arg4[%c0_6, %c0_7], %13 {strides = array<i32>} : memref<8x128xbf16, #tpu.memory_space<vmem>>, vector<8x128xbf16>,
    return
  }
  func.func @transform_0(%arg0: i32) -> (i32, i32) {
    %c0_i32 = arith.constant 0 : i32
    %c0_i32_0 = arith.constant 0 : i32
    return %arg0, %c0_i32 : i32, i32
  }
  func.func @transform_1(%arg0: i32) -> (i32, i32) {
    %c0_i32 = arith.constant 0 : i32
    %c0_i32_0 = arith.constant 0 : i32
    %c0_i32_1 = arith.constant 0 : i32
    return %c0_i32, %c0_i32_0 : i32, i32
  }
  func.func @transform_2(%arg0: i32) -> (i32, i32) {
    %c0_i32 = arith.constant 0 : i32
    %c0_i32_0 = arith.constant 0 : i32
    return %arg0, %c0_i32 : i32, i32
  }
  func.func @transform_3(%arg0: i32) -> (i32, i32) {
    %c0_i32 = arith.constant 0 : i32
    %c0_i32_0 = arith.constant 0 : i32
    return %arg0, %c0_i32 : i32, i32
  }
}

module attributes {stable_mosaic.version = 11 : i64} {
  func.func @_avgpool_fc_kernel(%arg0: i32, %arg1: memref<2x4x128xbf16, #tpu.memory_space<vmem>>, %arg2: memref<128x128xf32, #tpu.memory_space<vmem>>, %arg3: memref<1x128xf32, #tpu.memory_space<vmem>>, %arg4: memref<2x128xf32, #tpu.memory_space<vmem>>, %arg5: memref<2x128xf32, #tpu.memory_space<vmem>>) attributes {dimension_semantics = [#tpu.dimension_semantics<arbitrary>], iteration_bounds = array<i64: 1>, scalar_prefetch = 0 : i64, scratch_operands = 1 : i64, tpu.core_type = #tpu.core_type<tc>, window_params = [{transform_indices = @transform_0, window_bounds = array<i64: 2, 4, 128>}, {pipeline_mode = #tpu.pipeline_mode<synchronous>, transform_indices = @transform_1, window_bounds = array<i64: 128, 128>}, {pipeline_mode = #tpu.pipeline_mode<synchronous>, transform_indices = @transform_2, window_bounds = array<i64: 1, 128>}, {pipeline_mode = #tpu.pipeline_mode<synchronous>, transform_indices = @transform_3, window_bounds = array<i64: 2, 128>}]} {
    %c0_i32 = arith.constant 0 : i32
    %0 = arith.cmpi eq, %arg0, %c0_i32 : i32
    %1 = arith.extui %0 : i1 to i32
    %c0_i32_0 = arith.constant 0 : i32
    %2 = arith.cmpi ne, %1, %c0_i32_0 : i32
    scf.if %2 {
      %cst_9 = arith.constant 0.000000e+00 : f32
      %12 = vector.broadcast %cst_9 : f32 to vector<2x128xf32>
      %c0_10 = arith.constant 0 : index
      %c0_11 = arith.constant 0 : index
      %13 = vector.load %arg5[%c0_10, %c0_11] : memref<2x128xf32, #tpu.memory_space<vmem>>, vector<2x128xf32>
      tpu.vector_store %arg5[%c0_10, %c0_11], %12 {strides = array<i32>} : memref<2x128xf32, #tpu.memory_space<vmem>>, vector<2x128xf32>,
    } else {
    }
    %c0 = arith.constant 0 : index
    %c0_1 = arith.constant 0 : index
    %3 = vector.load %arg5[%c0, %c0_1] : memref<2x128xf32, #tpu.memory_space<vmem>>, vector<2x128xf32>
    %c0_2 = arith.constant 0 : index
    %c0_3 = arith.constant 0 : index
    %c0_4 = arith.constant 0 : index
    %4 = vector.load %arg1[%c0_2, %c0_3, %c0_4] : memref<2x4x128xbf16, #tpu.memory_space<vmem>>, vector<2x4x128xbf16>
    %5 = arith.extf %4 : vector<2x4x128xbf16> to vector<2x4x128xf32>
    %cst = arith.constant dense<0.000000e+00> : vector<2x128xf32>
    %6 = vector.multi_reduction <add>, %5, %cst [1] : vector<2x4x128xf32> to vector<2x128xf32>
    %7 = arith.addf %3, %6 : vector<2x128xf32>
    %c0_5 = arith.constant 0 : index
    %c0_6 = arith.constant 0 : index
    %8 = vector.load %arg5[%c0_5, %c0_6] : memref<2x128xf32, #tpu.memory_space<vmem>>, vector<2x128xf32>
    tpu.vector_store %arg5[%c0_5, %c0_6], %7 {strides = array<i32>} : memref<2x128xf32, #tpu.memory_space<vmem>>, vector<2x128xf32>,
    %c0_i32_7 = arith.constant 0 : i32
    %9 = arith.cmpi eq, %arg0, %c0_i32_7 : i32
    %10 = arith.extui %9 : i1 to i32
    %c0_i32_8 = arith.constant 0 : i32
    %11 = arith.cmpi ne, %10, %c0_i32_8 : i32
    scf.if %11 {
      %c0_9 = arith.constant 0 : index
      %c0_10 = arith.constant 0 : index
      %12 = vector.load %arg5[%c0_9, %c0_10] : memref<2x128xf32, #tpu.memory_space<vmem>>, vector<2x128xf32>
      %cst_11 = arith.constant 2.500000e-01 : f32
      %13 = vector.broadcast %cst_11 : f32 to vector<2x128xf32>
      %14 = arith.mulf %12, %13 : vector<2x128xf32>
      %c0_12 = arith.constant 0 : index
      %c0_13 = arith.constant 0 : index
      %15 = vector.load %arg2[%c0_12, %c0_13] : memref<128x128xf32, #tpu.memory_space<vmem>>, vector<128x128xf32>
      %cst_14 = arith.constant dense<0.000000e+00> : vector<2x128xf32>
      %16 = tpu.matmul %14, %15, %cst_14 {dimension_numbers = #tpu.dot_dimension_numbers<[1], [0], [0], [1], [0, 0, 1, 1], [], []>} : vector<2x128xf32>, vector<128x128xf32>, vector<2x128xf32> -> vector<2x128xf32>
      %c0_15 = arith.constant 0 : index
      %c0_16 = arith.constant 0 : index
      %17 = vector.load %arg3[%c0_15, %c0_16] : memref<1x128xf32, #tpu.memory_space<vmem>>, vector<1x128xf32>
      %18 = vector.broadcast %17 : vector<1x128xf32> to vector<2x128xf32>
      %19 = arith.addf %16, %18 : vector<2x128xf32>
      %c0_17 = arith.constant 0 : index
      %c0_18 = arith.constant 0 : index
      %20 = vector.load %arg4[%c0_17, %c0_18] : memref<2x128xf32, #tpu.memory_space<vmem>>, vector<2x128xf32>
      tpu.vector_store %arg4[%c0_17, %c0_18], %19 {strides = array<i32>} : memref<2x128xf32, #tpu.memory_space<vmem>>, vector<2x128xf32>,
    } else {
    }
    return
  }
  func.func @transform_0(%arg0: i32) -> (i32, i32, i32) {
    %c0_i32 = arith.constant 0 : i32
    %c0_i32_0 = arith.constant 0 : i32
    %c0_i32_1 = arith.constant 0 : i32
    return %c0_i32, %arg0, %c0_i32_0 : i32, i32, i32
  }
  func.func @transform_1(%arg0: i32) -> (i32, i32) {
    %c0_i32 = arith.constant 0 : i32
    %c0_i32_0 = arith.constant 0 : i32
    %c0_i32_1 = arith.constant 0 : i32
    return %c0_i32, %c0_i32_0 : i32, i32
  }
  func.func @transform_2(%arg0: i32) -> (i32, i32) {
    %c0_i32 = arith.constant 0 : i32
    %c0_i32_0 = arith.constant 0 : i32
    %c0_i32_1 = arith.constant 0 : i32
    return %c0_i32, %c0_i32_0 : i32, i32
  }
  func.func @transform_3(%arg0: i32) -> (i32, i32) {
    %c0_i32 = arith.constant 0 : i32
    %c0_i32_0 = arith.constant 0 : i32
    %c0_i32_1 = arith.constant 0 : i32
    return %c0_i32, %c0_i32_0 : i32, i32
  }
}

</mosaic_0001>

<bundles_post_ra>
// kernel: _lambda_.28
= control target key start
LH: loop header
LB: loop body
LE: loop exit
PB: predicated region body
PF: predicated region fallthrough
CT: control target
= control target key end

     0   :  { %s1490_s0 = inlined_call_operand.vmem [shape: bf16[512,128], index: 0, kind: input, shape index: {}]   ;;  %s1491_s1 = inlined_call_operand.vmem [shape: f32[2,128], index: 1, kind: input, shape index: {}]   ;;  %s1492_s2 = inlined_call_operand.vmem [shape: bf16[512,128], index: 2, kind: output, shape index: {}]  }
   0x1   :  { %v796_v0 = vld [vmem:[%s1490_s0] sm:$0xff]   ;;  %v1083_v4 = vld [vmem:[%s1490_s0 + $0x8] sm:$0xff]   ;;  %v1084_v5 = vld [vmem:[%s1490_s0 + $0x10] sm:$0xff]  }
   0x2   :  { %v1166_v1 = vld [vmem:[%s1491_s1] ss:$0 sm:$0xff]  ;;  %v797_v2 = vunpack.c.l.bf16 %v796_v0  ;;  %v798_v3 = vunpack.c.h.bf16 %v796_v0  ;;  %v1085_v6 = vld [vmem:[%s1490_s0 + $0x18] sm:$0xff]   ;;  %v1180_v7 = vld [vmem:[%s1491_s1 + $0x1] ss:$0 sm:$0xff]  ;;  %v801_v8 = vunpack.c.l.bf16 %v1083_v4  ;;  %v802_v9 = vunpack.c.h.bf16 %v1083_v4 }
   0x3   :  { %v805_v10 = vunpack.c.l.bf16 %v1084_v5  ;;  %v806_v11 = vunpack.c.h.bf16 %v1084_v5  ;;  %v809_v14 = vunpack.c.l.bf16 %v1085_v6  ;;  %v810_v15 = vunpack.c.h.bf16 %v1085_v6  ;;  %v1086_v28 = vld [vmem:[%s1490_s0 + $0x20] sm:$0xff]   ;;  %v1087_v33 = vld [vmem:[%s1490_s0 + $0x28] sm:$0xff]   ;;  %v1088_v38 = vld [vmem:[%s1490_s0 + $0x30] sm:$0xff]  }
   0x4   :  { %v144_v12 = vmul.f32 %v797_v2, %v1166_v1  ;;  %v145_v13 = vmul.f32 %v798_v3, %v1166_v1  ;;  %v146_v16 = vmul.f32 %v801_v8, %v1166_v1  ;;  %v147_v17 = vmul.f32 %v802_v9, %v1166_v1  ;;  %v1089_v43 = vld [vmem:[%s1490_s0 + $0x38] sm:$0xff]   ;;  %v1090_v0 = vld [vmem:[%s1490_s0 + $0x40] sm:$0xff]  }
   0x5   :  { %v148_v18 = vmul.f32 %v805_v10, %v1166_v1  ;;  %v149_v19 = vmul.f32 %v806_v11, %v1166_v1  ;;  %v150_v22 = vmul.f32 %v809_v14, %v1166_v1  ;;  %v151_v23 = vmul.f32 %v810_v15, %v1166_v1  ;;  %v1091_v11 = vld [vmem:[%s1490_s0 + $0x48] sm:$0xff]  }
   0x6   :  { %v213_v20 = vadd.f32 %v1180_v7, %v144_v12  ;;  %v214_v21 = vadd.f32 %v1180_v7, %v145_v13  ;;  %v215_v24 = vadd.f32 %v1180_v7, %v146_v16  ;;  %v216_v25 = vadd.f32 %v1180_v7, %v147_v17  ;;  %v1092_v16 = vld [vmem:[%s1490_s0 + $0x50] sm:$0xff]  }
   0x7   :  { %v217_v26 = vadd.f32 %v1180_v7, %v148_v18  ;;  %v218_v27 = vadd.f32 %v1180_v7, %v149_v19  ;;  %v219_v31 = vadd.f32 %v1180_v7, %v150_v22  ;;  %v220_v32 = vadd.f32 %v1180_v7, %v151_v23 }
   0x8   :  { %v277_v29 = vmax.f32 %v213_v20, 0.0  ;;  %v278_v30 = vmax.f32 %v214_v21, 0.0  ;;  %v279_v34 = vmax.f32 %v215_v24, 0.0  ;;  %v280_v35 = vmax.f32 %v216_v25, 0.0  ;;  %v1093_v25 = vld [vmem:[%s1490_s0 + $0x58] sm:$0xff]  }
   0x9   :  { %v281_v36 = vmax.f32 %v217_v26, 0.0  ;;  %v282_v37 = vmax.f32 %v218_v27, 0.0  ;;  %v283_v40 = vmax.f32 %v219_v31, 0.0  ;;  %v284_v41 = vmax.f32 %v220_v32, 0.0 }
   0xa   :  { %v926_v39 = vpack.c.bf16 %v278_v30, %v277_v29  ;;  %v813_v42 = vunpack.c.l.bf16 %v1086_v28  ;;  %v931_v44 = vpack.c.bf16 %v280_v35, %v279_v34  ;;  %v814_v46 = vunpack.c.h.bf16 %v1086_v28 }
   0xb   :  { %v936_v45 = vpack.c.bf16 %v282_v37, %v281_v36  ;;  %v817_v47 = vunpack.c.l.bf16 %v1087_v33  ;;  %v941_v48 = vpack.c.bf16 %v284_v41, %v283_v40  ;;  %v818_v50 = vunpack.c.h.bf16 %v1087_v33 }
   0xc   :  { %927 = vst [vmem:[%s1492_s2] sm:$0xff] %v926_v39   ;;  %v152_v49 = vmul.f32 %v813_v42, %v1166_v1  ;;  %v821_v51 = vunpack.c.l.bf16 %v1088_v38  ;;  %1114 = vst [vmem:[%s1492_s2 + $0x8] sm:$0xff] %v931_v44   ;;  %v153_v52 = vmul.f32 %v814_v46, %v1166_v1  ;;  %v822_v54 = vunpack.c.h.bf16 %v1088_v38  ;;  %v1094_v38 = vld [vmem:[%s1490_s0 + $0x60] sm:$0xff]  }
   0xd   :  { %1115 = vst [vmem:[%s1492_s2 + $0x10] sm:$0xff] %v936_v45   ;;  %v154_v53 = vmul.f32 %v817_v47, %v1166_v1  ;;  %v825_v55 = vunpack.c.l.bf16 %v1089_v43  ;;  %1116 = vst [vmem:[%s1492_s2 + $0x18] sm:$0xff] %v941_v48   ;;  %v155_v57 = vmul.f32 %v818_v50, %v1166_v1  ;;  %v826_v59 = vunpack.c.h.bf16 %v1089_v43 }
   0xe   :  { %v221_v56 = vadd.f32 %v1180_v7, %v152_v49  ;;  %v156_v58 = vmul.f32 %v821_v51, %v1166_v1  ;;  %v222_v60 = vadd.f32 %v1180_v7, %v153_v52  ;;  %v157_v62 = vmul.f32 %v822_v54, %v1166_v1  ;;  %v1095_v51 = vld [vmem:[%s1490_s0 + $0x68] sm:$0xff]  }
   0xf   :  { %v223_v61 = vadd.f32 %v1180_v7, %v154_v53  ;;  %v158_v63 = vmul.f32 %v825_v55, %v1166_v1  ;;  %v224_v3 = vadd.f32 %v1180_v7, %v155_v57  ;;  %v159_v5 = vmul.f32 %v826_v59, %v1166_v1 }
  0x10   :  { %v285_v2 = vmax.f32 %v221_v56, 0.0  ;;  %v225_v4 = vadd.f32 %v1180_v7, %v156_v58  ;;  %v286_v6 = vmax.f32 %v222_v60, 0.0  ;;  %v226_v9 = vadd.f32 %v1180_v7, %v157_v62  ;;  %v1096_v60 = vld [vmem:[%s1490_s0 + $0x70] sm:$0xff]  }
  0x11   :  { %v287_v8 = vmax.f32 %v223_v61, 0.0  ;;  %v227_v10 = vadd.f32 %v1180_v7, %v158_v63  ;;  %v288_v12 = vmax.f32 %v224_v3, 0.0  ;;  %v228_v14 = vadd.f32 %v1180_v7, %v159_v5 }
  0x12   :  { %v289_v13 = vmax.f32 %v225_v4, 0.0  ;;  %v829_v15 = vunpack.c.l.bf16 %v1090_v0  ;;  %v946_v17 = vpack.c.bf16 %v286_v6, %v285_v2  ;;  %v290_v18 = vmax.f32 %v226_v9, 0.0  ;;  %v1097_v2 = vld [vmem:[%s1490_s0 + $0x78] sm:$0xff]  }
  0x13   :  { %v291_v19 = vmax.f32 %v227_v10, 0.0  ;;  %v830_v20 = vunpack.c.h.bf16 %v1090_v0  ;;  %v951_v21 = vpack.c.bf16 %v288_v12, %v287_v8  ;;  %v292_v22 = vmax.f32 %v228_v14, 0.0  ;;  %v1098_v12 = vld [vmem:[%s1490_s0 + $0x80] sm:$0xff]  }
  0x14   :  { %v160_v23 = vmul.f32 %v829_v15, %v1166_v1  ;;  %v833_v24 = vunpack.c.l.bf16 %v1091_v11  ;;  %1117 = vst [vmem:[%s1492_s2 + $0x20] sm:$0xff] %v946_v17   ;;  %v956_v26 = vpack.c.bf16 %v290_v18, %v289_v13  ;;  %v834_v28 = vunpack.c.h.bf16 %v1091_v11 }
  0x15   :  { %v161_v27 = vmul.f32 %v830_v20, %v1166_v1  ;;  %v837_v29 = vunpack.c.l.bf16 %v1092_v16  ;;  %1118 = vst [vmem:[%s1492_s2 + $0x28] sm:$0xff] %v951_v21   ;;  %v961_v30 = vpack.c.bf16 %v292_v22, %v291_v19  ;;  %v838_v33 = vunpack.c.h.bf16 %v1092_v16 }
  0x16   :  { %v229_v31 = vadd.f32 %v1180_v7, %v160_v23  ;;  %v162_v32 = vmul.f32 %v833_v24, %v1166_v1  ;;  %1119 = vst [vmem:[%s1492_s2 + $0x30] sm:$0xff] %v956_v26   ;;  %v163_v35 = vmul.f32 %v834_v28, %v1166_v1  ;;  %v841_v37 = vunpack.c.l.bf16 %v1093_v25 }
  0x17   :  { %v230_v34 = vadd.f32 %v1180_v7, %v161_v27  ;;  %v164_v36 = vmul.f32 %v837_v29, %v1166_v1  ;;  %1120 = vst [vmem:[%s1492_s2 + $0x38] sm:$0xff] %v961_v30   ;;  %v165_v41 = vmul.f32 %v838_v33, %v1166_v1  ;;  %v842_v42 = vunpack.c.h.bf16 %v1093_v25  ;;  %v1099_v29 = vld [vmem:[%s1490_s0 + $0x88] sm:$0xff]  }
  0x18   :  { %v293_v39 = vmax.f32 %v229_v31, 0.0  ;;  %v231_v40 = vadd.f32 %v1180_v7, %v162_v32  ;;  %v232_v44 = vadd.f32 %v1180_v7, %v163_v35  ;;  %v166_v46 = vmul.f32 %v841_v37, %v1166_v1 }
  0x19   :  { %v294_v43 = vmax.f32 %v230_v34, 0.0  ;;  %v233_v45 = vadd.f32 %v1180_v7, %v164_v36  ;;  %v234_v48 = vadd.f32 %v1180_v7, %v165_v41  ;;  %v167_v49 = vmul.f32 %v842_v42, %v1166_v1  ;;  %v1100_v34 = vld [vmem:[%s1490_s0 + $0x90] sm:$0xff]  }
  0x1a   :  { %v295_v47 = vmax.f32 %v231_v40, 0.0  ;;  %v845_v50 = vunpack.c.l.bf16 %v1094_v38  ;;  %v296_v53 = vmax.f32 %v232_v44, 0.0  ;;  %v235_v55 = vadd.f32 %v1180_v7, %v166_v46 }
  0x1b   :  { %v966_v52 = vpack.c.bf16 %v294_v43, %v293_v39  ;;  %v297_v54 = vmax.f32 %v233_v45, 0.0  ;;  %v298_v56 = vmax.f32 %v234_v48, 0.0  ;;  %v236_v57 = vadd.f32 %v1180_v7, %v167_v49  ;;  %v1101_v43 = vld [vmem:[%s1490_s0 + $0x98] sm:$0xff]  }
  0x1c   :  { %v846_v58 = vunpack.c.h.bf16 %v1094_v38  ;;  %v168_v59 = vmul.f32 %v845_v50, %v1166_v1  ;;  %v971_v61 = vpack.c.bf16 %v296_v53, %v295_v47  ;;  %v299_v62 = vmax.f32 %v235_v55, 0.0 }
  0x1d   :  { %1121 = vst [vmem:[%s1492_s2 + $0x40] sm:$0xff] %v966_v52   ;;  %v849_v63 = vunpack.c.l.bf16 %v1095_v51  ;;  %v850_v0 = vunpack.c.h.bf16 %v1095_v51  ;;  %v976_v3 = vpack.c.bf16 %v298_v56, %v297_v54  ;;  %v300_v4 = vmax.f32 %v236_v57, 0.0  ;;  %v1102_v56 = vld [vmem:[%s1490_s0 + $0xa0] sm:$0xff]  }
  0x1e   :  { %v169_v5 = vmul.f32 %v846_v58, %v1166_v1  ;;  %v237_v6 = vadd.f32 %v1180_v7, %v168_v59  ;;  %1122 = vst [vmem:[%s1492_s2 + $0x48] sm:$0xff] %v971_v61   ;;  %v853_v10 = vunpack.c.l.bf16 %v1096_v60  ;;  %v854_v11 = vunpack.c.h.bf16 %v1096_v60 }
  0x1f   :  { %v170_v8 = vmul.f32 %v849_v63, %v1166_v1  ;;  %v171_v9 = vmul.f32 %v850_v0, %v1166_v1  ;;  %1123 = vst [vmem:[%s1492_s2 + $0x50] sm:$0xff] %v976_v3   ;;  %v981_v13 = vpack.c.bf16 %v300_v4, %v299_v62  ;;  %v857_v16 = vunpack.c.l.bf16 %v1097_v2 }
  0x20   :  { %v238_v14 = vadd.f32 %v1180_v7, %v169_v5  ;;  %v301_v15 = vmax.f32 %v237_v6, 0.0  ;;  %v172_v19 = vmul.f32 %v853_v10, %v1166_v1  ;;  %v173_v20 = vmul.f32 %v854_v11, %v1166_v1 }
  0x21   :  { %v239_v17 = vadd.f32 %v1180_v7, %v170_v8  ;;  %v240_v18 = vadd.f32 %v1180_v7, %v171_v9  ;;  %1124 = vst [vmem:[%s1492_s2 + $0x58] sm:$0xff] %v981_v13   ;;  %v858_v22 = vunpack.c.h.bf16 %v1097_v2  ;;  %v174_v23 = vmul.f32 %v857_v16, %v1166_v1  ;;  %v1103_v2 = vld [vmem:[%s1490_s0 + $0xa8] sm:$0xff]   ;;  %v1104_v16 = vld [vmem:[%s1490_s0 + $0xb0] sm:$0xff]  }
  0x22   :  { %v302_v21 = vmax.f32 %v238_v14, 0.0  ;;  %v861_v24 = vunpack.c.l.bf16 %v1098_v12  ;;  %v241_v27 = vadd.f32 %v1180_v7, %v172_v19  ;;  %v242_v28 = vadd.f32 %v1180_v7, %v173_v20 }
  0x23   :  { %v303_v25 = vmax.f32 %v239_v17, 0.0  ;;  %v304_v26 = vmax.f32 %v240_v18, 0.0  ;;  %v175_v31 = vmul.f32 %v858_v22, %v1166_v1  ;;  %v243_v32 = vadd.f32 %v1180_v7, %v174_v23 }
  0x24   :  { %v986_v30 = vpack.c.bf16 %v302_v21, %v301_v15  ;;  %v862_v33 = vunpack.c.h.bf16 %v1098_v12  ;;  %v305_v36 = vmax.f32 %v241_v27, 0.0  ;;  %v306_v37 = vmax.f32 %v242_v28, 0.0  ;;  %v1105_v21 = vld [vmem:[%s1490_s0 + $0xb8] sm:$0xff]  }
  0x25   :  { %v991_v35 = vpack.c.bf16 %v304_v26, %v303_v25  ;;  %v176_v38 = vmul.f32 %v861_v24, %v1166_v1  ;;  %v244_v39 = vadd.f32 %v1180_v7, %v175_v31  ;;  %v307_v40 = vmax.f32 %v243_v32, 0.0 }
  0x26   :  { %1125 = vst [vmem:[%s1492_s2 + $0x60] sm:$0xff] %v986_v30   ;;  %v177_v41 = vmul.f32 %v862_v33, %v1166_v1  ;;  %v865_v42 = vunpack.c.l.bf16 %v1099_v29  ;;  %v996_v44 = vpack.c.bf16 %v306_v37, %v305_v36  ;;  %v866_v46 = vunpack.c.h.bf16 %v1099_v29 }
  0x27   :  { %1126 = vst [vmem:[%s1492_s2 + $0x68] sm:$0xff] %v991_v35   ;;  %v245_v45 = vadd.f32 %v1180_v7, %v176_v38  ;;  %v869_v47 = vunpack.c.l.bf16 %v1100_v34  ;;  %v308_v48 = vmax.f32 %v244_v39, 0.0  ;;  %v870_v51 = vunpack.c.h.bf16 %v1100_v34  ;;  %v1106_v34 = vld [vmem:[%s1490_s0 + $0xc0] sm:$0xff]  }
  0x28   :  { %v246_v49 = vadd.f32 %v1180_v7, %v177_v41  ;;  %v178_v50 = vmul.f32 %v865_v42, %v1166_v1  ;;  %1127 = vst [vmem:[%s1492_s2 + $0x70] sm:$0xff] %v996_v44   ;;  %v179_v53 = vmul.f32 %v866_v46, %v1166_v1  ;;  %v873_v55 = vunpack.c.l.bf16 %v1101_v43 }
  0x29   :  { %v309_v52 = vmax.f32 %v245_v45, 0.0  ;;  %v180_v54 = vmul.f32 %v869_v47, %v1166_v1  ;;  %v1001_v57 = vpack.c.bf16 %v308_v48, %v307_v40  ;;  %v181_v60 = vmul.f32 %v870_v51, %v1166_v1  ;;  %v1107_v47 = vld [vmem:[%s1490_s0 + $0xc8] sm:$0xff]  }
  0x2a   :  { %v310_v58 = vmax.f32 %v246_v49, 0.0  ;;  %v247_v59 = vadd.f32 %v1180_v7, %v178_v50  ;;  %v248_v61 = vadd.f32 %v1180_v7, %v179_v53  ;;  %v874_v63 = vunpack.c.h.bf16 %v1101_v43 }
  0x2b   :  { %v249_v62 = vadd.f32 %v1180_v7, %v180_v54  ;;  %v182_v0 = vmul.f32 %v873_v55, %v1166_v1  ;;  %1128 = vst [vmem:[%s1492_s2 + $0x78] sm:$0xff] %v1001_v57   ;;  %v250_v5 = vadd.f32 %v1180_v7, %v181_v60  ;;  %v877_v6 = vunpack.c.l.bf16 %v1102_v56 }
  0x2c   :  { %v1006_v3 = vpack.c.bf16 %v310_v58, %v309_v52  ;;  %v311_v4 = vmax.f32 %v247_v59, 0.0  ;;  %v312_v8 = vmax.f32 %v248_v61, 0.0  ;;  %v183_v10 = vmul.f32 %v874_v63, %v1166_v1  ;;  %v1108_v52 = vld [vmem:[%s1490_s0 + $0xd0] sm:$0xff]   ;;  %v1109_v61 = vld [vmem:[%s1490_s0 + $0xd8] sm:$0xff]  }
  0x2d   :  { %v313_v9 = vmax.f32 %v249_v62, 0.0  ;;  %v251_v11 = vadd.f32 %v1180_v7, %v182_v0  ;;  %v314_v12 = vmax.f32 %v250_v5, 0.0  ;;  %v878_v13 = vunpack.c.h.bf16 %v1102_v56 }
  0x2e   :  { %1129 = vst [vmem:[%s1492_s2 + $0x80] sm:$0xff] %v1006_v3   ;;  %v184_v14 = vmul.f32 %v877_v6, %v1166_v1  ;;  %v881_v15 = vunpack.c.l.bf16 %v1103_v2  ;;  %v1011_v17 = vpack.c.bf16 %v312_v8, %v311_v4  ;;  %v252_v18 = vadd.f32 %v1180_v7, %v183_v10 }
  0x2f   :  { %v315_v19 = vmax.f32 %v251_v11, 0.0  ;;  %v882_v20 = vunpack.c.h.bf16 %v1103_v2  ;;  %v1016_v22 = vpack.c.bf16 %v314_v12, %v313_v9  ;;  %v185_v23 = vmul.f32 %v878_v13, %v1166_v1  ;;  %v1110_v12 = vld [vmem:[%s1490_s0 + $0xe0] sm:$0xff]  }
  0x30   :  { %v253_v24 = vadd.f32 %v1180_v7, %v184_v14  ;;  %v186_v25 = vmul.f32 %v881_v15, %v1166_v1  ;;  %1130 = vst [vmem:[%s1492_s2 + $0x88] sm:$0xff] %v1011_v17   ;;  %v316_v26 = vmax.f32 %v252_v18, 0.0  ;;  %v885_v28 = vunpack.c.l.bf16 %v1104_v16 }
  0x31   :  { %v187_v27 = vmul.f32 %v882_v20, %v1166_v1  ;;  %v886_v29 = vunpack.c.h.bf16 %v1104_v16  ;;  %1131 = vst [vmem:[%s1492_s2 + $0x90] sm:$0xff] %v1016_v22   ;;  %v254_v30 = vadd.f32 %v1180_v7, %v185_v23  ;;  %v889_v33 = vunpack.c.l.bf16 %v1105_v21 }
  0x32   :  { %v317_v31 = vmax.f32 %v253_v24, 0.0  ;;  %v255_v32 = vadd.f32 %v1180_v7, %v186_v25  ;;  %v1021_v35 = vpack.c.bf16 %v316_v26, %v315_v19  ;;  %v188_v37 = vmul.f32 %v885_v28, %v1166_v1 }
  0x33   :  { %v256_v36 = vadd.f32 %v1180_v7, %v187_v27  ;;  %v189_v38 = vmul.f32 %v886_v29, %v1166_v1  ;;  %v318_v39 = vmax.f32 %v254_v30, 0.0  ;;  %v890_v41 = vunpack.c.h.bf16 %v1105_v21  ;;  %v1111_v21 = vld [vmem:[%s1490_s0 + $0xe8] sm:$0xff]  }
  0x34   :  { %v319_v40 = vmax.f32 %v255_v32, 0.0  ;;  %v190_v42 = vmul.f32 %v889_v33, %v1166_v1  ;;  %1132 = vst [vmem:[%s1492_s2 + $0x98] sm:$0xff] %v1021_v35   ;;  %v257_v44 = vadd.f32 %v1180_v7, %v188_v37  ;;  %v893_v46 = vunpack.c.l.bf16 %v1106_v34 }
  0x35   :  { %v320_v43 = vmax.f32 %v256_v36, 0.0  ;;  %v258_v45 = vadd.f32 %v1180_v7, %v189_v38  ;;  %v1026_v48 = vpack.c.bf16 %v318_v39, %v317_v31  ;;  %v191_v49 = vmul.f32 %v890_v41, %v1166_v1  ;;  %v1113_v39 = vld [vmem:[%s1490_s0 + $0xf8] sm:$0xff]  }
  0x36   :  { %v259_v50 = vadd.f32 %v1180_v7, %v190_v42  ;;  %v894_v51 = vunpack.c.h.bf16 %v1106_v34  ;;  %v321_v54 = vmax.f32 %v257_v44, 0.0  ;;  %v192_v56 = vmul.f32 %v893_v46, %v1166_v1  ;;  %v1112_v34 = vld [vmem:[%s1490_s0 + $0xf0] sm:$0xff]  }
  0x37   :  { %v1031_v53 = vpack.c.bf16 %v320_v43, %v319_v40  ;;  %v322_v55 = vmax.f32 %v258_v45, 0.0  ;;  %1133 = vst [vmem:[%s1492_s2 + $0xa0] sm:$0xff] %v1026_v48   ;;  %v260_v57 = vadd.f32 %v1180_v7, %v191_v49  ;;  %v897_v60 = vunpack.c.l.bf16 %v1107_v47 }
  0x38   :  { %v323_v58 = vmax.f32 %v259_v50, 0.0  ;;  %v193_v59 = vmul.f32 %v894_v51, %v1166_v1  ;;  %v261_v63 = vadd.f32 %v1180_v7, %v192_v56  ;;  %v898_v0 = vunpack.c.h.bf16 %v1107_v47 }
  0x39   :  { %1134 = vst [vmem:[%s1492_s2 + $0xa8] sm:$0xff] %v1031_v53   ;;  %v1036_v62 = vpack.c.bf16 %v322_v55, %v321_v54  ;;  %v901_v2 = vunpack.c.l.bf16 %v1108_v52  ;;  %v324_v3 = vmax.f32 %v260_v57, 0.0  ;;  %v194_v5 = vmul.f32 %v897_v60, %v1166_v1 }
  0x3a   :  { %v262_v4 = vadd.f32 %v1180_v7, %v193_v59  ;;  %v902_v6 = vunpack.c.h.bf16 %v1108_v52  ;;  %v325_v8 = vmax.f32 %v261_v63, 0.0  ;;  %v195_v9 = vmul.f32 %v898_v0, %v1166_v1 }
  0x3b   :  { %1135 = vst [vmem:[%s1492_s2 + $0xb0] sm:$0xff] %v1036_v62   ;;  %v196_v10 = vmul.f32 %v901_v2, %v1166_v1  ;;  %v905_v11 = vunpack.c.l.bf16 %v1109_v61  ;;  %v1041_v13 = vpack.c.bf16 %v324_v3, %v323_v58  ;;  %v263_v15 = vadd.f32 %v1180_v7, %v194_v5 }
  0x3c   :  { %v326_v14 = vmax.f32 %v262_v4, 0.0  ;;  %v197_v16 = vmul.f32 %v902_v6, %v1166_v1  ;;  %v264_v17 = vadd.f32 %v1180_v7, %v195_v9  ;;  %v906_v19 = vunpack.c.h.bf16 %v1109_v61 }
  0x3d   :  { %v265_v18 = vadd.f32 %v1180_v7, %v196_v10  ;;  %v198_v20 = vmul.f32 %v905_v11, %v1166_v1  ;;  %1136 = vst [vmem:[%s1492_s2 + $0xb8] sm:$0xff] %v1041_v13   ;;  %v327_v23 = vmax.f32 %v263_v15, 0.0  ;;  %v909_v25 = vunpack.c.l.bf16 %v1110_v12 }
  0x3e   :  { %v1046_v22 = vpack.c.bf16 %v326_v14, %v325_v8  ;;  %v266_v24 = vadd.f32 %v1180_v7, %v197_v16  ;;  %v328_v26 = vmax.f32 %v264_v17, 0.0  ;;  %v199_v28 = vmul.f32 %v906_v19, %v1166_v1 }
  0x3f   :  { %v329_v27 = vmax.f32 %v265_v18, 0.0  ;;  %v267_v29 = vadd.f32 %v1180_v7, %v198_v20  ;;  %v910_v31 = vunpack.c.h.bf16 %v1110_v12  ;;  %v200_v32 = vmul.f32 %v909_v25, %v1166_v1 }
  0x40   :  { %1137 = vst [vmem:[%s1492_s2 + $0xc0] sm:$0xff] %v1046_v22   ;;  %v330_v30 = vmax.f32 %v266_v24, 0.0  ;;  %v913_v33 = vunpack.c.l.bf16 %v1111_v21  ;;  %v1051_v35 = vpack.c.bf16 %v328_v26, %v327_v23  ;;  %v268_v36 = vadd.f32 %v1180_v7, %v199_v28 }
  0x41   :  { %v331_v37 = vmax.f32 %v267_v29, 0.0  ;;  %v914_v38 = vunpack.c.h.bf16 %v1111_v21  ;;  %v201_v41 = vmul.f32 %v910_v31, %v1166_v1  ;;  %v269_v42 = vadd.f32 %v1180_v7, %v200_v32 }
  0x42   :  { %v1056_v40 = vpack.c.bf16 %v330_v30, %v329_v27  ;;  %v202_v43 = vmul.f32 %v913_v33, %v1166_v1  ;;  %1138 = vst [vmem:[%s1492_s2 + $0xc8] sm:$0xff] %v1051_v35   ;;  %v332_v44 = vmax.f32 %v268_v36, 0.0  ;;  %v917_v46 = vunpack.c.l.bf16 %v1112_v34 }
  0x43   :  { %v203_v45 = vmul.f32 %v914_v38, %v1166_v1  ;;  %v918_v47 = vunpack.c.h.bf16 %v1112_v34  ;;  %v270_v48 = vadd.f32 %v1180_v7, %v201_v41  ;;  %v333_v49 = vmax.f32 %v269_v42, 0.0 }
  0x44   :  { %1139 = vst [vmem:[%s1492_s2 + $0xd0] sm:$0xff] %v1056_v40   ;;  %v271_v50 = vadd.f32 %v1180_v7, %v202_v43  ;;  %v921_v51 = vunpack.c.l.bf16 %v1113_v39  ;;  %v1061_v52 = vpack.c.bf16 %v332_v44, %v331_v37  ;;  %v204_v54 = vmul.f32 %v917_v46, %v1166_v1 }
  0x45   :  { %v272_v53 = vadd.f32 %v1180_v7, %v203_v45  ;;  %v205_v55 = vmul.f32 %v918_v47, %v1166_v1  ;;  %v334_v56 = vmax.f32 %v270_v48, 0.0  ;;  %v922_v58 = vunpack.c.h.bf16 %v1113_v39 }
  0x46   :  { %v335_v57 = vmax.f32 %v271_v50, 0.0  ;;  %v206_v59 = vmul.f32 %v921_v51, %v1166_v1  ;;  %1140 = vst [vmem:[%s1492_s2 + $0xd8] sm:$0xff] %v1061_v52   ;;  %v273_v61 = vadd.f32 %v1180_v7, %v204_v54 }
  0x47   :  { %v336_v60 = vmax.f32 %v272_v53, 0.0  ;;  %v274_v62 = vadd.f32 %v1180_v7, %v205_v55  ;;  %v1066_v63 = vpack.c.bf16 %v334_v56, %v333_v49  ;;  %v207_v0 = vmul.f32 %v922_v58, %v1166_v1 }
  0x48   :  { %v275_v2 = vadd.f32 %v1180_v7, %v206_v59  ;;  %v337_v4 = vmax.f32 %v273_v61, 0.0 }
  0x49   :  { %v1071_v3 = vpack.c.bf16 %v336_v60, %v335_v57  ;;  %v338_v5 = vmax.f32 %v274_v62, 0.0  ;;  %1141 = vst [vmem:[%s1492_s2 + $0xe0] sm:$0xff] %v1066_v63   ;;  %v276_v6 = vadd.f32 %v1180_v7, %v207_v0 }
  0x4a   :  { %v339_v8 = vmax.f32 %v275_v2, 0.0 }
  0x4b   :  { %1142 = vst [vmem:[%s1492_s2 + $0xe8] sm:$0xff] %v1071_v3   ;;  %v1076_v9 = vpack.c.bf16 %v338_v5, %v337_v4  ;;  %v340_v10 = vmax.f32 %v276_v6, 0.0 }
  0x4d   :  { %1143 = vst [vmem:[%s1492_s2 + $0xf0] sm:$0xff] %v1076_v9   ;;  %v1081_v1 = vpack.c.bf16 %v340_v10, %v339_v8 }
  0x4f   :  { %1144 = vst [vmem:[%s1492_s2 + $0xf8] sm:$0xff] %v1081_v1  }

// kernel: _lambda_.27
= control target key start
LH: loop header
LB: loop body
LE: loop exit
PB: predicated region body
PF: predicated region fallthrough
CT: control target
= control target key end

     0   :  { %v1891_v0 = vmov 0   ;;  %s2478_s1 = inlined_call_operand.vmem [shape: bf16[256,128], index: 1, kind: input, shape index: {}]   ;;  %s2479_s0 = inlined_call_operand.vmem [shape: bf16[512,256], index: 0, kind: input, shape index: {}]   ;;  %s2480_s2 = inlined_call_operand.vmem [shape: bf16[512,128], index: 2, kind: output, shape index: {0}]   ;;  %s2481_s3 = inlined_call_operand.vmem [shape: f32[1,2,128], index: 3, kind: output, shape index: {1}]  }
   0x1   :  { %526 = vmatprep.subr.bf16.mxu0 %v1891_v0  ;;  %v1779_v1 = vld [vmem:[%s2478_s1] sm:$0xff]   ;;  %1746 = vmatprep.subr.bf16.mxu1 %v1891_v0  ;;  %v1780_v2 = vld [vmem:[%s2478_s1 + $0x8] sm:$0xff]   ;;  %v1781_v3 = vld [vmem:[%s2478_s1 + $0x10] sm:$0xff]  }
   0x2   :  { %527 = vmatpush1.bf16.msra.mxu0 %v1779_v1  ;;  %1762 = vmatpush1.bf16.msra.mxu1 %v1779_v1  ;;  %v1782_v4 = vld [vmem:[%s2478_s1 + $0x18] sm:$0xff]   ;;  %v1783_v5 = vld [vmem:[%s2478_s1 + $0x20] sm:$0xff]   ;;  %v1784_v7 = vld [vmem:[%s2478_s1 + $0x28] sm:$0xff]  }
   0x3   :  { %528 = vmatprep.subr.bf16.mxu0 %v1891_v0  ;;  %1747 = vmatprep.subr.bf16.mxu1 %v1891_v0  ;;  %v1797_v6 = vld [vmem:[%s2479_s0 + $0x4] ss:$8 sps:$4 sm:$0xff]   ;;  %v1785_v8 = vld [vmem:[%s2478_s1 + $0x30] sm:$0xff]   ;;  %v1786_v9 = vld [vmem:[%s2478_s1 + $0x38] sm:$0xff]  }
   0x4   :  { %558 = vmatprep.mubr.bf16.mxu0 %v1797_v6  ;;  %v1821_v10 = vld [vmem:[%s2479_s0 + $0x104] ss:$8 sps:$4 sm:$0xff]   ;;  %v1789_v13 = vld [vmem:[%s2478_s1 + $0x50] sm:$0xff]   ;;  %v1790_v14 = vld [vmem:[%s2478_s1 + $0x58] sm:$0xff]  }
   0x5   :  { %686 = vmatprep.mubr.bf16.mxu1 %v1821_v10  ;;  %v1787_v11 = vld [vmem:[%s2478_s1 + $0x40] sm:$0xff]   ;;  %v1788_v12 = vld [vmem:[%s2478_s1 + $0x48] sm:$0xff]   ;;  %v1793_v17 = vld [vmem:[%s2478_s1 + $0x70] sm:$0xff]  }
   0x6   :  { %529 = vmatpush1.bf16.msra.mxu0 %v1780_v2  ;;  %1763 = vmatpush1.bf16.msra.mxu1 %v1780_v2  ;;  %v1791_v15 = vld [vmem:[%s2478_s1 + $0x60] sm:$0xff]   ;;  %v1792_v16 = vld [vmem:[%s2478_s1 + $0x68] sm:$0xff]   ;;  %v1794_v18 = vld [vmem:[%s2478_s1 + $0x78] sm:$0xff]  }
   0x7   :  { %530 = vmatprep.subr.bf16.mxu0 %v1891_v0  ;;  %1748 = vmatprep.subr.bf16.mxu1 %v1891_v0  ;;  %v1795_v19 = vld [vmem:[%s2479_s0] ss:$8 sps:$4 sm:$0xff]   ;;  %v1798_v21 = vld [vmem:[%s2479_s0 + $0x14] ss:$8 sps:$4 sm:$0xff]   ;;  %v1800_v23 = vld [vmem:[%s2479_s0 + $0x10] ss:$8 sps:$4 sm:$0xff]  }
   0x8   :  { %v1819_v20 = vld [vmem:[%s2479_s0 + $0x100] ss:$8 sps:$4 sm:$0xff]   ;;  %v1825_v22 = vld [vmem:[%s2479_s0 + $0x114] ss:$8 sps:$4 sm:$0xff]   ;;  %v1827_v24 = vld [vmem:[%s2479_s0 + $0x110] ss:$8 sps:$4 sm:$0xff]  }
   0x9   :  { %v1801_v25 = vld [vmem:[%s2479_s0 + $0x24] ss:$8 sps:$4 sm:$0xff]   ;;  %v1803_v27 = vld [vmem:[%s2479_s0 + $0x20] ss:$8 sps:$4 sm:$0xff]   ;;  %v1804_v29 = vld [vmem:[%s2479_s0 + $0x34] ss:$8 sps:$4 sm:$0xff]  }
   0xa   :  { %531 = vmatpush1.bf16.msra.mxu0 %v1781_v3  ;;  %1764 = vmatpush1.bf16.msra.mxu1 %v1781_v3  ;;  %v1831_v26 = vld [vmem:[%s2479_s0 + $0x124] ss:$8 sps:$4 sm:$0xff]   ;;  %v1833_v28 = vld [vmem:[%s2479_s0 + $0x120] ss:$8 sps:$4 sm:$0xff]   ;;  %v1837_v30 = vld [vmem:[%s2479_s0 + $0x134] ss:$8 sps:$4 sm:$0xff]  }
   0xb   :  { %532 = vmatprep.subr.bf16.mxu0 %v1891_v0  ;;  %1749 = vmatprep.subr.bf16.mxu1 %v1891_v0  ;;  %v1806_v31 = vld [vmem:[%s2479_s0 + $0x30] ss:$8 sps:$4 sm:$0xff]   ;;  %v1807_v33 = vld [vmem:[%s2479_s0 + $0x44] ss:$8 sps:$4 sm:$0xff]   ;;  %v1809_v35 = vld [vmem:[%s2479_s0 + $0x40] ss:$8 sps:$4 sm:$0xff]  }
   0xc   :  { %v1839_v32 = vld [vmem:[%s2479_s0 + $0x130] ss:$8 sps:$4 sm:$0xff]   ;;  %v1843_v34 = vld [vmem:[%s2479_s0 + $0x144] ss:$8 sps:$4 sm:$0xff]   ;;  %v1845_v36 = vld [vmem:[%s2479_s0 + $0x140] ss:$8 sps:$4 sm:$0xff]  }
   0xd   :  { %v1810_v37 = vld [vmem:[%s2479_s0 + $0x54] ss:$8 sps:$4 sm:$0xff]   ;;  %v1812_v39 = vld [vmem:[%s2479_s0 + $0x50] ss:$8 sps:$4 sm:$0xff]   ;;  %v1813_v41 = vld [vmem:[%s2479_s0 + $0x64] ss:$8 sps:$4 sm:$0xff]  }
   0xe   :  { %533 = vmatpush1.bf16.msra.mxu0 %v1782_v4  ;;  %1765 = vmatpush1.bf16.msra.mxu1 %v1782_v4  ;;  %v1849_v38 = vld [vmem:[%s2479_s0 + $0x154] ss:$8 sps:$4 sm:$0xff]   ;;  %v1851_v40 = vld [vmem:[%s2479_s0 + $0x150] ss:$8 sps:$4 sm:$0xff]   ;;  %v1855_v42 = vld [vmem:[%s2479_s0 + $0x164] ss:$8 sps:$4 sm:$0xff]  }
   0xf   :  { %534 = vmatprep.subr.bf16.mxu0 %v1891_v0  ;;  %1750 = vmatprep.subr.bf16.mxu1 %v1891_v0  ;;  %v1815_v43 = vld [vmem:[%s2479_s0 + $0x60] ss:$8 sps:$4 sm:$0xff]   ;;  %v1816_v45 = vld [vmem:[%s2479_s0 + $0x74] ss:$8 sps:$4 sm:$0xff]   ;;  %v1818_v47 = vld [vmem:[%s2479_s0 + $0x70] ss:$8 sps:$4 sm:$0xff]  }
  0x10   :  { %v1857_v44 = vld [vmem:[%s2479_s0 + $0x160] ss:$8 sps:$4 sm:$0xff]   ;;  %v1861_v46 = vld [vmem:[%s2479_s0 + $0x174] ss:$8 sps:$4 sm:$0xff]   ;;  %v1863_v48 = vld [vmem:[%s2479_s0 + $0x170] ss:$8 sps:$4 sm:$0xff]  }
  0x11   :  { %v1822_v49 = vld [vmem:[%s2479_s0 + $0x84] ss:$8 sps:$4 sm:$0xff]   ;;  %v1824_v51 = vld [vmem:[%s2479_s0 + $0x80] ss:$8 sps:$4 sm:$0xff]   ;;  %v1828_v53 = vld [vmem:[%s2479_s0 + $0x94] ss:$8 sps:$4 sm:$0xff]  }
  0x12   :  { %535 = vmatpush1.bf16.msra.mxu0 %v1783_v5  ;;  %1766 = vmatpush1.bf16.msra.mxu1 %v1783_v5  ;;  %v1867_v50 = vld [vmem:[%s2479_s0 + $0x184] ss:$8 sps:$4 sm:$0xff]   ;;  %v1869_v52 = vld [vmem:[%s2479_s0 + $0x180] ss:$8 sps:$4 sm:$0xff]   ;;  %v1870_v54 = vld [vmem:[%s2479_s0 + $0x194] ss:$8 sps:$4 sm:$0xff]  }
  0x13   :  { %536 = vmatprep.subr.bf16.mxu0 %v1891_v0  ;;  %1751 = vmatprep.subr.bf16.mxu1 %v1891_v0  ;;  %v1830_v55 = vld [vmem:[%s2479_s0 + $0x90] ss:$8 sps:$4 sm:$0xff]   ;;  %v1834_v57 = vld [vmem:[%s2479_s0 + $0xa4] ss:$8 sps:$4 sm:$0xff]   ;;  %v1836_v59 = vld [vmem:[%s2479_s0 + $0xa0] ss:$8 sps:$4 sm:$0xff]  }
  0x14   :  { %v1872_v56 = vld [vmem:[%s2479_s0 + $0x190] ss:$8 sps:$4 sm:$0xff]   ;;  %v1873_v58 = vld [vmem:[%s2479_s0 + $0x1a4] ss:$8 sps:$4 sm:$0xff]   ;;  %v1875_v60 = vld [vmem:[%s2479_s0 + $0x1a0] ss:$8 sps:$4 sm:$0xff]  }
  0x15   :  { %v1840_v61 = vld [vmem:[%s2479_s0 + $0xb4] ss:$8 sps:$4 sm:$0xff]   ;;  %v1842_v63 = vld [vmem:[%s2479_s0 + $0xb0] ss:$8 sps:$4 sm:$0xff]   ;;  %v1846_v1 = vld [vmem:[%s2479_s0 + $0xc4] ss:$8 sps:$4 sm:$0xff]  }
  0x16   :  { %537 = vmatpush1.bf16.msra.mxu0 %v1784_v7  ;;  %1767 = vmatpush1.bf16.msra.mxu1 %v1784_v7  ;;  %v1876_v62 = vld [vmem:[%s2479_s0 + $0x1b4] ss:$8 sps:$4 sm:$0xff]   ;;  %v1879_v2 = vld [vmem:[%s2479_s0 + $0x1c4] ss:$8 sps:$4 sm:$0xff]   ;;  %v1848_v3 = vld [vmem:[%s2479_s0 + $0xc0] ss:$8 sps:$4 sm:$0xff]  }
  0x17   :  { %538 = vmatprep.subr.bf16.mxu0 %v1891_v0  ;;  %1752 = vmatprep.subr.bf16.mxu1 %v1891_v0  ;;  %v1881_v4 = vld [vmem:[%s2479_s0 + $0x1c0] ss:$8 sps:$4 sm:$0xff]   ;;  %v1852_v5 = vld [vmem:[%s2479_s0 + $0xd4] ss:$8 sps:$4 sm:$0xff]   ;;  %v1854_v7 = vld [vmem:[%s2479_s0 + $0xd0] ss:$8 sps:$4 sm:$0xff]  }
  0x18   :  { %v1882_v6 = vld [vmem:[%s2479_s0 + $0x1d4] ss:$8 sps:$4 sm:$0xff]   ;;  %v1885_v10 = vld [vmem:[%s2479_s0 + $0x1e4] ss:$8 sps:$4 sm:$0xff]  }
  0x1a   :  { %539 = vmatpush1.bf16.msra.mxu0 %v1785_v8  ;;  %1768 = vmatpush1.bf16.msra.mxu1 %v1785_v8  ;;  %v1884_v8 = vld [vmem:[%s2479_s0 + $0x1d0] ss:$8 sps:$4 sm:$0xff]  }
  0x1b   :  { %540 = vmatprep.subr.bf16.mxu0 %v1891_v0  ;;  %1753 = vmatprep.subr.bf16.mxu1 %v1891_v0 }
  0x1e   :  { %541 = vmatpush1.bf16.msra.mxu0 %v1786_v9  ;;  %1769 = vmatpush1.bf16.msra.mxu1 %v1786_v9  ;;  %v1858_v9 = vld [vmem:[%s2479_s0 + $0xe4] ss:$8 sps:$4 sm:$0xff]  }
  0x1f   :  { %542 = vmatprep.subr.bf16.mxu0 %v1891_v0  ;;  %1754 = vmatprep.subr.bf16.mxu1 %v1891_v0 }
  0x22   :  { %543 = vmatpush1.bf16.msra.mxu0 %v1787_v11  ;;  %1770 = vmatpush1.bf16.msra.mxu1 %v1787_v11  ;;  %v1860_v11 = vld [vmem:[%s2479_s0 + $0xe0] ss:$8 sps:$4 sm:$0xff]  }
  0x23   :  { %544 = vmatprep.subr.bf16.mxu0 %v1891_v0  ;;  %1755 = vmatprep.subr.bf16.mxu1 %v1891_v0 }
  0x26   :  { %545 = vmatpush1.bf16.msra.mxu0 %v1788_v12  ;;  %1771 = vmatpush1.bf16.msra.mxu1 %v1788_v12  ;;  %v1887_v12 = vld [vmem:[%s2479_s0 + $0x1e0] ss:$8 sps:$4 sm:$0xff]  }
  0x27   :  { %546 = vmatprep.subr.bf16.mxu0 %v1891_v0  ;;  %1756 = vmatprep.subr.bf16.mxu1 %v1891_v0 }
  0x2a   :  { %547 = vmatpush1.bf16.msra.mxu0 %v1789_v13  ;;  %1772 = vmatpush1.bf16.msra.mxu1 %v1789_v13  ;;  %v1864_v13 = vld [vmem:[%s2479_s0 + $0xf4] ss:$8 sps:$4 sm:$0xff]  }
  0x2b   :  { %548 = vmatprep.subr.bf16.mxu0 %v1891_v0  ;;  %1757 = vmatprep.subr.bf16.mxu1 %v1891_v0 }
  0x2e   :  { %549 = vmatpush1.bf16.msra.mxu0 %v1790_v14  ;;  %1773 = vmatpush1.bf16.msra.mxu1 %v1790_v14  ;;  %v1888_v14 = vld [vmem:[%s2479_s0 + $0x1f4] ss:$8 sps:$4 sm:$0xff]  }
  0x2f   :  { %550 = vmatprep.subr.bf16.mxu0 %v1891_v0  ;;  %1758 = vmatprep.subr.bf16.mxu1 %v1891_v0 }
  0x32   :  { %551 = vmatpush1.bf16.msra.mxu0 %v1791_v15  ;;  %1774 = vmatpush1.bf16.msra.mxu1 %v1791_v15  ;;  %v1866_v15 = vld [vmem:[%s2479_s0 + $0xf0] ss:$8 sps:$4 sm:$0xff]  }
  0x33   :  { %552 = vmatprep.subr.bf16.mxu0 %v1891_v0  ;;  %1759 = vmatprep.subr.bf16.mxu1 %v1891_v0 }
  0x36   :  { %553 = vmatpush1.bf16.msra.mxu0 %v1792_v16  ;;  %1775 = vmatpush1.bf16.msra.mxu1 %v1792_v16  ;;  %v1890_v16 = vld [vmem:[%s2479_s0 + $0x1f0] ss:$8 sps:$4 sm:$0xff]  }
  0x37   :  { %554 = vmatprep.subr.bf16.mxu0 %v1891_v0  ;;  %1760 = vmatprep.subr.bf16.mxu1 %v1891_v0 }
  0x3a   :  { %555 = vmatpush1.bf16.msra.mxu0 %v1793_v17  ;;  %1776 = vmatpush1.bf16.msra.mxu1 %v1793_v17 }
  0x3b   :  { %556 = vmatprep.subr.bf16.mxu0 %v1891_v0  ;;  %1761 = vmatprep.subr.bf16.mxu1 %v1891_v0  ;;  %v1878_v0 = vld [vmem:[%s2479_s0 + $0x1b0] ss:$8 sps:$4 sm:$0xff]  }
  0x3e   :  { %557 = vmatpush1.bf16.msra.mxu0 %v1794_v18  ;;  %1777 = vmatpush1.bf16.msra.mxu1 %v1794_v18 }
  0x41   :  { %559 = vmatmul.mubr.bf16.vlgmr.msra.gmra.mrb[0].mxu0 %v1795_v19  ;;  %687 = vmatmul.mubr.bf16.vlgmr.msra.gmra.mrb[0].mxu1 %v1819_v20 }
  0x42   :  { %566 = vmatprep.mubr.bf16.mxu0 %v1798_v21  ;;  %694 = vmatprep.mubr.bf16.mxu1 %v1825_v22 }
  0x49   :  { %567 = vmatmul.mubr.bf16.gmra.mrb[4].mxu0 %v1800_v23  ;;  %695 = vmatmul.mubr.bf16.gmra.mrb[4].mxu1 %v1827_v24 }
  0x4a   :  { %574 = vmatprep.mubr.bf16.mxu0 %v1801_v25  ;;  %702 = vmatprep.mubr.bf16.mxu1 %v1831_v26 }
  0x51   :  { %575 = vmatmul.mubr.bf16.gmra.mrb[8].mxu0 %v1803_v27  ;;  %703 = vmatmul.mubr.bf16.gmra.mrb[8].mxu1 %v1833_v28 }
  0x52   :  { %582 = vmatprep.mubr.bf16.mxu0 %v1804_v29  ;;  %710 = vmatprep.mubr.bf16.mxu1 %v1837_v30 }
  0x59   :  { %583 = vmatmul.mubr.bf16.gmra.mrb[12].mxu0 %v1806_v31  ;;  %711 = vmatmul.mubr.bf16.gmra.mrb[12].mxu1 %v1839_v32 }
  0x5a   :  { %590 = vmatprep.mubr.bf16.mxu0 %v1807_v33  ;;  %718 = vmatprep.mubr.bf16.mxu1 %v1843_v34 }
  0x61   :  { %591 = vmatmul.mubr.bf16.gmra.mrb[16].mxu0 %v1809_v35  ;;  %719 = vmatmul.mubr.bf16.gmra.mrb[16].mxu1 %v1845_v36 }
  0x62   :  { %598 = vmatprep.mubr.bf16.mxu0 %v1810_v37  ;;  %726 = vmatprep.mubr.bf16.mxu1 %v1849_v38 }
  0x69   :  { %599 = vmatmul.mubr.bf16.gmra.mrb[20].mxu0 %v1812_v39  ;;  %727 = vmatmul.mubr.bf16.gmra.mrb[20].mxu1 %v1851_v40 }
  0x6a   :  { %606 = vmatprep.mubr.bf16.mxu0 %v1813_v41  ;;  %734 = vmatprep.mubr.bf16.mxu1 %v1855_v42 }
  0x71   :  { %607 = vmatmul.mubr.bf16.gmra.mrb[24].mxu0 %v1815_v43  ;;  %735 = vmatmul.mubr.bf16.gmra.mrb[24].mxu1 %v1857_v44 }
  0x72   :  { %614 = vmatprep.mubr.bf16.mxu0 %v1816_v45  ;;  %742 = vmatprep.mubr.bf16.mxu1 %v1861_v46 }
  0x79   :  { %615 = vmatmul.mubr.bf16.gmra.mrb[28].mxu0 %v1818_v47  ;;  %743 = vmatmul.mubr.bf16.gmra.mrb[28].mxu1 %v1863_v48 }
  0x7a   :  { %622 = vmatprep.mubr.bf16.mxu0 %v1822_v49  ;;  %750 = vmatprep.mubr.bf16.mxu1 %v1867_v50 }
  0x81   :  { %623 = vmatmul.mubr.bf16.gmra.mrb[32].mxu0 %v1824_v51  ;;  %751 = vmatmul.mubr.bf16.gmra.mrb[32].mxu1 %v1869_v52 }
  0x82   :  { %630 = vmatprep.mubr.bf16.mxu0 %v1828_v53  ;;  %758 = vmatprep.mubr.bf16.mxu1 %v1870_v54 }
  0x89   :  { %631 = vmatmul.mubr.bf16.gmra.mrb[36].mxu0 %v1830_v55  ;;  %759 = vmatmul.mubr.bf16.gmra.mrb[36].mxu1 %v1872_v56 }
  0x8a   :  { %638 = vmatprep.mubr.bf16.mxu0 %v1834_v57  ;;  %766 = vmatprep.mubr.bf16.mxu1 %v1873_v58 }
  0x91   :  { %639 = vmatmul.mubr.bf16.gmra.mrb[40].mxu0 %v1836_v59  ;;  %767 = vmatmul.mubr.bf16.gmra.mrb[40].mxu1 %v1875_v60 }
  0x92   :  { %646 = vmatprep.mubr.bf16.mxu0 %v1840_v61  ;;  %774 = vmatprep.mubr.bf16.mxu1 %v1876_v62 }
  0x99   :  { %647 = vmatmul.mubr.bf16.gmra.mrb[44].mxu0 %v1842_v63  ;;  %775 = vmatmul.mubr.bf16.gmra.mrb[44].mxu1 %v1878_v0 }
  0x9a   :  { %654 = vmatprep.mubr.bf16.mxu0 %v1846_v1  ;;  %782 = vmatprep.mubr.bf16.mxu1 %v1879_v2 }
  0xa1   :  { %655 = vmatmul.mubr.bf16.gmra.mrb[48].mxu0 %v1848_v3  ;;  %783 = vmatmul.mubr.bf16.gmra.mrb[48].mxu1 %v1881_v4 }
  0xa2   :  { %662 = vmatprep.mubr.bf16.mxu0 %v1852_v5  ;;  %790 = vmatprep.mubr.bf16.mxu1 %v1882_v6 }
  0xa9   :  { %663 = vmatmul.mubr.bf16.gmra.mrb[52].mxu0 %v1854_v7  ;;  %791 = vmatmul.mubr.bf16.gmra.mrb[52].mxu1 %v1884_v8 }
  0xaa   :  { %670 = vmatprep.mubr.bf16.mxu0 %v1858_v9  ;;  %798 = vmatprep.mubr.bf16.mxu1 %v1885_v10 }
  0xb1   :  { %671 = vmatmul.mubr.bf16.gmra.mrb[56].mxu0 %v1860_v11  ;;  %799 = vmatmul.mubr.bf16.gmra.mrb[56].mxu1 %v1887_v12 }
  0xb2   :  { %678 = vmatprep.mubr.bf16.mxu0 %v1864_v13  ;;  %806 = vmatprep.mubr.bf16.mxu1 %v1888_v14 }
  0xb9   :  { %679 = vmatmul.mubr.bf16.gmra.mrb[60].mxu0 %v1866_v15  ;;  %807 = vmatmul.mubr.bf16.gmra.mrb[60].mxu1 %v1890_v16 }
 0x114   :  { %v560_v17 = vpop.f32.mrb[0].mxu0  ;;  %v2184_v18 = vpop.f32.mrb[0].mxu1 }
 0x115   :  { %v562_v19 = vpop.f32.mrb[1].mxu0  ;;  %v690_v20 = vpop.f32.mrb[1].mxu1  ;;  %v1205_v21 = vmul.f32 %v560_v17, %v560_v17 }
 0x116   :  { %v563_v22 = vpop.f32.mrb[2].mxu0  ;;  %v2186_v23 = vpop.f32.mrb[2].mxu1 }
 0x117   :  { %v1558_v24 = vpack.c.bf16 %v563_v22, %v560_v17  ;;  %v1135_v25 = vadd.f32 %v563_v22, %v560_v17  ;;  %v1206_v26 = vmul.f32 %v563_v22, %v563_v22  ;;  %v565_v27 = vpop.f32.mrb[3].mxu0  ;;  %v1638_v28 = vpack.c.bf16 %v2186_v23, %v2184_v18  ;;  %v693_v29 = vpop.f32.mrb[3].mxu1 }
 0x119   :  { %1559 = vst [vmem:[%s2480_s2] sm:$0xff] %v1558_v24   ;;  %v1269_v30 = vadd.f32 %v1206_v26, %v1205_v21  ;;  %1730 = vst [vmem:[%s2480_s2 + $0x80] sm:$0xff] %v1638_v28  }
 0x11c   :  { %v568_v31 = vpop.f32.mrb[4].mxu0  ;;  %v2196_v32 = vpop.f32.mrb[4].mxu1 }
 0x11d   :  { %v1136_v33 = vadd.f32 %v1135_v25, %v568_v31  ;;  %v1207_v34 = vmul.f32 %v568_v31, %v568_v31  ;;  %v570_v35 = vpop.f32.mrb[5].mxu0  ;;  %v698_v36 = vpop.f32.mrb[5].mxu1 }
 0x11e   :  { %v571_v37 = vpop.f32.mrb[6].mxu0  ;;  %v2198_v38 = vpop.f32.mrb[6].mxu1 }
 0x11f   :  { %v1270_v39 = vadd.f32 %v1269_v30, %v1207_v34  ;;  %v1563_v40 = vpack.c.bf16 %v571_v37, %v568_v31  ;;  %v1137_v41 = vadd.f32 %v1136_v33, %v571_v37  ;;  %v1208_v42 = vmul.f32 %v571_v37, %v571_v37  ;;  %v573_v43 = vpop.f32.mrb[7].mxu0  ;;  %v701_v44 = vpop.f32.mrb[7].mxu1 }
 0x120   :  { %v1643_v45 = vpack.c.bf16 %v2198_v38, %v2196_v32 }
 0x121   :  { %1715 = vst [vmem:[%s2480_s2 + $0x8] sm:$0xff] %v1563_v40   ;;  %v1271_v46 = vadd.f32 %v1270_v39, %v1208_v42 }
 0x122   :  { %1731 = vst [vmem:[%s2480_s2 + $0x88] sm:$0xff] %v1643_v45  }
 0x124   :  { %v576_v47 = vpop.f32.mrb[8].mxu0  ;;  %v2208_v48 = vpop.f32.mrb[8].mxu1 }
 0x125   :  { %v1138_v49 = vadd.f32 %v1137_v41, %v576_v47  ;;  %v1209_v50 = vmul.f32 %v576_v47, %v576_v47  ;;  %v578_v51 = vpop.f32.mrb[9].mxu0  ;;  %v706_v52 = vpop.f32.mrb[9].mxu1 }
 0x126   :  { %v579_v53 = vpop.f32.mrb[10].mxu0  ;;  %v2210_v54 = vpop.f32.mrb[10].mxu1 }
 0x127   :  { %v1272_v55 = vadd.f32 %v1271_v46, %v1209_v50  ;;  %v1568_v56 = vpack.c.bf16 %v579_v53, %v576_v47  ;;  %v1139_v57 = vadd.f32 %v1138_v49, %v579_v53  ;;  %v1210_v58 = vmul.f32 %v579_v53, %v579_v53  ;;  %v581_v59 = vpop.f32.mrb[11].mxu0  ;;  %v709_v60 = vpop.f32.mrb[11].mxu1 }
 0x128   :  { %v1648_v61 = vpack.c.bf16 %v2210_v54, %v2208_v48 }
 0x129   :  { %1716 = vst [vmem:[%s2480_s2 + $0x10] sm:$0xff] %v1568_v56   ;;  %v1273_v62 = vadd.f32 %v1272_v55, %v1210_v58 }
 0x12a   :  { %1732 = vst [vmem:[%s2480_s2 + $0x90] sm:$0xff] %v1648_v61  }
 0x12c   :  { %v584_v63 = vpop.f32.mrb[12].mxu0  ;;  %v2220_v0 = vpop.f32.mrb[12].mxu1 }
 0x12d   :  { %v1140_v1 = vadd.f32 %v1139_v57, %v584_v63  ;;  %v1211_v2 = vmul.f32 %v584_v63, %v584_v63  ;;  %v586_v3 = vpop.f32.mrb[13].mxu0  ;;  %v714_v4 = vpop.f32.mrb[13].mxu1 }
 0x12e   :  { %v587_v5 = vpop.f32.mrb[14].mxu0  ;;  %v2222_v6 = vpop.f32.mrb[14].mxu1 }
 0x12f   :  { %v1274_v7 = vadd.f32 %v1273_v62, %v1211_v2  ;;  %v1573_v8 = vpack.c.bf16 %v587_v5, %v584_v63  ;;  %v1141_v9 = vadd.f32 %v1140_v1, %v587_v5  ;;  %v1212_v10 = vmul.f32 %v587_v5, %v587_v5  ;;  %v589_v11 = vpop.f32.mrb[15].mxu0  ;;  %v717_v12 = vpop.f32.mrb[15].mxu1 }
 0x130   :  { %v1653_v13 = vpack.c.bf16 %v2222_v6, %v2220_v0 }
 0x131   :  { %1717 = vst [vmem:[%s2480_s2 + $0x18] sm:$0xff] %v1573_v8   ;;  %v1275_v14 = vadd.f32 %v1274_v7, %v1212_v10 }
 0x132   :  { %1733 = vst [vmem:[%s2480_s2 + $0x98] sm:$0xff] %v1653_v13  }
 0x134   :  { %v592_v15 = vpop.f32.mrb[16].mxu0  ;;  %v2232_v16 = vpop.f32.mrb[16].mxu1 }
 0x135   :  { %v1142_v17 = vadd.f32 %v1141_v9, %v592_v15  ;;  %v1213_v19 = vmul.f32 %v592_v15, %v592_v15  ;;  %v594_v20 = vpop.f32.mrb[17].mxu0  ;;  %v722_v21 = vpop.f32.mrb[17].mxu1 }
 0x136   :  { %v595_v22 = vpop.f32.mrb[18].mxu0  ;;  %v2234_v24 = vpop.f32.mrb[18].mxu1 }
 0x137   :  { %v1276_v25 = vadd.f32 %v1275_v14, %v1213_v19  ;;  %v1578_v26 = vpack.c.bf16 %v595_v22, %v592_v15  ;;  %v1143_v27 = vadd.f32 %v1142_v17, %v595_v22  ;;  %v1214_v28 = vmul.f32 %v595_v22, %v595_v22  ;;  %v597_v29 = vpop.f32.mrb[19].mxu0  ;;  %v725_v30 = vpop.f32.mrb[19].mxu1 }
 0x138   :  { %v1658_v31 = vpack.c.bf16 %v2234_v24, %v2232_v16 }
 0x139   :  { %1718 = vst [vmem:[%s2480_s2 + $0x20] sm:$0xff] %v1578_v26   ;;  %v1277_v33 = vadd.f32 %v1276_v25, %v1214_v28 }
 0x13a   :  { %1734 = vst [vmem:[%s2480_s2 + $0xa0] sm:$0xff] %v1658_v31  }
 0x13c   :  { %v600_v34 = vpop.f32.mrb[20].mxu0  ;;  %v2244_v35 = vpop.f32.mrb[20].mxu1 }
 0x13d   :  { %v1144_v36 = vadd.f32 %v1143_v27, %v600_v34  ;;  %v1215_v37 = vmul.f32 %v600_v34, %v600_v34  ;;  %v602_v39 = vpop.f32.mrb[21].mxu0  ;;  %v730_v40 = vpop.f32.mrb[21].mxu1 }
 0x13e   :  { %v603_v41 = vpop.f32.mrb[22].mxu0  ;;  %v2246_v42 = vpop.f32.mrb[22].mxu1 }
 0x13f   :  { %v1278_v43 = vadd.f32 %v1277_v33, %v1215_v37  ;;  %v1583_v44 = vpack.c.bf16 %v603_v41, %v600_v34  ;;  %v1145_v45 = vadd.f32 %v1144_v36, %v603_v41  ;;  %v1216_v46 = vmul.f32 %v603_v41, %v603_v41  ;;  %v605_v47 = vpop.f32.mrb[23].mxu0  ;;  %v733_v49 = vpop.f32.mrb[23].mxu1 }
 0x140   :  { %v1663_v50 = vpack.c.bf16 %v2246_v42, %v2244_v35 }
 0x141   :  { %1719 = vst [vmem:[%s2480_s2 + $0x28] sm:$0xff] %v1583_v44   ;;  %v1279_v51 = vadd.f32 %v1278_v43, %v1216_v46 }
 0x142   :  { %1735 = vst [vmem:[%s2480_s2 + $0xa8] sm:$0xff] %v1663_v50  }
 0x144   :  { %v608_v52 = vpop.f32.mrb[24].mxu0  ;;  %v2256_v53 = vpop.f32.mrb[24].mxu1 }
 0x145   :  { %v1146_v55 = vadd.f32 %v1145_v45, %v608_v52  ;;  %v1217_v56 = vmul.f32 %v608_v52, %v608_v52  ;;  %v610_v57 = vpop.f32.mrb[25].mxu0  ;;  %v738_v58 = vpop.f32.mrb[25].mxu1 }
 0x146   :  { %v611_v59 = vpop.f32.mrb[26].mxu0  ;;  %v2258_v60 = vpop.f32.mrb[26].mxu1 }
 0x147   :  { %v1280_v61 = vadd.f32 %v1279_v51, %v1217_v56  ;;  %v1588_v62 = vpack.c.bf16 %v611_v59, %v608_v52  ;;  %v1147_v63 = vadd.f32 %v1146_v55, %v611_v59  ;;  %v1218_v1 = vmul.f32 %v611_v59, %v611_v59  ;;  %v613_v2 = vpop.f32.mrb[27].mxu0  ;;  %v741_v3 = vpop.f32.mrb[27].mxu1 }
 0x148   :  { %v1668_v4 = vpack.c.bf16 %v2258_v60, %v2256_v53 }
 0x149   :  { %1720 = vst [vmem:[%s2480_s2 + $0x30] sm:$0xff] %v1588_v62   ;;  %v1281_v5 = vadd.f32 %v1280_v61, %v1218_v1 }
 0x14a   :  { %1736 = vst [vmem:[%s2480_s2 + $0xb0] sm:$0xff] %v1668_v4  }
 0x14c   :  { %v616_v7 = vpop.f32.mrb[28].mxu0  ;;  %v2268_v8 = vpop.f32.mrb[28].mxu1 }
 0x14d   :  { %v1148_v9 = vadd.f32 %v1147_v63, %v616_v7  ;;  %v1219_v10 = vmul.f32 %v616_v7, %v616_v7  ;;  %v618_v11 = vpop.f32.mrb[29].mxu0  ;;  %v746_v12 = vpop.f32.mrb[29].mxu1 }
 0x14e   :  { %v619_v13 = vpop.f32.mrb[30].mxu0  ;;  %v2270_v14 = vpop.f32.mrb[30].mxu1 }
 0x14f   :  { %v1282_v15 = vadd.f32 %v1281_v5, %v1219_v10  ;;  %v1593_v17 = vpack.c.bf16 %v619_v13, %v616_v7  ;;  %v1149_v19 = vadd.f32 %v1148_v9, %v619_v13  ;;  %v1220_v20 = vmul.f32 %v619_v13, %v619_v13  ;;  %v621_v21 = vpop.f32.mrb[31].mxu0  ;;  %v749_v22 = vpop.f32.mrb[31].mxu1 }
 0x150   :  { %v1673_v25 = vpack.c.bf16 %v2270_v14, %v2268_v8 }
 0x151   :  { %1721 = vst [vmem:[%s2480_s2 + $0x38] sm:$0xff] %v1593_v17   ;;  %v1283_v26 = vadd.f32 %v1282_v15, %v1220_v20 }
 0x152   :  { %1737 = vst [vmem:[%s2480_s2 + $0xb8] sm:$0xff] %v1673_v25  }
 0x154   :  { %v624_v27 = vpop.f32.mrb[32].mxu0  ;;  %v2280_v28 = vpop.f32.mrb[32].mxu1 }
 0x155   :  { %v1150_v29 = vadd.f32 %v1149_v19, %v624_v27  ;;  %v1221_v30 = vmul.f32 %v624_v27, %v624_v27  ;;  %v626_v31 = vpop.f32.mrb[33].mxu0  ;;  %v754_v33 = vpop.f32.mrb[33].mxu1 }
 0x156   :  { %v627_v34 = vpop.f32.mrb[34].mxu0  ;;  %v2282_v36 = vpop.f32.mrb[34].mxu1 }
 0x157   :  { %v1284_v37 = vadd.f32 %v1283_v26, %v1221_v30  ;;  %v1598_v39 = vpack.c.bf16 %v627_v34, %v624_v27  ;;  %v1151_v40 = vadd.f32 %v1150_v29, %v627_v34  ;;  %v1222_v41 = vmul.f32 %v627_v34, %v627_v34  ;;  %v629_v43 = vpop.f32.mrb[35].mxu0  ;;  %v757_v44 = vpop.f32.mrb[35].mxu1 }
 0x158   :  { %v1678_v45 = vpack.c.bf16 %v2282_v36, %v2280_v28 }
 0x159   :  { %1722 = vst [vmem:[%s2480_s2 + $0x40] sm:$0xff] %v1598_v39   ;;  %v1285_v46 = vadd.f32 %v1284_v37, %v1222_v41 }
 0x15a   :  { %1738 = vst [vmem:[%s2480_s2 + $0xc0] sm:$0xff] %v1678_v45  }
 0x15c   :  { %v632_v47 = vpop.f32.mrb[36].mxu0  ;;  %v2292_v49 = vpop.f32.mrb[36].mxu1 }
 0x15d   :  { %v1152_v50 = vadd.f32 %v1151_v40, %v632_v47  ;;  %v1223_v51 = vmul.f32 %v632_v47, %v632_v47  ;;  %v634_v52 = vpop.f32.mrb[37].mxu0  ;;  %v762_v55 = vpop.f32.mrb[37].mxu1 }
 0x15e   :  { %v635_v56 = vpop.f32.mrb[38].mxu0  ;;  %v2294_v57 = vpop.f32.mrb[38].mxu1 }
 0x15f   :  { %v1286_v58 = vadd.f32 %v1285_v46, %v1223_v51  ;;  %v1603_v59 = vpack.c.bf16 %v635_v56, %v632_v47  ;;  %v1153_v61 = vadd.f32 %v1152_v50, %v635_v56  ;;  %v1224_v62 = vmul.f32 %v635_v56, %v635_v56  ;;  %v637_v63 = vpop.f32.mrb[39].mxu0  ;;  %v765_v1 = vpop.f32.mrb[39].mxu1 }
 0x160   :  { %v1683_v2 = vpack.c.bf16 %v2294_v57, %v2292_v49 }
 0x161   :  { %1723 = vst [vmem:[%s2480_s2 + $0x48] sm:$0xff] %v1603_v59   ;;  %v1287_v3 = vadd.f32 %v1286_v58, %v1224_v62 }
 0x162   :  { %1739 = vst [vmem:[%s2480_s2 + $0xc8] sm:$0xff] %v1683_v2  }
 0x164   :  { %v640_v4 = vpop.f32.mrb[40].mxu0  ;;  %v2304_v5 = vpop.f32.mrb[40].mxu1 }
 0x165   :  { %v1154_v7 = vadd.f32 %v1153_v61, %v640_v4  ;;  %v1225_v9 = vmul.f32 %v640_v4, %v640_v4  ;;  %v642_v10 = vpop.f32.mrb[41].mxu0  ;;  %v770_v11 = vpop.f32.mrb[41].mxu1 }
 0x166   :  { %v643_v12 = vpop.f32.mrb[42].mxu0  ;;  %v2306_v13 = vpop.f32.mrb[42].mxu1 }
 0x167   :  { %v1288_v15 = vadd.f32 %v1287_v3, %v1225_v9  ;;  %v1608_v17 = vpack.c.bf16 %v643_v12, %v640_v4  ;;  %v1155_v19 = vadd.f32 %v1154_v7, %v643_v12  ;;  %v1226_v20 = vmul.f32 %v643_v12, %v643_v12  ;;  %v645_v21 = vpop.f32.mrb[43].mxu0  ;;  %v773_v22 = vpop.f32.mrb[43].mxu1 }
 0x168   :  { %v1688_v25 = vpack.c.bf16 %v2306_v13, %v2304_v5 }
 0x169   :  { %1724 = vst [vmem:[%s2480_s2 + $0x50] sm:$0xff] %v1608_v17   ;;  %v1289_v26 = vadd.f32 %v1288_v15, %v1226_v20 }
 0x16a   :  { %1740 = vst [vmem:[%s2480_s2 + $0xd0] sm:$0xff] %v1688_v25  }
 0x16c   :  { %v648_v27 = vpop.f32.mrb[44].mxu0  ;;  %v2316_v29 = vpop.f32.mrb[44].mxu1 }
 0x16d   :  { %v1156_v30 = vadd.f32 %v1155_v19, %v648_v27  ;;  %v1227_v31 = vmul.f32 %v648_v27, %v648_v27  ;;  %v650_v33 = vpop.f32.mrb[45].mxu0  ;;  %v778_v34 = vpop.f32.mrb[45].mxu1 }
 0x16e   :  { %v651_v37 = vpop.f32.mrb[46].mxu0  ;;  %v2318_v39 = vpop.f32.mrb[46].mxu1 }
 0x16f   :  { %v1290_v40 = vadd.f32 %v1289_v26, %v1227_v31  ;;  %v1613_v41 = vpack.c.bf16 %v651_v37, %v648_v27  ;;  %v1157_v43 = vadd.f32 %v1156_v30, %v651_v37  ;;  %v1228_v44 = vmul.f32 %v651_v37, %v651_v37  ;;  %v653_v45 = vpop.f32.mrb[47].mxu0  ;;  %v781_v46 = vpop.f32.mrb[47].mxu1 }
 0x170   :  { %v1693_v47 = vpack.c.bf16 %v2318_v39, %v2316_v29 }
 0x171   :  { %1725 = vst [vmem:[%s2480_s2 + $0x58] sm:$0xff] %v1613_v41   ;;  %v1291_v50 = vadd.f32 %v1290_v40, %v1228_v44 }
 0x172   :  { %1741 = vst [vmem:[%s2480_s2 + $0xd8] sm:$0xff] %v1693_v47  }
 0x174   :  { %v656_v51 = vpop.f32.mrb[48].mxu0  ;;  %v2328_v52 = vpop.f32.mrb[48].mxu1 }
 0x175   :  { %v1158_v55 = vadd.f32 %v1157_v43, %v656_v51  ;;  %v1229_v56 = vmul.f32 %v656_v51, %v656_v51  ;;  %v658_v58 = vpop.f32.mrb[49].mxu0  ;;  %v786_v59 = vpop.f32.mrb[49].mxu1 }
 0x176   :  { %v659_v61 = vpop.f32.mrb[50].mxu0  ;;  %v2330_v62 = vpop.f32.mrb[50].mxu1 }
 0x177   :  { %v1292_v63 = vadd.f32 %v1291_v50, %v1229_v56  ;;  %v1618_v1 = vpack.c.bf16 %v659_v61, %v656_v51  ;;  %v1159_v2 = vadd.f32 %v1158_v55, %v659_v61  ;;  %v1230_v3 = vmul.f32 %v659_v61, %v659_v61  ;;  %v661_v4 = vpop.f32.mrb[51].mxu0  ;;  %v789_v7 = vpop.f32.mrb[51].mxu1 }
 0x178   :  { %v1698_v9 = vpack.c.bf16 %v2330_v62, %v2328_v52 }
 0x179   :  { %1726 = vst [vmem:[%s2480_s2 + $0x60] sm:$0xff] %v1618_v1   ;;  %v1293_v10 = vadd.f32 %v1292_v63, %v1230_v3 }
 0x17a   :  { %1742 = vst [vmem:[%s2480_s2 + $0xe0] sm:$0xff] %v1698_v9  }
 0x17c   :  { %v664_v11 = vpop.f32.mrb[52].mxu0  ;;  %v2340_v12 = vpop.f32.mrb[52].mxu1 }
 0x17d   :  { %v1160_v15 = vadd.f32 %v1159_v2, %v664_v11  ;;  %v1231_v17 = vmul.f32 %v664_v11, %v664_v11  ;;  %v666_v19 = vpop.f32.mrb[53].mxu0  ;;  %v794_v20 = vpop.f32.mrb[53].mxu1 }
 0x17e   :  { %v667_v21 = vpop.f32.mrb[54].mxu0  ;;  %v2342_v22 = vpop.f32.mrb[54].mxu1 }
 0x17f   :  { %v1294_v25 = vadd.f32 %v1293_v10, %v1231_v17  ;;  %v1623_v26 = vpack.c.bf16 %v667_v21, %v664_v11  ;;  %v1161_v27 = vadd.f32 %v1160_v15, %v667_v21  ;;  %v1232_v30 = vmul.f32 %v667_v21, %v667_v21  ;;  %v669_v31 = vpop.f32.mrb[55].mxu0  ;;  %v797_v33 = vpop.f32.mrb[55].mxu1 }
 0x180   :  { %v1703_v34 = vpack.c.bf16 %v2342_v22, %v2340_v12 }
 0x181   :  { %1727 = vst [vmem:[%s2480_s2 + $0x68] sm:$0xff] %v1623_v26   ;;  %v1295_v37 = vadd.f32 %v1294_v25, %v1232_v30  ;;  %v1237_v30 = vmul.f32 %v2184_v18, %v2184_v18 }
 0x182   :  { %1743 = vst [vmem:[%s2480_s2 + $0xe8] sm:$0xff] %v1703_v34   ;;  %v1238_v34 = vmul.f32 %v2186_v23, %v2186_v23 }
 0x184   :  { %v672_v40 = vpop.f32.mrb[56].mxu0  ;;  %v2352_v41 = vpop.f32.mrb[56].mxu1 }
 0x185   :  { %v1162_v43 = vadd.f32 %v1161_v27, %v672_v40  ;;  %v1233_v44 = vmul.f32 %v672_v40, %v672_v40  ;;  %v674_v45 = vpop.f32.mrb[57].mxu0  ;;  %v802_v46 = vpop.f32.mrb[57].mxu1 }
 0x186   :  { %v675_v47 = vpop.f32.mrb[58].mxu0  ;;  %v2354_v50 = vpop.f32.mrb[58].mxu1 }
 0x187   :  { %v1296_v51 = vadd.f32 %v1295_v37, %v1233_v44  ;;  %v1628_v55 = vpack.c.bf16 %v675_v47, %v672_v40  ;;  %v1163_v56 = vadd.f32 %v1162_v43, %v675_v47  ;;  %v1234_v58 = vmul.f32 %v675_v47, %v675_v47  ;;  %v677_v59 = vpop.f32.mrb[59].mxu0  ;;  %v805_v61 = vpop.f32.mrb[59].mxu1 }
 0x188   :  { %v1708_v63 = vpack.c.bf16 %v2354_v50, %v2352_v41  ;;  %v1239_v43 = vmul.f32 %v2196_v32, %v2196_v32 }
 0x189   :  { %1728 = vst [vmem:[%s2480_s2 + $0x70] sm:$0xff] %v1628_v55   ;;  %v1297_v1 = vadd.f32 %v1296_v51, %v1234_v58  ;;  %v1241_v51 = vmul.f32 %v2208_v48, %v2208_v48 }
 0x18a   :  { %1744 = vst [vmem:[%s2480_s2 + $0xf0] sm:$0xff] %v1708_v63  }
 0x18c   :  { %v680_v2 = vpop.f32.mrb[60].mxu0  ;;  %v2364_v3 = vpop.f32.mrb[60].mxu1 }
 0x18d   :  { %v1164_v4 = vadd.f32 %v1163_v56, %v680_v2  ;;  %v1235_v7 = vmul.f32 %v680_v2, %v680_v2  ;;  %v682_v9 = vpop.f32.mrb[61].mxu0  ;;  %v810_v10 = vpop.f32.mrb[61].mxu1 }
 0x18e   :  { %v683_v11 = vpop.f32.mrb[62].mxu0  ;;  %v2366_v15 = vpop.f32.mrb[62].mxu1 }
 0x18f   :  { %v1298_v17 = vadd.f32 %v1297_v1, %v1235_v7  ;;  %v1633_v19 = vpack.c.bf16 %v683_v11, %v680_v2  ;;  %v1165_v20 = vadd.f32 %v1164_v4, %v683_v11  ;;  %v1236_v21 = vmul.f32 %v683_v11, %v683_v11  ;;  %v685_v25 = vpop.f32.mrb[63].mxu0  ;;  %v813_v26 = vpop.f32.mrb[63].mxu1 }
 0x190   :  { %v1713_v27 = vpack.c.bf16 %v2366_v15, %v2364_v3 }
 0x191   :  { %1729 = vst [vmem:[%s2480_s2 + $0x78] sm:$0xff] %v1633_v19   ;;  %v1166_v31 = vadd.f32 %v1165_v20, %v2184_v18  ;;  %v1299_v33 = vadd.f32 %v1298_v17, %v1236_v21  ;;  %v1240_v18 = vmul.f32 %v2198_v38, %v2198_v38 }
 0x192   :  { %1745 = vst [vmem:[%s2480_s2 + $0xf8] sm:$0xff] %v1713_v27  }
 0x193   :  { %v1167_v37 = vadd.f32 %v1166_v31, %v2186_v23  ;;  %v1300_v40 = vadd.f32 %v1299_v33, %v1237_v30  ;;  %v1242_v23 = vmul.f32 %v2210_v54, %v2210_v54 }
 0x195   :  { %v1168_v44 = vadd.f32 %v1167_v37, %v2196_v32  ;;  %v1301_v45 = vadd.f32 %v1300_v40, %v1238_v34  ;;  %v1243_v32 = vmul.f32 %v2220_v0, %v2220_v0  ;;  %v1253_v37 = vmul.f32 %v2280_v28, %v2280_v28 }
 0x197   :  { %v1169_v46 = vadd.f32 %v1168_v44, %v2198_v38  ;;  %v1302_v47 = vadd.f32 %v1301_v45, %v1239_v43  ;;  %v1244_v38 = vmul.f32 %v2222_v6, %v2222_v6  ;;  %v1254_v44 = vmul.f32 %v2282_v36, %v2282_v36 }
 0x199   :  { %v1170_v55 = vadd.f32 %v1169_v46, %v2208_v48  ;;  %v1303_v56 = vadd.f32 %v1302_v47, %v1240_v18  ;;  %v1245_v48 = vmul.f32 %v2232_v16, %v2232_v16  ;;  %v1255_v18 = vmul.f32 %v2292_v49, %v2292_v49 }
 0x19a   :  { %v1256_v47 = vmul.f32 %v2294_v57, %v2294_v57 }
 0x19b   :  { %v1171_v58 = vadd.f32 %v1170_v55, %v2210_v54  ;;  %v1304_v59 = vadd.f32 %v1303_v56, %v1241_v51  ;;  %v1246_v54 = vmul.f32 %v2234_v24, %v2234_v24  ;;  %v1257_v55 = vmul.f32 %v2304_v5, %v2304_v5 }
 0x19d   :  { %v1172_v61 = vadd.f32 %v1171_v58, %v2220_v0  ;;  %v1305_v63 = vadd.f32 %v1304_v59, %v1242_v23  ;;  %v1247_v0 = vmul.f32 %v2244_v35, %v2244_v35  ;;  %v1258_v23 = vmul.f32 %v2306_v13, %v2306_v13 }
 0x19e   :  { %v1259_v59 = vmul.f32 %v2316_v29, %v2316_v29 }
 0x19f   :  { %v1173_v1 = vadd.f32 %v1172_v61, %v2222_v6  ;;  %v1306_v2 = vadd.f32 %v1305_v63, %v1243_v32  ;;  %v1248_v6 = vmul.f32 %v2246_v42, %v2246_v42  ;;  %v1260_v61 = vmul.f32 %v2318_v39, %v2318_v39 }
 0x1a1   :  { %v1307_v4 = vadd.f32 %v1306_v2, %v1244_v38  ;;  %v1174_v7 = vadd.f32 %v1173_v1, %v2232_v16  ;;  %v1249_v16 = vmul.f32 %v2256_v53, %v2256_v53  ;;  %v1261_v38 = vmul.f32 %v2328_v52, %v2328_v52 }
 0x1a2   :  { %v1262_v2 = vmul.f32 %v2330_v62, %v2330_v62 }
 0x1a3   :  { %v1175_v9 = vadd.f32 %v1174_v7, %v2234_v24  ;;  %v1308_v10 = vadd.f32 %v1307_v4, %v1245_v48  ;;  %v1250_v24 = vmul.f32 %v2258_v60, %v2258_v60  ;;  %v1263_v4 = vmul.f32 %v2340_v12, %v2340_v12 }
 0x1a5   :  { %v1176_v11 = vadd.f32 %v1175_v9, %v2244_v35  ;;  %v1309_v17 = vadd.f32 %v1308_v10, %v1246_v54  ;;  %v1251_v35 = vmul.f32 %v2268_v8, %v2268_v8  ;;  %v1264_v54 = vmul.f32 %v2342_v22, %v2342_v22 }
 0x1a6   :  { %v1265_v10 = vmul.f32 %v2352_v41, %v2352_v41 }
 0x1a7   :  { %v1177_v19 = vadd.f32 %v1176_v11, %v2246_v42  ;;  %v1310_v20 = vadd.f32 %v1309_v17, %v1247_v0  ;;  %v1252_v42 = vmul.f32 %v2270_v14, %v2270_v14  ;;  %v1266_v11 = vmul.f32 %v2354_v50, %v2354_v50 }
 0x1a9   :  { %v1178_v21 = vadd.f32 %v1177_v19, %v2256_v53  ;;  %v1311_v25 = vadd.f32 %v1310_v20, %v1248_v6  ;;  %v1268_v20 = vmul.f32 %v2366_v15, %v2366_v15 }
 0x1ab   :  { %v1179_v26 = vadd.f32 %v1178_v21, %v2258_v60  ;;  %v1312_v27 = vadd.f32 %v1311_v25, %v1249_v16 }
 0x1ad   :  { %v1180_v30 = vadd.f32 %v1179_v26, %v2268_v8  ;;  %v1313_v31 = vadd.f32 %v1312_v27, %v1250_v24 }
 0x1af   :  { %v1181_v33 = vadd.f32 %v1180_v30, %v2270_v14  ;;  %v1314_v34 = vadd.f32 %v1313_v31, %v1251_v35 }
 0x1b1   :  { %v1182_v53 = vadd.f32 %v1181_v33, %v2280_v28  ;;  %v1315_v40 = vadd.f32 %v1314_v34, %v1252_v42 }
 0x1b3   :  { %v1316_v60 = vadd.f32 %v1315_v40, %v1253_v37  ;;  %v1183_v43 = vadd.f32 %v1182_v53, %v2282_v36 }
 0x1b5   :  { %v1317_v8 = vadd.f32 %v1316_v60, %v1254_v44  ;;  %v1184_v45 = vadd.f32 %v1183_v43, %v2292_v49 }
 0x1b7   :  { %v1318_v14 = vadd.f32 %v1317_v8, %v1255_v18  ;;  %v1185_v46 = vadd.f32 %v1184_v45, %v2294_v57 }
 0x1b9   :  { %v1319_v28 = vadd.f32 %v1318_v14, %v1256_v47  ;;  %v1186_v51 = vadd.f32 %v1185_v46, %v2304_v5 }
 0x1bb   :  { %v1320_v56 = vadd.f32 %v1319_v28, %v1257_v55  ;;  %v1187_v36 = vadd.f32 %v1186_v51, %v2306_v13 }
 0x1bd   :  { %v1321_v58 = vadd.f32 %v1320_v56, %v1258_v23  ;;  %v1188_v49 = vadd.f32 %v1187_v36, %v2316_v29 }
 0x1bf   :  { %v1322_v32 = vadd.f32 %v1321_v58, %v1259_v59  ;;  %v1189_v57 = vadd.f32 %v1188_v49, %v2318_v39 }
 0x1c1   :  { %v1323_v63 = vadd.f32 %v1322_v32, %v1260_v61  ;;  %v1190_v5 = vadd.f32 %v1189_v57, %v2328_v52 }
 0x1c3   :  { %v1324_v1 = vadd.f32 %v1323_v63, %v1261_v38  ;;  %v1191_v13 = vadd.f32 %v1190_v5, %v2330_v62 }
 0x1c5   :  { %v1325_v48 = vadd.f32 %v1324_v1, %v1262_v2  ;;  %v1192_v29 = vadd.f32 %v1191_v13, %v2340_v12  ;;  %v1267_v12 = vmul.f32 %v2364_v3, %v2364_v3 }
 0x1c7   :  { %v1326_v7 = vadd.f32 %v1325_v48, %v1263_v4  ;;  %v1193_v39 = vadd.f32 %v1192_v29, %v2342_v22 }
 0x1c9   :  { %v1327_v9 = vadd.f32 %v1326_v7, %v1264_v54  ;;  %v1194_v52 = vadd.f32 %v1193_v39, %v2352_v41 }
 0x1cb   :  { %v1328_v0 = vadd.f32 %v1327_v9, %v1265_v10  ;;  %v1195_v62 = vadd.f32 %v1194_v52, %v2354_v50 }
 0x1cd   :  { %v1329_v17 = vadd.f32 %v1328_v0, %v1266_v11  ;;  %v1196_v6 = vadd.f32 %v1195_v62, %v2364_v3 }
 0x1cf   :  { %v1330_v19 = vadd.f32 %v1329_v17, %v1267_v12  ;;  %v1197_v22 = vadd.f32 %v1196_v6, %v2366_v15 }
 0x1d1   :  { %v1198_v16 = vrot.slane %v1197_v22, 4  ;;  %v1331_v41 = vadd.f32 %v1330_v19, %v1268_v20 }
 0x1d3   :  { %v1199_v21 = vadd.f32 %v1198_v16, %v1197_v22  ;;  %v1332_v25 = vrot.slane %v1331_v41, 4 }
 0x1d5   :  { %v1200_v24 = vrot.slane %v1199_v21, 2  ;;  %v1333_v26 = vadd.f32 %v1332_v25, %v1331_v41 }
 0x1d7   :  { %v1201_v27 = vadd.f32 %v1200_v24, %v1199_v21  ;;  %v1334_v50 = vrot.slane %v1333_v26, 2 }
 0x1d9   :  { %v1202_v35 = vrot.slane %v1201_v27, 1  ;;  %v1335_v30 = vadd.f32 %v1334_v50, %v1333_v26 }
 0x1db   :  { %v1203_v31 = vadd.f32 %v1202_v35, %v1201_v27  ;;  %v1336_v42 = vrot.slane %v1335_v30, 1 }
 0x1dd   :  { %1204 = vst [vmem:[%s2481_s3] sm:$0x1] %v1203_v31  ;;  %v1337_v3 = vadd.f32 %v1336_v42, %v1335_v30 }
 0x1df   :  { %1338 = vst [vmem:[%s2481_s3 + $0x1] sm:$0x1] %v1337_v3 }

// kernel: _lambda_.32
= control target key start
LH: loop header
LB: loop body
LE: loop exit
PB: predicated region body
PF: predicated region fallthrough
CT: control target
= control target key end

     0   :  { %s410_s0 = inlined_call_operand.vmem [shape: bf16[128,128], index: 0, kind: input, shape index: {}]   ;;  %s411_s1 = inlined_call_operand.vmem [shape: f32[2,128], index: 1, kind: input, shape index: {}]   ;;  %s412_s2 = inlined_call_operand.vmem [shape: bf16[128,128], index: 2, kind: output, shape index: {}]  }
   0x1   :  { %v220_v0 = vld [vmem:[%s410_s0] sm:$0xff]   ;;  %v291_v4 = vld [vmem:[%s410_s0 + $0x8] sm:$0xff]   ;;  %v292_v5 = vld [vmem:[%s410_s0 + $0x10] sm:$0xff]  }
   0x2   :  { %v326_v1 = vld [vmem:[%s411_s1] ss:$0 sm:$0xff]  ;;  %v221_v2 = vunpack.c.l.bf16 %v220_v0  ;;  %v222_v3 = vunpack.c.h.bf16 %v220_v0  ;;  %v293_v6 = vld [vmem:[%s410_s0 + $0x18] sm:$0xff]   ;;  %v340_v7 = vld [vmem:[%s411_s1 + $0x1] ss:$0 sm:$0xff]  ;;  %v225_v8 = vunpack.c.l.bf16 %v291_v4  ;;  %v226_v9 = vunpack.c.h.bf16 %v291_v4 }
   0x3   :  { %v229_v10 = vunpack.c.l.bf16 %v292_v5  ;;  %v230_v11 = vunpack.c.h.bf16 %v292_v5  ;;  %v233_v14 = vunpack.c.l.bf16 %v293_v6  ;;  %v234_v15 = vunpack.c.h.bf16 %v293_v6  ;;  %v294_v28 = vld [vmem:[%s410_s0 + $0x20] sm:$0xff]   ;;  %v295_v33 = vld [vmem:[%s410_s0 + $0x28] sm:$0xff]   ;;  %v296_v38 = vld [vmem:[%s410_s0 + $0x30] sm:$0xff]  }
   0x4   :  { %v48_v12 = vmul.f32 %v221_v2, %v326_v1  ;;  %v49_v13 = vmul.f32 %v222_v3, %v326_v1  ;;  %v50_v16 = vmul.f32 %v225_v8, %v326_v1  ;;  %v51_v17 = vmul.f32 %v226_v9, %v326_v1  ;;  %v297_v43 = vld [vmem:[%s410_s0 + $0x38] sm:$0xff]  }
   0x5   :  { %v52_v18 = vmul.f32 %v229_v10, %v326_v1  ;;  %v53_v19 = vmul.f32 %v230_v11, %v326_v1  ;;  %v54_v22 = vmul.f32 %v233_v14, %v326_v1  ;;  %v55_v23 = vmul.f32 %v234_v15, %v326_v1 }
   0x6   :  { %v69_v20 = vadd.f32 %v340_v7, %v48_v12  ;;  %v70_v21 = vadd.f32 %v340_v7, %v49_v13  ;;  %v71_v24 = vadd.f32 %v340_v7, %v50_v16  ;;  %v72_v25 = vadd.f32 %v340_v7, %v51_v17 }
   0x7   :  { %v73_v26 = vadd.f32 %v340_v7, %v52_v18  ;;  %v74_v27 = vadd.f32 %v340_v7, %v53_v19  ;;  %v75_v31 = vadd.f32 %v340_v7, %v54_v22  ;;  %v76_v32 = vadd.f32 %v340_v7, %v55_v23 }
   0x8   :  { %v85_v29 = vmax.f32 %v69_v20, 0.0  ;;  %v86_v30 = vmax.f32 %v70_v21, 0.0  ;;  %v87_v34 = vmax.f32 %v71_v24, 0.0  ;;  %v88_v35 = vmax.f32 %v72_v25, 0.0 }
   0x9   :  { %v89_v36 = vmax.f32 %v73_v26, 0.0  ;;  %v90_v37 = vmax.f32 %v74_v27, 0.0  ;;  %v91_v40 = vmax.f32 %v75_v31, 0.0  ;;  %v92_v41 = vmax.f32 %v76_v32, 0.0 }
   0xa   :  { %v254_v39 = vpack.c.bf16 %v86_v30, %v85_v29  ;;  %v237_v42 = vunpack.c.l.bf16 %v294_v28  ;;  %v259_v44 = vpack.c.bf16 %v88_v35, %v87_v34  ;;  %v238_v46 = vunpack.c.h.bf16 %v294_v28 }
   0xb   :  { %v264_v45 = vpack.c.bf16 %v90_v37, %v89_v36  ;;  %v241_v47 = vunpack.c.l.bf16 %v295_v33  ;;  %v269_v48 = vpack.c.bf16 %v92_v41, %v91_v40  ;;  %v242_v50 = vunpack.c.h.bf16 %v295_v33 }
   0xc   :  { %255 = vst [vmem:[%s412_s2] sm:$0xff] %v254_v39   ;;  %v56_v49 = vmul.f32 %v237_v42, %v326_v1  ;;  %v245_v51 = vunpack.c.l.bf16 %v296_v38  ;;  %298 = vst [vmem:[%s412_s2 + $0x8] sm:$0xff] %v259_v44   ;;  %v57_v52 = vmul.f32 %v238_v46, %v326_v1  ;;  %v246_v54 = vunpack.c.h.bf16 %v296_v38 }
   0xd   :  { %299 = vst [vmem:[%s412_s2 + $0x10] sm:$0xff] %v264_v45   ;;  %v58_v53 = vmul.f32 %v241_v47, %v326_v1  ;;  %v249_v55 = vunpack.c.l.bf16 %v297_v43  ;;  %300 = vst [vmem:[%s412_s2 + $0x18] sm:$0xff] %v269_v48   ;;  %v59_v57 = vmul.f32 %v242_v50, %v326_v1  ;;  %v250_v59 = vunpack.c.h.bf16 %v297_v43 }
   0xe   :  { %v77_v56 = vadd.f32 %v340_v7, %v56_v49  ;;  %v60_v58 = vmul.f32 %v245_v51, %v326_v1  ;;  %v78_v60 = vadd.f32 %v340_v7, %v57_v52  ;;  %v61_v62 = vmul.f32 %v246_v54, %v326_v1 }
   0xf   :  { %v79_v61 = vadd.f32 %v340_v7, %v58_v53  ;;  %v62_v63 = vmul.f32 %v249_v55, %v326_v1  ;;  %v80_v2 = vadd.f32 %v340_v7, %v59_v57  ;;  %v63_v4 = vmul.f32 %v250_v59, %v326_v1 }
  0x10   :  { %v93_v0 = vmax.f32 %v77_v56, 0.0  ;;  %v81_v3 = vadd.f32 %v340_v7, %v60_v58  ;;  %v94_v5 = vmax.f32 %v78_v60, 0.0  ;;  %v82_v8 = vadd.f32 %v340_v7, %v61_v62 }
  0x11   :  { %v95_v6 = vmax.f32 %v79_v61, 0.0  ;;  %v83_v9 = vadd.f32 %v340_v7, %v62_v63  ;;  %v96_v10 = vmax.f32 %v80_v2, 0.0  ;;  %v84_v12 = vadd.f32 %v340_v7, %v63_v4 }
  0x12   :  { %v97_v11 = vmax.f32 %v81_v3, 0.0  ;;  %v274_v13 = vpack.c.bf16 %v94_v5, %v93_v0  ;;  %v98_v14 = vmax.f32 %v82_v8, 0.0 }
  0x13   :  { %v99_v15 = vmax.f32 %v83_v9, 0.0  ;;  %v279_v16 = vpack.c.bf16 %v96_v10, %v95_v6  ;;  %v100_v17 = vmax.f32 %v84_v12, 0.0 }
  0x14   :  { %301 = vst [vmem:[%s412_s2 + $0x20] sm:$0xff] %v274_v13   ;;  %v284_v1 = vpack.c.bf16 %v98_v14, %v97_v11 }
  0x15   :  { %302 = vst [vmem:[%s412_s2 + $0x28] sm:$0xff] %v279_v16   ;;  %v289_v18 = vpack.c.bf16 %v100_v17, %v99_v15 }
  0x16   :  { %303 = vst [vmem:[%s412_s2 + $0x30] sm:$0xff] %v284_v1  }
  0x17   :  { %304 = vst [vmem:[%s412_s2 + $0x38] sm:$0xff] %v289_v18  }

// kernel: _lambda_.29
= control target key start
LH: loop header
LB: loop body
LE: loop exit
PB: predicated region body
PF: predicated region fallthrough
CT: control target
= control target key end

     0   :  { %v5999_v0 = vmov 0   ;;  %s7704_s1 = inlined_call_operand.vmem [shape: bf16[1152,128], index: 1, kind: input, shape index: {}]   ;;  %s7705_s0 = inlined_call_operand.vmem [shape: bf16[512,1152], index: 0, kind: input, shape index: {}]   ;;  %s7706_s2 = inlined_call_operand.vmem [shape: bf16[512,128], index: 2, kind: output, shape index: {0}]   ;;  %s7707_s3 = inlined_call_operand.vmem [shape: f32[1,2,128], index: 3, kind: output, shape index: {1}]  }
   0x1   :  { %2382 = vmatprep.subr.bf16.mxu1 %v5999_v0  ;;  %2671 = vmatprep.subr.bf16.mxu0 %v5999_v0  ;;  %v5511_v1 = vld [vmem:[%s7704_s1] sm:$0xff]   ;;  %v5513_v3 = vld [vmem:[%s7704_s1 + $0x8] sm:$0xff]   ;;  %v5515_v5 = vld [vmem:[%s7704_s1 + $0x10] sm:$0xff]  }
   0x2   :  { %v6028_v2 = vld [vmem:[%s7704_s1 + $0x80] sm:$0xff]   ;;  %2383 = vmatpush1.bf16.msra.mxu1 %v5511_v1  ;;  %v6038_v4 = vld [vmem:[%s7704_s1 + $0x88] sm:$0xff]   ;;  %v6049_v6 = vld [vmem:[%s7704_s1 + $0x90] sm:$0xff]  }
   0x3   :  { %2672 = vmatpush1.bf16.msra.mxu0 %v6028_v2  ;;  %2384 = vmatprep.subr.bf16.mxu1 %v5999_v0  ;;  %v5517_v7 = vld [vmem:[%s7704_s1 + $0x18] sm:$0xff]   ;;  %v5519_v9 = vld [vmem:[%s7704_s1 + $0x20] sm:$0xff]   ;;  %v5521_v11 = vld [vmem:[%s7704_s1 + $0x28] sm:$0xff]  }
   0x4   :  { %2673 = vmatprep.subr.bf16.mxu0 %v5999_v0  ;;  %v6060_v8 = vld [vmem:[%s7704_s1 + $0x98] sm:$0xff]   ;;  %v6071_v10 = vld [vmem:[%s7704_s1 + $0xa0] sm:$0xff]   ;;  %v6082_v12 = vld [vmem:[%s7704_s1 + $0xa8] sm:$0xff]  }
   0x5   :  { %v5523_v13 = vld [vmem:[%s7704_s1 + $0x30] sm:$0xff]   ;;  %v5525_v15 = vld [vmem:[%s7704_s1 + $0x38] sm:$0xff]   ;;  %v5527_v17 = vld [vmem:[%s7704_s1 + $0x40] sm:$0xff]  }
   0x6   :  { %2385 = vmatpush1.bf16.msra.mxu1 %v5513_v3  ;;  %v6093_v14 = vld [vmem:[%s7704_s1 + $0xb0] sm:$0xff]   ;;  %v6104_v16 = vld [vmem:[%s7704_s1 + $0xb8] sm:$0xff]   ;;  %v6115_v18 = vld [vmem:[%s7704_s1 + $0xc0] sm:$0xff]  }
   0x7   :  { %2674 = vmatpush1.bf16.msra.mxu0 %v6038_v4  ;;  %2386 = vmatprep.subr.bf16.mxu1 %v5999_v0  ;;  %v5545_v19 = vld [vmem:[%s7705_s0 + $0x4] ss:$36 sps:$4 sm:$0xff]   ;;  %v5548_v21 = vld [vmem:[%s7705_s0 + $0xc] ss:$36 sps:$4 sm:$0xff]   ;;  %v5533_v25 = vld [vmem:[%s7704_s1 + $0x58] sm:$0xff]  }
   0x8   :  { %2675 = vmatprep.subr.bf16.mxu0 %v5999_v0  ;;  %v5529_v20 = vld [vmem:[%s7704_s1 + $0x48] sm:$0xff]   ;;  %2414 = vmatprep.mubr.bf16.mxu1 %v5545_v19  ;;  %v5531_v23 = vld [vmem:[%s7704_s1 + $0x50] sm:$0xff]   ;;  %v6154_v26 = vld [vmem:[%s7704_s1 + $0xd8] sm:$0xff]  }
   0x9   :  { %v6132_v22 = vld [vmem:[%s7704_s1 + $0xc8] sm:$0xff]   ;;  %2703 = vmatprep.mubr.bf16.mxu0 %v5548_v21  ;;  %v6143_v24 = vld [vmem:[%s7704_s1 + $0xd0] sm:$0xff]   ;;  %v5535_v27 = vld [vmem:[%s7704_s1 + $0x60] sm:$0xff]  }
   0xa   :  { %2387 = vmatpush1.bf16.msra.mxu1 %v5515_v5  ;;  %v6165_v28 = vld [vmem:[%s7704_s1 + $0xe0] sm:$0xff]   ;;  %v5537_v29 = vld [vmem:[%s7704_s1 + $0x68] sm:$0xff]   ;;  %v5539_v31 = vld [vmem:[%s7704_s1 + $0x70] sm:$0xff]  }
   0xb   :  { %2676 = vmatpush1.bf16.msra.mxu0 %v6049_v6  ;;  %2388 = vmatprep.subr.bf16.mxu1 %v5999_v0  ;;  %v6176_v30 = vld [vmem:[%s7704_s1 + $0xe8] sm:$0xff]   ;;  %v6187_v32 = vld [vmem:[%s7704_s1 + $0xf0] sm:$0xff]   ;;  %v5541_v33 = vld [vmem:[%s7704_s1 + $0x78] sm:$0xff]  }
   0xc   :  { %2677 = vmatprep.subr.bf16.mxu0 %v5999_v0  ;;  %v6198_v34 = vld [vmem:[%s7704_s1 + $0xf8] sm:$0xff]   ;;  %v5543_v35 = vld [vmem:[%s7705_s0] ss:$36 sps:$4 sm:$0xff]   ;;  %v5546_v36 = vld [vmem:[%s7705_s0 + $0x8] ss:$36 sps:$4 sm:$0xff]  }
   0xd   :  { %v5549_v37 = vld [vmem:[%s7704_s1 + $0x100] sm:$0xff]   ;;  %v5551_v38 = vld [vmem:[%s7705_s0 + $0x4c] ss:$36 sps:$4 sm:$0xff]   ;;  %v5553_v39 = vld [vmem:[%s7705_s0 + $0x54] ss:$36 sps:$4 sm:$0xff]  }
   0xe   :  { %2389 = vmatpush1.bf16.msra.mxu1 %v5517_v7  ;;  %v5550_v40 = vld [vmem:[%s7704_s1 + $0x108] sm:$0xff]   ;;  %v5556_v42 = vld [vmem:[%s7705_s0 + $0x50] ss:$36 sps:$4 sm:$0xff]   ;;  %v5561_v45 = vld [vmem:[%s7705_s0 + $0x9c] ss:$36 sps:$4 sm:$0xff]  }
   0xf   :  { %2678 = vmatpush1.bf16.msra.mxu0 %v6060_v8  ;;  %2390 = vmatprep.subr.bf16.mxu1 %v5999_v0  ;;  %v5555_v41 = vld [vmem:[%s7705_s0 + $0x48] ss:$36 sps:$4 sm:$0xff]   ;;  %v5559_v43 = vld [vmem:[%s7705_s0 + $0x94] ss:$36 sps:$4 sm:$0xff]   ;;  %v5565_v49 = vld [vmem:[%s7704_s1 + $0x120] sm:$0xff]  }
  0x10   :  { %2679 = vmatprep.subr.bf16.mxu0 %v5999_v0  ;;  %v5557_v44 = vld [vmem:[%s7704_s1 + $0x110] sm:$0xff]   ;;  %v5558_v46 = vld [vmem:[%s7704_s1 + $0x118] sm:$0xff]   ;;  %v5569_v51 = vld [vmem:[%s7705_s0 + $0xe4] ss:$36 sps:$4 sm:$0xff]  }
  0x11   :  { %v5563_v47 = vld [vmem:[%s7705_s0 + $0x90] ss:$36 sps:$4 sm:$0xff]   ;;  %v5564_v48 = vld [vmem:[%s7705_s0 + $0x98] ss:$36 sps:$4 sm:$0xff]   ;;  %v5566_v52 = vld [vmem:[%s7704_s1 + $0x128] sm:$0xff]  }
  0x12   :  { %2391 = vmatpush1.bf16.msra.mxu1 %v5519_v9  ;;  %v5567_v50 = vld [vmem:[%s7705_s0 + $0xdc] ss:$36 sps:$4 sm:$0xff]   ;;  %v5575_v55 = vld [vmem:[%s7705_s0 + $0x124] ss:$36 sps:$4 sm:$0xff]   ;;  %v5573_v56 = vld [vmem:[%s7704_s1 + $0x130] sm:$0xff]  }
  0x13   :  { %2680 = vmatpush1.bf16.msra.mxu0 %v6071_v10  ;;  %2392 = vmatprep.subr.bf16.mxu1 %v5999_v0  ;;  %v5571_v53 = vld [vmem:[%s7705_s0 + $0xd8] ss:$36 sps:$4 sm:$0xff]   ;;  %v5572_v54 = vld [vmem:[%s7705_s0 + $0xe0] ss:$36 sps:$4 sm:$0xff]   ;;  %v5577_v57 = vld [vmem:[%s7705_s0 + $0x12c] ss:$36 sps:$4 sm:$0xff]  }
  0x14   :  { %2681 = vmatprep.subr.bf16.mxu0 %v5999_v0  ;;  %v5574_v58 = vld [vmem:[%s7704_s1 + $0x138] sm:$0xff]   ;;  %v5579_v59 = vld [vmem:[%s7705_s0 + $0x120] ss:$36 sps:$4 sm:$0xff]   ;;  %v5580_v60 = vld [vmem:[%s7705_s0 + $0x128] ss:$36 sps:$4 sm:$0xff]  }
  0x15   :  { %v5581_v61 = vld [vmem:[%s7704_s1 + $0x140] sm:$0xff]   ;;  %v5583_v62 = vld [vmem:[%s7705_s0 + $0x16c] ss:$36 sps:$4 sm:$0xff]   ;;  %v5585_v63 = vld [vmem:[%s7705_s0 + $0x174] ss:$36 sps:$4 sm:$0xff]  }
  0x16   :  { %2393 = vmatpush1.bf16.msra.mxu1 %v5521_v11  ;;  %v5582_v1 = vld [vmem:[%s7704_s1 + $0x148] sm:$0xff]   ;;  %v5588_v3 = vld [vmem:[%s7705_s0 + $0x170] ss:$36 sps:$4 sm:$0xff]   ;;  %v5590_v7 = vld [vmem:[%s7704_s1 + $0x158] sm:$0xff]  }
  0x17   :  { %2682 = vmatpush1.bf16.msra.mxu0 %v6082_v12  ;;  %2394 = vmatprep.subr.bf16.mxu1 %v5999_v0  ;;  %v5589_v5 = vld [vmem:[%s7704_s1 + $0x150] sm:$0xff]   ;;  %v5596_v9 = vld [vmem:[%s7705_s0 + $0x1b8] ss:$36 sps:$4 sm:$0xff]  }
  0x18   :  { %2683 = vmatprep.subr.bf16.mxu0 %v5999_v0  ;;  %v5599_v11 = vld [vmem:[%s7705_s0 + $0x1fc] ss:$36 sps:$4 sm:$0xff]   ;;  %v5609_v21 = vld [vmem:[%s7705_s0 + $0x10] ss:$36 sps:$4 sm:$0xff]  }
  0x19   :  { %v5606_v19 = vld [vmem:[%s7704_s1 + $0x178] sm:$0xff]  }
  0x1a   :  { %2395 = vmatpush1.bf16.msra.mxu1 %v5523_v13  ;;  %v5598_v13 = vld [vmem:[%s7704_s1 + $0x168] sm:$0xff]  }
  0x1b   :  { %2684 = vmatpush1.bf16.msra.mxu0 %v6093_v14  ;;  %2396 = vmatprep.subr.bf16.mxu1 %v5999_v0 }
  0x1c   :  { %2685 = vmatprep.subr.bf16.mxu0 %v5999_v0 }
  0x1e   :  { %2397 = vmatpush1.bf16.msra.mxu1 %v5525_v15  ;;  %v5604_v15 = vld [vmem:[%s7705_s0 + $0x200] ss:$36 sps:$4 sm:$0xff]  }
  0x1f   :  { %2686 = vmatpush1.bf16.msra.mxu0 %v6104_v16  ;;  %2398 = vmatprep.subr.bf16.mxu1 %v5999_v0 }
  0x20   :  { %2687 = vmatprep.subr.bf16.mxu0 %v5999_v0 }
  0x22   :  { %2399 = vmatpush1.bf16.msra.mxu1 %v5527_v17  ;;  %v5605_v17 = vld [vmem:[%s7704_s1 + $0x170] sm:$0xff]  }
  0x23   :  { %2688 = vmatpush1.bf16.msra.mxu0 %v6115_v18  ;;  %2400 = vmatprep.subr.bf16.mxu1 %v5999_v0 }
  0x24   :  { %2689 = vmatprep.subr.bf16.mxu0 %v5999_v0 }
  0x26   :  { %2401 = vmatpush1.bf16.msra.mxu1 %v5529_v20  ;;  %v5612_v20 = vld [vmem:[%s7705_s0 + $0x240] ss:$36 sps:$4 sm:$0xff]  }
  0x27   :  { %2690 = vmatpush1.bf16.msra.mxu0 %v6132_v22  ;;  %2402 = vmatprep.subr.bf16.mxu1 %v5999_v0 }
  0x28   :  { %2691 = vmatprep.subr.bf16.mxu0 %v5999_v0 }
  0x2a   :  { %2403 = vmatpush1.bf16.msra.mxu1 %v5531_v23  ;;  %v5613_v23 = vld [vmem:[%s7704_s1 + $0x180] sm:$0xff]  }
  0x2b   :  { %2692 = vmatpush1.bf16.msra.mxu0 %v6143_v24  ;;  %2404 = vmatprep.subr.bf16.mxu1 %v5999_v0 }
  0x2c   :  { %2693 = vmatprep.subr.bf16.mxu0 %v5999_v0 }
  0x2e   :  { %2405 = vmatpush1.bf16.msra.mxu1 %v5533_v25  ;;  %v5618_v25 = vld [vmem:[%s7705_s0 + $0x288] ss:$36 sps:$4 sm:$0xff]  }
  0x2f   :  { %2694 = vmatpush1.bf16.msra.mxu0 %v6154_v26  ;;  %2406 = vmatprep.subr.bf16.mxu1 %v5999_v0 }
  0x30   :  { %2695 = vmatprep.subr.bf16.mxu0 %v5999_v0 }
  0x32   :  { %2407 = vmatpush1.bf16.msra.mxu1 %v5535_v27  ;;  %v5619_v27 = vld [vmem:[%s7705_s0 + $0x58] ss:$36 sps:$4 sm:$0xff]  }
  0x33   :  { %2696 = vmatpush1.bf16.msra.mxu0 %v6165_v28  ;;  %2408 = vmatprep.subr.bf16.mxu1 %v5999_v0 }
  0x34   :  { %2697 = vmatprep.subr.bf16.mxu0 %v5999_v0 }
  0x36   :  { %2409 = vmatpush1.bf16.msra.mxu1 %v5537_v29  ;;  %v5622_v29 = vld [vmem:[%s7705_s0 + $0xa4] ss:$36 sps:$4 sm:$0xff]  }
  0x37   :  { %2698 = vmatpush1.bf16.msra.mxu0 %v6176_v30  ;;  %2410 = vmatprep.subr.bf16.mxu1 %v5999_v0 }
  0x38   :  { %2699 = vmatprep.subr.bf16.mxu0 %v5999_v0 }
  0x3a   :  { %2411 = vmatpush1.bf16.msra.mxu1 %v5539_v31  ;;  %v5624_v31 = vld [vmem:[%s7705_s0 + $0x2d0] ss:$36 sps:$4 sm:$0xff]  }
  0x3b   :  { %2700 = vmatpush1.bf16.msra.mxu0 %v6187_v32  ;;  %2412 = vmatprep.subr.bf16.mxu1 %v5999_v0 }
  0x3c   :  { %2701 = vmatprep.subr.bf16.mxu0 %v5999_v0 }
  0x3e   :  { %2413 = vmatpush1.bf16.msra.mxu1 %v5541_v33  ;;  %v5625_v33 = vld [vmem:[%s7705_s0 + $0xa0] ss:$36 sps:$4 sm:$0xff]  }
  0x3f   :  { %2702 = vmatpush1.bf16.msra.mxu0 %v6198_v34  ;;  %5158 = vmatprep.subr.bf16.mxu1 %v5999_v0 }
  0x40   :  { %2960 = vmatprep.subr.bf16.mxu0 %v5999_v0 }
  0x41   :  { %2415 = vmatmul.mubr.bf16.vlgmr.msra.gmra.mrb[0].mxu1 %v5543_v35  ;;  %v5629_v35 = vld [vmem:[%s7705_s0 + $0xec] ss:$36 sps:$4 sm:$0xff]  }
  0x42   :  { %2704 = vmatmul.mubr.bf16.vlgmr.msra.gmra.mrb[0].mxu0 %v5546_v36  ;;  %5174 = vmatpush1.bf16.msra.mxu1 %v6028_v2  ;;  %v5587_v2 = vld [vmem:[%s7705_s0 + $0x168] ss:$36 sps:$4 sm:$0xff]   ;;  %v5665_v36 = vld [vmem:[%s7704_s1 + $0x1a0] sm:$0xff]  }
  0x43   :  { %2961 = vmatpush1.bf16.msra.mxu0 %v5549_v37  ;;  %2422 = vmatprep.mubr.bf16.mxu1 %v5551_v38  ;;  %v5678_v37 = vld [vmem:[%s7704_s1 + $0x1a8] sm:$0xff]   ;;  %v5631_v38 = vld [vmem:[%s7705_s0 + $0x318] ss:$36 sps:$4 sm:$0xff]  }
  0x44   :  { %2962 = vmatprep.subr.bf16.mxu0 %v5999_v0  ;;  %2711 = vmatprep.mubr.bf16.mxu0 %v5553_v39  ;;  %v5632_v39 = vld [vmem:[%s7705_s0 + $0xe8] ss:$36 sps:$4 sm:$0xff]  }
  0x45   :  { %5159 = vmatprep.subr.bf16.mxu1 %v5999_v0 }
  0x46   :  { %5175 = vmatpush1.bf16.msra.mxu1 %v6038_v4  ;;  %v5591_v4 = vld [vmem:[%s7705_s0 + $0x1b4] ss:$36 sps:$4 sm:$0xff]  }
  0x47   :  { %2963 = vmatpush1.bf16.msra.mxu0 %v5550_v40  ;;  %5160 = vmatprep.subr.bf16.mxu1 %v5999_v0  ;;  %v5633_v40 = vld [vmem:[%s7705_s0 + $0x364] ss:$36 sps:$4 sm:$0xff]  }
  0x48   :  { %2964 = vmatprep.subr.bf16.mxu0 %v5999_v0 }
  0x49   :  { %2423 = vmatmul.mubr.bf16.gmra.mrb[4].mxu1 %v5555_v41  ;;  %v5635_v41 = vld [vmem:[%s7705_s0 + $0x134] ss:$36 sps:$4 sm:$0xff]  }
  0x4a   :  { %2712 = vmatmul.mubr.bf16.gmra.mrb[4].mxu0 %v5556_v42  ;;  %2430 = vmatprep.mubr.bf16.mxu1 %v5559_v43  ;;  %v5691_v42 = vld [vmem:[%s7704_s1 + $0x1b0] sm:$0xff]   ;;  %v5704_v43 = vld [vmem:[%s7704_s1 + $0x1b8] sm:$0xff]  }
  0x4b   :  { %2965 = vmatpush1.bf16.msra.mxu0 %v5557_v44  ;;  %2719 = vmatprep.mubr.bf16.mxu0 %v5561_v45  ;;  %v5637_v44 = vld [vmem:[%s7705_s0 + $0x360] ss:$36 sps:$4 sm:$0xff]   ;;  %v5638_v45 = vld [vmem:[%s7705_s0 + $0x130] ss:$36 sps:$4 sm:$0xff]  }
  0x4c   :  { %2966 = vmatprep.subr.bf16.mxu0 %v5999_v0  ;;  %5176 = vmatpush1.bf16.msra.mxu1 %v6049_v6  ;;  %v5593_v6 = vld [vmem:[%s7705_s0 + $0x1bc] ss:$36 sps:$4 sm:$0xff]  }
  0x4d   :  { %5161 = vmatprep.subr.bf16.mxu1 %v5999_v0 }
  0x4f   :  { %2967 = vmatpush1.bf16.msra.mxu0 %v5558_v46  ;;  %v5640_v46 = vld [vmem:[%s7705_s0 + $0x3ac] ss:$36 sps:$4 sm:$0xff]  }
  0x50   :  { %2968 = vmatprep.subr.bf16.mxu0 %v5999_v0  ;;  %5177 = vmatpush1.bf16.msra.mxu1 %v6060_v8  ;;  %v5595_v8 = vld [vmem:[%s7705_s0 + $0x1b0] ss:$36 sps:$4 sm:$0xff]  }
  0x51   :  { %2431 = vmatmul.mubr.bf16.gmra.mrb[8].mxu1 %v5563_v47  ;;  %5162 = vmatprep.subr.bf16.mxu1 %v5999_v0  ;;  %v5642_v47 = vld [vmem:[%s7705_s0 + $0x17c] ss:$36 sps:$4 sm:$0xff]  }
  0x52   :  { %2720 = vmatmul.mubr.bf16.gmra.mrb[8].mxu0 %v5564_v48  ;;  %2438 = vmatprep.mubr.bf16.mxu1 %v5567_v50  ;;  %v5717_v48 = vld [vmem:[%s7704_s1 + $0x1c0] sm:$0xff]   ;;  %v5644_v50 = vld [vmem:[%s7705_s0 + $0x3a8] ss:$36 sps:$4 sm:$0xff]  }
  0x53   :  { %2969 = vmatpush1.bf16.msra.mxu0 %v5565_v49  ;;  %2727 = vmatprep.mubr.bf16.mxu0 %v5569_v51  ;;  %v5730_v49 = vld [vmem:[%s7704_s1 + $0x1c8] sm:$0xff]   ;;  %v5645_v51 = vld [vmem:[%s7705_s0 + $0x178] ss:$36 sps:$4 sm:$0xff]  }
  0x54   :  { %2970 = vmatprep.subr.bf16.mxu0 %v5999_v0  ;;  %5178 = vmatpush1.bf16.msra.mxu1 %v6071_v10  ;;  %v5597_v10 = vld [vmem:[%s7704_s1 + $0x160] sm:$0xff]  }
  0x55   :  { %5163 = vmatprep.subr.bf16.mxu1 %v5999_v0 }
  0x57   :  { %2971 = vmatpush1.bf16.msra.mxu0 %v5566_v52  ;;  %v5646_v52 = vld [vmem:[%s7705_s0 + $0x3f4] ss:$36 sps:$4 sm:$0xff]  }
  0x58   :  { %2972 = vmatprep.subr.bf16.mxu0 %v5999_v0  ;;  %5179 = vmatpush1.bf16.msra.mxu1 %v6082_v12  ;;  %v5601_v12 = vld [vmem:[%s7705_s0 + $0x204] ss:$36 sps:$4 sm:$0xff]  }
  0x59   :  { %2439 = vmatmul.mubr.bf16.gmra.mrb[12].mxu1 %v5571_v53  ;;  %5164 = vmatprep.subr.bf16.mxu1 %v5999_v0  ;;  %v5648_v53 = vld [vmem:[%s7705_s0 + $0x1c4] ss:$36 sps:$4 sm:$0xff]  }
  0x5a   :  { %2728 = vmatmul.mubr.bf16.gmra.mrb[12].mxu0 %v5572_v54  ;;  %2446 = vmatprep.mubr.bf16.mxu1 %v5575_v55  ;;  %v5743_v54 = vld [vmem:[%s7704_s1 + $0x1d0] sm:$0xff]  }
  0x5b   :  { %2973 = vmatpush1.bf16.msra.mxu0 %v5573_v56  ;;  %2735 = vmatprep.mubr.bf16.mxu0 %v5577_v57  ;;  %v5650_v55 = vld [vmem:[%s7705_s0 + $0x3f0] ss:$36 sps:$4 sm:$0xff]   ;;  %v5651_v56 = vld [vmem:[%s7705_s0 + $0x1c0] ss:$36 sps:$4 sm:$0xff]  }
  0x5c   :  { %2974 = vmatprep.subr.bf16.mxu0 %v5999_v0  ;;  %5180 = vmatpush1.bf16.msra.mxu1 %v6093_v14  ;;  %v5603_v14 = vld [vmem:[%s7705_s0 + $0x1f8] ss:$36 sps:$4 sm:$0xff]  }
  0x5d   :  { %5165 = vmatprep.subr.bf16.mxu1 %v5999_v0  ;;  %v5653_v57 = vld [vmem:[%s7705_s0 + $0x43c] ss:$36 sps:$4 sm:$0xff]  }
  0x5f   :  { %2975 = vmatpush1.bf16.msra.mxu0 %v5574_v58  ;;  %v5655_v58 = vld [vmem:[%s7705_s0 + $0x20c] ss:$36 sps:$4 sm:$0xff]  }
  0x60   :  { %2976 = vmatprep.subr.bf16.mxu0 %v5999_v0  ;;  %5181 = vmatpush1.bf16.msra.mxu1 %v6104_v16  ;;  %v5607_v16 = vld [vmem:[%s7705_s0 + $0x244] ss:$36 sps:$4 sm:$0xff]  }
  0x61   :  { %2447 = vmatmul.mubr.bf16.gmra.mrb[16].mxu1 %v5579_v59  ;;  %5166 = vmatprep.subr.bf16.mxu1 %v5999_v0  ;;  %v5657_v59 = vld [vmem:[%s7705_s0 + $0x438] ss:$36 sps:$4 sm:$0xff]  }
  0x62   :  { %2736 = vmatmul.mubr.bf16.gmra.mrb[16].mxu0 %v5580_v60  ;;  %2454 = vmatprep.mubr.bf16.mxu1 %v5583_v62  ;;  %v5658_v60 = vld [vmem:[%s7705_s0 + $0x208] ss:$36 sps:$4 sm:$0xff]   ;;  %v5756_v62 = vld [vmem:[%s7704_s1 + $0x1d8] sm:$0xff]  }
  0x63   :  { %2977 = vmatpush1.bf16.msra.mxu0 %v5581_v61  ;;  %2743 = vmatprep.mubr.bf16.mxu0 %v5585_v63  ;;  %v5659_v61 = vld [vmem:[%s7705_s0 + $0x484] ss:$36 sps:$4 sm:$0xff]   ;;  %v5661_v63 = vld [vmem:[%s7705_s0 + $0x254] ss:$36 sps:$4 sm:$0xff]  }
  0x64   :  { %2978 = vmatprep.subr.bf16.mxu0 %v5999_v0  ;;  %5182 = vmatpush1.bf16.msra.mxu1 %v6115_v18  ;;  %v5611_v18 = vld [vmem:[%s7705_s0 + $0x14] ss:$36 sps:$4 sm:$0xff]  }
  0x65   :  { %5167 = vmatprep.subr.bf16.mxu1 %v5999_v0 }
  0x67   :  { %2979 = vmatpush1.bf16.msra.mxu0 %v5582_v1  ;;  %v5663_v1 = vld [vmem:[%s7705_s0 + $0x480] ss:$36 sps:$4 sm:$0xff]  }
  0x68   :  { %2980 = vmatprep.subr.bf16.mxu0 %v5999_v0  ;;  %5183 = vmatpush1.bf16.msra.mxu1 %v6132_v22  ;;  %v5614_v22 = vld [vmem:[%s7705_s0 + $0x28c] ss:$36 sps:$4 sm:$0xff]  }
  0x69   :  { %2455 = vmatmul.mubr.bf16.gmra.mrb[20].mxu1 %v5587_v2  ;;  %5168 = vmatprep.subr.bf16.mxu1 %v5999_v0  ;;  %v5664_v2 = vld [vmem:[%s7705_s0 + $0x250] ss:$36 sps:$4 sm:$0xff]  }
  0x6a   :  { %2744 = vmatmul.mubr.bf16.gmra.mrb[20].mxu0 %v5588_v3  ;;  %2462 = vmatprep.mubr.bf16.mxu1 %v5591_v4  ;;  %v5666_v3 = vld [vmem:[%s7705_s0 + $0x4cc] ss:$36 sps:$4 sm:$0xff]   ;;  %v5668_v4 = vld [vmem:[%s7705_s0 + $0x29c] ss:$36 sps:$4 sm:$0xff]  }
  0x6b   :  { %2981 = vmatpush1.bf16.msra.mxu0 %v5589_v5  ;;  %2751 = vmatprep.mubr.bf16.mxu0 %v5593_v6  ;;  %v6554_v5 = vld [vmem:[%s7704_s1 + $0x200] sm:$0xff]   ;;  %v5670_v6 = vld [vmem:[%s7705_s0 + $0x4c8] ss:$36 sps:$4 sm:$0xff]  }
  0x6c   :  { %2982 = vmatprep.subr.bf16.mxu0 %v5999_v0  ;;  %5184 = vmatpush1.bf16.msra.mxu1 %v6143_v24  ;;  %v5616_v24 = vld [vmem:[%s7705_s0 + $0x5c] ss:$36 sps:$4 sm:$0xff]  }
  0x6d   :  { %5169 = vmatprep.subr.bf16.mxu1 %v5999_v0 }
  0x6f   :  { %2983 = vmatpush1.bf16.msra.mxu0 %v5590_v7  ;;  %v5671_v7 = vld [vmem:[%s7705_s0 + $0x298] ss:$36 sps:$4 sm:$0xff]  }
  0x70   :  { %2984 = vmatprep.subr.bf16.mxu0 %v5999_v0  ;;  %5185 = vmatpush1.bf16.msra.mxu1 %v6154_v26  ;;  %v5626_v26 = vld [vmem:[%s7704_s1 + $0x188] sm:$0xff]  }
  0x71   :  { %2463 = vmatmul.mubr.bf16.gmra.mrb[24].mxu1 %v5595_v8  ;;  %5170 = vmatprep.subr.bf16.mxu1 %v5999_v0  ;;  %v5672_v8 = vld [vmem:[%s7705_s0 + $0x514] ss:$36 sps:$4 sm:$0xff]  }
  0x72   :  { %2752 = vmatmul.mubr.bf16.gmra.mrb[24].mxu0 %v5596_v9  ;;  %2470 = vmatprep.mubr.bf16.mxu1 %v5599_v11  ;;  %v5770_v9 = vld [vmem:[%s7704_s1 + $0x1e0] sm:$0xff]   ;;  %v5676_v11 = vld [vmem:[%s7705_s0 + $0x510] ss:$36 sps:$4 sm:$0xff]  }
  0x73   :  { %2985 = vmatpush1.bf16.msra.mxu0 %v5597_v10  ;;  %2759 = vmatprep.mubr.bf16.mxu0 %v5601_v12  ;;  %v5674_v10 = vld [vmem:[%s7705_s0 + $0x2e4] ss:$36 sps:$4 sm:$0xff]  }
  0x74   :  { %2986 = vmatprep.subr.bf16.mxu0 %v5999_v0  ;;  %5186 = vmatpush1.bf16.msra.mxu1 %v6165_v28  ;;  %v5620_v28 = vld [vmem:[%s7705_s0 + $0x2d4] ss:$36 sps:$4 sm:$0xff]   ;;  %v5677_v12 = vld [vmem:[%s7705_s0 + $0x2e0] ss:$36 sps:$4 sm:$0xff]  }
  0x75   :  { %5171 = vmatprep.subr.bf16.mxu1 %v5999_v0 }
  0x77   :  { %2987 = vmatpush1.bf16.msra.mxu0 %v5598_v13  ;;  %v5679_v13 = vld [vmem:[%s7705_s0 + $0x55c] ss:$36 sps:$4 sm:$0xff]  }
  0x78   :  { %2988 = vmatprep.subr.bf16.mxu0 %v5999_v0  ;;  %5187 = vmatpush1.bf16.msra.mxu1 %v6176_v30  ;;  %v5639_v30 = vld [vmem:[%s7704_s1 + $0x190] sm:$0xff]  }
  0x79   :  { %2471 = vmatmul.mubr.bf16.gmra.mrb[28].mxu1 %v5603_v14  ;;  %5172 = vmatprep.subr.bf16.mxu1 %v5999_v0  ;;  %v5681_v14 = vld [vmem:[%s7705_s0 + $0x32c] ss:$36 sps:$4 sm:$0xff]  }
  0x7a   :  { %2760 = vmatmul.mubr.bf16.gmra.mrb[28].mxu0 %v5604_v15  ;;  %2478 = vmatprep.mubr.bf16.mxu1 %v5607_v16  ;;  %v5783_v15 = vld [vmem:[%s7704_s1 + $0x1e8] sm:$0xff]   ;;  %v5683_v16 = vld [vmem:[%s7705_s0 + $0x558] ss:$36 sps:$4 sm:$0xff]  }
  0x7b   :  { %2989 = vmatpush1.bf16.msra.mxu0 %v5605_v17  ;;  %2992 = vmatprep.mubr.bf16.mxu0 %v5611_v18  ;;  %v5684_v17 = vld [vmem:[%s7705_s0 + $0x328] ss:$36 sps:$4 sm:$0xff]  }
  0x7c   :  { %2990 = vmatprep.subr.bf16.mxu0 %v5999_v0  ;;  %5188 = vmatpush1.bf16.msra.mxu1 %v6187_v32  ;;  %v5652_v32 = vld [vmem:[%s7704_s1 + $0x198] sm:$0xff]   ;;  %v5685_v18 = vld [vmem:[%s7705_s0 + $0x5a4] ss:$36 sps:$4 sm:$0xff]  }
  0x7d   :  { %5173 = vmatprep.subr.bf16.mxu1 %v5999_v0 }
  0x7f   :  { %2991 = vmatpush1.bf16.msra.mxu0 %v5606_v19  ;;  %v5687_v19 = vld [vmem:[%s7705_s0 + $0x374] ss:$36 sps:$4 sm:$0xff]  }
  0x80   :  { %3249 = vmatprep.subr.bf16.mxu0 %v5999_v0  ;;  %5189 = vmatpush1.bf16.msra.mxu1 %v6198_v34  ;;  %v5627_v34 = vld [vmem:[%s7705_s0 + $0x31c] ss:$36 sps:$4 sm:$0xff]  }
  0x81   :  { %2479 = vmatmul.mubr.bf16.gmra.mrb[32].mxu1 %v5612_v20  ;;  %5078 = vmatprep.subr.bf16.mxu1 %v6554_v5  ;;  %v5689_v20 = vld [vmem:[%s7705_s0 + $0x5a0] ss:$36 sps:$4 sm:$0xff]  }
  0x82   :  { %2993 = vmatmul.mubr.bf16.vlgmr.msra.gmra.mrb[0].mxu0 %v5609_v21  ;;  %2486 = vmatprep.mubr.bf16.mxu1 %v5614_v22  ;;  %v5690_v21 = vld [vmem:[%s7705_s0 + $0x370] ss:$36 sps:$4 sm:$0xff]  }
  0x83   :  { %3250 = vmatpush1.bf16.msra.mxu0 %v5613_v23  ;;  %3000 = vmatprep.mubr.bf16.mxu0 %v5616_v24  ;;  %v5692_v22 = vld [vmem:[%s7705_s0 + $0x5ec] ss:$36 sps:$4 sm:$0xff]   ;;  %v5694_v23 = vld [vmem:[%s7705_s0 + $0x3bc] ss:$36 sps:$4 sm:$0xff]  }
  0x84   :  { %3251 = vmatprep.subr.bf16.mxu0 %v5999_v0  ;;  %v5797_v24 = vld [vmem:[%s7704_s1 + $0x1f0] sm:$0xff]  }
  0x87   :  { %3252 = vmatpush1.bf16.msra.mxu0 %v5626_v26  ;;  %v5697_v26 = vld [vmem:[%s7705_s0 + $0x3b8] ss:$36 sps:$4 sm:$0xff]  }
  0x88   :  { %3253 = vmatprep.subr.bf16.mxu0 %v5999_v0 }
  0x89   :  { %2487 = vmatmul.mubr.bf16.gmra.mrb[36].mxu1 %v5618_v25  ;;  %v5696_v25 = vld [vmem:[%s7705_s0 + $0x5e8] ss:$36 sps:$4 sm:$0xff]  }
  0x8a   :  { %3001 = vmatmul.mubr.bf16.gmra.mrb[4].mxu0 %v5619_v27  ;;  %2494 = vmatprep.mubr.bf16.mxu1 %v5620_v28  ;;  %v5698_v27 = vld [vmem:[%s7705_s0 + $0x634] ss:$36 sps:$4 sm:$0xff]   ;;  %v5700_v28 = vld [vmem:[%s7705_s0 + $0x404] ss:$36 sps:$4 sm:$0xff]  }
  0x8b   :  { %3008 = vmatprep.mubr.bf16.mxu0 %v5622_v29  ;;  %3254 = vmatpush1.bf16.msra.mxu0 %v5639_v30  ;;  %v5703_v29 = vld [vmem:[%s7705_s0 + $0x400] ss:$36 sps:$4 sm:$0xff]  }
  0x8c   :  { %3255 = vmatprep.subr.bf16.mxu0 %v5999_v0  ;;  %v5705_v30 = vld [vmem:[%s7705_s0 + $0x67c] ss:$36 sps:$4 sm:$0xff]  }
  0x8f   :  { %3256 = vmatpush1.bf16.msra.mxu0 %v5652_v32  ;;  %v5811_v32 = vld [vmem:[%s7704_s1 + $0x1f8] sm:$0xff]  }
  0x90   :  { %3257 = vmatprep.subr.bf16.mxu0 %v5999_v0 }
  0x91   :  { %2495 = vmatmul.mubr.bf16.gmra.mrb[40].mxu1 %v5624_v31  ;;  %v5707_v31 = vld [vmem:[%s7705_s0 + $0x44c] ss:$36 sps:$4 sm:$0xff]  }
  0x92   :  { %3009 = vmatmul.mubr.bf16.gmra.mrb[8].mxu0 %v5625_v33  ;;  %2502 = vmatprep.mubr.bf16.mxu1 %v5627_v34  ;;  %v5709_v33 = vld [vmem:[%s7705_s0 + $0x678] ss:$36 sps:$4 sm:$0xff]   ;;  %v5710_v34 = vld [vmem:[%s7705_s0 + $0x448] ss:$36 sps:$4 sm:$0xff]  }
  0x93   :  { %3016 = vmatprep.mubr.bf16.mxu0 %v5629_v35  ;;  %3258 = vmatpush1.bf16.msra.mxu0 %v5665_v36  ;;  %v5711_v35 = vld [vmem:[%s7705_s0 + $0x6c4] ss:$36 sps:$4 sm:$0xff]   ;;  %v5713_v36 = vld [vmem:[%s7705_s0 + $0x494] ss:$36 sps:$4 sm:$0xff]  }
  0x94   :  { %3259 = vmatprep.subr.bf16.mxu0 %v5999_v0 }
  0x97   :  { %3260 = vmatpush1.bf16.msra.mxu0 %v5678_v37  ;;  %v5715_v37 = vld [vmem:[%s7705_s0 + $0x6c0] ss:$36 sps:$4 sm:$0xff]  }
  0x98   :  { %3261 = vmatprep.subr.bf16.mxu0 %v5999_v0 }
  0x99   :  { %2503 = vmatmul.mubr.bf16.gmra.mrb[44].mxu1 %v5631_v38  ;;  %v5716_v38 = vld [vmem:[%s7705_s0 + $0x490] ss:$36 sps:$4 sm:$0xff]  }
  0x9a   :  { %3017 = vmatmul.mubr.bf16.gmra.mrb[12].mxu0 %v5632_v39  ;;  %2510 = vmatprep.mubr.bf16.mxu1 %v5633_v40  ;;  %v5718_v39 = vld [vmem:[%s7705_s0 + $0x70c] ss:$36 sps:$4 sm:$0xff]   ;;  %v5720_v40 = vld [vmem:[%s7705_s0 + $0x4dc] ss:$36 sps:$4 sm:$0xff]  }
  0x9b   :  { %3024 = vmatprep.mubr.bf16.mxu0 %v5635_v41  ;;  %3262 = vmatpush1.bf16.msra.mxu0 %v5691_v42  ;;  %v5722_v41 = vld [vmem:[%s7705_s0 + $0x708] ss:$36 sps:$4 sm:$0xff]   ;;  %v5723_v42 = vld [vmem:[%s7705_s0 + $0x4d8] ss:$36 sps:$4 sm:$0xff]  }
  0x9c   :  { %3263 = vmatprep.subr.bf16.mxu0 %v5999_v0 }
  0x9f   :  { %3264 = vmatpush1.bf16.msra.mxu0 %v5704_v43  ;;  %v5724_v43 = vld [vmem:[%s7705_s0 + $0x754] ss:$36 sps:$4 sm:$0xff]  }
  0xa0   :  { %3265 = vmatprep.subr.bf16.mxu0 %v5999_v0 }
  0xa1   :  { %2511 = vmatmul.mubr.bf16.gmra.mrb[48].mxu1 %v5637_v44  ;;  %v5726_v44 = vld [vmem:[%s7705_s0 + $0x524] ss:$36 sps:$4 sm:$0xff]  }
  0xa2   :  { %3025 = vmatmul.mubr.bf16.gmra.mrb[16].mxu0 %v5638_v45  ;;  %2518 = vmatprep.mubr.bf16.mxu1 %v5640_v46  ;;  %v5728_v45 = vld [vmem:[%s7705_s0 + $0x750] ss:$36 sps:$4 sm:$0xff]   ;;  %v5729_v46 = vld [vmem:[%s7705_s0 + $0x520] ss:$36 sps:$4 sm:$0xff]  }
  0xa3   :  { %3032 = vmatprep.mubr.bf16.mxu0 %v5642_v47  ;;  %3266 = vmatpush1.bf16.msra.mxu0 %v5717_v48  ;;  %v5731_v47 = vld [vmem:[%s7705_s0 + $0x79c] ss:$36 sps:$4 sm:$0xff]   ;;  %v5733_v48 = vld [vmem:[%s7705_s0 + $0x56c] ss:$36 sps:$4 sm:$0xff]  }
  0xa4   :  { %3267 = vmatprep.subr.bf16.mxu0 %v5999_v0 }
  0xa7   :  { %3268 = vmatpush1.bf16.msra.mxu0 %v5730_v49 }
  0xa8   :  { %3269 = vmatprep.subr.bf16.mxu0 %v5999_v0 }
  0xa9   :  { %2519 = vmatmul.mubr.bf16.gmra.mrb[52].mxu1 %v5644_v50 }
  0xaa   :  { %3033 = vmatmul.mubr.bf16.gmra.mrb[20].mxu0 %v5645_v51  ;;  %2526 = vmatprep.mubr.bf16.mxu1 %v5646_v52  ;;  %v5735_v51 = vld [vmem:[%s7705_s0 + $0x798] ss:$36 sps:$4 sm:$0xff]  }
  0xab   :  { %3040 = vmatprep.mubr.bf16.mxu0 %v5648_v53  ;;  %3270 = vmatpush1.bf16.msra.mxu0 %v5743_v54  ;;  %v5736_v53 = vld [vmem:[%s7705_s0 + $0x568] ss:$36 sps:$4 sm:$0xff]  }
  0xac   :  { %3271 = vmatprep.subr.bf16.mxu0 %v5999_v0  ;;  %v5737_v54 = vld [vmem:[%s7705_s0 + $0x7e4] ss:$36 sps:$4 sm:$0xff]  }
  0xaf   :  { %3272 = vmatpush1.bf16.msra.mxu0 %v5756_v62  ;;  %v5744_v62 = vld [vmem:[%s7705_s0 + $0x82c] ss:$36 sps:$4 sm:$0xff]  }
  0xb0   :  { %3273 = vmatprep.subr.bf16.mxu0 %v5999_v0 }
  0xb1   :  { %2527 = vmatmul.mubr.bf16.gmra.mrb[56].mxu1 %v5650_v55 }
  0xb2   :  { %3041 = vmatmul.mubr.bf16.gmra.mrb[24].mxu0 %v5651_v56  ;;  %2534 = vmatprep.mubr.bf16.mxu1 %v5653_v57  ;;  %v5739_v56 = vld [vmem:[%s7705_s0 + $0x5b4] ss:$36 sps:$4 sm:$0xff]  }
  0xb3   :  { %3048 = vmatprep.mubr.bf16.mxu0 %v5655_v58  ;;  %3274 = vmatpush1.bf16.msra.mxu0 %v5770_v9 }
  0xb4   :  { %3275 = vmatprep.subr.bf16.mxu0 %v5999_v0 }
  0xb7   :  { %3276 = vmatpush1.bf16.msra.mxu0 %v5783_v15  ;;  %v5755_v15 = vld [vmem:[%s7705_s0 + $0x640] ss:$36 sps:$4 sm:$0xff]  }
  0xb8   :  { %3277 = vmatprep.subr.bf16.mxu0 %v5999_v0 }
  0xb9   :  { %2535 = vmatmul.mubr.bf16.gmra.mrb[60].mxu1 %v5657_v59  ;;  %v5741_v59 = vld [vmem:[%s7705_s0 + $0x7e0] ss:$36 sps:$4 sm:$0xff]  }
  0xba   :  { %3049 = vmatmul.mubr.bf16.gmra.mrb[28].mxu0 %v5658_v60  ;;  %2542 = vmatprep.mubr.bf16.mxu1 %v5659_v61  ;;  %v5742_v61 = vld [vmem:[%s7705_s0 + $0x5b0] ss:$36 sps:$4 sm:$0xff]  }
  0xbb   :  { %3056 = vmatprep.mubr.bf16.mxu0 %v5661_v63  ;;  %3278 = vmatpush1.bf16.msra.mxu0 %v5797_v24  ;;  %v5765_v24 = vld [vmem:[%s7705_s0 + $0x24c] ss:$36 sps:$4 sm:$0xff]  }
  0xbc   :  { %3279 = vmatprep.subr.bf16.mxu0 %v5999_v0  ;;  %v5702_v0 = vld [vmem:[%s7705_s0 + $0x630] ss:$36 sps:$4 sm:$0xff]  }
  0xbf   :  { %3280 = vmatpush1.bf16.msra.mxu0 %v5811_v32  ;;  %v5771_v32 = vld [vmem:[%s7705_s0 + $0x294] ss:$36 sps:$4 sm:$0xff]  }
  0xc1   :  { %2543 = vmatmul.mubr.bf16.gmra.mrb[64].mxu1 %v5663_v1  ;;  %v5746_v1 = vld [vmem:[%s7705_s0 + $0x5fc] ss:$36 sps:$4 sm:$0xff]  }
  0xc2   :  { %3057 = vmatmul.mubr.bf16.gmra.mrb[32].mxu0 %v5664_v2  ;;  %2550 = vmatprep.mubr.bf16.mxu1 %v5666_v3 }
  0xc3   :  { %3064 = vmatprep.mubr.bf16.mxu0 %v5668_v4  ;;  %v5748_v4 = vld [vmem:[%s7705_s0 + $0x828] ss:$36 sps:$4 sm:$0xff]  }
  0xc9   :  { %2551 = vmatmul.mubr.bf16.gmra.mrb[68].mxu1 %v5670_v6 }
  0xca   :  { %3065 = vmatmul.mubr.bf16.gmra.mrb[36].mxu0 %v5671_v7  ;;  %2558 = vmatprep.mubr.bf16.mxu1 %v5672_v8  ;;  %v5749_v7 = vld [vmem:[%s7705_s0 + $0x5f8] ss:$36 sps:$4 sm:$0xff]  }
  0xcb   :  { %3072 = vmatprep.mubr.bf16.mxu0 %v5674_v10  ;;  %v5750_v8 = vld [vmem:[%s7705_s0 + $0x874] ss:$36 sps:$4 sm:$0xff]   ;;  %v5752_v10 = vld [vmem:[%s7705_s0 + $0x644] ss:$36 sps:$4 sm:$0xff]  }
  0xd1   :  { %2559 = vmatmul.mubr.bf16.gmra.mrb[72].mxu1 %v5676_v11 }
  0xd2   :  { %3073 = vmatmul.mubr.bf16.gmra.mrb[40].mxu0 %v5677_v12  ;;  %2566 = vmatprep.mubr.bf16.mxu1 %v5679_v13  ;;  %v5754_v13 = vld [vmem:[%s7705_s0 + $0x870] ss:$36 sps:$4 sm:$0xff]  }
  0xd3   :  { %3080 = vmatprep.mubr.bf16.mxu0 %v5681_v14 }
  0xd9   :  { %2567 = vmatmul.mubr.bf16.gmra.mrb[76].mxu1 %v5683_v16  ;;  %v5757_v16 = vld [vmem:[%s7705_s0 + $0x8bc] ss:$36 sps:$4 sm:$0xff]  }
  0xda   :  { %3081 = vmatmul.mubr.bf16.gmra.mrb[44].mxu0 %v5684_v17  ;;  %2574 = vmatprep.mubr.bf16.mxu1 %v5685_v18  ;;  %v5759_v18 = vld [vmem:[%s7705_s0 + $0x68c] ss:$36 sps:$4 sm:$0xff]  }
  0xdb   :  { %3088 = vmatprep.mubr.bf16.mxu0 %v5687_v19 }
  0xe1   :  { %2575 = vmatmul.mubr.bf16.gmra.mrb[80].mxu1 %v5689_v20 }
  0xe2   :  { %3089 = vmatmul.mubr.bf16.gmra.mrb[48].mxu0 %v5690_v21  ;;  %2582 = vmatprep.mubr.bf16.mxu1 %v5692_v22  ;;  %v5761_v21 = vld [vmem:[%s7705_s0 + $0x8b8] ss:$36 sps:$4 sm:$0xff]  }
  0xe3   :  { %3096 = vmatprep.mubr.bf16.mxu0 %v5694_v23  ;;  %v5762_v23 = vld [vmem:[%s7705_s0 + $0x688] ss:$36 sps:$4 sm:$0xff]  }
  0xe9   :  { %2583 = vmatmul.mubr.bf16.gmra.mrb[84].mxu1 %v5696_v25 }
  0xea   :  { %3097 = vmatmul.mubr.bf16.gmra.mrb[52].mxu0 %v5697_v26  ;;  %2590 = vmatprep.mubr.bf16.mxu1 %v5698_v27  ;;  %v5766_v26 = vld [vmem:[%s7705_s0 + $0x6d4] ss:$36 sps:$4 sm:$0xff]  }
  0xeb   :  { %3104 = vmatprep.mubr.bf16.mxu0 %v5700_v28 }
  0xf1   :  { %2591 = vmatmul.mubr.bf16.gmra.mrb[88].mxu1 %v5702_v0  ;;  %v5763_v0 = vld [vmem:[%s7705_s0 + $0x248] ss:$36 sps:$4 sm:$0xff]  }
  0xf2   :  { %3105 = vmatmul.mubr.bf16.gmra.mrb[56].mxu0 %v5703_v29  ;;  %2598 = vmatprep.mubr.bf16.mxu1 %v5705_v30  ;;  %v5768_v30 = vld [vmem:[%s7705_s0 + $0x6d0] ss:$36 sps:$4 sm:$0xff]  }
  0xf3   :  { %3112 = vmatprep.mubr.bf16.mxu0 %v5707_v31 }
  0xf9   :  { %2599 = vmatmul.mubr.bf16.gmra.mrb[92].mxu1 %v5709_v33  ;;  %v5773_v33 = vld [vmem:[%s7705_s0 + $0x71c] ss:$36 sps:$4 sm:$0xff]  }
  0xfa   :  { %3113 = vmatmul.mubr.bf16.gmra.mrb[60].mxu0 %v5710_v34  ;;  %2606 = vmatprep.mubr.bf16.mxu1 %v5711_v35  ;;  %v5790_v34 = vld [vmem:[%s7704_s1 + $0x208] sm:$0xff]   ;;  %v5810_v35 = vld [vmem:[%s7704_s1 + $0x210] sm:$0xff]  }
  0xfb   :  { %3120 = vmatprep.mubr.bf16.mxu0 %v5713_v36 }
 0x101   :  { %2607 = vmatmul.mubr.bf16.gmra.mrb[96].mxu1 %v5715_v37 }
 0x102   :  { %3121 = vmatmul.mubr.bf16.gmra.mrb[64].mxu0 %v5716_v38  ;;  %2614 = vmatprep.mubr.bf16.mxu1 %v5718_v39  ;;  %v5775_v38 = vld [vmem:[%s7705_s0 + $0x290] ss:$36 sps:$4 sm:$0xff]  }
 0x103   :  { %3128 = vmatprep.mubr.bf16.mxu0 %v5720_v40  ;;  %v5777_v40 = vld [vmem:[%s7705_s0 + $0x2dc] ss:$36 sps:$4 sm:$0xff]  }
 0x109   :  { %2615 = vmatmul.mubr.bf16.gmra.mrb[100].mxu1 %v5722_v41 }
 0x10a   :  { %3129 = vmatmul.mubr.bf16.gmra.mrb[68].mxu0 %v5723_v42  ;;  %2622 = vmatprep.mubr.bf16.mxu1 %v5724_v43  ;;  %v5779_v42 = vld [vmem:[%s7705_s0 + $0x764] ss:$36 sps:$4 sm:$0xff]   ;;  %v5830_v43 = vld [vmem:[%s7704_s1 + $0x218] sm:$0xff]  }
 0x10b   :  { %3136 = vmatprep.mubr.bf16.mxu0 %v5726_v44 }
 0x111   :  { %2623 = vmatmul.mubr.bf16.gmra.mrb[104].mxu1 %v5728_v45  ;;  %v5849_v45 = vld [vmem:[%s7704_s1 + $0x220] sm:$0xff]  }
 0x112   :  { %3137 = vmatmul.mubr.bf16.gmra.mrb[72].mxu0 %v5729_v46  ;;  %2630 = vmatprep.mubr.bf16.mxu1 %v5731_v47  ;;  %v5781_v47 = vld [vmem:[%s7705_s0 + $0x2d8] ss:$36 sps:$4 sm:$0xff]  }
 0x113   :  { %3144 = vmatprep.mubr.bf16.mxu0 %v5733_v48 }
 0x114   :  { %v6692_v49 = vpop.f32.mrb[0].mxu1 }
 0x115   :  { %v2418_v50 = vpop.f32.mrb[1].mxu1 }
 0x116   :  { %v6697_v52 = vpop.f32.mrb[2].mxu1  ;;  %v5782_v50 = vld [vmem:[%s7705_s0 + $0x760] ss:$36 sps:$4 sm:$0xff]  }
 0x117   :  { %v2421_v55 = vpop.f32.mrb[3].mxu1 }
 0x118   :  { %v5868_v55 = vld [vmem:[%s7704_s1 + $0x228] sm:$0xff]  }
 0x119   :  { %2631 = vmatmul.mubr.bf16.gmra.mrb[108].mxu1 %v5735_v51  ;;  %v5784_v51 = vld [vmem:[%s7705_s0 + $0x324] ss:$36 sps:$4 sm:$0xff]  }
 0x11a   :  { %3145 = vmatmul.mubr.bf16.gmra.mrb[76].mxu0 %v5736_v53  ;;  %2638 = vmatprep.mubr.bf16.mxu1 %v5737_v54  ;;  %v5786_v54 = vld [vmem:[%s7705_s0 + $0x7ac] ss:$36 sps:$4 sm:$0xff]  }
 0x11b   :  { %3152 = vmatprep.mubr.bf16.mxu0 %v5739_v56  ;;  %v5887_v56 = vld [vmem:[%s7704_s1 + $0x230] sm:$0xff]  }
 0x11c   :  { %v6708_v57 = vpop.f32.mrb[4].mxu1 }
 0x11d   :  { %v2426_v58 = vpop.f32.mrb[5].mxu1 }
 0x11e   :  { %v6713_v60 = vpop.f32.mrb[6].mxu1  ;;  %v5788_v58 = vld [vmem:[%s7705_s0 + $0x320] ss:$36 sps:$4 sm:$0xff]  }
 0x11f   :  { %v2429_v63 = vpop.f32.mrb[7].mxu1 }
 0x120   :  { %v5795_v63 = vld [vmem:[%s7705_s0 + $0x368] ss:$36 sps:$4 sm:$0xff]  }
 0x121   :  { %2639 = vmatmul.mubr.bf16.gmra.mrb[112].mxu1 %v5741_v59  ;;  %v5789_v59 = vld [vmem:[%s7705_s0 + $0x7a8] ss:$36 sps:$4 sm:$0xff]  }
 0x122   :  { %3153 = vmatmul.mubr.bf16.gmra.mrb[80].mxu0 %v5742_v61  ;;  %2646 = vmatprep.mubr.bf16.mxu1 %v5744_v62  ;;  %v5791_v61 = vld [vmem:[%s7705_s0 + $0x36c] ss:$36 sps:$4 sm:$0xff]   ;;  %v5793_v62 = vld [vmem:[%s7705_s0 + $0x7f4] ss:$36 sps:$4 sm:$0xff]  }
 0x123   :  { %3160 = vmatprep.mubr.bf16.mxu0 %v5746_v1  ;;  %v5796_v1 = vld [vmem:[%s7705_s0 + $0x7f0] ss:$36 sps:$4 sm:$0xff]  }
 0x124   :  { %v6724_v2 = vpop.f32.mrb[8].mxu1 }
 0x125   :  { %v2434_v3 = vpop.f32.mrb[9].mxu1 }
 0x126   :  { %v6729_v6 = vpop.f32.mrb[10].mxu1  ;;  %v5798_v3 = vld [vmem:[%s7705_s0 + $0x3b4] ss:$36 sps:$4 sm:$0xff]  }
 0x127   :  { %v2437_v9 = vpop.f32.mrb[11].mxu1 }
 0x128   :  { %v5804_v9 = vld [vmem:[%s7705_s0 + $0x3fc] ss:$36 sps:$4 sm:$0xff]  }
 0x129   :  { %2647 = vmatmul.mubr.bf16.gmra.mrb[116].mxu1 %v5748_v4  ;;  %v5800_v4 = vld [vmem:[%s7705_s0 + $0x83c] ss:$36 sps:$4 sm:$0xff]  }
 0x12a   :  { %3161 = vmatmul.mubr.bf16.gmra.mrb[84].mxu0 %v5749_v7  ;;  %2654 = vmatprep.mubr.bf16.mxu1 %v5750_v8  ;;  %v5802_v7 = vld [vmem:[%s7705_s0 + $0x3b0] ss:$36 sps:$4 sm:$0xff]   ;;  %v5803_v8 = vld [vmem:[%s7705_s0 + $0x838] ss:$36 sps:$4 sm:$0xff]  }
 0x12b   :  { %3168 = vmatprep.mubr.bf16.mxu0 %v5752_v10  ;;  %v5806_v10 = vld [vmem:[%s7705_s0 + $0x884] ss:$36 sps:$4 sm:$0xff]  }
 0x12c   :  { %v6740_v11 = vpop.f32.mrb[12].mxu1 }
 0x12d   :  { %v2442_v12 = vpop.f32.mrb[13].mxu1 }
 0x12e   :  { %v6745_v14 = vpop.f32.mrb[14].mxu1  ;;  %v5906_v12 = vld [vmem:[%s7704_s1 + $0x238] sm:$0xff]  }
 0x12f   :  { %v2445_v17 = vpop.f32.mrb[15].mxu1 }
 0x130   :  { %v5814_v17 = vld [vmem:[%s7705_s0 + $0x8cc] ss:$36 sps:$4 sm:$0xff]  }
 0x131   :  { %2655 = vmatmul.mubr.bf16.gmra.mrb[120].mxu1 %v5754_v13  ;;  %v5808_v13 = vld [vmem:[%s7705_s0 + $0x3f8] ss:$36 sps:$4 sm:$0xff]  }
 0x132   :  { %3169 = vmatmul.mubr.bf16.gmra.mrb[88].mxu0 %v5755_v15  ;;  %2662 = vmatprep.mubr.bf16.mxu1 %v5757_v16  ;;  %v5809_v15 = vld [vmem:[%s7705_s0 + $0x880] ss:$36 sps:$4 sm:$0xff]  }
 0x133   :  { %3176 = vmatprep.mubr.bf16.mxu0 %v5759_v18  ;;  %v5812_v16 = vld [vmem:[%s7705_s0 + $0x444] ss:$36 sps:$4 sm:$0xff]  }
 0x134   :  { %v6756_v19 = vpop.f32.mrb[16].mxu1  ;;  %v5816_v18 = vld [vmem:[%s7705_s0 + $0x440] ss:$36 sps:$4 sm:$0xff]  }
 0x135   :  { %v2450_v20 = vpop.f32.mrb[17].mxu1 }
 0x136   :  { %v6761_v22 = vpop.f32.mrb[18].mxu1  ;;  %v5817_v20 = vld [vmem:[%s7705_s0 + $0x8c8] ss:$36 sps:$4 sm:$0xff]  }
 0x137   :  { %v2453_v25 = vpop.f32.mrb[19].mxu1 }
 0x138   :  { %v5820_v25 = vld [vmem:[%s7705_s0 + $0x18] ss:$36 sps:$4 sm:$0xff]  }
 0x139   :  { %2663 = vmatmul.mubr.bf16.gmra.mrb[124].mxu1 %v5761_v21  ;;  %v5818_v21 = vld [vmem:[%s7705_s0 + $0x48c] ss:$36 sps:$4 sm:$0xff]  }
 0x13a   :  { %3177 = vmatmul.mubr.bf16.gmra.mrb[92].mxu0 %v5762_v23  ;;  %2767 = vmatprep.mubr.bf16.mxu1 %v5765_v24  ;;  %v5822_v23 = vld [vmem:[%s7705_s0 + $0x1c] ss:$36 sps:$4 sm:$0xff]   ;;  %v5823_v24 = vld [vmem:[%s7705_s0 + $0x488] ss:$36 sps:$4 sm:$0xff]  }
 0x13b   :  { %3184 = vmatprep.mubr.bf16.mxu0 %v5766_v26  ;;  %v5824_v26 = vld [vmem:[%s7705_s0 + $0x4d4] ss:$36 sps:$4 sm:$0xff]  }
 0x13c   :  { %v6772_v27 = vpop.f32.mrb[20].mxu1 }
 0x13d   :  { %v2458_v28 = vpop.f32.mrb[21].mxu1 }
 0x13e   :  { %v6777_v29 = vpop.f32.mrb[22].mxu1  ;;  %v5826_v28 = vld [vmem:[%s7705_s0 + $0x64] ss:$36 sps:$4 sm:$0xff]  }
 0x13f   :  { %v2461_v31 = vpop.f32.mrb[23].mxu1 }
 0x140   :  { %v5831_v31 = vld [vmem:[%s7705_s0 + $0x51c] ss:$36 sps:$4 sm:$0xff]  }
 0x141   :  { %2768 = vmatmul.mubr.bf16.vlgmr.msra.gmra.mrb[32].mxu1 %v5763_v0  ;;  %v5828_v0 = vld [vmem:[%s7705_s0 + $0x4d0] ss:$36 sps:$4 sm:$0xff]  }
 0x142   :  { %3185 = vmatmul.mubr.bf16.gmra.mrb[96].mxu0 %v5768_v30  ;;  %5079 = vmatpush3.bf16.msra.mxu1 %v6554_v5  ;;  %v5776_v5 = vld [vmem:[%s7705_s0 + $0x718] ss:$36 sps:$4 sm:$0xff]   ;;  %v5829_v30 = vld [vmem:[%s7705_s0 + $0x60] ss:$36 sps:$4 sm:$0xff]  }
 0x143   :  { %2775 = vmatprep.mubr.bf16.mxu1 %v5771_v32  ;;  %3192 = vmatprep.mubr.bf16.mxu0 %v5773_v33  ;;  %v5833_v32 = vld [vmem:[%s7705_s0 + $0xac] ss:$36 sps:$4 sm:$0xff]   ;;  %v5835_v33 = vld [vmem:[%s7705_s0 + $0x518] ss:$36 sps:$4 sm:$0xff]  }
 0x144   :  { %v6795_v36 = vpop.f32.mrb[24].mxu1  ;;  %5080 = vmatprep.subr.bf16.mxu1 %v5790_v34 }
 0x145   :  { %v2466_v37 = vpop.f32.mrb[25].mxu1 }
 0x146   :  { %v6800_v39 = vpop.f32.mrb[26].mxu1  ;;  %5081 = vmatpush3.bf16.msra.mxu1 %v5790_v34  ;;  %v5836_v34 = vld [vmem:[%s7705_s0 + $0xa8] ss:$36 sps:$4 sm:$0xff]   ;;  %v5839_v37 = vld [vmem:[%s7705_s0 + $0xf4] ss:$36 sps:$4 sm:$0xff]  }
 0x147   :  { %v2469_v41 = vpop.f32.mrb[27].mxu1  ;;  %5082 = vmatprep.subr.bf16.mxu1 %v5810_v35 }
 0x148   :  { %v5845_v41 = vld [vmem:[%s7705_s0 + $0x13c] ss:$36 sps:$4 sm:$0xff]  }
 0x149   :  { %2776 = vmatmul.mubr.bf16.gmra.mrb[36].mxu1 %v5775_v38  ;;  %v5841_v38 = vld [vmem:[%s7705_s0 + $0x560] ss:$36 sps:$4 sm:$0xff]  }
 0x14a   :  { %3193 = vmatmul.mubr.bf16.gmra.mrb[100].mxu0 %v5776_v5  ;;  %2783 = vmatprep.mubr.bf16.mxu1 %v5777_v40  ;;  %v5842_v5 = vld [vmem:[%s7705_s0 + $0xf0] ss:$36 sps:$4 sm:$0xff]  }
 0x14b   :  { %3200 = vmatprep.mubr.bf16.mxu0 %v5779_v42  ;;  %5083 = vmatpush3.bf16.msra.mxu1 %v5810_v35  ;;  %v5837_v35 = vld [vmem:[%s7705_s0 + $0x564] ss:$36 sps:$4 sm:$0xff]   ;;  %v5843_v40 = vld [vmem:[%s7705_s0 + $0x5ac] ss:$36 sps:$4 sm:$0xff]  }
 0x14c   :  { %v6814_v44 = vpop.f32.mrb[28].mxu1  ;;  %5084 = vmatprep.subr.bf16.mxu1 %v5830_v43  ;;  %v5847_v42 = vld [vmem:[%s7705_s0 + $0x5a8] ss:$36 sps:$4 sm:$0xff]  }
 0x14d   :  { %v2474_v46 = vpop.f32.mrb[29].mxu1 }
 0x14e   :  { %v6822_v48 = vpop.f32.mrb[30].mxu1  ;;  %v5852_v46 = vld [vmem:[%s7705_s0 + $0x184] ss:$36 sps:$4 sm:$0xff]  }
 0x14f   :  { %v2477_v53 = vpop.f32.mrb[31].mxu1  ;;  %5085 = vmatpush3.bf16.msra.mxu1 %v5830_v43  ;;  %v5848_v43 = vld [vmem:[%s7705_s0 + $0x138] ss:$36 sps:$4 sm:$0xff]  }
 0x150   :  { %5086 = vmatprep.subr.bf16.mxu1 %v5849_v45  ;;  %v5858_v53 = vld [vmem:[%s7705_s0 + $0x1cc] ss:$36 sps:$4 sm:$0xff]  }
 0x151   :  { %2784 = vmatmul.mubr.bf16.gmra.mrb[40].mxu1 %v5781_v47  ;;  %v5854_v47 = vld [vmem:[%s7705_s0 + $0x5f0] ss:$36 sps:$4 sm:$0xff]  }
 0x152   :  { %3201 = vmatmul.mubr.bf16.gmra.mrb[104].mxu0 %v5782_v50  ;;  %2791 = vmatprep.mubr.bf16.mxu1 %v5784_v51  ;;  %v5855_v50 = vld [vmem:[%s7705_s0 + $0x180] ss:$36 sps:$4 sm:$0xff]  }
 0x153   :  { %3208 = vmatprep.mubr.bf16.mxu0 %v5786_v54  ;;  %5087 = vmatpush3.bf16.msra.mxu1 %v5849_v45  ;;  %v5850_v45 = vld [vmem:[%s7705_s0 + $0x5f4] ss:$36 sps:$4 sm:$0xff]   ;;  %v5856_v51 = vld [vmem:[%s7705_s0 + $0x63c] ss:$36 sps:$4 sm:$0xff]  }
 0x154   :  { %5088 = vmatprep.subr.bf16.mxu1 %v5868_v55  ;;  %v5860_v54 = vld [vmem:[%s7705_s0 + $0x638] ss:$36 sps:$4 sm:$0xff]  }
 0x157   :  { %5089 = vmatpush3.bf16.msra.mxu1 %v5868_v55  ;;  %v5861_v55 = vld [vmem:[%s7705_s0 + $0x1c8] ss:$36 sps:$4 sm:$0xff]  }
 0x158   :  { %5090 = vmatprep.subr.bf16.mxu1 %v5887_v56 }
 0x159   :  { %2792 = vmatmul.mubr.bf16.gmra.mrb[44].mxu1 %v5788_v58  ;;  %v5864_v58 = vld [vmem:[%s7705_s0 + $0x214] ss:$36 sps:$4 sm:$0xff]  }
 0x15a   :  { %3209 = vmatmul.mubr.bf16.gmra.mrb[108].mxu0 %v5789_v59  ;;  %2799 = vmatprep.mubr.bf16.mxu1 %v5791_v61  ;;  %v5866_v59 = vld [vmem:[%s7705_s0 + $0x680] ss:$36 sps:$4 sm:$0xff]   ;;  %v5867_v61 = vld [vmem:[%s7705_s0 + $0x210] ss:$36 sps:$4 sm:$0xff]  }
 0x15b   :  { %3216 = vmatprep.mubr.bf16.mxu0 %v5793_v62  ;;  %5091 = vmatpush3.bf16.msra.mxu1 %v5887_v56  ;;  %v5862_v56 = vld [vmem:[%s7705_s0 + $0x684] ss:$36 sps:$4 sm:$0xff]   ;;  %v5869_v62 = vld [vmem:[%s7705_s0 + $0x6cc] ss:$36 sps:$4 sm:$0xff]  }
 0x15c   :  { %5092 = vmatprep.subr.bf16.mxu1 %v5906_v12 }
 0x15f   :  { %5093 = vmatpush3.bf16.msra.mxu1 %v5906_v12  ;;  %v5883_v12 = vld [vmem:[%s7705_s0 + $0x2ec] ss:$36 sps:$4 sm:$0xff]  }
 0x161   :  { %2800 = vmatmul.mubr.bf16.gmra.mrb[48].mxu1 %v5795_v63  ;;  %v5871_v63 = vld [vmem:[%s7705_s0 + $0x25c] ss:$36 sps:$4 sm:$0xff]  }
 0x162   :  { %3217 = vmatmul.mubr.bf16.gmra.mrb[112].mxu0 %v5796_v1  ;;  %2807 = vmatprep.mubr.bf16.mxu1 %v5798_v3  ;;  %v5873_v1 = vld [vmem:[%s7705_s0 + $0x6c8] ss:$36 sps:$4 sm:$0xff]   ;;  %v5874_v3 = vld [vmem:[%s7705_s0 + $0x258] ss:$36 sps:$4 sm:$0xff]  }
 0x163   :  { %3224 = vmatprep.mubr.bf16.mxu0 %v5800_v4  ;;  %v5875_v4 = vld [vmem:[%s7705_s0 + $0x714] ss:$36 sps:$4 sm:$0xff]  }
 0x169   :  { %2808 = vmatmul.mubr.bf16.gmra.mrb[52].mxu1 %v5802_v7  ;;  %v5877_v7 = vld [vmem:[%s7705_s0 + $0x2a4] ss:$36 sps:$4 sm:$0xff]  }
 0x16a   :  { %3225 = vmatmul.mubr.bf16.gmra.mrb[116].mxu0 %v5803_v8  ;;  %2815 = vmatprep.mubr.bf16.mxu1 %v5804_v9  ;;  %v5879_v8 = vld [vmem:[%s7705_s0 + $0x710] ss:$36 sps:$4 sm:$0xff]   ;;  %v5880_v9 = vld [vmem:[%s7705_s0 + $0x2a0] ss:$36 sps:$4 sm:$0xff]  }
 0x16b   :  { %3232 = vmatprep.mubr.bf16.mxu0 %v5806_v10  ;;  %v5881_v10 = vld [vmem:[%s7705_s0 + $0x75c] ss:$36 sps:$4 sm:$0xff]  }
 0x171   :  { %2816 = vmatmul.mubr.bf16.gmra.mrb[56].mxu1 %v5808_v13  ;;  %v5885_v13 = vld [vmem:[%s7705_s0 + $0x758] ss:$36 sps:$4 sm:$0xff]  }
 0x172   :  { %3233 = vmatmul.mubr.bf16.gmra.mrb[120].mxu0 %v5809_v15  ;;  %2823 = vmatprep.mubr.bf16.mxu1 %v5812_v16  ;;  %v5886_v15 = vld [vmem:[%s7705_s0 + $0x2e8] ss:$36 sps:$4 sm:$0xff]  }
 0x173   :  { %3240 = vmatprep.mubr.bf16.mxu0 %v5814_v17  ;;  %v5888_v16 = vld [vmem:[%s7705_s0 + $0x7a4] ss:$36 sps:$4 sm:$0xff]   ;;  %v5890_v17 = vld [vmem:[%s7705_s0 + $0x334] ss:$36 sps:$4 sm:$0xff]  }
 0x179   :  { %2824 = vmatmul.mubr.bf16.gmra.mrb[60].mxu1 %v5816_v18  ;;  %v5892_v18 = vld [vmem:[%s7705_s0 + $0x7a0] ss:$36 sps:$4 sm:$0xff]  }
 0x17a   :  { %3241 = vmatmul.mubr.bf16.gmra.mrb[124].mxu0 %v5817_v20  ;;  %2831 = vmatprep.mubr.bf16.mxu1 %v5818_v21  ;;  %v5893_v20 = vld [vmem:[%s7705_s0 + $0x330] ss:$36 sps:$4 sm:$0xff]  }
 0x17b   :  { %3281 = vmatprep.mubr.bf16.mxu0 %v5822_v23  ;;  %v5894_v21 = vld [vmem:[%s7705_s0 + $0x7ec] ss:$36 sps:$4 sm:$0xff]   ;;  %v5896_v23 = vld [vmem:[%s7705_s0 + $0x37c] ss:$36 sps:$4 sm:$0xff]  }
 0x181   :  { %2832 = vmatmul.mubr.bf16.gmra.mrb[64].mxu1 %v5823_v24  ;;  %v5898_v24 = vld [vmem:[%s7705_s0 + $0x7e8] ss:$36 sps:$4 sm:$0xff]  }
 0x182   :  { %3282 = vmatmul.mubr.bf16.vlgmr.msra.gmra.mrb[0].mxu0 %v5820_v25  ;;  %2839 = vmatprep.mubr.bf16.mxu1 %v5824_v26  ;;  %v5899_v25 = vld [vmem:[%s7705_s0 + $0x378] ss:$36 sps:$4 sm:$0xff]  }
 0x183   :  { %3289 = vmatprep.mubr.bf16.mxu0 %v5826_v28  ;;  %v5900_v26 = vld [vmem:[%s7705_s0 + $0x834] ss:$36 sps:$4 sm:$0xff]   ;;  %v5902_v28 = vld [vmem:[%s7705_s0 + $0x3c4] ss:$36 sps:$4 sm:$0xff]  }
 0x189   :  { %2840 = vmatmul.mubr.bf16.gmra.mrb[68].mxu1 %v5828_v0  ;;  %v5904_v0 = vld [vmem:[%s7705_s0 + $0x830] ss:$36 sps:$4 sm:$0xff]  }
 0x18a   :  { %3290 = vmatmul.mubr.bf16.gmra.mrb[4].mxu0 %v5829_v30  ;;  %2847 = vmatprep.mubr.bf16.mxu1 %v5831_v31  ;;  %v5905_v30 = vld [vmem:[%s7705_s0 + $0x3c0] ss:$36 sps:$4 sm:$0xff]  }
 0x18b   :  { %3297 = vmatprep.mubr.bf16.mxu0 %v5833_v32  ;;  %v5907_v31 = vld [vmem:[%s7705_s0 + $0x87c] ss:$36 sps:$4 sm:$0xff]   ;;  %v5909_v32 = vld [vmem:[%s7705_s0 + $0x40c] ss:$36 sps:$4 sm:$0xff]  }
 0x191   :  { %2848 = vmatmul.mubr.bf16.gmra.mrb[72].mxu1 %v5835_v33  ;;  %v5911_v33 = vld [vmem:[%s7705_s0 + $0x878] ss:$36 sps:$4 sm:$0xff]  }
 0x192   :  { %3298 = vmatmul.mubr.bf16.gmra.mrb[8].mxu0 %v5836_v34  ;;  %2855 = vmatprep.mubr.bf16.mxu1 %v5837_v35  ;;  %v5912_v34 = vld [vmem:[%s7705_s0 + $0x408] ss:$36 sps:$4 sm:$0xff]  }
 0x193   :  { %3305 = vmatprep.mubr.bf16.mxu0 %v5839_v37  ;;  %v5913_v35 = vld [vmem:[%s7705_s0 + $0x8c4] ss:$36 sps:$4 sm:$0xff]   ;;  %v5915_v37 = vld [vmem:[%s7705_s0 + $0x454] ss:$36 sps:$4 sm:$0xff]  }
 0x199   :  { %2856 = vmatmul.mubr.bf16.gmra.mrb[76].mxu1 %v5841_v38  ;;  %v5917_v38 = vld [vmem:[%s7705_s0 + $0x8c0] ss:$36 sps:$4 sm:$0xff]  }
 0x19a   :  { %3306 = vmatmul.mubr.bf16.gmra.mrb[12].mxu0 %v5842_v5  ;;  %2863 = vmatprep.mubr.bf16.mxu1 %v5843_v40  ;;  %v5918_v5 = vld [vmem:[%s7705_s0 + $0x450] ss:$36 sps:$4 sm:$0xff]   ;;  %v5921_v40 = vld [vmem:[%s7705_s0 + $0x20] ss:$36 sps:$4 sm:$0xff]  }
 0x19b   :  { %3313 = vmatprep.mubr.bf16.mxu0 %v5845_v41  ;;  %v5919_v41 = vld [vmem:[%s7705_s0 + $0x49c] ss:$36 sps:$4 sm:$0xff]  }
 0x1a1   :  { %2864 = vmatmul.mubr.bf16.gmra.mrb[80].mxu1 %v5847_v42  ;;  %v5923_v42 = vld [vmem:[%s7705_s0 + $0x68] ss:$36 sps:$4 sm:$0xff]  }
 0x1a2   :  { %3314 = vmatmul.mubr.bf16.gmra.mrb[16].mxu0 %v5848_v43  ;;  %2871 = vmatprep.mubr.bf16.mxu1 %v5850_v45  ;;  %v5922_v43 = vld [vmem:[%s7705_s0 + $0x498] ss:$36 sps:$4 sm:$0xff]   ;;  %v5926_v45 = vld [vmem:[%s7705_s0 + $0xb0] ss:$36 sps:$4 sm:$0xff]  }
 0x1a3   :  { %3321 = vmatprep.mubr.bf16.mxu0 %v5852_v46  ;;  %v5924_v46 = vld [vmem:[%s7705_s0 + $0x4e4] ss:$36 sps:$4 sm:$0xff]  }
 0x1a9   :  { %2872 = vmatmul.mubr.bf16.gmra.mrb[84].mxu1 %v5854_v47  ;;  %v5928_v47 = vld [vmem:[%s7705_s0 + $0xf8] ss:$36 sps:$4 sm:$0xff]  }
 0x1aa   :  { %3322 = vmatmul.mubr.bf16.gmra.mrb[20].mxu0 %v5855_v50  ;;  %2879 = vmatprep.mubr.bf16.mxu1 %v5856_v51  ;;  %v5927_v50 = vld [vmem:[%s7705_s0 + $0x4e0] ss:$36 sps:$4 sm:$0xff]  }
 0x1ab   :  { %3329 = vmatprep.mubr.bf16.mxu0 %v5858_v53  ;;  %v5931_v51 = vld [vmem:[%s7705_s0 + $0x140] ss:$36 sps:$4 sm:$0xff]   ;;  %v5929_v53 = vld [vmem:[%s7705_s0 + $0x52c] ss:$36 sps:$4 sm:$0xff]  }
 0x1b1   :  { %2880 = vmatmul.mubr.bf16.gmra.mrb[88].mxu1 %v5860_v54  ;;  %v5933_v54 = vld [vmem:[%s7705_s0 + $0x188] ss:$36 sps:$4 sm:$0xff]  }
 0x1b2   :  { %3330 = vmatmul.mubr.bf16.gmra.mrb[24].mxu0 %v5861_v55  ;;  %2887 = vmatprep.mubr.bf16.mxu1 %v5862_v56  ;;  %v5932_v55 = vld [vmem:[%s7705_s0 + $0x528] ss:$36 sps:$4 sm:$0xff]   ;;  %v5936_v56 = vld [vmem:[%s7705_s0 + $0x1d0] ss:$36 sps:$4 sm:$0xff]  }
 0x1b3   :  { %3337 = vmatprep.mubr.bf16.mxu0 %v5864_v58  ;;  %v5934_v58 = vld [vmem:[%s7705_s0 + $0x574] ss:$36 sps:$4 sm:$0xff]  }
 0x1b9   :  { %2888 = vmatmul.mubr.bf16.gmra.mrb[92].mxu1 %v5866_v59 }
 0x1ba   :  { %3338 = vmatmul.mubr.bf16.gmra.mrb[28].mxu0 %v5867_v61  ;;  %2895 = vmatprep.mubr.bf16.mxu1 %v5869_v62  ;;  %v5938_v62 = vld [vmem:[%s7705_s0 + $0x218] ss:$36 sps:$4 sm:$0xff]  }
 0x1bb   :  { %3345 = vmatprep.mubr.bf16.mxu0 %v5871_v63 }
 0x1c1   :  { %2896 = vmatmul.mubr.bf16.gmra.mrb[96].mxu1 %v5873_v1  ;;  %v5937_v1 = vld [vmem:[%s7705_s0 + $0x570] ss:$36 sps:$4 sm:$0xff]  }
 0x1c2   :  { %3346 = vmatmul.mubr.bf16.gmra.mrb[32].mxu0 %v5874_v3  ;;  %2903 = vmatprep.mubr.bf16.mxu1 %v5875_v4  ;;  %v5941_v3 = vld [vmem:[%s7705_s0 + $0x260] ss:$36 sps:$4 sm:$0xff]  }
 0x1c3   :  { %3353 = vmatprep.mubr.bf16.mxu0 %v5877_v7  ;;  %v5939_v7 = vld [vmem:[%s7705_s0 + $0x5bc] ss:$36 sps:$4 sm:$0xff]  }
 0x1c9   :  { %2904 = vmatmul.mubr.bf16.gmra.mrb[100].mxu1 %v5879_v8 }
 0x1ca   :  { %3354 = vmatmul.mubr.bf16.gmra.mrb[36].mxu0 %v5880_v9  ;;  %2911 = vmatprep.mubr.bf16.mxu1 %v5881_v10  ;;  %v5943_v10 = vld [vmem:[%s7705_s0 + $0x2a8] ss:$36 sps:$4 sm:$0xff]  }
 0x1cb   :  { %3361 = vmatprep.mubr.bf16.mxu0 %v5883_v12 }
 0x1d1   :  { %2912 = vmatmul.mubr.bf16.gmra.mrb[104].mxu1 %v5885_v13  ;;  %v5942_v13 = vld [vmem:[%s7705_s0 + $0x5b8] ss:$36 sps:$4 sm:$0xff]  }
 0x1d2   :  { %3362 = vmatmul.mubr.bf16.gmra.mrb[40].mxu0 %v5886_v15  ;;  %2919 = vmatprep.mubr.bf16.mxu1 %v5888_v16  ;;  %v5946_v15 = vld [vmem:[%s7705_s0 + $0x2f0] ss:$36 sps:$4 sm:$0xff]  }
 0x1d3   :  { %3369 = vmatprep.mubr.bf16.mxu0 %v5890_v17  ;;  %v5944_v17 = vld [vmem:[%s7705_s0 + $0x604] ss:$36 sps:$4 sm:$0xff]  }
 0x1d9   :  { %2920 = vmatmul.mubr.bf16.gmra.mrb[108].mxu1 %v5892_v18 }
 0x1da   :  { %3370 = vmatmul.mubr.bf16.gmra.mrb[44].mxu0 %v5893_v20  ;;  %2927 = vmatprep.mubr.bf16.mxu1 %v5894_v21  ;;  %v5948_v21 = vld [vmem:[%s7705_s0 + $0x338] ss:$36 sps:$4 sm:$0xff]  }
 0x1db   :  { %3377 = vmatprep.mubr.bf16.mxu0 %v5896_v23 }
 0x1e1   :  { %2928 = vmatmul.mubr.bf16.gmra.mrb[112].mxu1 %v5898_v24  ;;  %v5947_v24 = vld [vmem:[%s7705_s0 + $0x600] ss:$36 sps:$4 sm:$0xff]  }
 0x1e2   :  { %3378 = vmatmul.mubr.bf16.gmra.mrb[48].mxu0 %v5899_v25  ;;  %2935 = vmatprep.mubr.bf16.mxu1 %v5900_v26  ;;  %v5951_v25 = vld [vmem:[%s7705_s0 + $0x380] ss:$36 sps:$4 sm:$0xff]  }
 0x1e3   :  { %3385 = vmatprep.mubr.bf16.mxu0 %v5902_v28  ;;  %v5949_v28 = vld [vmem:[%s7705_s0 + $0x64c] ss:$36 sps:$4 sm:$0xff]  }
 0x1e9   :  { %2936 = vmatmul.mubr.bf16.gmra.mrb[116].mxu1 %v5904_v0 }
 0x1ea   :  { %3386 = vmatmul.mubr.bf16.gmra.mrb[52].mxu0 %v5905_v30  ;;  %2943 = vmatprep.mubr.bf16.mxu1 %v5907_v31  ;;  %v5953_v31 = vld [vmem:[%s7705_s0 + $0x3c8] ss:$36 sps:$4 sm:$0xff]  }
 0x1eb   :  { %3393 = vmatprep.mubr.bf16.mxu0 %v5909_v32 }
 0x1f1   :  { %2944 = vmatmul.mubr.bf16.gmra.mrb[120].mxu1 %v5911_v33  ;;  %v5952_v33 = vld [vmem:[%s7705_s0 + $0x648] ss:$36 sps:$4 sm:$0xff]  }
 0x1f2   :  { %3394 = vmatmul.mubr.bf16.gmra.mrb[56].mxu0 %v5912_v34  ;;  %2951 = vmatprep.mubr.bf16.mxu1 %v5913_v35  ;;  %v5956_v34 = vld [vmem:[%s7705_s0 + $0x410] ss:$36 sps:$4 sm:$0xff]  }
 0x1f3   :  { %3401 = vmatprep.mubr.bf16.mxu0 %v5915_v37  ;;  %v5954_v37 = vld [vmem:[%s7705_s0 + $0x694] ss:$36 sps:$4 sm:$0xff]  }
 0x1f9   :  { %2952 = vmatmul.mubr.bf16.gmra.mrb[124].mxu1 %v5917_v38 }
 0x1fa   :  { %3402 = vmatmul.mubr.bf16.gmra.mrb[60].mxu0 %v5918_v5  ;;  %5094 = vmatprep.mubr.bf16.mxu1 %v5921_v40  ;;  %v5958_v40 = vld [vmem:[%s7705_s0 + $0x458] ss:$36 sps:$4 sm:$0xff]  }
 0x1fb   :  { %3409 = vmatprep.mubr.bf16.mxu0 %v5919_v41 }
 0x201   :  { %5095 = vmatmul.mubr.bf16.vlgmr.msra.gmra.mrb[128].mxu1 %v5923_v42  ;;  %v5957_v42 = vld [vmem:[%s7705_s0 + $0x690] ss:$36 sps:$4 sm:$0xff]  }
 0x202   :  { %3410 = vmatmul.mubr.bf16.gmra.mrb[64].mxu0 %v5922_v43  ;;  %5098 = vmatprep.mubr.bf16.mxu1 %v5926_v45  ;;  %v5961_v43 = vld [vmem:[%s7705_s0 + $0x4a0] ss:$36 sps:$4 sm:$0xff]  }
 0x203   :  { %3417 = vmatprep.mubr.bf16.mxu0 %v5924_v46  ;;  %v5959_v46 = vld [vmem:[%s7705_s0 + $0x6dc] ss:$36 sps:$4 sm:$0xff]  }
 0x209   :  { %5099 = vmatmul.mubr.bf16.gmra.mrb[132].mxu1 %v5928_v47 }
 0x20a   :  { %3418 = vmatmul.mubr.bf16.gmra.mrb[68].mxu0 %v5927_v50  ;;  %5102 = vmatprep.mubr.bf16.mxu1 %v5931_v51  ;;  %v5963_v51 = vld [vmem:[%s7705_s0 + $0x4e8] ss:$36 sps:$4 sm:$0xff]  }
 0x20b   :  { %3425 = vmatprep.mubr.bf16.mxu0 %v5929_v53 }
 0x211   :  { %5103 = vmatmul.mubr.bf16.gmra.mrb[136].mxu1 %v5933_v54  ;;  %v5962_v54 = vld [vmem:[%s7705_s0 + $0x6d8] ss:$36 sps:$4 sm:$0xff]  }
 0x212   :  { %3426 = vmatmul.mubr.bf16.gmra.mrb[72].mxu0 %v5932_v55  ;;  %5106 = vmatprep.mubr.bf16.mxu1 %v5936_v56  ;;  %v5966_v55 = vld [vmem:[%s7705_s0 + $0x530] ss:$36 sps:$4 sm:$0xff]  }
 0x213   :  { %3433 = vmatprep.mubr.bf16.mxu0 %v5934_v58  ;;  %v5964_v58 = vld [vmem:[%s7705_s0 + $0x724] ss:$36 sps:$4 sm:$0xff]  }
 0x214   :  { %v7130_v59 = vpop.f32.mrb[32].mxu1 }
 0x215   :  { %v2771_v61 = vpop.f32.mrb[33].mxu1 }
 0x216   :  { %v7135_v63 = vpop.f32.mrb[34].mxu1 }
 0x217   :  { %v2774_v4 = vpop.f32.mrb[35].mxu1 }
 0x218   :  { %v5967_v4 = vld [vmem:[%s7705_s0 + $0x720] ss:$36 sps:$4 sm:$0xff]  }
 0x219   :  { %5107 = vmatmul.mubr.bf16.gmra.mrb[140].mxu1 %v5938_v62 }
 0x21a   :  { %3434 = vmatmul.mubr.bf16.gmra.mrb[76].mxu0 %v5937_v1  ;;  %5110 = vmatprep.mubr.bf16.mxu1 %v5941_v3  ;;  %v5968_v1 = vld [vmem:[%s7705_s0 + $0x578] ss:$36 sps:$4 sm:$0xff]  }
 0x21b   :  { %3441 = vmatprep.mubr.bf16.mxu0 %v5939_v7  ;;  %v5971_v7 = vld [vmem:[%s7705_s0 + $0x5c0] ss:$36 sps:$4 sm:$0xff]  }
 0x21c   :  { %v7146_v8 = vpop.f32.mrb[36].mxu1 }
 0x21d   :  { %v2779_v9 = vpop.f32.mrb[37].mxu1 }
 0x21e   :  { %v7151_v12 = vpop.f32.mrb[38].mxu1 }
 0x21f   :  { %v2782_v16 = vpop.f32.mrb[39].mxu1 }
 0x220   :  { %v5973_v16 = vld [vmem:[%s7705_s0 + $0x608] ss:$36 sps:$4 sm:$0xff]  }
 0x221   :  { %5111 = vmatmul.mubr.bf16.gmra.mrb[144].mxu1 %v5943_v10  ;;  %v5969_v10 = vld [vmem:[%s7705_s0 + $0x76c] ss:$36 sps:$4 sm:$0xff]  }
 0x222   :  { %3442 = vmatmul.mubr.bf16.gmra.mrb[80].mxu0 %v5942_v13  ;;  %5114 = vmatprep.mubr.bf16.mxu1 %v5946_v15 }
 0x223   :  { %3449 = vmatprep.mubr.bf16.mxu0 %v5944_v17 }
 0x224   :  { %v7162_v18 = vpop.f32.mrb[40].mxu1 }
 0x225   :  { %v2787_v20 = vpop.f32.mrb[41].mxu1 }
 0x226   :  { %v7167_v23 = vpop.f32.mrb[42].mxu1  ;;  %v5972_v20 = vld [vmem:[%s7705_s0 + $0x768] ss:$36 sps:$4 sm:$0xff]  }
 0x227   :  { %v2790_v26 = vpop.f32.mrb[43].mxu1 }
 0x229   :  { %5115 = vmatmul.mubr.bf16.gmra.mrb[148].mxu1 %v5948_v21  ;;  %v5976_v21 = vld [vmem:[%s7705_s0 + $0x650] ss:$36 sps:$4 sm:$0xff]  }
 0x22a   :  { %3450 = vmatmul.mubr.bf16.gmra.mrb[84].mxu0 %v5947_v24  ;;  %5118 = vmatprep.mubr.bf16.mxu1 %v5951_v25  ;;  %v5974_v25 = vld [vmem:[%s7705_s0 + $0x7b4] ss:$36 sps:$4 sm:$0xff]  }
 0x22b   :  { %3457 = vmatprep.mubr.bf16.mxu0 %v5949_v28 }
 0x22c   :  { %v7178_v0 = vpop.f32.mrb[44].mxu1 }
 0x22d   :  { %v2795_v30 = vpop.f32.mrb[45].mxu1 }
 0x22e   :  { %v7183_v32 = vpop.f32.mrb[46].mxu1 }
 0x22f   :  { %v2798_v35 = vpop.f32.mrb[47].mxu1 }
 0x231   :  { %5119 = vmatmul.mubr.bf16.gmra.mrb[152].mxu1 %v5953_v31  ;;  %v5978_v31 = vld [vmem:[%s7705_s0 + $0x698] ss:$36 sps:$4 sm:$0xff]  }
 0x232   :  { %3458 = vmatmul.mubr.bf16.gmra.mrb[88].mxu0 %v5952_v33  ;;  %5122 = vmatprep.mubr.bf16.mxu1 %v5956_v34 }
 0x233   :  { %3465 = vmatprep.mubr.bf16.mxu0 %v5954_v37  ;;  %v5977_v37 = vld [vmem:[%s7705_s0 + $0x7b0] ss:$36 sps:$4 sm:$0xff]  }
 0x234   :  { %v7194_v38 = vpop.f32.mrb[48].mxu1 }
 0x235   :  { %v2803_v5 = vpop.f32.mrb[49].mxu1 }
 0x236   :  { %v7199_v41 = vpop.f32.mrb[50].mxu1  ;;  %v5981_v5 = vld [vmem:[%s7705_s0 + $0x6e0] ss:$36 sps:$4 sm:$0xff]  }
 0x237   :  { %v2806_v45 = vpop.f32.mrb[51].mxu1 }
 0x239   :  { %5123 = vmatmul.mubr.bf16.gmra.mrb[156].mxu1 %v5958_v40 }
 0x23a   :  { %3466 = vmatmul.mubr.bf16.gmra.mrb[92].mxu0 %v5957_v42  ;;  %5126 = vmatprep.mubr.bf16.mxu1 %v5961_v43  ;;  %v5979_v43 = vld [vmem:[%s7705_s0 + $0x7fc] ss:$36 sps:$4 sm:$0xff]  }
 0x23b   :  { %3473 = vmatprep.mubr.bf16.mxu0 %v5959_v46 }
 0x23c   :  { %v7210_v47 = vpop.f32.mrb[52].mxu1 }
 0x23d   :  { %v2811_v50 = vpop.f32.mrb[53].mxu1 }
 0x23e   :  { %v7215_v53 = vpop.f32.mrb[54].mxu1 }
 0x23f   :  { %v2814_v56 = vpop.f32.mrb[55].mxu1 }
 0x241   :  { %5127 = vmatmul.mubr.bf16.gmra.mrb[160].mxu1 %v5963_v51 }
 0x242   :  { %3474 = vmatmul.mubr.bf16.gmra.mrb[96].mxu0 %v5962_v54  ;;  %5130 = vmatprep.mubr.bf16.mxu1 %v5966_v55  ;;  %v5983_v54 = vld [vmem:[%s7705_s0 + $0x728] ss:$36 sps:$4 sm:$0xff]  }
 0x243   :  { %3481 = vmatprep.mubr.bf16.mxu0 %v5964_v58 }
 0x244   :  { %v7226_v61 = vpop.f32.mrb[56].mxu1 }
 0x245   :  { %v2819_v62 = vpop.f32.mrb[57].mxu1 }
 0x246   :  { %v7231_v3 = vpop.f32.mrb[58].mxu1  ;;  %v5986_v62 = vld [vmem:[%s7705_s0 + $0x770] ss:$36 sps:$4 sm:$0xff]  }
 0x247   :  { %v2822_v9 = vpop.f32.mrb[59].mxu1 }
 0x249   :  { %5131 = vmatmul.mubr.bf16.gmra.mrb[164].mxu1 %v5968_v1 }
 0x24a   :  { %3482 = vmatmul.mubr.bf16.gmra.mrb[100].mxu0 %v5967_v4  ;;  %5134 = vmatprep.mubr.bf16.mxu1 %v5971_v7  ;;  %v5984_v7 = vld [vmem:[%s7705_s0 + $0x844] ss:$36 sps:$4 sm:$0xff]  }
 0x24b   :  { %3489 = vmatprep.mubr.bf16.mxu0 %v5969_v10 }
 0x24c   :  { %v7242_v13 = vpop.f32.mrb[60].mxu1 }
 0x24d   :  { %v2827_v15 = vpop.f32.mrb[61].mxu1 }
 0x24e   :  { %v7247_v17 = vpop.f32.mrb[62].mxu1 }
 0x24f   :  { %v2830_v24 = vpop.f32.mrb[63].mxu1 }
 0x251   :  { %5135 = vmatmul.mubr.bf16.gmra.mrb[168].mxu1 %v5973_v16 }
 0x252   :  { %3490 = vmatmul.mubr.bf16.gmra.mrb[104].mxu0 %v5972_v20  ;;  %5138 = vmatprep.mubr.bf16.mxu1 %v5976_v21  ;;  %v5988_v20 = vld [vmem:[%s7705_s0 + $0x7b8] ss:$36 sps:$4 sm:$0xff]  }
 0x253   :  { %3497 = vmatprep.mubr.bf16.mxu0 %v5974_v25 }
 0x254   :  { %v7258_v26 = vpop.f32.mrb[64].mxu1 }
 0x255   :  { %v3283_v28 = vpop.f32.mrb[0].mxu0  ;;  %v2835_v30 = vpop.f32.mrb[65].mxu1 }
 0x256   :  { %v7264_v33 = vadd.f32 %v3283_v28, %v6692_v49  ;;  %v3285_v34 = vpop.f32.mrb[1].mxu0  ;;  %v7266_v35 = vpop.f32.mrb[66].mxu1  ;;  %v5991_v28 = vld [vmem:[%s7705_s0 + $0x800] ss:$36 sps:$4 sm:$0xff]  }
 0x257   :  { %v3286_v40 = vpop.f32.mrb[2].mxu0  ;;  %v2838_v42 = vpop.f32.mrb[67].mxu1  ;;  %v5989_v34 = vld [vmem:[%s7705_s0 + $0x88c] ss:$36 sps:$4 sm:$0xff]  }
 0x258   :  { %v7278_v49 = vadd.f32 %v3286_v40, %v6697_v52  ;;  %v3288_v45 = vpop.f32.mrb[3].mxu0  ;;  %v5982_v52 = vld [vmem:[%s7705_s0 + $0x7f8] ss:$36 sps:$4 sm:$0xff]  }
 0x259   :  { %5139 = vmatmul.mubr.bf16.gmra.mrb[172].mxu1 %v5978_v31 }
 0x25a   :  { %3498 = vmatmul.mubr.bf16.gmra.mrb[108].mxu0 %v5977_v37  ;;  %5142 = vmatprep.mubr.bf16.mxu1 %v5981_v5 }
 0x25b   :  { %3505 = vmatprep.mubr.bf16.mxu0 %v5979_v43  ;;  %v5993_v43 = vld [vmem:[%s7705_s0 + $0x848] ss:$36 sps:$4 sm:$0xff]  }
 0x25c   :  { %v7280_v46 = vpop.f32.mrb[68].mxu1 }
 0x25d   :  { %v3291_v50 = vpop.f32.mrb[4].mxu0  ;;  %v2843_v51 = vpop.f32.mrb[69].mxu1 }
 0x25e   :  { %v7286_v55 = vadd.f32 %v3291_v50, %v6708_v57  ;;  %v3293_v56 = vpop.f32.mrb[5].mxu0  ;;  %v7288_v58 = vpop.f32.mrb[70].mxu1 }
 0x25f   :  { %v3294_v1 = vpop.f32.mrb[6].mxu0  ;;  %v2846_v4 = vpop.f32.mrb[71].mxu1 }
 0x260   :  { %v7300_v57 = vadd.f32 %v3294_v1, %v6713_v60  ;;  %v3296_v9 = vpop.f32.mrb[7].mxu0  ;;  %v5987_v60 = vld [vmem:[%s7705_s0 + $0x840] ss:$36 sps:$4 sm:$0xff]  }
 0x261   :  { %5143 = vmatmul.mubr.bf16.gmra.mrb[176].mxu1 %v5983_v54  ;;  %v5996_v54 = vld [vmem:[%s7705_s0 + $0x890] ss:$36 sps:$4 sm:$0xff]  }
 0x262   :  { %3506 = vmatmul.mubr.bf16.gmra.mrb[112].mxu0 %v5982_v52  ;;  %5146 = vmatprep.mubr.bf16.mxu1 %v5986_v62  ;;  %v5994_v62 = vld [vmem:[%s7705_s0 + $0x8d4] ss:$36 sps:$4 sm:$0xff]  }
 0x263   :  { %3513 = vmatprep.mubr.bf16.mxu0 %v5984_v7 }
 0x264   :  { %v7302_v10 = vpop.f32.mrb[72].mxu1 }
 0x265   :  { %v3299_v15 = vpop.f32.mrb[8].mxu0  ;;  %v2851_v16 = vpop.f32.mrb[73].mxu1 }
 0x266   :  { %v7308_v21 = vadd.f32 %v3299_v15, %v6724_v2  ;;  %v3301_v24 = vpop.f32.mrb[9].mxu0  ;;  %v7310_v25 = vpop.f32.mrb[74].mxu1  ;;  %v5998_v15 = vld [vmem:[%s7705_s0 + $0x8d8] ss:$36 sps:$4 sm:$0xff]  }
 0x267   :  { %v3302_v30 = vpop.f32.mrb[10].mxu0  ;;  %v2854_v31 = vpop.f32.mrb[75].mxu1 }
 0x268   :  { %v7322_v2 = vadd.f32 %v3302_v30, %v6729_v6  ;;  %v3304_v37 = vpop.f32.mrb[11].mxu0  ;;  %v5992_v6 = vld [vmem:[%s7705_s0 + $0x888] ss:$36 sps:$4 sm:$0xff]  }
 0x269   :  { %5147 = vmatmul.mubr.bf16.gmra.mrb[180].mxu1 %v5988_v20 }
 0x26a   :  { %3514 = vmatmul.mubr.bf16.gmra.mrb[116].mxu0 %v5987_v60  ;;  %5150 = vmatprep.mubr.bf16.mxu1 %v5991_v28 }
 0x26b   :  { %3521 = vmatprep.mubr.bf16.mxu0 %v5989_v34 }
 0x26c   :  { %v7324_v5 = vpop.f32.mrb[76].mxu1 }
 0x26d   :  { %v3307_v40 = vpop.f32.mrb[12].mxu0  ;;  %v2859_v42 = vpop.f32.mrb[77].mxu1 }
 0x26e   :  { %v7330_v45 = vadd.f32 %v3307_v40, %v6740_v11  ;;  %v3309_v50 = vpop.f32.mrb[13].mxu0  ;;  %v7332_v51 = vpop.f32.mrb[78].mxu1 }
 0x26f   :  { %v3310_v56 = vpop.f32.mrb[14].mxu0  ;;  %v2862_v52 = vpop.f32.mrb[79].mxu1 }
 0x270   :  { %v7344_v11 = vadd.f32 %v3310_v56, %v6745_v14  ;;  %v3312_v1 = vpop.f32.mrb[15].mxu0  ;;  %v5997_v14 = vld [vmem:[%s7705_s0 + $0x8d0] ss:$36 sps:$4 sm:$0xff]  }
 0x271   :  { %5151 = vmatmul.mubr.bf16.gmra.mrb[184].mxu1 %v5993_v43 }
 0x272   :  { %3522 = vmatmul.mubr.bf16.gmra.mrb[120].mxu0 %v5992_v6  ;;  %5154 = vmatprep.mubr.bf16.mxu1 %v5996_v54 }
 0x273   :  { %3529 = vmatprep.mubr.bf16.mxu0 %v5994_v62 }
 0x274   :  { %v7346_v4 = vpop.f32.mrb[80].mxu1 }
 0x275   :  { %v3315_v7 = vpop.f32.mrb[16].mxu0  ;;  %v2867_v9 = vpop.f32.mrb[81].mxu1 }
 0x276   :  { %v7352_v16 = vadd.f32 %v3315_v7, %v6756_v19  ;;  %v3317_v20 = vpop.f32.mrb[17].mxu0  ;;  %v7354_v24 = vpop.f32.mrb[82].mxu1 }
 0x277   :  { %v3318_v60 = vpop.f32.mrb[18].mxu0  ;;  %v2870_v28 = vpop.f32.mrb[83].mxu1 }
 0x278   :  { %v7360_v30 = vadd.f32 %v3318_v60, %v6761_v22  ;;  %v3320_v31 = vpop.f32.mrb[19].mxu0 }
 0x279   :  { %5155 = vmatmul.mubr.bf16.gmra.mrb[188].mxu1 %v5998_v15 }
 0x27a   :  { %3530 = vmatmul.mubr.bf16.gmra.mrb[124].mxu0 %v5997_v14 }
 0x27c   :  { %v7362_v34 = vpop.f32.mrb[84].mxu1 }
 0x27d   :  { %v3323_v37 = vpop.f32.mrb[20].mxu0  ;;  %v2875_v19 = vpop.f32.mrb[85].mxu1 }
 0x27e   :  { %v7365_v40 = vadd.f32 %v3323_v37, %v6772_v27  ;;  %v3325_v42 = vpop.f32.mrb[21].mxu0  ;;  %v7367_v43 = vpop.f32.mrb[86].mxu1 }
 0x27f   :  { %v3326_v50 = vpop.f32.mrb[22].mxu0  ;;  %v2878_v6 = vpop.f32.mrb[87].mxu1 }
 0x280   :  { %v7370_v54 = vadd.f32 %v3326_v50, %v6777_v29  ;;  %v3328_v22 = vpop.f32.mrb[23].mxu0 }
 0x284   :  { %v7372_v56 = vpop.f32.mrb[88].mxu1 }
 0x285   :  { %v3331_v52 = vpop.f32.mrb[24].mxu0  ;;  %v2883_v62 = vpop.f32.mrb[89].mxu1 }
 0x286   :  { %v7375_v1 = vadd.f32 %v3331_v52, %v6795_v36  ;;  %v3333_v7 = vpop.f32.mrb[25].mxu0  ;;  %v7377_v9 = vpop.f32.mrb[90].mxu1 }
 0x287   :  { %v3334_v27 = vpop.f32.mrb[26].mxu0  ;;  %v2886_v15 = vpop.f32.mrb[91].mxu1 }
 0x288   :  { %v7380_v20 = vadd.f32 %v3334_v27, %v6800_v39  ;;  %v3336_v14 = vpop.f32.mrb[27].mxu0 }
 0x28c   :  { %v7382_v60 = vpop.f32.mrb[92].mxu1 }
 0x28d   :  { %v3339_v29 = vpop.f32.mrb[28].mxu0  ;;  %v2891_v28 = vpop.f32.mrb[93].mxu1 }
 0x28e   :  { %v7385_v31 = vadd.f32 %v3339_v29, %v6814_v44  ;;  %v3341_v37 = vpop.f32.mrb[29].mxu0  ;;  %v7387_v19 = vpop.f32.mrb[94].mxu1 }
 0x28f   :  { %v3342_v36 = vpop.f32.mrb[30].mxu0  ;;  %v2894_v42 = vpop.f32.mrb[95].mxu1 }
 0x290   :  { %v7390_v50 = vadd.f32 %v3342_v36, %v6822_v48  ;;  %v3344_v6 = vpop.f32.mrb[31].mxu0 }
 0x294   :  { %v7392_v22 = vpop.f32.mrb[96].mxu1 }
 0x295   :  { %7708 = vst [vmem:[#allocation2_spill] sm:$0xff] %v7392_v22  ;;  %v3347_v39 = vpop.f32.mrb[32].mxu0  ;;  %v2899_v52 = vpop.f32.mrb[97].mxu1 }
 0x296   :  { %v7395_v62 = vadd.f32 %v3347_v39, %v7130_v59  ;;  %v3349_v7 = vpop.f32.mrb[33].mxu0  ;;  %v7397_v27 = vpop.f32.mrb[98].mxu1 }
 0x297   :  { %7709 = vst [vmem:[#allocation3_spill] sm:$0xff] %v7397_v27  ;;  %v3350_v44 = vpop.f32.mrb[34].mxu0  ;;  %v2902_v15 = vpop.f32.mrb[99].mxu1 }
 0x298   :  { %v7400_v14 = vadd.f32 %v3350_v44, %v7135_v63  ;;  %v3352_v29 = vpop.f32.mrb[35].mxu0 }
 0x29c   :  { %v7402_v28 = vpop.f32.mrb[100].mxu1 }
 0x29d   :  { %7710 = vst [vmem:[#allocation4_spill] sm:$0xff] %v7402_v28  ;;  %v3355_v48 = vpop.f32.mrb[36].mxu0  ;;  %v2907_v37 = vpop.f32.mrb[101].mxu1 }
 0x29e   :  { %v7405_v36 = vadd.f32 %v3355_v48, %v7146_v8  ;;  %v3357_v42 = vpop.f32.mrb[37].mxu0  ;;  %v7407_v6 = vpop.f32.mrb[102].mxu1 }
 0x29f   :  { %7711 = vst [vmem:[#allocation5_spill] sm:$0xff] %v7407_v6  ;;  %v3358_v59 = vpop.f32.mrb[38].mxu0  ;;  %v2910_v39 = vpop.f32.mrb[103].mxu1 }
 0x2a0   :  { %v7410_v52 = vadd.f32 %v3358_v59, %v7151_v12  ;;  %v3360_v7 = vpop.f32.mrb[39].mxu0 }
 0x2a4   :  { %v7412_v15 = vpop.f32.mrb[104].mxu1 }
 0x2a5   :  { %7712 = vst [vmem:[#allocation6_spill] sm:$0xff] %v7412_v15  ;;  %v3363_v63 = vpop.f32.mrb[40].mxu0  ;;  %v2915_v44 = vpop.f32.mrb[105].mxu1 }
 0x2a6   :  { %v7415_v29 = vadd.f32 %v3363_v63, %v7162_v18  ;;  %v3365_v37 = vpop.f32.mrb[41].mxu0  ;;  %v7417_v28 = vpop.f32.mrb[106].mxu1 }
 0x2a7   :  { %7713 = vst [vmem:[#allocation7_spill] sm:$0xff] %v7417_v28  ;;  %v3366_v8 = vpop.f32.mrb[42].mxu0  ;;  %v2918_v48 = vpop.f32.mrb[107].mxu1 }
 0x2a8   :  { %v7420_v42 = vadd.f32 %v3366_v8, %v7167_v23  ;;  %v3368_v39 = vpop.f32.mrb[43].mxu0 }
 0x2ac   :  { %v7422_v6 = vpop.f32.mrb[108].mxu1 }
 0x2ad   :  { %7714 = vst [vmem:[#allocation8_spill] sm:$0xff] %v7422_v6  ;;  %v3371_v12 = vpop.f32.mrb[44].mxu0  ;;  %v2923_v59 = vpop.f32.mrb[109].mxu1 }
 0x2ae   :  { %v7425_v7 = vadd.f32 %v3371_v12, %v7178_v0  ;;  %v3373_v44 = vpop.f32.mrb[45].mxu0  ;;  %v7427_v15 = vpop.f32.mrb[110].mxu1 }
 0x2af   :  { %7715 = vst [vmem:[#allocation9_spill] sm:$0xff] %v7427_v15  ;;  %v3374_v18 = vpop.f32.mrb[46].mxu0  ;;  %v2926_v63 = vpop.f32.mrb[111].mxu1 }
 0x2b0   :  { %v7430_v37 = vadd.f32 %v3374_v18, %v7183_v32  ;;  %v3376_v48 = vpop.f32.mrb[47].mxu0 }
 0x2b4   :  { %v7432_v28 = vpop.f32.mrb[112].mxu1 }
 0x2b5   :  { %7716 = vst [vmem:[#allocation10_spill] sm:$0xff] %v7432_v28  ;;  %v3379_v23 = vpop.f32.mrb[48].mxu0  ;;  %v2931_v8 = vpop.f32.mrb[113].mxu1 }
 0x2b6   :  { %v7435_v39 = vadd.f32 %v3379_v23, %v7194_v38  ;;  %v3381_v59 = vpop.f32.mrb[49].mxu0  ;;  %v7437_v6 = vpop.f32.mrb[114].mxu1 }
 0x2b7   :  { %7717 = vst [vmem:[#allocation11_spill] sm:$0xff] %v7437_v6  ;;  %v3382_v0 = vpop.f32.mrb[50].mxu0  ;;  %v2934_v12 = vpop.f32.mrb[115].mxu1 }
 0x2b8   :  { %v7440_v44 = vadd.f32 %v3382_v0, %v7199_v41  ;;  %v3384_v63 = vpop.f32.mrb[51].mxu0 }
 0x2bc   :  { %v7442_v15 = vpop.f32.mrb[116].mxu1 }
 0x2bd   :  { %7718 = vst [vmem:[#allocation12_spill] sm:$0xff] %v7442_v15  ;;  %v3387_v32 = vpop.f32.mrb[52].mxu0  ;;  %v2939_v18 = vpop.f32.mrb[117].mxu1 }
 0x2be   :  { %v7445_v48 = vadd.f32 %v3387_v32, %v7210_v47  ;;  %v3389_v8 = vpop.f32.mrb[53].mxu0  ;;  %v7447_v28 = vpop.f32.mrb[118].mxu1 }
 0x2bf   :  { %7719 = vst [vmem:[#allocation13_spill] sm:$0xff] %v7447_v28  ;;  %v3390_v38 = vpop.f32.mrb[54].mxu0  ;;  %v2942_v23 = vpop.f32.mrb[119].mxu1 }
 0x2c0   :  { %v7450_v59 = vadd.f32 %v3390_v38, %v7215_v53  ;;  %v3392_v12 = vpop.f32.mrb[55].mxu0 }
 0x2c4   :  { %v7452_v6 = vpop.f32.mrb[120].mxu1 }
 0x2c5   :  { %7720 = vst [vmem:[#allocation14_spill] sm:$0xff] %v7452_v6  ;;  %v3395_v41 = vpop.f32.mrb[56].mxu0  ;;  %v2947_v0 = vpop.f32.mrb[121].mxu1 }
 0x2c6   :  { %v7455_v63 = vadd.f32 %v3395_v41, %v7226_v61  ;;  %v3397_v18 = vpop.f32.mrb[57].mxu0  ;;  %v7457_v15 = vpop.f32.mrb[122].mxu1 }
 0x2c7   :  { %7721 = vst [vmem:[#allocation15_spill] sm:$0xff] %v7457_v15  ;;  %v3398_v47 = vpop.f32.mrb[58].mxu0  ;;  %v2950_v32 = vpop.f32.mrb[123].mxu1 }
 0x2c8   :  { %v7460_v8 = vadd.f32 %v3398_v47, %v7231_v3  ;;  %v3400_v23 = vpop.f32.mrb[59].mxu0 }
 0x2cc   :  { %v7462_v28 = vpop.f32.mrb[124].mxu1 }
 0x2cd   :  { %7722 = vst [vmem:[#allocation16_spill] sm:$0xff] %v7462_v28  ;;  %v3403_v53 = vpop.f32.mrb[60].mxu0  ;;  %v2955_v38 = vpop.f32.mrb[125].mxu1 }
 0x2ce   :  { %v7465_v12 = vadd.f32 %v3403_v53, %v7242_v13  ;;  %v3405_v0 = vpop.f32.mrb[61].mxu0  ;;  %v7467_v6 = vpop.f32.mrb[126].mxu1 }
 0x2cf   :  { %7723 = vst [vmem:[#allocation17_spill] sm:$0xff] %v7467_v6  ;;  %v3406_v61 = vpop.f32.mrb[62].mxu0  ;;  %v2958_v41 = vpop.f32.mrb[127].mxu1 }
 0x2d0   :  { %v7470_v18 = vadd.f32 %v3406_v61, %v7247_v17  ;;  %v3408_v32 = vpop.f32.mrb[63].mxu0 }
 0x2d4   :  { %v5096_v15 = vpop.f32.mrb[128].mxu1 }
 0x2d5   :  { %v3411_v3 = vpop.f32.mrb[64].mxu0  ;;  %v3581_v47 = vadd.f32 %v7286_v55, %v5096_v15  ;;  %v3572_v23 = vpop.f32.mrb[129].mxu1 }
 0x2d6   :  { %v7474_v28 = vadd.f32 %v3411_v3, %v7258_v26  ;;  %v3413_v38 = vpop.f32.mrb[65].mxu0  ;;  %v3573_v13 = vadd.f32 %v7264_v33, %v3572_v23  ;;  %v5097_v53 = vpop.f32.mrb[130].mxu1 }
 0x2d7   :  { %v3414_v0 = vpop.f32.mrb[66].mxu0  ;;  %v3584_v6 = vadd.f32 %v7300_v57, %v5097_v53  ;;  %v3575_v41 = vpop.f32.mrb[131].mxu1  ;;  %v4219_v33 = vmul.f32 %v3581_v47, %v3581_v47 }
 0x2d8   :  { %7724 = vst [vmem:[#allocation18_spill] sm:$0xff] %v7474_v28  ;;  %v7479_v17 = vadd.f32 %v3414_v0, %v7266_v35  ;;  %v3416_v61 = vpop.f32.mrb[67].mxu0  ;;  %v3576_v32 = vadd.f32 %v7278_v49, %v3575_v41  ;;  %v4217_v55 = vmul.f32 %v3573_v13, %v3573_v13 }
 0x2d9   :  { %v4855_v27 = vpack.c.bf16 %v3584_v6, %v3581_v47  ;;  %v4220_v23 = vmul.f32 %v3584_v6, %v3584_v6 }
 0x2da   :  { %7725 = vst [vmem:[#allocation19_spill] sm:$0xff] %v7479_v17  ;;  %v4850_v15 = vpack.c.bf16 %v3576_v32, %v3573_v13  ;;  %v4147_v22 = vadd.f32 %v3576_v32, %v3573_v13  ;;  %v4218_v26 = vmul.f32 %v3576_v32, %v3576_v32 }
 0x2db   :  { %5007 = vst [vmem:[%s7706_s2 + $0x8] sm:$0xff] %v4855_v27  }
 0x2dc   :  { %4851 = vst [vmem:[%s7706_s2] sm:$0xff] %v4850_v15   ;;  %v4148_v57 = vadd.f32 %v4147_v22, %v3581_v47  ;;  %v4281_v35 = vadd.f32 %v4218_v26, %v4217_v55  ;;  %v5100_v3 = vpop.f32.mrb[132].mxu1 }
 0x2dd   :  { %v3419_v38 = vpop.f32.mrb[68].mxu0  ;;  %v3597_v49 = vadd.f32 %v7330_v45, %v5100_v3  ;;  %v3588_v53 = vpop.f32.mrb[133].mxu1 }
 0x2de   :  { %v4282_v0 = vadd.f32 %v4281_v35, %v4219_v33  ;;  %v7490_v13 = vadd.f32 %v3419_v38, %v7280_v46  ;;  %v3421_v41 = vpop.f32.mrb[69].mxu0  ;;  %v3589_v27 = vadd.f32 %v7308_v21, %v3588_v53  ;;  %v4149_v61 = vadd.f32 %v4148_v57, %v3584_v6  ;;  %v5101_v32 = vpop.f32.mrb[134].mxu1 }
 0x2df   :  { %v3422_v17 = vpop.f32.mrb[70].mxu0  ;;  %v3600_v15 = vadd.f32 %v7344_v11, %v5101_v32  ;;  %v3591_v22 = vpop.f32.mrb[135].mxu1  ;;  %v4223_v3 = vmul.f32 %v3597_v49, %v3597_v49 }
 0x2e0   :  { %v4150_v47 = vadd.f32 %v4149_v61, %v3589_v27  ;;  %v4221_v55 = vmul.f32 %v3589_v27, %v3589_v27  ;;  %v4283_v26 = vadd.f32 %v4282_v0, %v4220_v23  ;;  %v7495_v28 = vadd.f32 %v3422_v17, %v7288_v58  ;;  %v3424_v45 = vpop.f32.mrb[71].mxu0 }
 0x2e1   :  { %v4865_v33 = vpack.c.bf16 %v3600_v15, %v3597_v49  ;;  %v3592_v46 = vadd.f32 %v7322_v2, %v3591_v22  ;;  %v4224_v61 = vmul.f32 %v3600_v15, %v3600_v15 }
 0x2e2   :  { %v4284_v35 = vadd.f32 %v4283_v26, %v4221_v55 }
 0x2e3   :  { %5009 = vst [vmem:[%s7706_s2 + $0x18] sm:$0xff] %v4865_v33   ;;  %v4860_v21 = vpack.c.bf16 %v3592_v46, %v3589_v27  ;;  %v4151_v6 = vadd.f32 %v4150_v47, %v3592_v46  ;;  %v4222_v57 = vmul.f32 %v3592_v46, %v3592_v46 }
 0x2e4   :  { %v5104_v11 = vpop.f32.mrb[136].mxu1 }
 0x2e5   :  { %5008 = vst [vmem:[%s7706_s2 + $0x10] sm:$0xff] %v4860_v21   ;;  %v4152_v58 = vadd.f32 %v4151_v6, %v3597_v49  ;;  %v4285_v17 = vadd.f32 %v4284_v35, %v4222_v57  ;;  %v3427_v23 = vpop.f32.mrb[72].mxu0  ;;  %v3613_v38 = vadd.f32 %v7365_v40, %v5104_v11  ;;  %v3604_v2 = vpop.f32.mrb[137].mxu1 }
 0x2e6   :  { %v7506_v53 = vadd.f32 %v3427_v23, %v7302_v10  ;;  %v3429_v0 = vpop.f32.mrb[73].mxu0  ;;  %v3605_v41 = vadd.f32 %v7352_v16, %v3604_v2  ;;  %v5105_v27 = vpop.f32.mrb[138].mxu1 }
 0x2e7   :  { %v4286_v32 = vadd.f32 %v4285_v17, %v4223_v3  ;;  %v4153_v22 = vadd.f32 %v4152_v58, %v3600_v15  ;;  %v3430_v47 = vpop.f32.mrb[74].mxu0  ;;  %v3616_v55 = vadd.f32 %v7370_v54, %v5105_v27  ;;  %v3607_v26 = vpop.f32.mrb[139].mxu1  ;;  %v4227_v54 = vmul.f32 %v3613_v38, %v3613_v38 }
 0x2e8   :  { %v4225_v49 = vmul.f32 %v3605_v41, %v3605_v41  ;;  %v7511_v45 = vadd.f32 %v3430_v47, %v7310_v25  ;;  %v3432_v40 = vpop.f32.mrb[75].mxu0  ;;  %v3608_v33 = vadd.f32 %v7360_v30, %v3607_v26 }
 0x2e9   :  { %v4154_v10 = vadd.f32 %v4153_v22, %v3605_v41  ;;  %v4287_v46 = vadd.f32 %v4286_v32, %v4224_v61  ;;  %v4875_v35 = vpack.c.bf16 %v3616_v55, %v3613_v38 }
 0x2ea   :  { %v4870_v21 = vpack.c.bf16 %v3608_v33, %v3605_v41  ;;  %v4226_v16 = vmul.f32 %v3608_v33, %v3608_v33  ;;  %v4228_v41 = vmul.f32 %v3616_v55, %v3616_v55 }
 0x2eb   :  { %v4288_v6 = vadd.f32 %v4287_v46, %v4225_v49  ;;  %5011 = vst [vmem:[%s7706_s2 + $0x28] sm:$0xff] %v4875_v35   ;;  %v4155_v15 = vadd.f32 %v4154_v10, %v3608_v33 }
 0x2ec   :  { %5010 = vst [vmem:[%s7706_s2 + $0x20] sm:$0xff] %v4870_v21   ;;  %v5108_v25 = vpop.f32.mrb[140].mxu1 }
 0x2ed   :  { %v4156_v57 = vadd.f32 %v4155_v15, %v3613_v38  ;;  %v4289_v11 = vadd.f32 %v4288_v6, %v4226_v16  ;;  %v3435_v30 = vpop.f32.mrb[76].mxu0  ;;  %v3629_v3 = vadd.f32 %v7385_v31, %v5108_v25  ;;  %v3620_v58 = vpop.f32.mrb[141].mxu1 }
 0x2ee   :  { %v7522_v17 = vadd.f32 %v3435_v30, %v7324_v5  ;;  %v3437_v23 = vpop.f32.mrb[77].mxu0  ;;  %v3621_v2 = vadd.f32 %v7375_v1, %v3620_v58  ;;  %v5109_v0 = vpop.f32.mrb[142].mxu1 }
 0x2ef   :  { %v4290_v27 = vadd.f32 %v4289_v11, %v4227_v54  ;;  %v4157_v61 = vadd.f32 %v4156_v57, %v3616_v55  ;;  %v3438_v32 = vpop.f32.mrb[78].mxu0  ;;  %v3632_v22 = vadd.f32 %v7390_v50, %v5109_v0  ;;  %v3623_v47 = vpop.f32.mrb[143].mxu1  ;;  %v4231_v50 = vmul.f32 %v3629_v3, %v3629_v3 }
 0x2f0   :  { %v4229_v38 = vmul.f32 %v3621_v2, %v3621_v2  ;;  %v7527_v26 = vadd.f32 %v3438_v32, %v7332_v51  ;;  %v3440_v31 = vpop.f32.mrb[79].mxu0  ;;  %v3624_v49 = vadd.f32 %v7380_v20, %v3623_v47 }
 0x2f1   :  { %v4158_v5 = vadd.f32 %v4157_v61, %v3621_v2  ;;  %v4291_v40 = vadd.f32 %v4290_v27, %v4228_v41  ;;  %v4885_v33 = vpack.c.bf16 %v3632_v22, %v3629_v3  ;;  %v4232_v11 = vmul.f32 %v3632_v22, %v3632_v22 }
 0x2f2   :  { %v4880_v10 = vpack.c.bf16 %v3624_v49, %v3621_v2  ;;  %v4230_v1 = vmul.f32 %v3624_v49, %v3624_v49 }
 0x2f3   :  { %v4292_v46 = vadd.f32 %v4291_v40, %v4229_v38  ;;  %5013 = vst [vmem:[%s7706_s2 + $0x38] sm:$0xff] %v4885_v33   ;;  %v4159_v55 = vadd.f32 %v4158_v5, %v3624_v49 }
 0x2f4   :  { %5012 = vst [vmem:[%s7706_s2 + $0x30] sm:$0xff] %v4880_v10   ;;  %v5112_v51 = vpop.f32.mrb[144].mxu1 }
 0x2f5   :  { %v4160_v35 = vadd.f32 %v4159_v55, %v3629_v3  ;;  %v4293_v21 = vadd.f32 %v4292_v46, %v4230_v1  ;;  %v3443_v20 = vpop.f32.mrb[80].mxu0  ;;  %v3645_v16 = vadd.f32 %v7405_v36, %v5112_v51  ;;  %v3636_v6 = vpop.f32.mrb[145].mxu1 }
 0x2f6   :  { %v7538_v15 = vadd.f32 %v3443_v20, %v7346_v4  ;;  %v3445_v25 = vpop.f32.mrb[81].mxu0  ;;  %v3637_v54 = vadd.f32 %v7395_v62, %v3636_v6  ;;  %v5113_v57 = vpop.f32.mrb[146].mxu1 }
 0x2f7   :  { %v4294_v30 = vadd.f32 %v4293_v21, %v4231_v50  ;;  %v4161_v58 = vadd.f32 %v4160_v35, %v3632_v22  ;;  %v3446_v23 = vpop.f32.mrb[82].mxu0  ;;  %v3648_v2 = vadd.f32 %v7410_v52, %v5113_v57  ;;  %v3639_v0 = vpop.f32.mrb[147].mxu1  ;;  %v4235_v52 = vmul.f32 %v3645_v16, %v3645_v16 }
 0x2f8   :  { %v4233_v3 = vmul.f32 %v3637_v54, %v3637_v54  ;;  %v7543_v41 = vadd.f32 %v3446_v23, %v7354_v24  ;;  %v3448_v36 = vpop.f32.mrb[83].mxu0  ;;  %v3640_v27 = vadd.f32 %v7400_v14, %v3639_v0 }
 0x2f9   :  { %v4162_v4 = vadd.f32 %v4161_v58, %v3637_v54  ;;  %v4295_v61 = vadd.f32 %v4294_v30, %v4232_v11  ;;  %v4895_v32 = vpack.c.bf16 %v3648_v2, %v3645_v16  ;;  %v4236_v55 = vmul.f32 %v3648_v2, %v3648_v2 }
 0x2fa   :  { %v4890_v47 = vpack.c.bf16 %v3640_v27, %v3637_v54  ;;  %v4234_v62 = vmul.f32 %v3640_v27, %v3640_v27 }
 0x2fb   :  { %v4296_v38 = vadd.f32 %v4295_v61, %v4233_v3  ;;  %5015 = vst [vmem:[%s7706_s2 + $0x48] sm:$0xff] %v4895_v32   ;;  %v4163_v22 = vadd.f32 %v4162_v4, %v3640_v27 }
 0x2fc   :  { %5014 = vst [vmem:[%s7706_s2 + $0x40] sm:$0xff] %v4890_v47   ;;  %v5116_v24 = vpop.f32.mrb[148].mxu1 }
 0x2fd   :  { %v4164_v31 = vadd.f32 %v4163_v22, %v3645_v16  ;;  %v4297_v49 = vadd.f32 %v4296_v38, %v4234_v62  ;;  %v3451_v14 = vpop.f32.mrb[84].mxu0  ;;  %v3661_v5 = vadd.f32 %v7425_v7, %v5116_v24  ;;  %v3652_v40 = vpop.f32.mrb[149].mxu1 }
 0x2fe   :  { %v7554_v33 = vadd.f32 %v3451_v14, %v7362_v34  ;;  %v3453_v10 = vpop.f32.mrb[85].mxu0  ;;  %v3653_v1 = vadd.f32 %v7415_v29, %v3652_v40  ;;  %v5117_v46 = vpop.f32.mrb[150].mxu1 }
 0x2ff   :  { %v4298_v51 = vadd.f32 %v4297_v49, %v4235_v52  ;;  %v4165_v50 = vadd.f32 %v4164_v31, %v3648_v2  ;;  %v3454_v35 = vpop.f32.mrb[86].mxu0  ;;  %v3664_v21 = vadd.f32 %v7430_v37, %v5117_v46  ;;  %v3655_v20 = vpop.f32.mrb[151].mxu1  ;;  %v4239_v37 = vmul.f32 %v3661_v5, %v3661_v5 }
 0x300   :  { %v4237_v16 = vmul.f32 %v3653_v1, %v3653_v1  ;;  %v7559_v6 = vadd.f32 %v3454_v35, %v7367_v43  ;;  %v3456_v7 = vpop.f32.mrb[87].mxu0  ;;  %v3656_v25 = vadd.f32 %v7420_v42, %v3655_v20 }
 0x301   :  { %v4166_v34 = vadd.f32 %v4165_v50, %v3653_v1  ;;  %v4299_v54 = vadd.f32 %v4298_v51, %v4236_v55  ;;  %v4905_v57 = vpack.c.bf16 %v3664_v21, %v3661_v5  ;;  %v4240_v32 = vmul.f32 %v3664_v21, %v3664_v21 }
 0x302   :  { %v4900_v11 = vpack.c.bf16 %v3656_v25, %v3653_v1  ;;  %v4238_v29 = vmul.f32 %v3656_v25, %v3656_v25 }
 0x303   :  { %v4300_v30 = vadd.f32 %v4299_v54, %v4237_v16  ;;  %5017 = vst [vmem:[%s7706_s2 + $0x58] sm:$0xff] %v4905_v57   ;;  %v4167_v58 = vadd.f32 %v4166_v34, %v3656_v25 }
 0x304   :  { %5016 = vst [vmem:[%s7706_s2 + $0x50] sm:$0xff] %v4900_v11   ;;  %v5120_v43 = vpop.f32.mrb[152].mxu1 }
 0x305   :  { %v4168_v23 = vadd.f32 %v4167_v58, %v3661_v5  ;;  %v4301_v2 = vadd.f32 %v4300_v30, %v4238_v29  ;;  %v3459_v42 = vpop.f32.mrb[88].mxu0  ;;  %v3677_v0 = vadd.f32 %v7445_v48, %v5120_v43  ;;  %v3668_v3 = vpop.f32.mrb[153].mxu1 }
 0x306   :  { %v7570_v36 = vadd.f32 %v3459_v42, %v7372_v56  ;;  %v3461_v27 = vpop.f32.mrb[89].mxu0  ;;  %v3669_v4 = vadd.f32 %v7435_v39, %v3668_v3  ;;  %v5121_v61 = vpop.f32.mrb[154].mxu1 }
 0x307   :  { %v4302_v47 = vadd.f32 %v4301_v2, %v4239_v37  ;;  %v4169_v62 = vadd.f32 %v4168_v23, %v3664_v21  ;;  %v3462_v38 = vpop.f32.mrb[90].mxu0  ;;  %v3680_v22 = vadd.f32 %v7450_v59, %v5121_v61  ;;  %v3671_v24 = vpop.f32.mrb[155].mxu1  ;;  %v4243_v59 = vmul.f32 %v3677_v0, %v3677_v0  ;;  %v7726_v61 = vld [vmem:[#allocation2_spill] sm:$0xff] }
 0x308   :  { %v4241_v52 = vmul.f32 %v3669_v4, %v3669_v4  ;;  %v7575_v31 = vadd.f32 %v3462_v38, %v7377_v9  ;;  %v3464_v48 = vpop.f32.mrb[91].mxu0  ;;  %v3672_v49 = vadd.f32 %v7440_v44, %v3671_v24 }
 0x309   :  { %v4170_v56 = vadd.f32 %v4169_v62, %v3669_v4  ;;  %v4303_v14 = vadd.f32 %v4302_v47, %v4240_v32  ;;  %v4915_v5 = vpack.c.bf16 %v3680_v22, %v3677_v0  ;;  %v4244_v7 = vmul.f32 %v3680_v22, %v3680_v22  ;;  %v7727_v62 = vld [vmem:[#allocation18_spill] sm:$0xff] }
 0x30a   :  { %v4910_v40 = vpack.c.bf16 %v3672_v49, %v3669_v4  ;;  %v4242_v39 = vmul.f32 %v3672_v49, %v3672_v49 }
 0x30b   :  { %v4304_v10 = vadd.f32 %v4303_v14, %v4241_v52  ;;  %5019 = vst [vmem:[%s7706_s2 + $0x68] sm:$0xff] %v4915_v5   ;;  %v4171_v1 = vadd.f32 %v4170_v56, %v3672_v49 }
 0x30c   :  { %5018 = vst [vmem:[%s7706_s2 + $0x60] sm:$0xff] %v4910_v40   ;;  %v5124_v9 = vpop.f32.mrb[156].mxu1  ;;  %v7728_v40 = vld [vmem:[#allocation3_spill] sm:$0xff] }
 0x30d   :  { %v4172_v46 = vadd.f32 %v4171_v1, %v3677_v0  ;;  %v4305_v55 = vadd.f32 %v4304_v10, %v4242_v39  ;;  %v3467_v44 = vpop.f32.mrb[92].mxu0  ;;  %v3693_v51 = vadd.f32 %v7465_v12, %v5124_v9  ;;  %v3684_v50 = vpop.f32.mrb[157].mxu1  ;;  %v7729_v10 = vld [vmem:[#allocation19_spill] sm:$0xff] }
 0x30e   :  { %v7586_v35 = vadd.f32 %v3467_v44, %v7382_v60  ;;  %v3469_v21 = vpop.f32.mrb[93].mxu0  ;;  %v3685_v20 = vadd.f32 %v7455_v63, %v3684_v50  ;;  %v5125_v16 = vpop.f32.mrb[158].mxu1 }
 0x30f   :  { %v4306_v25 = vadd.f32 %v4305_v55, %v4243_v59  ;;  %v4173_v34 = vadd.f32 %v4172_v46, %v3680_v22  ;;  %v3470_v54 = vpop.f32.mrb[94].mxu0  ;;  %v3696_v57 = vadd.f32 %v7470_v18, %v5125_v16  ;;  %v3687_v11 = vpop.f32.mrb[159].mxu1  ;;  %v4247_v18 = vmul.f32 %v3693_v51, %v3693_v51 }
 0x310   :  { %v4245_v29 = vmul.f32 %v3685_v20, %v3685_v20  ;;  %v7591_v30 = vadd.f32 %v3470_v54, %v7387_v19  ;;  %v3472_v12 = vpop.f32.mrb[95].mxu0  ;;  %v3688_v58 = vadd.f32 %v7460_v8, %v3687_v11  ;;  %v7730_v54 = vld [vmem:[#allocation4_spill] sm:$0xff] }
 0x311   :  { %v4174_v60 = vadd.f32 %v4173_v34, %v3685_v20  ;;  %v4307_v43 = vadd.f32 %v4306_v25, %v4244_v7  ;;  %v4925_v37 = vpack.c.bf16 %v3696_v57, %v3693_v51  ;;  %v4248_v24 = vmul.f32 %v3696_v57, %v3696_v57 }
 0x312   :  { %v4920_v23 = vpack.c.bf16 %v3688_v58, %v3685_v20  ;;  %v4246_v63 = vmul.f32 %v3688_v58, %v3688_v58 }
 0x313   :  { %v4308_v2 = vadd.f32 %v4307_v43, %v4245_v29  ;;  %5021 = vst [vmem:[%s7706_s2 + $0x78] sm:$0xff] %v4925_v37   ;;  %v4175_v42 = vadd.f32 %v4174_v60, %v3688_v58 }
 0x314   :  { %5020 = vst [vmem:[%s7706_s2 + $0x70] sm:$0xff] %v4920_v23   ;;  %v5128_v19 = vpop.f32.mrb[160].mxu1 }
 0x315   :  { %v4176_v0 = vadd.f32 %v4175_v42, %v3693_v51  ;;  %v4309_v3 = vadd.f32 %v4308_v2, %v4246_v63  ;;  %v3475_v8 = vpop.f32.mrb[96].mxu0  ;;  %v3709_v27 = vadd.f32 %v7490_v13, %v5128_v19  ;;  %v3700_v4 = vpop.f32.mrb[161].mxu1  ;;  %v7731_v42 = vld [vmem:[#allocation5_spill] sm:$0xff] }
 0x316   :  { %v7602_v32 = vadd.f32 %v3475_v8, %v7726_v61  ;;  %v3477_v47 = vpop.f32.mrb[97].mxu0  ;;  %v3701_v38 = vadd.f32 %v7727_v62, %v3700_v4  ;;  %v5129_v22 = vpop.f32.mrb[162].mxu1 }
 0x317   :  { %v4310_v52 = vadd.f32 %v4309_v3, %v4247_v18  ;;  %v4177_v48 = vadd.f32 %v4176_v0, %v3696_v57  ;;  %v3478_v49 = vpop.f32.mrb[98].mxu0  ;;  %v3712_v56 = vadd.f32 %v7495_v28, %v5129_v22  ;;  %v3703_v14 = vpop.f32.mrb[163].mxu1  ;;  %v4251_v21 = vmul.f32 %v3709_v27, %v3709_v27 }
 0x318   :  { %v4249_v5 = vmul.f32 %v3701_v38, %v3701_v38  ;;  %v7607_v39 = vadd.f32 %v3478_v49, %v7728_v40  ;;  %v3480_v13 = vpop.f32.mrb[99].mxu0  ;;  %v3704_v1 = vadd.f32 %v7729_v10, %v3703_v14 }
 0x319   :  { %v4178_v9 = vadd.f32 %v4177_v48, %v3701_v38  ;;  %v4311_v59 = vadd.f32 %v4310_v52, %v4248_v24  ;;  %v4935_v46 = vpack.c.bf16 %v3712_v56, %v3709_v27  ;;  %v4252_v58 = vmul.f32 %v3712_v56, %v3712_v56  ;;  %v7732_v52 = vld [vmem:[#allocation6_spill] sm:$0xff] }
 0x31a   :  { %v4930_v55 = vpack.c.bf16 %v3704_v1, %v3701_v38  ;;  %v4250_v44 = vmul.f32 %v3704_v1, %v3704_v1 }
 0x31b   :  { %v4312_v51 = vadd.f32 %v4311_v59, %v4249_v5  ;;  %5023 = vst [vmem:[%s7706_s2 + $0x88] sm:$0xff] %v4935_v46   ;;  %v4179_v50 = vadd.f32 %v4178_v9, %v3704_v1  ;;  %v7733_v46 = vld [vmem:[#allocation7_spill] sm:$0xff] }
 0x31c   :  { %5022 = vst [vmem:[%s7706_s2 + $0x80] sm:$0xff] %v4930_v55   ;;  %v5132_v28 = vpop.f32.mrb[164].mxu1 }
 0x31d   :  { %v4180_v20 = vadd.f32 %v4179_v50, %v3709_v27  ;;  %v4313_v16 = vadd.f32 %v4312_v51, %v4250_v44  ;;  %v3483_v7 = vpop.f32.mrb[100].mxu0  ;;  %v3725_v25 = vadd.f32 %v7522_v17, %v5132_v28  ;;  %v3716_v34 = vpop.f32.mrb[165].mxu1 }
 0x31e   :  { %v7618_v57 = vadd.f32 %v3483_v7, %v7730_v54  ;;  %v3485_v11 = vpop.f32.mrb[101].mxu0  ;;  %v3717_v29 = vadd.f32 %v7506_v53, %v3716_v34  ;;  %v5133_v12 = vpop.f32.mrb[166].mxu1 }
 0x31f   :  { %v4314_v60 = vadd.f32 %v4313_v16, %v4251_v21  ;;  %v4181_v43 = vadd.f32 %v4180_v20, %v3712_v56  ;;  %v3486_v37 = vpop.f32.mrb[102].mxu0  ;;  %v3728_v23 = vadd.f32 %v7527_v26, %v5133_v12  ;;  %v3719_v63 = vpop.f32.mrb[167].mxu1  ;;  %v4255_v47 = vmul.f32 %v3725_v25, %v3725_v25 }
 0x320   :  { %v4253_v2 = vmul.f32 %v3717_v29, %v3717_v29  ;;  %v7623_v19 = vadd.f32 %v3486_v37, %v7731_v42  ;;  %v3488_v17 = vpop.f32.mrb[103].mxu0  ;;  %v3720_v18 = vadd.f32 %v7511_v45, %v3719_v63 }
 0x321   :  { %v4182_v0 = vadd.f32 %v4181_v43, %v3717_v29  ;;  %v4315_v3 = vadd.f32 %v4314_v60, %v4252_v58  ;;  %v4945_v8 = vpack.c.bf16 %v3728_v23, %v3725_v25  ;;  %v4256_v5 = vmul.f32 %v3728_v23, %v3728_v23 }
 0x322   :  { %v4940_v27 = vpack.c.bf16 %v3720_v18, %v3717_v29  ;;  %v4254_v53 = vmul.f32 %v3720_v18, %v3720_v18  ;;  %v7734_v29 = vld [vmem:[#allocation8_spill] sm:$0xff] }
 0x323   :  { %v4316_v4 = vadd.f32 %v4315_v3, %v4253_v2  ;;  %5025 = vst [vmem:[%s7706_s2 + $0x98] sm:$0xff] %v4945_v8   ;;  %v4183_v61 = vadd.f32 %v4182_v0, %v3720_v18  ;;  %v7735_v0 = vld [vmem:[#allocation9_spill] sm:$0xff] }
 0x324   :  { %5024 = vst [vmem:[%s7706_s2 + $0x90] sm:$0xff] %v4940_v27   ;;  %v5136_v26 = vpop.f32.mrb[168].mxu1 }
 0x325   :  { %v4184_v62 = vadd.f32 %v4183_v61, %v3725_v25  ;;  %v4317_v38 = vadd.f32 %v4316_v4, %v4254_v53  ;;  %v3491_v45 = vpop.f32.mrb[104].mxu0  ;;  %v3741_v22 = vadd.f32 %v7554_v33, %v5136_v26  ;;  %v3732_v24 = vpop.f32.mrb[169].mxu1 }
 0x326   :  { %v7634_v48 = vadd.f32 %v3491_v45, %v7732_v52  ;;  %v3493_v49 = vpop.f32.mrb[105].mxu0  ;;  %v3733_v56 = vadd.f32 %v7538_v15, %v3732_v24  ;;  %v5137_v14 = vpop.f32.mrb[170].mxu1  ;;  %v7736_v52 = vld [vmem:[#allocation10_spill] sm:$0xff] }
 0x327   :  { %v4318_v40 = vadd.f32 %v4317_v38, %v4255_v47  ;;  %v4185_v13 = vadd.f32 %v4184_v62, %v3728_v23  ;;  %v3494_v10 = vpop.f32.mrb[106].mxu0  ;;  %v3744_v1 = vadd.f32 %v7559_v6, %v5137_v14  ;;  %v3735_v9 = vpop.f32.mrb[171].mxu1  ;;  %v4259_v7 = vmul.f32 %v3741_v22, %v3741_v22 }
 0x328   :  { %v4257_v59 = vmul.f32 %v3733_v56, %v3733_v56  ;;  %v7639_v55 = vadd.f32 %v3494_v10, %v7733_v46  ;;  %v3496_v33 = vpop.f32.mrb[107].mxu0  ;;  %v3736_v44 = vadd.f32 %v7543_v41, %v3735_v9 }
 0x329   :  { %v4186_v51 = vadd.f32 %v4185_v13, %v3733_v56  ;;  %v4319_v50 = vadd.f32 %v4318_v40, %v4256_v5  ;;  %v4955_v28 = vpack.c.bf16 %v3744_v1, %v3741_v22  ;;  %v4260_v37 = vmul.f32 %v3744_v1, %v3744_v1  ;;  %v7737_v33 = vld [vmem:[#allocation11_spill] sm:$0xff] }
 0x32a   :  { %v4950_v21 = vpack.c.bf16 %v3736_v44, %v3733_v56  ;;  %v4258_v15 = vmul.f32 %v3736_v44, %v3736_v44 }
 0x32b   :  { %v4320_v20 = vadd.f32 %v4319_v50, %v4257_v59  ;;  %5027 = vst [vmem:[%s7706_s2 + $0xa8] sm:$0xff] %v4955_v28   ;;  %v4187_v16 = vadd.f32 %v4186_v51, %v3736_v44 }
 0x32c   :  { %5026 = vst [vmem:[%s7706_s2 + $0xa0] sm:$0xff] %v4950_v21   ;;  %v5140_v6 = vpop.f32.mrb[172].mxu1 }
 0x32d   :  { %v4188_v25 = vadd.f32 %v4187_v16, %v3741_v22  ;;  %v4321_v34 = vadd.f32 %v4320_v20, %v4258_v15  ;;  %v3499_v41 = vpop.f32.mrb[108].mxu0  ;;  %v3757_v54 = vadd.f32 %v7586_v35, %v5140_v6  ;;  %v3748_v11 = vpop.f32.mrb[173].mxu1 }
 0x32e   :  { %v5244_v12 = vadd.f32 %v3499_v41, %v7734_v29  ;;  %v3501_v58 = vpop.f32.mrb[109].mxu0  ;;  %v3749_v60 = vadd.f32 %v7570_v36, %v3748_v11  ;;  %v5141_v43 = vpop.f32.mrb[174].mxu1 }
 0x32f   :  { %v4322_v23 = vadd.f32 %v4321_v34, %v4259_v7  ;;  %v4189_v63 = vadd.f32 %v4188_v25, %v3744_v1  ;;  %v3502_v2 = vpop.f32.mrb[110].mxu0  ;;  %v3760_v42 = vadd.f32 %v7591_v30, %v5141_v43  ;;  %v3751_v17 = vpop.f32.mrb[175].mxu1  ;;  %v4263_v62 = vmul.f32 %v3757_v54, %v3757_v54 }
 0x330   :  { %v4261_v18 = vmul.f32 %v3749_v60, %v3749_v60  ;;  %v5245_v3 = vadd.f32 %v3502_v2, %v7735_v0  ;;  %v3504_v8 = vpop.f32.mrb[111].mxu0  ;;  %v3752_v35 = vadd.f32 %v7575_v31, %v3751_v17 }
 0x331   :  { %v4190_v27 = vadd.f32 %v4189_v63, %v3749_v60  ;;  %v4323_v53 = vadd.f32 %v4322_v23, %v4260_v37  ;;  %v4965_v4 = vpack.c.bf16 %v3760_v42, %v3757_v54  ;;  %v4264_v40 = vmul.f32 %v3760_v42, %v3760_v42 }
 0x332   :  { %v4960_v61 = vpack.c.bf16 %v3752_v35, %v3749_v60  ;;  %v4262_v26 = vmul.f32 %v3752_v35, %v3752_v35 }
 0x333   :  { %v4324_v36 = vadd.f32 %v4323_v53, %v4261_v18  ;;  %5029 = vst [vmem:[%s7706_s2 + $0xb8] sm:$0xff] %v4965_v4   ;;  %v4191_v47 = vadd.f32 %v4190_v27, %v3752_v35  ;;  %v7739_v18 = vld [vmem:[#allocation13_spill] sm:$0xff] }
 0x334   :  { %5028 = vst [vmem:[%s7706_s2 + $0xb0] sm:$0xff] %v4960_v61   ;;  %v5144_v30 = vpop.f32.mrb[176].mxu1 }
 0x335   :  { %v4192_v38 = vadd.f32 %v4191_v47, %v3757_v54  ;;  %v4325_v45 = vadd.f32 %v4324_v36, %v4262_v26  ;;  %v3507_v31 = vpop.f32.mrb[112].mxu0  ;;  %v3773_v22 = vadd.f32 %v7618_v57, %v5144_v30  ;;  %v3764_v24 = vpop.f32.mrb[177].mxu1  ;;  %v7738_v54 = vld [vmem:[#allocation12_spill] sm:$0xff] }
 0x336   :  { %v5246_v49 = vadd.f32 %v3507_v31, %v7736_v52  ;;  %v3509_v56 = vpop.f32.mrb[113].mxu0  ;;  %v3765_v14 = vadd.f32 %v7602_v32, %v3764_v24  ;;  %v5145_v5 = vpop.f32.mrb[178].mxu1 }
 0x337   :  { %v4326_v13 = vadd.f32 %v4325_v45, %v4263_v62  ;;  %v4193_v10 = vadd.f32 %v4192_v38, %v3760_v42  ;;  %v3510_v1 = vpop.f32.mrb[114].mxu0  ;;  %v3776_v9 = vadd.f32 %v7623_v19, %v5145_v5  ;;  %v3767_v59 = vpop.f32.mrb[179].mxu1  ;;  %v4267_v6 = vmul.f32 %v3773_v22, %v3773_v22  ;;  %v7740_v45 = vld [vmem:[#allocation14_spill] sm:$0xff] }
 0x338   :  { %v4265_v46 = vmul.f32 %v3765_v14, %v3765_v14  ;;  %v5247_v44 = vadd.f32 %v3510_v1, %v7737_v33  ;;  %v3512_v51 = vpop.f32.mrb[115].mxu0  ;;  %v3768_v57 = vadd.f32 %v7607_v39, %v3767_v59 }
 0x339   :  { %v4194_v50 = vadd.f32 %v4193_v10, %v3765_v14  ;;  %v4327_v28 = vadd.f32 %v4326_v13, %v4264_v40  ;;  %v4975_v21 = vpack.c.bf16 %v3776_v9, %v3773_v22  ;;  %v4268_v43 = vmul.f32 %v3776_v9, %v3776_v9 }
 0x33a   :  { %v4970_v15 = vpack.c.bf16 %v3768_v57, %v3765_v14  ;;  %v4266_v20 = vmul.f32 %v3768_v57, %v3768_v57 }
 0x33b   :  { %v4328_v32 = vadd.f32 %v4327_v28, %v4265_v46  ;;  %5031 = vst [vmem:[%s7706_s2 + $0xc8] sm:$0xff] %v4975_v21   ;;  %v4195_v16 = vadd.f32 %v4194_v50, %v3768_v57 }
 0x33c   :  { %5030 = vst [vmem:[%s7706_s2 + $0xc0] sm:$0xff] %v4970_v15   ;;  %v5148_v19 = vpop.f32.mrb[180].mxu1 }
 0x33d   :  { %v4196_v7 = vadd.f32 %v4195_v16, %v3773_v22  ;;  %v4329_v25 = vadd.f32 %v4328_v32, %v4266_v20  ;;  %v3515_v39 = vpop.f32.mrb[116].mxu0  ;;  %v3789_v34 = vadd.f32 %v5244_v12, %v5148_v19  ;;  %v3780_v41 = vpop.f32.mrb[181].mxu1 }
 0x33e   :  { %v5248_v11 = vadd.f32 %v3515_v39, %v7738_v54  ;;  %v3517_v29 = vpop.f32.mrb[117].mxu0  ;;  %v3781_v58 = vadd.f32 %v7634_v48, %v3780_v41  ;;  %v5149_v60 = vpop.f32.mrb[182].mxu1 }
 0x33f   :  { %v4330_v37 = vadd.f32 %v4329_v25, %v4267_v6  ;;  %v4197_v23 = vadd.f32 %v4196_v7, %v3776_v9  ;;  %v3518_v63 = vpop.f32.mrb[118].mxu0  ;;  %v3792_v2 = vadd.f32 %v5245_v3, %v5149_v60  ;;  %v3783_v42 = vpop.f32.mrb[183].mxu1  ;;  %v4271_v36 = vmul.f32 %v3789_v34, %v3789_v34  ;;  %v7741_v9 = vld [vmem:[#allocation15_spill] sm:$0xff]  ;;  %v7742_v7 = vld [vmem:[#allocation16_spill] sm:$0xff] }
 0x340   :  { %v4269_v17 = vmul.f32 %v3781_v58, %v3781_v58  ;;  %v5249_v0 = vadd.f32 %v3518_v63, %v7739_v18  ;;  %v3520_v8 = vpop.f32.mrb[119].mxu0  ;;  %v3784_v35 = vadd.f32 %v7639_v55, %v3783_v42 }
 0x341   :  { %v4198_v12 = vadd.f32 %v4197_v23, %v3781_v58  ;;  %v4331_v27 = vadd.f32 %v4330_v37, %v4268_v43  ;;  %v4985_v53 = vpack.c.bf16 %v3792_v2, %v3789_v34  ;;  %v4272_v56 = vmul.f32 %v3792_v2, %v3792_v2  ;;  %v7743_v23 = vld [vmem:[#allocation17_spill] sm:$0xff] }
 0x342   :  { %v4980_v4 = vpack.c.bf16 %v3784_v35, %v3781_v58  ;;  %v4270_v61 = vmul.f32 %v3784_v35, %v3784_v35 }
 0x343   :  { %v4332_v26 = vadd.f32 %v4331_v27, %v4269_v17  ;;  %5033 = vst [vmem:[%s7706_s2 + $0xd8] sm:$0xff] %v4985_v53   ;;  %v4199_v48 = vadd.f32 %v4198_v12, %v3784_v35 }
 0x344   :  { %5032 = vst [vmem:[%s7706_s2 + $0xd0] sm:$0xff] %v4980_v4   ;;  %v5152_v3 = vpop.f32.mrb[184].mxu1 }
 0x345   :  { %v4200_v47 = vadd.f32 %v4199_v48, %v3789_v34  ;;  %v4333_v30 = vadd.f32 %v4332_v26, %v4270_v61  ;;  %v3523_v55 = vpop.f32.mrb[120].mxu0  ;;  %v3805_v62 = vadd.f32 %v5248_v11, %v5152_v3  ;;  %v3796_v38 = vpop.f32.mrb[185].mxu1 }
 0x346   :  { %v5250_v31 = vadd.f32 %v3523_v55, %v7740_v45  ;;  %v3525_v22 = vpop.f32.mrb[121].mxu0  ;;  %v3797_v24 = vadd.f32 %v5246_v49, %v3796_v38  ;;  %v5153_v52 = vpop.f32.mrb[186].mxu1 }
 0x347   :  { %v4334_v14 = vadd.f32 %v4333_v30, %v4271_v36  ;;  %v4201_v5 = vadd.f32 %v4200_v47, %v3792_v2  ;;  %v3526_v40 = vpop.f32.mrb[122].mxu0  ;;  %v3808_v13 = vadd.f32 %v5249_v0, %v5153_v52  ;;  %v3799_v10 = vpop.f32.mrb[187].mxu1  ;;  %v4275_v32 = vmul.f32 %v3805_v62, %v3805_v62 }
 0x348   :  { %v4273_v1 = vmul.f32 %v3797_v24, %v3797_v24  ;;  %v5251_v59 = vadd.f32 %v3526_v40, %v7741_v9  ;;  %v3528_v46 = vpop.f32.mrb[123].mxu0  ;;  %v3800_v33 = vadd.f32 %v5247_v44, %v3799_v10 }
 0x349   :  { %v4202_v51 = vadd.f32 %v4201_v5, %v3797_v24  ;;  %v4335_v57 = vadd.f32 %v4334_v14, %v4272_v56  ;;  %v4995_v50 = vpack.c.bf16 %v3808_v13, %v3805_v62  ;;  %v4276_v54 = vmul.f32 %v3808_v13, %v3808_v13 }
 0x34a   :  { %v4990_v28 = vpack.c.bf16 %v3800_v33, %v3797_v24  ;;  %v4274_v21 = vmul.f32 %v3800_v33, %v3800_v33 }
 0x34b   :  { %v4336_v15 = vadd.f32 %v4335_v57, %v4273_v1  ;;  %5035 = vst [vmem:[%s7706_s2 + $0xe8] sm:$0xff] %v4995_v50   ;;  %v4203_v49 = vadd.f32 %v4202_v51, %v3800_v33 }
 0x34c   :  { %5034 = vst [vmem:[%s7706_s2 + $0xe0] sm:$0xff] %v4990_v28   ;;  %v5156_v20 = vpop.f32.mrb[188].mxu1 }
 0x34d   :  { %v4204_v16 = vadd.f32 %v4203_v49, %v3805_v62  ;;  %v4337_v19 = vadd.f32 %v4336_v15, %v4274_v21  ;;  %v3531_v44 = vpop.f32.mrb[124].mxu0  ;;  %v3812_v6 = vpop.f32.mrb[189].mxu1 }
 0x34e   :  { %v5252_v25 = vadd.f32 %v3531_v44, %v7742_v7  ;;  %v3533_v39 = vpop.f32.mrb[125].mxu0  ;;  %v3813_v34 = vadd.f32 %v5250_v31, %v3812_v6  ;;  %v5157_v41 = vpop.f32.mrb[190].mxu1 }
 0x34f   :  { %v4338_v11 = vadd.f32 %v4337_v19, %v4275_v32  ;;  %v4205_v29 = vadd.f32 %v4204_v16, %v3808_v13  ;;  %v3534_v58 = vpop.f32.mrb[126].mxu0  ;;  %v3815_v60 = vpop.f32.mrb[191].mxu1 }
 0x350   :  { %v3821_v43 = vadd.f32 %v5252_v25, %v5156_v20  ;;  %v4277_v37 = vmul.f32 %v3813_v34, %v3813_v34  ;;  %v5253_v63 = vadd.f32 %v3534_v58, %v7743_v23  ;;  %v3536_v2 = vpop.f32.mrb[127].mxu0  ;;  %v3816_v42 = vadd.f32 %v5251_v59, %v3815_v60 }
 0x351   :  { %v4206_v17 = vadd.f32 %v4205_v29, %v3813_v34  ;;  %v4339_v18 = vadd.f32 %v4338_v11, %v4276_v54 }
 0x352   :  { %v3824_v0 = vadd.f32 %v5253_v63, %v5157_v41  ;;  %v5000_v8 = vpack.c.bf16 %v3816_v42, %v3813_v34  ;;  %v4278_v35 = vmul.f32 %v3816_v42, %v3816_v42  ;;  %v4279_v4 = vmul.f32 %v3821_v43, %v3821_v43 }
 0x353   :  { %v4340_v12 = vadd.f32 %v4339_v18, %v4277_v37  ;;  %v4207_v27 = vadd.f32 %v4206_v17, %v3816_v42 }
 0x354   :  { %v5005_v53 = vpack.c.bf16 %v3824_v0, %v3821_v43  ;;  %5036 = vst [vmem:[%s7706_s2 + $0xf0] sm:$0xff] %v5000_v8   ;;  %v4280_v48 = vmul.f32 %v3824_v0, %v3824_v0 }
 0x355   :  { %v4208_v61 = vadd.f32 %v4207_v27, %v3821_v43  ;;  %v4341_v26 = vadd.f32 %v4340_v12, %v4278_v35 }
 0x356   :  { %5037 = vst [vmem:[%s7706_s2 + $0xf8] sm:$0xff] %v5005_v53  }
 0x357   :  { %v4209_v3 = vadd.f32 %v4208_v61, %v3824_v0  ;;  %v4342_v36 = vadd.f32 %v4341_v26, %v4279_v4 }
 0x359   :  { %v4210_v47 = vrot.slane %v4209_v3, 4  ;;  %v4343_v30 = vadd.f32 %v4342_v36, %v4280_v48 }
 0x35b   :  { %v4211_v55 = vadd.f32 %v4210_v47, %v4209_v3  ;;  %v4344_v62 = vrot.slane %v4343_v30, 4 }
 0x35d   :  { %v4212_v38 = vrot.slane %v4211_v55, 2  ;;  %v4345_v45 = vadd.f32 %v4344_v62, %v4343_v30 }
 0x35f   :  { %v4213_v31 = vadd.f32 %v4212_v38, %v4211_v55  ;;  %v4346_v22 = vrot.slane %v4345_v45, 2 }
 0x361   :  { %v4214_v24 = vrot.slane %v4213_v31, 1  ;;  %v4347_v52 = vadd.f32 %v4346_v22, %v4345_v45 }
 0x363   :  { %v4215_v56 = vadd.f32 %v4214_v24, %v4213_v31  ;;  %v4348_v14 = vrot.slane %v4347_v52, 1 }
 0x365   :  { %4216 = vst [vmem:[%s7707_s3] sm:$0x1] %v4215_v56  ;;  %v4349_v5 = vadd.f32 %v4348_v14, %v4347_v52 }
 0x367   :  { %4350 = vst [vmem:[%s7707_s3 + $0x1] sm:$0x1] %v4349_v5 }

// kernel: _lambda_.31
= control target key start
LH: loop header
LB: loop body
LE: loop exit
PB: predicated region body
PF: predicated region fallthrough
CT: control target
= control target key end

     0   :  { %s2968_s1 = inlined_call_operand.vmem [shape: bf16[1152,128], index: 1, kind: input, shape index: {}]   ;;  %s2969_s0 = inlined_call_operand.vmem [shape: bf16[128,1152], index: 0, kind: input, shape index: {}]   ;;  %s2970_s2 = inlined_call_operand.vmem [shape: bf16[128,128], index: 2, kind: output, shape index: {0}]   ;;  %s2971_s3 = inlined_call_operand.vmem [shape: f32[1,2,128], index: 3, kind: output, shape index: {1}]  }
   0x1   :  { %v2214_v0 = vld [vmem:[%s2968_s1 + $0x40] sm:$0xff]   ;;  %v2218_v4 = vld [vmem:[%s2968_s1 + $0x48] sm:$0xff]   ;;  %v2222_v8 = vld [vmem:[%s2968_s1 + $0x50] sm:$0xff]  }
   0x2   :  { %v2215_v1 = vld [vmem:[%s2968_s1 + $0xc0] sm:$0xff]   ;;  %1894 = vmatprep.subr.bf16.mxu0 %v2214_v0  ;;  %v2219_v5 = vld [vmem:[%s2968_s1 + $0xc8] sm:$0xff]   ;;  %v2223_v9 = vld [vmem:[%s2968_s1 + $0xd0] sm:$0xff]  }
   0x3   :  { %v2216_v2 = vld [vmem:[%s2968_s1] sm:$0xff]   ;;  %1958 = vmatprep.subr.bf16.mxu1 %v2215_v1  ;;  %v2220_v6 = vld [vmem:[%s2968_s1 + $0x8] sm:$0xff]   ;;  %v2224_v10 = vld [vmem:[%s2968_s1 + $0x10] sm:$0xff]  }
   0x4   :  { %v2217_v3 = vld [vmem:[%s2968_s1 + $0x80] sm:$0xff]   ;;  %1895 = vmatpush3.bf16.msra.mxu0 %v2216_v2  ;;  %v2221_v7 = vld [vmem:[%s2968_s1 + $0x88] sm:$0xff]   ;;  %v2225_v11 = vld [vmem:[%s2968_s1 + $0x90] sm:$0xff]  }
   0x5   :  { %1959 = vmatpush3.bf16.msra.mxu1 %v2217_v3  ;;  %1896 = vmatprep.subr.bf16.mxu0 %v2218_v4  ;;  %v2226_v12 = vld [vmem:[%s2968_s1 + $0x58] sm:$0xff]   ;;  %v2230_v16 = vld [vmem:[%s2968_s1 + $0x60] sm:$0xff]   ;;  %v2234_v20 = vld [vmem:[%s2968_s1 + $0x68] sm:$0xff]  }
   0x6   :  { %1960 = vmatprep.subr.bf16.mxu1 %v2219_v5  ;;  %v2227_v13 = vld [vmem:[%s2968_s1 + $0xd8] sm:$0xff]   ;;  %v2231_v17 = vld [vmem:[%s2968_s1 + $0xe0] sm:$0xff]   ;;  %v2235_v21 = vld [vmem:[%s2968_s1 + $0xe8] sm:$0xff]  }
   0x7   :  { %v2228_v14 = vld [vmem:[%s2968_s1 + $0x18] sm:$0xff]   ;;  %v2232_v18 = vld [vmem:[%s2968_s1 + $0x20] sm:$0xff]   ;;  %v2236_v22 = vld [vmem:[%s2968_s1 + $0x28] sm:$0xff]  }
   0x8   :  { %1897 = vmatpush3.bf16.msra.mxu0 %v2220_v6  ;;  %v2229_v15 = vld [vmem:[%s2968_s1 + $0x98] sm:$0xff]   ;;  %v2233_v19 = vld [vmem:[%s2968_s1 + $0xa0] sm:$0xff]   ;;  %v2237_v23 = vld [vmem:[%s2968_s1 + $0xa8] sm:$0xff]  }
   0x9   :  { %1961 = vmatpush3.bf16.msra.mxu1 %v2221_v7  ;;  %1898 = vmatprep.subr.bf16.mxu0 %v2222_v8  ;;  %v2238_v24 = vld [vmem:[%s2968_s1 + $0x70] sm:$0xff]   ;;  %v2242_v28 = vld [vmem:[%s2968_s1 + $0x78] sm:$0xff]   ;;  %v2246_v32 = vld [vmem:[%s2969_s0] ss:$36 sps:$4 sm:$0xff]  }
   0xa   :  { %1962 = vmatprep.subr.bf16.mxu1 %v2223_v9  ;;  %v2239_v25 = vld [vmem:[%s2968_s1 + $0xf0] sm:$0xff]   ;;  %v2243_v29 = vld [vmem:[%s2968_s1 + $0xf8] sm:$0xff]   ;;  %v2248_v33 = vld [vmem:[%s2969_s0 + $0x4] ss:$36 sps:$4 sm:$0xff]  }
   0xb   :  { %v2240_v26 = vld [vmem:[%s2968_s1 + $0x30] sm:$0xff]   ;;  %v2244_v30 = vld [vmem:[%s2968_s1 + $0x38] sm:$0xff]   ;;  %v2249_v34 = vld [vmem:[%s2969_s0 + $0x8] ss:$36 sps:$4 sm:$0xff]   ;;  %1070 = vmatprep.mubr.bf16.mxu0 %v2248_v33 }
   0xc   :  { %1899 = vmatpush3.bf16.msra.mxu0 %v2224_v10  ;;  %v2241_v27 = vld [vmem:[%s2968_s1 + $0xb0] sm:$0xff]   ;;  %v2245_v31 = vld [vmem:[%s2968_s1 + $0xb8] sm:$0xff]   ;;  %v2252_v36 = vld [vmem:[%s2968_s1 + $0x140] sm:$0xff]  }
   0xd   :  { %1963 = vmatpush3.bf16.msra.mxu1 %v2225_v11  ;;  %1900 = vmatprep.subr.bf16.mxu0 %v2226_v12  ;;  %v2251_v35 = vld [vmem:[%s2969_s0 + $0xc] ss:$36 sps:$4 sm:$0xff]   ;;  %v2253_v37 = vld [vmem:[%s2968_s1 + $0x100] sm:$0xff]   ;;  %v2256_v39 = vld [vmem:[%s2969_s0 + $0x54] ss:$36 sps:$4 sm:$0xff]  }
   0xe   :  { %1964 = vmatprep.subr.bf16.mxu1 %v2227_v13  ;;  %1167 = vmatprep.mubr.bf16.mxu1 %v2251_v35  ;;  %v2254_v38 = vld [vmem:[%s2969_s0 + $0x4c] ss:$36 sps:$4 sm:$0xff]   ;;  %v2262_v44 = vld [vmem:[%s2969_s0 + $0x94] ss:$36 sps:$4 sm:$0xff]   ;;  %v2264_v45 = vld [vmem:[%s2969_s0 + $0x9c] ss:$36 sps:$4 sm:$0xff]  }
   0xf   :  { %v2258_v40 = vld [vmem:[%s2969_s0 + $0x48] ss:$36 sps:$4 sm:$0xff]   ;;  %v2259_v41 = vld [vmem:[%s2969_s0 + $0x50] ss:$36 sps:$4 sm:$0xff]   ;;  %v2269_v47 = vld [vmem:[%s2968_s1 + $0x1c0] sm:$0xff]  }
  0x10   :  { %1901 = vmatpush3.bf16.msra.mxu0 %v2228_v14  ;;  %v2260_v42 = vld [vmem:[%s2968_s1 + $0x148] sm:$0xff]   ;;  %v2268_v46 = vld [vmem:[%s2968_s1 + $0x150] sm:$0xff]   ;;  %v2271_v50 = vld [vmem:[%s2968_s1 + $0x180] sm:$0xff]  }
  0x11   :  { %1965 = vmatpush3.bf16.msra.mxu1 %v2229_v15  ;;  %1902 = vmatprep.subr.bf16.mxu0 %v2230_v16  ;;  %v2261_v43 = vld [vmem:[%s2968_s1 + $0x108] sm:$0xff]   ;;  %v2266_v48 = vld [vmem:[%s2969_s0 + $0x90] ss:$36 sps:$4 sm:$0xff]   ;;  %v2267_v51 = vld [vmem:[%s2969_s0 + $0x98] ss:$36 sps:$4 sm:$0xff]  }
  0x12   :  { %1966 = vmatprep.subr.bf16.mxu1 %v2231_v17  ;;  %v2270_v49 = vld [vmem:[%s2968_s1 + $0x110] sm:$0xff]   ;;  %v2272_v52 = vld [vmem:[%s2969_s0 + $0xdc] ss:$36 sps:$4 sm:$0xff]   ;;  %v2274_v53 = vld [vmem:[%s2969_s0 + $0xe4] ss:$36 sps:$4 sm:$0xff]  }
  0x13   :  { %v2278_v54 = vld [vmem:[%s2968_s1 + $0x158] sm:$0xff]   ;;  %v2279_v55 = vld [vmem:[%s2968_s1 + $0x1c8] sm:$0xff]   ;;  %v2277_v59 = vld [vmem:[%s2969_s0 + $0xe0] ss:$36 sps:$4 sm:$0xff]  }
  0x14   :  { %1903 = vmatpush3.bf16.msra.mxu0 %v2232_v18  ;;  %v2280_v56 = vld [vmem:[%s2968_s1 + $0x118] sm:$0xff]   ;;  %v2281_v57 = vld [vmem:[%s2968_s1 + $0x188] sm:$0xff]   ;;  %v2288_v62 = vld [vmem:[%s2968_s1 + $0x160] sm:$0xff]  }
  0x15   :  { %1967 = vmatpush3.bf16.msra.mxu1 %v2233_v19  ;;  %1904 = vmatprep.subr.bf16.mxu0 %v2234_v20  ;;  %v2276_v58 = vld [vmem:[%s2969_s0 + $0xd8] ss:$36 sps:$4 sm:$0xff]   ;;  %v2282_v60 = vld [vmem:[%s2969_s0 + $0x124] ss:$36 sps:$4 sm:$0xff]   ;;  %v2284_v61 = vld [vmem:[%s2969_s0 + $0x12c] ss:$36 sps:$4 sm:$0xff]  }
  0x16   :  { %1968 = vmatprep.subr.bf16.mxu1 %v2235_v21  ;;  %v2289_v63 = vld [vmem:[%s2968_s1 + $0x1d0] sm:$0xff]   ;;  %v2290_v0 = vld [vmem:[%s2968_s1 + $0x120] sm:$0xff]   ;;  %v2287_v3 = vld [vmem:[%s2969_s0 + $0x128] ss:$36 sps:$4 sm:$0xff]  }
  0x17   :  { %v2291_v1 = vld [vmem:[%s2968_s1 + $0x190] sm:$0xff]   ;;  %v2286_v2 = vld [vmem:[%s2969_s0 + $0x120] ss:$36 sps:$4 sm:$0xff]   ;;  %v2298_v6 = vld [vmem:[%s2968_s1 + $0x168] sm:$0xff]  }
  0x18   :  { %1905 = vmatpush3.bf16.msra.mxu0 %v2236_v22  ;;  %v2292_v4 = vld [vmem:[%s2969_s0 + $0x16c] ss:$36 sps:$4 sm:$0xff]   ;;  %v2294_v5 = vld [vmem:[%s2969_s0 + $0x174] ss:$36 sps:$4 sm:$0xff]   ;;  %v2304_v14 = vld [vmem:[%s2969_s0 + $0x1bc] ss:$36 sps:$4 sm:$0xff]  }
  0x19   :  { %1969 = vmatpush3.bf16.msra.mxu1 %v2237_v23  ;;  %1906 = vmatprep.subr.bf16.mxu0 %v2238_v24  ;;  %v2299_v7 = vld [vmem:[%s2968_s1 + $0x1d8] sm:$0xff]   ;;  %v2300_v8 = vld [vmem:[%s2968_s1 + $0x128] sm:$0xff]   ;;  %v2297_v11 = vld [vmem:[%s2969_s0 + $0x170] ss:$36 sps:$4 sm:$0xff]  }
  0x1a   :  { %1970 = vmatprep.subr.bf16.mxu1 %v2239_v25  ;;  %v2301_v9 = vld [vmem:[%s2968_s1 + $0x198] sm:$0xff]   ;;  %v2296_v10 = vld [vmem:[%s2969_s0 + $0x168] ss:$36 sps:$4 sm:$0xff]   ;;  %v2308_v13 = vld [vmem:[%s2968_s1 + $0x170] sm:$0xff]  }
  0x1b   :  { %v2302_v12 = vld [vmem:[%s2969_s0 + $0x1b4] ss:$36 sps:$4 sm:$0xff]   ;;  %v2309_v15 = vld [vmem:[%s2968_s1 + $0x1e0] sm:$0xff]   ;;  %v2312_v18 = vld [vmem:[%s2968_s1 + $0x1e8] sm:$0xff]  }
  0x1c   :  { %1907 = vmatpush3.bf16.msra.mxu0 %v2240_v26  ;;  %v2310_v16 = vld [vmem:[%s2968_s1 + $0x130] sm:$0xff]   ;;  %v2311_v17 = vld [vmem:[%s2968_s1 + $0x1a0] sm:$0xff]   ;;  %v2313_v19 = vld [vmem:[%s2968_s1 + $0x1a8] sm:$0xff]  }
  0x1d   :  { %1971 = vmatpush3.bf16.msra.mxu1 %v2241_v27  ;;  %1908 = vmatprep.subr.bf16.mxu0 %v2242_v28  ;;  %v2306_v20 = vld [vmem:[%s2969_s0 + $0x1b0] ss:$36 sps:$4 sm:$0xff]   ;;  %v2307_v21 = vld [vmem:[%s2969_s0 + $0x1b8] ss:$36 sps:$4 sm:$0xff]   ;;  %v2316_v23 = vld [vmem:[%s2969_s0 + $0x204] ss:$36 sps:$4 sm:$0xff]  }
  0x1e   :  { %1972 = vmatprep.subr.bf16.mxu1 %v2243_v29  ;;  %v2314_v22 = vld [vmem:[%s2969_s0 + $0x1fc] ss:$36 sps:$4 sm:$0xff]   ;;  %v2321_v25 = vld [vmem:[%s2968_s1 + $0x1f0] sm:$0xff]  }
  0x1f   :  { %v2320_v24 = vld [vmem:[%s2968_s1 + $0x178] sm:$0xff]   ;;  %v2323_v27 = vld [vmem:[%s2968_s1 + $0x1b0] sm:$0xff]  }
  0x20   :  { %1909 = vmatpush3.bf16.msra.mxu0 %v2244_v30  ;;  %v2322_v26 = vld [vmem:[%s2968_s1 + $0x138] sm:$0xff]   ;;  %v2319_v30 = vld [vmem:[%s2969_s0 + $0x200] ss:$36 sps:$4 sm:$0xff]   ;;  %v2326_v35 = vld [vmem:[%s2969_s0 + $0x10] ss:$36 sps:$4 sm:$0xff]  }
  0x21   :  { %1973 = vmatpush3.bf16.msra.mxu1 %v2245_v31  ;;  %2022 = vmatprep.subr.bf16.mxu0 %v2252_v36  ;;  %v2324_v28 = vld [vmem:[%s2968_s1 + $0x1f8] sm:$0xff]  }
  0x22   :  { %2086 = vmatprep.subr.bf16.mxu1 %v2269_v47  ;;  %v2318_v29 = vld [vmem:[%s2969_s0 + $0x1f8] ss:$36 sps:$4 sm:$0xff]   ;;  %v2344_v47 = vld [vmem:[%s2969_s0 + $0xa0] ss:$36 sps:$4 sm:$0xff]  }
  0x23   :  { %1071 = vmatmul.mubr.bf16.vlgmr.msra.gmra.mrb[0].mxu0 %v2246_v32  ;;  %v2325_v31 = vld [vmem:[%s2968_s1 + $0x1b8] sm:$0xff]   ;;  %v2332_v32 = vld [vmem:[%s2968_s1 + $0x200] sm:$0xff]  }
  0x24   :  { %1168 = vmatmul.mubr.bf16.vlgmr.msra.gmra.mrb[0].mxu1 %v2249_v34  ;;  %2023 = vmatpush3.bf16.msra.mxu0 %v2253_v37  ;;  %v2328_v33 = vld [vmem:[%s2969_s0 + $0x14] ss:$36 sps:$4 sm:$0xff]   ;;  %v2331_v34 = vld [vmem:[%s2969_s0 + $0x1c] ss:$36 sps:$4 sm:$0xff]  }
  0x25   :  { %1078 = vmatprep.mubr.bf16.mxu0 %v2254_v38  ;;  %1175 = vmatprep.mubr.bf16.mxu1 %v2256_v39  ;;  %v2329_v36 = vld [vmem:[%s2969_s0 + $0x18] ss:$36 sps:$4 sm:$0xff]   ;;  %v2335_v38 = vld [vmem:[%s2969_s0 + $0x64] ss:$36 sps:$4 sm:$0xff]  }
  0x26   :  { %2024 = vmatprep.subr.bf16.mxu0 %v2260_v42  ;;  %2087 = vmatpush3.bf16.msra.mxu1 %v2271_v50  ;;  %v2333_v37 = vld [vmem:[%s2969_s0 + $0x5c] ss:$36 sps:$4 sm:$0xff]   ;;  %v2339_v39 = vld [vmem:[%s2968_s1 + $0x208] sm:$0xff]   ;;  %v2349_v50 = vld [vmem:[%s2969_s0 + $0xf4] ss:$36 sps:$4 sm:$0xff]  }
  0x27   :  { %2088 = vmatprep.subr.bf16.mxu1 %v2279_v55  ;;  %v2338_v42 = vld [vmem:[%s2969_s0 + $0x60] ss:$36 sps:$4 sm:$0xff]   ;;  %v2354_v55 = vld [vmem:[%s2969_s0 + $0x134] ss:$36 sps:$4 sm:$0xff]  }
  0x28   :  { %2025 = vmatpush3.bf16.msra.mxu0 %v2261_v43  ;;  %v2340_v43 = vld [vmem:[%s2969_s0 + $0xa4] ss:$36 sps:$4 sm:$0xff]  }
  0x29   :  { %2026 = vmatprep.subr.bf16.mxu0 %v2268_v46  ;;  %v2360_v46 = vld [vmem:[%s2968_s1 + $0x220] sm:$0xff]  }
  0x2a   :  { %2089 = vmatpush3.bf16.msra.mxu1 %v2281_v57  ;;  %v2381_v57 = vld [vmem:[%s2968_s1 + $0x238] sm:$0xff]  }
  0x2b   :  { %1079 = vmatmul.mubr.bf16.gmra.mrb[4].mxu0 %v2258_v40  ;;  %2090 = vmatprep.subr.bf16.mxu1 %v2289_v63  ;;  %v2346_v40 = vld [vmem:[%s2968_s1 + $0x210] sm:$0xff]   ;;  %v2366_v63 = vld [vmem:[%s2969_s0 + $0x180] ss:$36 sps:$4 sm:$0xff]  }
  0x2c   :  { %1176 = vmatmul.mubr.bf16.gmra.mrb[4].mxu1 %v2259_v41  ;;  %1086 = vmatprep.mubr.bf16.mxu0 %v2262_v44  ;;  %v2337_v41 = vld [vmem:[%s2969_s0 + $0x58] ss:$36 sps:$4 sm:$0xff]   ;;  %v2342_v44 = vld [vmem:[%s2969_s0 + $0xac] ss:$36 sps:$4 sm:$0xff]  }
  0x2d   :  { %1183 = vmatprep.mubr.bf16.mxu1 %v2264_v45  ;;  %2027 = vmatpush3.bf16.msra.mxu0 %v2270_v49  ;;  %v2353_v45 = vld [vmem:[%s2968_s1 + $0x218] sm:$0xff]   ;;  %v2347_v49 = vld [vmem:[%s2969_s0 + $0xec] ss:$36 sps:$4 sm:$0xff]  }
  0x2e   :  { %2028 = vmatprep.subr.bf16.mxu0 %v2278_v54  ;;  %2091 = vmatpush3.bf16.msra.mxu1 %v2291_v1  ;;  %v2352_v54 = vld [vmem:[%s2969_s0 + $0xf0] ss:$36 sps:$4 sm:$0xff]  }
  0x2f   :  { %2092 = vmatprep.subr.bf16.mxu1 %v2299_v7  ;;  %v2370_v1 = vld [vmem:[%s2969_s0 + $0x1cc] ss:$36 sps:$4 sm:$0xff]  }
  0x30   :  { %v2380_v7 = vld [vmem:[%s2969_s0 + $0x210] ss:$36 sps:$4 sm:$0xff]  }
  0x31   :  { %2029 = vmatpush3.bf16.msra.mxu0 %v2280_v56  ;;  %v2356_v56 = vld [vmem:[%s2969_s0 + $0x13c] ss:$36 sps:$4 sm:$0xff]  }
  0x32   :  { %2030 = vmatprep.subr.bf16.mxu0 %v2288_v62  ;;  %2093 = vmatpush3.bf16.msra.mxu1 %v2301_v9  ;;  %v2365_v62 = vld [vmem:[%s2969_s0 + $0x178] ss:$36 sps:$4 sm:$0xff]   ;;  %v2383_v9 = vld [vmem:[%s2969_s0 + $0x140] ss:$36 sps:$4 sm:$0xff]  }
  0x33   :  { %1087 = vmatmul.mubr.bf16.gmra.mrb[8].mxu0 %v2266_v48  ;;  %2094 = vmatprep.subr.bf16.mxu1 %v2309_v15  ;;  %v2345_v48 = vld [vmem:[%s2969_s0 + $0xa8] ss:$36 sps:$4 sm:$0xff]   ;;  %v2389_v15 = vld [vmem:[%s2969_s0 + $0x218] ss:$36 sps:$4 sm:$0xff]  }
  0x34   :  { %1184 = vmatmul.mubr.bf16.gmra.mrb[8].mxu1 %v2267_v51  ;;  %1094 = vmatprep.mubr.bf16.mxu0 %v2272_v52  ;;  %v2367_v51 = vld [vmem:[%s2968_s1 + $0x228] sm:$0xff]  }
  0x35   :  { %1191 = vmatprep.mubr.bf16.mxu1 %v2274_v53  ;;  %2031 = vmatpush3.bf16.msra.mxu0 %v2290_v0  ;;  %v2351_v52 = vld [vmem:[%s2969_s0 + $0xe8] ss:$36 sps:$4 sm:$0xff]   ;;  %v2374_v53 = vld [vmem:[%s2968_s1 + $0x230] sm:$0xff]  }
  0x36   :  { %2032 = vmatprep.subr.bf16.mxu0 %v2298_v6  ;;  %2095 = vmatpush3.bf16.msra.mxu1 %v2311_v17  ;;  %v2368_v0 = vld [vmem:[%s2969_s0 + $0x1c4] ss:$36 sps:$4 sm:$0xff]  }
  0x37   :  { %2096 = vmatprep.subr.bf16.mxu1 %v2312_v18  ;;  %v2379_v6 = vld [vmem:[%s2969_s0 + $0x208] ss:$36 sps:$4 sm:$0xff]  }
  0x39   :  { %2033 = vmatpush3.bf16.msra.mxu0 %v2300_v8  ;;  %v2382_v8 = vld [vmem:[%s2969_s0 + $0x20] ss:$36 sps:$4 sm:$0xff]  }
  0x3a   :  { %2034 = vmatprep.subr.bf16.mxu0 %v2308_v13  ;;  %2097 = vmatpush3.bf16.msra.mxu1 %v2313_v19  ;;  %v2387_v13 = vld [vmem:[%s2969_s0 + $0x1d0] ss:$36 sps:$4 sm:$0xff]  }
  0x3b   :  { %1095 = vmatmul.mubr.bf16.gmra.mrb[12].mxu0 %v2276_v58  ;;  %2098 = vmatprep.subr.bf16.mxu1 %v2321_v25  ;;  %v2358_v58 = vld [vmem:[%s2969_s0 + $0x130] ss:$36 sps:$4 sm:$0xff]  }
  0x3c   :  { %1192 = vmatmul.mubr.bf16.gmra.mrb[12].mxu1 %v2277_v59  ;;  %1102 = vmatprep.mubr.bf16.mxu0 %v2282_v60  ;;  %v2359_v59 = vld [vmem:[%s2969_s0 + $0x138] ss:$36 sps:$4 sm:$0xff]  }
  0x3d   :  { %1199 = vmatprep.mubr.bf16.mxu1 %v2284_v61  ;;  %2035 = vmatpush3.bf16.msra.mxu0 %v2310_v16  ;;  %v2361_v60 = vld [vmem:[%s2969_s0 + $0x17c] ss:$36 sps:$4 sm:$0xff]   ;;  %v2363_v61 = vld [vmem:[%s2969_s0 + $0x184] ss:$36 sps:$4 sm:$0xff]  }
  0x3e   :  { %2036 = vmatprep.subr.bf16.mxu0 %v2320_v24  ;;  %2099 = vmatpush3.bf16.msra.mxu1 %v2323_v27 }
  0x3f   :  { %2100 = vmatprep.subr.bf16.mxu1 %v2324_v28 }
  0x41   :  { %2037 = vmatpush3.bf16.msra.mxu0 %v2322_v26 }
  0x42   :  { %2166 = vmatprep.subr.bf16.mxu0 %v2332_v32  ;;  %2101 = vmatpush3.bf16.msra.mxu1 %v2325_v31 }
  0x43   :  { %1103 = vmatmul.mubr.bf16.gmra.mrb[16].mxu0 %v2286_v2  ;;  %2198 = vmatprep.subr.bf16.mxu1 %v2332_v32  ;;  %v2372_v2 = vld [vmem:[%s2969_s0 + $0x1c0] ss:$36 sps:$4 sm:$0xff]  }
  0x44   :  { %1200 = vmatmul.mubr.bf16.gmra.mrb[16].mxu1 %v2287_v3  ;;  %1110 = vmatprep.mubr.bf16.mxu0 %v2292_v4  ;;  %v2373_v3 = vld [vmem:[%s2969_s0 + $0x1c8] ss:$36 sps:$4 sm:$0xff]  }
  0x45   :  { %1207 = vmatprep.mubr.bf16.mxu1 %v2294_v5  ;;  %v2375_v4 = vld [vmem:[%s2969_s0 + $0x20c] ss:$36 sps:$4 sm:$0xff]   ;;  %v2377_v5 = vld [vmem:[%s2969_s0 + $0x214] ss:$36 sps:$4 sm:$0xff]  }
  0x4b   :  { %1111 = vmatmul.mubr.bf16.gmra.mrb[20].mxu0 %v2296_v10  ;;  %v2384_v10 = vld [vmem:[%s2969_s0 + $0x68] ss:$36 sps:$4 sm:$0xff]  }
  0x4c   :  { %1208 = vmatmul.mubr.bf16.gmra.mrb[20].mxu1 %v2297_v11  ;;  %1118 = vmatprep.mubr.bf16.mxu0 %v2302_v12  ;;  %v2385_v11 = vld [vmem:[%s2969_s0 + $0x188] ss:$36 sps:$4 sm:$0xff]   ;;  %v2386_v12 = vld [vmem:[%s2969_s0 + $0xb0] ss:$36 sps:$4 sm:$0xff]  }
  0x4d   :  { %1215 = vmatprep.mubr.bf16.mxu1 %v2304_v14  ;;  %v2388_v14 = vld [vmem:[%s2969_s0 + $0xf8] ss:$36 sps:$4 sm:$0xff]  }
  0x53   :  { %1119 = vmatmul.mubr.bf16.gmra.mrb[24].mxu0 %v2306_v20 }
  0x54   :  { %1216 = vmatmul.mubr.bf16.gmra.mrb[24].mxu1 %v2307_v21  ;;  %1126 = vmatprep.mubr.bf16.mxu0 %v2314_v22 }
  0x55   :  { %1223 = vmatprep.mubr.bf16.mxu1 %v2316_v23 }
  0x5b   :  { %1127 = vmatmul.mubr.bf16.gmra.mrb[28].mxu0 %v2318_v29 }
  0x5c   :  { %1224 = vmatmul.mubr.bf16.gmra.mrb[28].mxu1 %v2319_v30  ;;  %1264 = vmatprep.mubr.bf16.mxu0 %v2328_v33 }
  0x5d   :  { %1361 = vmatprep.mubr.bf16.mxu1 %v2331_v34 }
  0x63   :  { %1265 = vmatmul.mubr.bf16.vlgmr.msra.gmra.mrb[32].mxu0 %v2326_v35 }
  0x64   :  { %1362 = vmatmul.mubr.bf16.vlgmr.msra.gmra.mrb[32].mxu1 %v2329_v36  ;;  %2167 = vmatpush3.bf16.msra.mxu0 %v2332_v32 }
  0x65   :  { %1272 = vmatprep.mubr.bf16.mxu0 %v2333_v37  ;;  %1369 = vmatprep.mubr.bf16.mxu1 %v2335_v38 }
  0x66   :  { %2168 = vmatprep.subr.bf16.mxu0 %v2339_v39  ;;  %2206 = vmatpush3.bf16.msra.mxu1 %v2332_v32 }
  0x67   :  { %2199 = vmatprep.subr.bf16.mxu1 %v2339_v39 }
  0x68   :  { %2169 = vmatpush3.bf16.msra.mxu0 %v2339_v39 }
  0x69   :  { %2170 = vmatprep.subr.bf16.mxu0 %v2346_v40 }
  0x6a   :  { %2207 = vmatpush3.bf16.msra.mxu1 %v2339_v39 }
  0x6b   :  { %1273 = vmatmul.mubr.bf16.gmra.mrb[36].mxu0 %v2337_v41  ;;  %2200 = vmatprep.subr.bf16.mxu1 %v2346_v40 }
  0x6c   :  { %1370 = vmatmul.mubr.bf16.gmra.mrb[36].mxu1 %v2338_v42  ;;  %1280 = vmatprep.mubr.bf16.mxu0 %v2340_v43 }
  0x6d   :  { %1377 = vmatprep.mubr.bf16.mxu1 %v2342_v44  ;;  %2171 = vmatpush3.bf16.msra.mxu0 %v2346_v40 }
  0x6e   :  { %2172 = vmatprep.subr.bf16.mxu0 %v2353_v45  ;;  %2208 = vmatpush3.bf16.msra.mxu1 %v2346_v40 }
  0x6f   :  { %2201 = vmatprep.subr.bf16.mxu1 %v2353_v45 }
  0x71   :  { %2173 = vmatpush3.bf16.msra.mxu0 %v2353_v45 }
  0x72   :  { %2174 = vmatprep.subr.bf16.mxu0 %v2360_v46  ;;  %2209 = vmatpush3.bf16.msra.mxu1 %v2353_v45 }
  0x73   :  { %1281 = vmatmul.mubr.bf16.gmra.mrb[40].mxu0 %v2344_v47  ;;  %2202 = vmatprep.subr.bf16.mxu1 %v2360_v46 }
  0x74   :  { %1378 = vmatmul.mubr.bf16.gmra.mrb[40].mxu1 %v2345_v48  ;;  %1288 = vmatprep.mubr.bf16.mxu0 %v2347_v49 }
  0x75   :  { %1385 = vmatprep.mubr.bf16.mxu1 %v2349_v50  ;;  %2175 = vmatpush3.bf16.msra.mxu0 %v2360_v46 }
  0x76   :  { %2176 = vmatprep.subr.bf16.mxu0 %v2367_v51  ;;  %2210 = vmatpush3.bf16.msra.mxu1 %v2360_v46 }
  0x77   :  { %2203 = vmatprep.subr.bf16.mxu1 %v2367_v51 }
  0x79   :  { %2177 = vmatpush3.bf16.msra.mxu0 %v2367_v51 }
  0x7a   :  { %2178 = vmatprep.subr.bf16.mxu0 %v2374_v53  ;;  %2211 = vmatpush3.bf16.msra.mxu1 %v2367_v51 }
  0x7b   :  { %1289 = vmatmul.mubr.bf16.gmra.mrb[44].mxu0 %v2351_v52  ;;  %2204 = vmatprep.subr.bf16.mxu1 %v2374_v53 }
  0x7c   :  { %1386 = vmatmul.mubr.bf16.gmra.mrb[44].mxu1 %v2352_v54  ;;  %1296 = vmatprep.mubr.bf16.mxu0 %v2354_v55 }
  0x7d   :  { %1393 = vmatprep.mubr.bf16.mxu1 %v2356_v56  ;;  %2179 = vmatpush3.bf16.msra.mxu0 %v2374_v53 }
  0x7e   :  { %2180 = vmatprep.subr.bf16.mxu0 %v2381_v57  ;;  %2212 = vmatpush3.bf16.msra.mxu1 %v2374_v53 }
  0x7f   :  { %2205 = vmatprep.subr.bf16.mxu1 %v2381_v57 }
  0x81   :  { %2181 = vmatpush3.bf16.msra.mxu0 %v2381_v57 }
  0x82   :  { %2213 = vmatpush3.bf16.msra.mxu1 %v2381_v57 }
  0x83   :  { %1297 = vmatmul.mubr.bf16.gmra.mrb[48].mxu0 %v2358_v58 }
  0x84   :  { %1394 = vmatmul.mubr.bf16.gmra.mrb[48].mxu1 %v2359_v59  ;;  %1304 = vmatprep.mubr.bf16.mxu0 %v2361_v60 }
  0x85   :  { %1401 = vmatprep.mubr.bf16.mxu1 %v2363_v61 }
  0x8b   :  { %1305 = vmatmul.mubr.bf16.gmra.mrb[52].mxu0 %v2365_v62 }
  0x8c   :  { %1402 = vmatmul.mubr.bf16.gmra.mrb[52].mxu1 %v2366_v63  ;;  %1312 = vmatprep.mubr.bf16.mxu0 %v2368_v0 }
  0x8d   :  { %1409 = vmatprep.mubr.bf16.mxu1 %v2370_v1 }
  0x93   :  { %1313 = vmatmul.mubr.bf16.gmra.mrb[56].mxu0 %v2372_v2 }
  0x94   :  { %1410 = vmatmul.mubr.bf16.gmra.mrb[56].mxu1 %v2373_v3  ;;  %1320 = vmatprep.mubr.bf16.mxu0 %v2375_v4 }
  0x95   :  { %1417 = vmatprep.mubr.bf16.mxu1 %v2377_v5 }
  0x9b   :  { %1321 = vmatmul.mubr.bf16.gmra.mrb[60].mxu0 %v2379_v6 }
  0x9c   :  { %1418 = vmatmul.mubr.bf16.gmra.mrb[60].mxu1 %v2380_v7  ;;  %2182 = vmatprep.mubr.bf16.mxu0 %v2382_v8 }
  0x9d   :  { %2190 = vmatprep.mubr.bf16.mxu1 %v2383_v9 }
  0xa3   :  { %2183 = vmatmul.mubr.bf16.vlgmr.msra.gmra.mrb[64].mxu0 %v2384_v10 }
  0xa4   :  { %2191 = vmatmul.mubr.bf16.vlgmr.msra.gmra.mrb[64].mxu1 %v2385_v11  ;;  %2186 = vmatprep.mubr.bf16.mxu0 %v2386_v12 }
  0xa5   :  { %2194 = vmatprep.mubr.bf16.mxu1 %v2387_v13 }
  0xab   :  { %2187 = vmatmul.mubr.bf16.gmra.mrb[68].mxu0 %v2388_v14 }
  0xac   :  { %2195 = vmatmul.mubr.bf16.gmra.mrb[68].mxu1 %v2389_v15 }
  0xf6   :  { %v1910_v16 = vpop.f32.mrb[0].mxu0 }
  0xf7   :  { %v1974_v17 = vpop.f32.mrb[0].mxu1  ;;  %v1911_v18 = vpop.f32.mrb[1].mxu0 }
  0xf8   :  { %v1912_v19 = vadd.f32 %v1911_v18, %v1910_v16  ;;  %v1975_v20 = vpop.f32.mrb[1].mxu1  ;;  %v1913_v21 = vpop.f32.mrb[2].mxu0 }
  0xf9   :  { %v1976_v22 = vadd.f32 %v1975_v20, %v1974_v17  ;;  %v1977_v23 = vpop.f32.mrb[2].mxu1  ;;  %v1914_v24 = vpop.f32.mrb[3].mxu0 }
  0xfa   :  { %v1915_v25 = vadd.f32 %v1914_v24, %v1913_v21  ;;  %v1978_v26 = vpop.f32.mrb[3].mxu1 }
  0xfb   :  { %v2842_v27 = vadd.f32 %v1976_v22, %v1912_v19  ;;  %v1979_v28 = vadd.f32 %v1978_v26, %v1977_v23 }
  0xfd   :  { %v2844_v29 = vadd.f32 %v1979_v28, %v1915_v25 }
  0xfe   :  { %v1916_v30 = vpop.f32.mrb[4].mxu0 }
  0xff   :  { %v1980_v31 = vpop.f32.mrb[4].mxu1  ;;  %v1917_v32 = vpop.f32.mrb[5].mxu0 }
 0x100   :  { %v1918_v33 = vadd.f32 %v1917_v32, %v1916_v30  ;;  %v1981_v34 = vpop.f32.mrb[5].mxu1  ;;  %v1919_v35 = vpop.f32.mrb[6].mxu0 }
 0x101   :  { %v1982_v36 = vadd.f32 %v1981_v34, %v1980_v31  ;;  %v1983_v37 = vpop.f32.mrb[6].mxu1  ;;  %v1920_v38 = vpop.f32.mrb[7].mxu0 }
 0x102   :  { %v1921_v39 = vadd.f32 %v1920_v38, %v1919_v35  ;;  %v1984_v40 = vpop.f32.mrb[7].mxu1 }
 0x103   :  { %v2846_v41 = vadd.f32 %v1982_v36, %v1918_v33  ;;  %v1985_v42 = vadd.f32 %v1984_v40, %v1983_v37 }
 0x105   :  { %v2848_v43 = vadd.f32 %v1985_v42, %v1921_v39 }
 0x106   :  { %v1922_v44 = vpop.f32.mrb[8].mxu0 }
 0x107   :  { %v1986_v45 = vpop.f32.mrb[8].mxu1  ;;  %v1923_v46 = vpop.f32.mrb[9].mxu0 }
 0x108   :  { %v1924_v47 = vadd.f32 %v1923_v46, %v1922_v44  ;;  %v1987_v48 = vpop.f32.mrb[9].mxu1  ;;  %v1925_v49 = vpop.f32.mrb[10].mxu0 }
 0x109   :  { %v1988_v50 = vadd.f32 %v1987_v48, %v1986_v45  ;;  %v1989_v51 = vpop.f32.mrb[10].mxu1  ;;  %v1926_v52 = vpop.f32.mrb[11].mxu0 }
 0x10a   :  { %v1927_v53 = vadd.f32 %v1926_v52, %v1925_v49  ;;  %v1990_v54 = vpop.f32.mrb[11].mxu1 }
 0x10b   :  { %v2850_v55 = vadd.f32 %v1988_v50, %v1924_v47  ;;  %v1991_v56 = vadd.f32 %v1990_v54, %v1989_v51 }
 0x10d   :  { %v2852_v57 = vadd.f32 %v1991_v56, %v1927_v53 }
 0x10e   :  { %v1928_v58 = vpop.f32.mrb[12].mxu0 }
 0x10f   :  { %v1992_v59 = vpop.f32.mrb[12].mxu1  ;;  %v1929_v60 = vpop.f32.mrb[13].mxu0 }
 0x110   :  { %v1930_v61 = vadd.f32 %v1929_v60, %v1928_v58  ;;  %v1993_v62 = vpop.f32.mrb[13].mxu1  ;;  %v1931_v63 = vpop.f32.mrb[14].mxu0 }
 0x111   :  { %v1994_v0 = vadd.f32 %v1993_v62, %v1992_v59  ;;  %v1995_v1 = vpop.f32.mrb[14].mxu1  ;;  %v1932_v2 = vpop.f32.mrb[15].mxu0 }
 0x112   :  { %v1933_v3 = vadd.f32 %v1932_v2, %v1931_v63  ;;  %v1996_v4 = vpop.f32.mrb[15].mxu1 }
 0x113   :  { %v2854_v5 = vadd.f32 %v1994_v0, %v1930_v61  ;;  %v1997_v6 = vadd.f32 %v1996_v4, %v1995_v1 }
 0x115   :  { %v2856_v7 = vadd.f32 %v1997_v6, %v1933_v3 }
 0x116   :  { %v1934_v8 = vpop.f32.mrb[16].mxu0 }
 0x117   :  { %v1998_v9 = vpop.f32.mrb[16].mxu1  ;;  %v1935_v10 = vpop.f32.mrb[17].mxu0 }
 0x118   :  { %v1936_v11 = vadd.f32 %v1935_v10, %v1934_v8  ;;  %v1999_v12 = vpop.f32.mrb[17].mxu1  ;;  %v1937_v13 = vpop.f32.mrb[18].mxu0 }
 0x119   :  { %v2000_v14 = vadd.f32 %v1999_v12, %v1998_v9  ;;  %v2001_v15 = vpop.f32.mrb[18].mxu1  ;;  %v1938_v16 = vpop.f32.mrb[19].mxu0 }
 0x11a   :  { %v1939_v17 = vadd.f32 %v1938_v16, %v1937_v13  ;;  %v2002_v18 = vpop.f32.mrb[19].mxu1 }
 0x11b   :  { %v2858_v19 = vadd.f32 %v2000_v14, %v1936_v11  ;;  %v2003_v20 = vadd.f32 %v2002_v18, %v2001_v15 }
 0x11d   :  { %v2860_v21 = vadd.f32 %v2003_v20, %v1939_v17 }
 0x11e   :  { %v1940_v22 = vpop.f32.mrb[20].mxu0 }
 0x11f   :  { %v2004_v23 = vpop.f32.mrb[20].mxu1  ;;  %v1941_v24 = vpop.f32.mrb[21].mxu0 }
 0x120   :  { %v1942_v25 = vadd.f32 %v1941_v24, %v1940_v22  ;;  %v2005_v26 = vpop.f32.mrb[21].mxu1  ;;  %v1943_v28 = vpop.f32.mrb[22].mxu0 }
 0x121   :  { %v2006_v30 = vadd.f32 %v2005_v26, %v2004_v23  ;;  %v2007_v31 = vpop.f32.mrb[22].mxu1  ;;  %v1944_v32 = vpop.f32.mrb[23].mxu0 }
 0x122   :  { %v1945_v33 = vadd.f32 %v1944_v32, %v1943_v28  ;;  %v2008_v34 = vpop.f32.mrb[23].mxu1 }
 0x123   :  { %v2862_v35 = vadd.f32 %v2006_v30, %v1942_v25  ;;  %v2009_v36 = vadd.f32 %v2008_v34, %v2007_v31 }
 0x125   :  { %v2864_v37 = vadd.f32 %v2009_v36, %v1945_v33 }
 0x126   :  { %v1946_v38 = vpop.f32.mrb[24].mxu0 }
 0x127   :  { %v2010_v39 = vpop.f32.mrb[24].mxu1  ;;  %v1947_v40 = vpop.f32.mrb[25].mxu0 }
 0x128   :  { %v1948_v42 = vadd.f32 %v1947_v40, %v1946_v38  ;;  %v2011_v44 = vpop.f32.mrb[25].mxu1  ;;  %v1949_v45 = vpop.f32.mrb[26].mxu0 }
 0x129   :  { %v2012_v46 = vadd.f32 %v2011_v44, %v2010_v39  ;;  %v2013_v47 = vpop.f32.mrb[26].mxu1  ;;  %v1950_v48 = vpop.f32.mrb[27].mxu0 }
 0x12a   :  { %v1951_v49 = vadd.f32 %v1950_v48, %v1949_v45  ;;  %v2014_v50 = vpop.f32.mrb[27].mxu1 }
 0x12b   :  { %v2866_v51 = vadd.f32 %v2012_v46, %v1948_v42  ;;  %v2015_v52 = vadd.f32 %v2014_v50, %v2013_v47 }
 0x12d   :  { %v2868_v53 = vadd.f32 %v2015_v52, %v1951_v49 }
 0x12e   :  { %v1952_v54 = vpop.f32.mrb[28].mxu0 }
 0x12f   :  { %v2016_v56 = vpop.f32.mrb[28].mxu1  ;;  %v1953_v58 = vpop.f32.mrb[29].mxu0 }
 0x130   :  { %v1954_v59 = vadd.f32 %v1953_v58, %v1952_v54  ;;  %v2017_v60 = vpop.f32.mrb[29].mxu1  ;;  %v1955_v61 = vpop.f32.mrb[30].mxu0 }
 0x131   :  { %v2018_v62 = vadd.f32 %v2017_v60, %v2016_v56  ;;  %v2019_v63 = vpop.f32.mrb[30].mxu1  ;;  %v1956_v0 = vpop.f32.mrb[31].mxu0 }
 0x132   :  { %v1957_v1 = vadd.f32 %v1956_v0, %v1955_v61  ;;  %v2020_v2 = vpop.f32.mrb[31].mxu1 }
 0x133   :  { %v2870_v3 = vadd.f32 %v2018_v62, %v1954_v59  ;;  %v2021_v4 = vadd.f32 %v2020_v2, %v2019_v63 }
 0x135   :  { %v2872_v6 = vadd.f32 %v2021_v4, %v1957_v1 }
 0x136   :  { %v2038_v8 = vpop.f32.mrb[32].mxu0 }
 0x137   :  { %v2039_v9 = vpop.f32.mrb[33].mxu0  ;;  %v2102_v10 = vpop.f32.mrb[32].mxu1 }
 0x138   :  { %v2040_v11 = vadd.f32 %v2039_v9, %v2038_v8  ;;  %v2041_v12 = vpop.f32.mrb[34].mxu0  ;;  %v2103_v13 = vpop.f32.mrb[33].mxu1 }
 0x139   :  { %v2042_v14 = vpop.f32.mrb[35].mxu0  ;;  %v2104_v15 = vadd.f32 %v2103_v13, %v2102_v10  ;;  %v2105_v16 = vpop.f32.mrb[34].mxu1 }
 0x13a   :  { %v1267_v17 = vadd.f32 %v2040_v11, %v2842_v27  ;;  %v2043_v18 = vadd.f32 %v2042_v14, %v2041_v12  ;;  %v2106_v20 = vpop.f32.mrb[35].mxu1 }
 0x13b   :  { %v2107_v22 = vadd.f32 %v2106_v20, %v2105_v16 }
 0x13c   :  { %v1270_v23 = vadd.f32 %v2043_v18, %v2844_v29  ;;  %v2876_v24 = vadd.f32 %v2104_v15, %v1267_v17 }
 0x13e   :  { %v2044_v25 = vpop.f32.mrb[36].mxu0  ;;  %v2878_v26 = vadd.f32 %v2107_v22, %v1270_v23 }
 0x13f   :  { %v2045_v28 = vpop.f32.mrb[37].mxu0  ;;  %v2108_v30 = vpop.f32.mrb[36].mxu1 }
 0x140   :  { %v2046_v31 = vadd.f32 %v2045_v28, %v2044_v25  ;;  %v2047_v32 = vpop.f32.mrb[38].mxu0  ;;  %v2109_v33 = vpop.f32.mrb[37].mxu1 }
 0x141   :  { %v2048_v34 = vpop.f32.mrb[39].mxu0  ;;  %v2110_v36 = vadd.f32 %v2109_v33, %v2108_v30  ;;  %v2111_v38 = vpop.f32.mrb[38].mxu1 }
 0x142   :  { %v1275_v27 = vadd.f32 %v2046_v31, %v2846_v41  ;;  %v2049_v39 = vadd.f32 %v2048_v34, %v2047_v32  ;;  %v2112_v40 = vpop.f32.mrb[39].mxu1 }
 0x143   :  { %v2113_v42 = vadd.f32 %v2112_v40, %v2111_v38 }
 0x144   :  { %v1278_v29 = vadd.f32 %v2049_v39, %v2848_v43  ;;  %v2882_v44 = vadd.f32 %v2110_v36, %v1275_v27 }
 0x146   :  { %v2050_v45 = vpop.f32.mrb[40].mxu0  ;;  %v2884_v46 = vadd.f32 %v2113_v42, %v1278_v29 }
 0x147   :  { %v2051_v47 = vpop.f32.mrb[41].mxu0  ;;  %v2114_v48 = vpop.f32.mrb[40].mxu1 }
 0x148   :  { %v2052_v49 = vadd.f32 %v2051_v47, %v2050_v45  ;;  %v2053_v50 = vpop.f32.mrb[42].mxu0  ;;  %v2115_v52 = vpop.f32.mrb[41].mxu1 }
 0x149   :  { %v2054_v54 = vpop.f32.mrb[43].mxu0  ;;  %v2116_v56 = vadd.f32 %v2115_v52, %v2114_v48  ;;  %v2117_v58 = vpop.f32.mrb[42].mxu1 }
 0x14a   :  { %v1283_v41 = vadd.f32 %v2052_v49, %v2850_v55  ;;  %v2055_v59 = vadd.f32 %v2054_v54, %v2053_v50  ;;  %v2118_v60 = vpop.f32.mrb[43].mxu1 }
 0x14b   :  { %v2119_v61 = vadd.f32 %v2118_v60, %v2117_v58 }
 0x14c   :  { %v1286_v43 = vadd.f32 %v2055_v59, %v2852_v57  ;;  %v2888_v62 = vadd.f32 %v2116_v56, %v1283_v41 }
 0x14e   :  { %v2056_v63 = vpop.f32.mrb[44].mxu0  ;;  %v2890_v0 = vadd.f32 %v2119_v61, %v1286_v43 }
 0x14f   :  { %v2057_v1 = vpop.f32.mrb[45].mxu0  ;;  %v2120_v2 = vpop.f32.mrb[44].mxu1 }
 0x150   :  { %v2058_v4 = vadd.f32 %v2057_v1, %v2056_v63  ;;  %v2059_v8 = vpop.f32.mrb[46].mxu0  ;;  %v2121_v9 = vpop.f32.mrb[45].mxu1 }
 0x151   :  { %v2060_v10 = vpop.f32.mrb[47].mxu0  ;;  %v2122_v11 = vadd.f32 %v2121_v9, %v2120_v2  ;;  %v2123_v12 = vpop.f32.mrb[46].mxu1 }
 0x152   :  { %v1291_v55 = vadd.f32 %v2058_v4, %v2854_v5  ;;  %v2061_v13 = vadd.f32 %v2060_v10, %v2059_v8  ;;  %v2124_v14 = vpop.f32.mrb[47].mxu1 }
 0x153   :  { %v2125_v15 = vadd.f32 %v2124_v14, %v2123_v12 }
 0x154   :  { %v1294_v57 = vadd.f32 %v2061_v13, %v2856_v7  ;;  %v2894_v16 = vadd.f32 %v2122_v11, %v1291_v55 }
 0x156   :  { %v2062_v17 = vpop.f32.mrb[48].mxu0  ;;  %v2896_v18 = vadd.f32 %v2125_v15, %v1294_v57 }
 0x157   :  { %v2063_v20 = vpop.f32.mrb[49].mxu0  ;;  %v2126_v22 = vpop.f32.mrb[48].mxu1 }
 0x158   :  { %v2064_v23 = vadd.f32 %v2063_v20, %v2062_v17  ;;  %v2065_v25 = vpop.f32.mrb[50].mxu0  ;;  %v2127_v28 = vpop.f32.mrb[49].mxu1 }
 0x159   :  { %v2066_v30 = vpop.f32.mrb[51].mxu0  ;;  %v2128_v31 = vadd.f32 %v2127_v28, %v2126_v22  ;;  %v2129_v32 = vpop.f32.mrb[50].mxu1 }
 0x15a   :  { %v1299_v5 = vadd.f32 %v2064_v23, %v2858_v19  ;;  %v2067_v33 = vadd.f32 %v2066_v30, %v2065_v25  ;;  %v2130_v34 = vpop.f32.mrb[51].mxu1 }
 0x15b   :  { %v2131_v36 = vadd.f32 %v2130_v34, %v2129_v32 }
 0x15c   :  { %v1302_v7 = vadd.f32 %v2067_v33, %v2860_v21  ;;  %v1396_v38 = vadd.f32 %v2128_v31, %v1299_v5 }
 0x15e   :  { %v2068_v27 = vpop.f32.mrb[52].mxu0  ;;  %v2900_v39 = vadd.f32 %v2131_v36, %v1302_v7 }
 0x15f   :  { %v2069_v40 = vpop.f32.mrb[53].mxu0  ;;  %v2132_v42 = vpop.f32.mrb[52].mxu1 }
 0x160   :  { %v2070_v29 = vadd.f32 %v2069_v40, %v2068_v27  ;;  %v2071_v45 = vpop.f32.mrb[54].mxu0  ;;  %v2133_v47 = vpop.f32.mrb[53].mxu1 }
 0x161   :  { %v2072_v48 = vpop.f32.mrb[55].mxu0  ;;  %v2134_v49 = vadd.f32 %v2133_v47, %v2132_v42  ;;  %v2135_v50 = vpop.f32.mrb[54].mxu1 }
 0x162   :  { %v1307_v52 = vadd.f32 %v2070_v29, %v2862_v35  ;;  %v2073_v19 = vadd.f32 %v2072_v48, %v2071_v45  ;;  %v2136_v54 = vpop.f32.mrb[55].mxu1 }
 0x163   :  { %v2137_v56 = vadd.f32 %v2136_v54, %v2135_v50 }
 0x164   :  { %v1310_v58 = vadd.f32 %v2073_v19, %v2864_v37  ;;  %v1404_v21 = vadd.f32 %v2134_v49, %v1307_v52 }
 0x166   :  { %v2074_v41 = vpop.f32.mrb[56].mxu0  ;;  %v1407_v59 = vadd.f32 %v2137_v56, %v1310_v58 }
 0x167   :  { %v2075_v60 = vpop.f32.mrb[57].mxu0  ;;  %v2138_v61 = vpop.f32.mrb[56].mxu1 }
 0x168   :  { %v2076_v43 = vadd.f32 %v2075_v60, %v2074_v41  ;;  %v2077_v63 = vpop.f32.mrb[58].mxu0  ;;  %v2139_v1 = vpop.f32.mrb[57].mxu1 }
 0x169   :  { %v2078_v2 = vpop.f32.mrb[59].mxu0  ;;  %v2140_v4 = vadd.f32 %v2139_v1, %v2138_v61  ;;  %v2141_v8 = vpop.f32.mrb[58].mxu1 }
 0x16a   :  { %v1315_v9 = vadd.f32 %v2076_v43, %v2866_v51  ;;  %v2079_v10 = vadd.f32 %v2078_v2, %v2077_v63  ;;  %v2142_v35 = vpop.f32.mrb[59].mxu1 }
 0x16b   :  { %v2143_v11 = vadd.f32 %v2142_v35, %v2141_v8 }
 0x16c   :  { %v1318_v12 = vadd.f32 %v2079_v10, %v2868_v53  ;;  %v1412_v55 = vadd.f32 %v2140_v4, %v1315_v9 }
 0x16e   :  { %v2080_v37 = vpop.f32.mrb[60].mxu0  ;;  %v2906_v13 = vadd.f32 %v2143_v11, %v1318_v12 }
 0x16f   :  { %v2081_v14 = vpop.f32.mrb[61].mxu0  ;;  %v2144_v15 = vpop.f32.mrb[60].mxu1 }
 0x170   :  { %v2082_v57 = vadd.f32 %v2081_v14, %v2080_v37  ;;  %v2083_v17 = vpop.f32.mrb[62].mxu0  ;;  %v2145_v20 = vpop.f32.mrb[61].mxu1 }
 0x171   :  { %v2084_v22 = vpop.f32.mrb[63].mxu0  ;;  %v2146_v23 = vadd.f32 %v2145_v20, %v2144_v15  ;;  %v2147_v25 = vpop.f32.mrb[62].mxu1 }
 0x172   :  { %v1323_v28 = vadd.f32 %v2082_v57, %v2870_v3  ;;  %v2085_v51 = vadd.f32 %v2084_v22, %v2083_v17  ;;  %v2148_v30 = vpop.f32.mrb[63].mxu1 }
 0x173   :  { %v2149_v31 = vadd.f32 %v2148_v30, %v2147_v25 }
 0x174   :  { %v1326_v32 = vadd.f32 %v2085_v51, %v2872_v6  ;;  %v1420_v53 = vadd.f32 %v2146_v23, %v1323_v28 }
 0x176   :  { %v2184_v5 = vpop.f32.mrb[64].mxu0  ;;  %v1423_v33 = vadd.f32 %v2149_v31, %v1326_v32 }
 0x177   :  { %v1469_v34 = vadd.f32 %v2184_v5, %v2882_v44  ;;  %v2192_v36 = vpop.f32.mrb[64].mxu1  ;;  %v1460_v7 = vpop.f32.mrb[65].mxu0 }
 0x178   :  { %v2911_v27 = vadd.f32 %v2192_v36, %v1404_v21  ;;  %v1461_v40 = vadd.f32 %v1460_v7, %v2876_v24  ;;  %v1492_v42 = vpop.f32.mrb[65].mxu1  ;;  %v2185_v29 = vpop.f32.mrb[66].mxu0 }
 0x179   :  { %v2914_v45 = vadd.f32 %v1492_v42, %v1396_v38  ;;  %v1472_v3 = vadd.f32 %v2185_v29, %v2884_v46  ;;  %v2193_v47 = vpop.f32.mrb[66].mxu1  ;;  %v1463_v48 = vpop.f32.mrb[67].mxu0  ;;  %v1627_v58 = vmul.f32 %v1469_v34, %v1469_v34 }
 0x17a   :  { %v2917_v6 = vadd.f32 %v2193_v47, %v1407_v59  ;;  %v1464_v49 = vadd.f32 %v1463_v48, %v2878_v26  ;;  %v1495_v50 = vpop.f32.mrb[67].mxu1  ;;  %v1625_v56 = vmul.f32 %v1461_v40, %v1461_v40  ;;  %v1635_v7 = vmul.f32 %v2911_v27, %v2911_v27 }
 0x17b   :  { %v1855_v44 = vpack.c.bf16 %v1472_v3, %v1469_v34  ;;  %v1496_v52 = vadd.f32 %v1495_v50, %v2900_v39  ;;  %v1628_v4 = vmul.f32 %v1472_v3, %v1472_v3  ;;  %v1633_v32 = vmul.f32 %v2914_v45, %v2914_v45 }
 0x17c   :  { %v1875_v19 = vpack.c.bf16 %v2917_v6, %v2911_v27  ;;  %v1850_v24 = vpack.c.bf16 %v1464_v49, %v1461_v40  ;;  %v1603_v54 = vadd.f32 %v1464_v49, %v1461_v40  ;;  %v1626_v46 = vmul.f32 %v1464_v49, %v1464_v49 }
 0x17d   :  { %1887 = vst [vmem:[%s2970_s2 + $0x8] sm:$0xff] %v1855_v44   ;;  %v1870_v38 = vpack.c.bf16 %v1496_v52, %v2914_v45  ;;  %v1636_v29 = vmul.f32 %v2917_v6, %v2917_v6 }
 0x17e   :  { %1891 = vst [vmem:[%s2970_s2 + $0x28] sm:$0xff] %v1875_v19   ;;  %1851 = vst [vmem:[%s2970_s2] sm:$0xff] %v1850_v24   ;;  %v1604_v26 = vadd.f32 %v1603_v54, %v1469_v34  ;;  %v2188_v39 = vpop.f32.mrb[68].mxu0  ;;  %v1641_v21 = vadd.f32 %v1626_v46, %v1625_v56 }
 0x17f   :  { %1890 = vst [vmem:[%s2970_s2 + $0x20] sm:$0xff] %v1870_v38   ;;  %v1485_v41 = vadd.f32 %v2188_v39, %v2894_v16  ;;  %v2196_v59 = vpop.f32.mrb[68].mxu1  ;;  %v1476_v60 = vpop.f32.mrb[69].mxu0 }
 0x180   :  { %v1517_v61 = vadd.f32 %v2196_v59, %v1420_v53  ;;  %v1477_v43 = vadd.f32 %v1476_v60, %v2888_v62  ;;  %v1605_v63 = vadd.f32 %v1604_v26, %v1472_v3  ;;  %v1508_v1 = vpop.f32.mrb[69].mxu1  ;;  %v2189_v2 = vpop.f32.mrb[70].mxu0  ;;  %v1642_v8 = vadd.f32 %v1641_v21, %v1627_v58 }
 0x181   :  { %v1509_v9 = vadd.f32 %v1508_v1, %v1412_v55  ;;  %v1488_v10 = vadd.f32 %v2189_v2, %v2896_v18  ;;  %v2197_v35 = vpop.f32.mrb[70].mxu1  ;;  %v1479_v11 = vpop.f32.mrb[71].mxu0  ;;  %v1631_v28 = vmul.f32 %v1485_v41, %v1485_v41 }
 0x182   :  { %v1606_v12 = vadd.f32 %v1605_v63, %v1477_v43  ;;  %v1629_v37 = vmul.f32 %v1477_v43, %v1477_v43  ;;  %v1520_v14 = vadd.f32 %v2197_v35, %v1423_v33  ;;  %v1511_v15 = vpop.f32.mrb[71].mxu1  ;;  %v1643_v16 = vadd.f32 %v1642_v8, %v1628_v4 }
 0x183   :  { %v1865_v57 = vpack.c.bf16 %v1488_v10, %v1485_v41  ;;  %v1480_v20 = vadd.f32 %v1479_v11, %v2890_v0  ;;  %v1512_v62 = vadd.f32 %v1511_v15, %v2906_v13  ;;  %v1632_v51 = vmul.f32 %v1488_v10, %v1488_v10 }
 0x184   :  { %v1885_v17 = vpack.c.bf16 %v1520_v14, %v1517_v61  ;;  %v1644_v22 = vadd.f32 %v1643_v16, %v1629_v37  ;;  %v1634_v33 = vmul.f32 %v1496_v52, %v1496_v52  ;;  %v1637_v48 = vmul.f32 %v1509_v9, %v1509_v9 }
 0x185   :  { %1889 = vst [vmem:[%s2970_s2 + $0x18] sm:$0xff] %v1865_v57   ;;  %v1860_v18 = vpack.c.bf16 %v1480_v20, %v1477_v43  ;;  %v1607_v55 = vadd.f32 %v1606_v12, %v1480_v20  ;;  %v1630_v23 = vmul.f32 %v1480_v20, %v1480_v20  ;;  %v1880_v25 = vpack.c.bf16 %v1512_v62, %v1509_v9 }
 0x186   :  { %1893 = vst [vmem:[%s2970_s2 + $0x38] sm:$0xff] %v1885_v17   ;;  %v1638_v44 = vmul.f32 %v1512_v62, %v1512_v62  ;;  %v1639_v24 = vmul.f32 %v1517_v61, %v1517_v61  ;;  %v1640_v56 = vmul.f32 %v1520_v14, %v1520_v14 }
 0x187   :  { %1888 = vst [vmem:[%s2970_s2 + $0x10] sm:$0xff] %v1860_v18   ;;  %v1608_v0 = vadd.f32 %v1607_v55, %v1485_v41  ;;  %v1645_v13 = vadd.f32 %v1644_v22, %v1630_v23  ;;  %1892 = vst [vmem:[%s2970_s2 + $0x30] sm:$0xff] %v1880_v25  }
 0x189   :  { %v1609_v30 = vadd.f32 %v1608_v0, %v1488_v10  ;;  %v1646_v31 = vadd.f32 %v1645_v13, %v1631_v28 }
 0x18b   :  { %v1610_v53 = vadd.f32 %v1609_v30, %v2914_v45  ;;  %v1647_v5 = vadd.f32 %v1646_v31, %v1632_v51 }
 0x18d   :  { %v1648_v34 = vadd.f32 %v1647_v5, %v1633_v32  ;;  %v1611_v36 = vadd.f32 %v1610_v53, %v1496_v52 }
 0x18f   :  { %v1612_v40 = vadd.f32 %v1611_v36, %v2911_v27  ;;  %v1649_v42 = vadd.f32 %v1648_v34, %v1634_v33 }
 0x191   :  { %v1613_v3 = vadd.f32 %v1612_v40, %v2917_v6  ;;  %v1650_v47 = vadd.f32 %v1649_v42, %v1635_v7 }
 0x193   :  { %v1614_v49 = vadd.f32 %v1613_v3, %v1509_v9  ;;  %v1651_v50 = vadd.f32 %v1650_v47, %v1636_v29 }
 0x195   :  { %v1615_v45 = vadd.f32 %v1614_v49, %v1512_v62  ;;  %v1652_v19 = vadd.f32 %v1651_v50, %v1637_v48 }
 0x197   :  { %v1616_v52 = vadd.f32 %v1615_v45, %v1517_v61  ;;  %v1653_v54 = vadd.f32 %v1652_v19, %v1638_v44 }
 0x199   :  { %v1617_v46 = vadd.f32 %v1616_v52, %v1520_v14  ;;  %v1654_v38 = vadd.f32 %v1653_v54, %v1639_v24 }
 0x19b   :  { %v1618_v27 = vrot.slane %v1617_v46, 4  ;;  %v1655_v26 = vadd.f32 %v1654_v38, %v1640_v56 }
 0x19d   :  { %v1619_v39 = vadd.f32 %v1618_v27, %v1617_v46  ;;  %v1656_v58 = vrot.slane %v1655_v26, 4 }
 0x19f   :  { %v1620_v21 = vrot.slane %v1619_v39, 2  ;;  %v1657_v41 = vadd.f32 %v1656_v58, %v1655_v26 }
 0x1a1   :  { %v1621_v6 = vadd.f32 %v1620_v21, %v1619_v39  ;;  %v1658_v59 = vrot.slane %v1657_v41, 2 }
 0x1a3   :  { %v1622_v60 = vrot.slane %v1621_v6, 1  ;;  %v1659_v43 = vadd.f32 %v1658_v59, %v1657_v41 }
 0x1a5   :  { %v1623_v63 = vadd.f32 %v1622_v60, %v1621_v6  ;;  %v1660_v1 = vrot.slane %v1659_v43, 1 }
 0x1a7   :  { %1624 = vst [vmem:[%s2971_s3] sm:$0x1] %v1623_v63  ;;  %v1661_v61 = vadd.f32 %v1660_v1, %v1659_v43 }
 0x1a9   :  { %1662 = vst [vmem:[%s2971_s3 + $0x1] sm:$0x1] %v1661_v61 }

// kernel: _lambda_.34
= control target key start
LH: loop header
LB: loop body
LE: loop exit
PB: predicated region body
PF: predicated region fallthrough
CT: control target
= control target key end

     0   :  { %s191_s0 = inlined_call_operand.vmem [shape: bf16[32,256], index: 0, kind: input, shape index: {}]   ;;  %s192_s1 = inlined_call_operand.vmem [shape: f32[2,128], index: 1, kind: input, shape index: {}]   ;;  %s193_s2 = inlined_call_operand.vmem [shape: bf16[32,128], index: 2, kind: output, shape index: {}]  }
   0x1   :  { %v24_v0 = vld [vmem:[%s191_s0] sm:$0xf]  ;;  %v26_v1 = vld [vmem:[%s191_s0 + $0x8] sm:$0xf]  ;;  %v28_v2 = vld [vmem:[%s191_s0 + $0x10] sm:$0xf] }
   0x2   :  { %25 = vst [vmem:[#allocation2] sm:$0xf] %v24_v0  ;;  %27 = vst [vmem:[#allocation2 + $0x4] sm:$0xf] %v26_v1  ;;  %v30_v3 = vld [vmem:[%s191_s0 + $0x18] sm:$0xf] }
   0x3   :  { %29 = vst [vmem:[#allocation2 + $0x8] sm:$0xf] %v28_v2  ;;  %31 = vst [vmem:[#allocation2 + $0xc] sm:$0xf] %v30_v3  ;;  %v122_v5 = vld [vmem:[%s192_s1] ss:$0 sm:$0xff] }
   0x4   :  { %v123_v9 = vld [vmem:[%s192_s1 + $0x1] ss:$0 sm:$0xff] }
   0x9   :  { %v133_v4 = vld [vmem:[#allocation2] sm:$0xff]  }
   0xa   :  { %v134_v6 = vunpack.c.l.bf16 %v133_v4  ;;  %v135_v7 = vunpack.c.h.bf16 %v133_v4  ;;  %v150_v8 = vld [vmem:[#allocation2 + $0x8] sm:$0xff]  }
   0xb   :  { %v138_v10 = vunpack.c.l.bf16 %v150_v8  ;;  %v139_v11 = vunpack.c.h.bf16 %v150_v8 }
   0xc   :  { %v77_v12 = vmul.f32 %v134_v6, %v122_v5  ;;  %v78_v13 = vmul.f32 %v135_v7, %v122_v5 }
   0xd   :  { %v79_v14 = vmul.f32 %v138_v10, %v122_v5  ;;  %v80_v15 = vmul.f32 %v139_v11, %v122_v5 }
   0xe   :  { %v86_v16 = vadd.f32 %v123_v9, %v77_v12  ;;  %v87_v17 = vadd.f32 %v123_v9, %v78_v13 }
   0xf   :  { %v88_v18 = vadd.f32 %v123_v9, %v79_v14  ;;  %v89_v19 = vadd.f32 %v123_v9, %v80_v15 }
  0x10   :  { %v90_v20 = vmax.f32 %v86_v16, 0.0  ;;  %v91_v21 = vmax.f32 %v87_v17, 0.0 }
  0x11   :  { %v92_v22 = vmax.f32 %v88_v18, 0.0  ;;  %v93_v23 = vmax.f32 %v89_v19, 0.0 }
  0x12   :  { %v143_v24 = vpack.c.bf16 %v91_v21, %v90_v20 }
  0x13   :  { %v148_v25 = vpack.c.bf16 %v93_v23, %v92_v22 }
  0x14   :  { %144 = vst [vmem:[%s193_s2] sm:$0xff] %v143_v24  }
  0x15   :  { %151 = vst [vmem:[%s193_s2 + $0x8] sm:$0xff] %v148_v25  }

// kernel: _lambda_.33
= control target key start
LH: loop header
LB: loop body
LE: loop exit
PB: predicated region body
PF: predicated region fallthrough
CT: control target
= control target key end

     0   :  { %s2367_s1 = inlined_call_operand.vmem [shape: bf16[1152,256], index: 1, kind: input, shape index: {}]   ;;  %s2368_s0 = inlined_call_operand.vmem [shape: bf16[32,1152], index: 0, kind: input, shape index: {}]   ;;  %s2369_s2 = inlined_call_operand.vmem [shape: bf16[32,256], index: 2, kind: output, shape index: {0}]   ;;  %s2370_s3 = inlined_call_operand.vmem [shape: f32[1,2,256], index: 3, kind: output, shape index: {1}]  }
   0x1   :  { %v1599_v0 = vld [vmem:[%s2367_s1 + $0x4] ss:$8 sps:$4 sm:$0xff]   ;;  %v1603_v2 = vld [vmem:[%s2367_s1] ss:$8 sps:$4 sm:$0xff]   ;;  %v1605_v4 = vld [vmem:[%s2367_s1 + $0x14] ss:$8 sps:$4 sm:$0xff]  }
   0x2   :  { %v1601_v1 = vld [vmem:[%s2367_s1 + $0x204] ss:$8 sps:$4 sm:$0xff]   ;;  %990 = vmatprep.subr.bf16.mxu1 %v1599_v0  ;;  %v1604_v3 = vld [vmem:[%s2367_s1 + $0x200] ss:$8 sps:$4 sm:$0xff]   ;;  %v1607_v5 = vld [vmem:[%s2367_s1 + $0x214] ss:$8 sps:$4 sm:$0xff]  }
   0x3   :  { %1096 = vmatprep.subr.bf16.mxu0 %v1601_v1  ;;  %991 = vmatpush1.bf16.msra.mxu1 %v1603_v2  ;;  %v1609_v6 = vld [vmem:[%s2367_s1 + $0x10] ss:$8 sps:$4 sm:$0xff]   ;;  %v1611_v8 = vld [vmem:[%s2367_s1 + $0x24] ss:$8 sps:$4 sm:$0xff]   ;;  %v1615_v10 = vld [vmem:[%s2367_s1 + $0x20] ss:$8 sps:$4 sm:$0xff]  }
   0x4   :  { %1097 = vmatpush1.bf16.msra.mxu0 %v1604_v3  ;;  %992 = vmatprep.subr.bf16.mxu1 %v1605_v4  ;;  %v1610_v7 = vld [vmem:[%s2367_s1 + $0x210] ss:$8 sps:$4 sm:$0xff]   ;;  %v1613_v9 = vld [vmem:[%s2367_s1 + $0x224] ss:$8 sps:$4 sm:$0xff]   ;;  %v1616_v11 = vld [vmem:[%s2367_s1 + $0x220] ss:$8 sps:$4 sm:$0xff]  }
   0x5   :  { %1098 = vmatprep.subr.bf16.mxu0 %v1607_v5  ;;  %v1617_v12 = vld [vmem:[%s2367_s1 + $0x34] ss:$8 sps:$4 sm:$0xff]   ;;  %v1621_v14 = vld [vmem:[%s2367_s1 + $0x30] ss:$8 sps:$4 sm:$0xff]   ;;  %v1623_v16 = vld [vmem:[%s2367_s1 + $0x44] ss:$8 sps:$4 sm:$0xff]  }
   0x6   :  { %v1619_v13 = vld [vmem:[%s2367_s1 + $0x234] ss:$8 sps:$4 sm:$0xff]   ;;  %v1622_v15 = vld [vmem:[%s2367_s1 + $0x230] ss:$8 sps:$4 sm:$0xff]   ;;  %v1625_v17 = vld [vmem:[%s2367_s1 + $0x244] ss:$8 sps:$4 sm:$0xff]  }
   0x7   :  { %993 = vmatpush1.bf16.msra.mxu1 %v1609_v6  ;;  %v1627_v18 = vld [vmem:[%s2367_s1 + $0x40] ss:$8 sps:$4 sm:$0xff]   ;;  %v1629_v20 = vld [vmem:[%s2367_s1 + $0x54] ss:$8 sps:$4 sm:$0xff]   ;;  %v1633_v22 = vld [vmem:[%s2367_s1 + $0x50] ss:$8 sps:$4 sm:$0xff]  }
   0x8   :  { %1099 = vmatpush1.bf16.msra.mxu0 %v1610_v7  ;;  %994 = vmatprep.subr.bf16.mxu1 %v1611_v8  ;;  %v1628_v19 = vld [vmem:[%s2367_s1 + $0x240] ss:$8 sps:$4 sm:$0xff]   ;;  %v1631_v21 = vld [vmem:[%s2367_s1 + $0x254] ss:$8 sps:$4 sm:$0xff]   ;;  %v1634_v23 = vld [vmem:[%s2367_s1 + $0x250] ss:$8 sps:$4 sm:$0xff]  }
   0x9   :  { %1100 = vmatprep.subr.bf16.mxu0 %v1613_v9  ;;  %v1635_v24 = vld [vmem:[%s2367_s1 + $0x64] ss:$8 sps:$4 sm:$0xff]   ;;  %v1639_v26 = vld [vmem:[%s2367_s1 + $0x60] ss:$8 sps:$4 sm:$0xff]   ;;  %v1641_v28 = vld [vmem:[%s2367_s1 + $0x74] ss:$8 sps:$4 sm:$0xff]  }
   0xa   :  { %v1637_v25 = vld [vmem:[%s2367_s1 + $0x264] ss:$8 sps:$4 sm:$0xff]   ;;  %v1640_v27 = vld [vmem:[%s2367_s1 + $0x260] ss:$8 sps:$4 sm:$0xff]   ;;  %v1643_v29 = vld [vmem:[%s2367_s1 + $0x274] ss:$8 sps:$4 sm:$0xff]  }
   0xb   :  { %995 = vmatpush1.bf16.msra.mxu1 %v1615_v10  ;;  %v1645_v30 = vld [vmem:[%s2367_s1 + $0x70] ss:$8 sps:$4 sm:$0xff]   ;;  %v1647_v32 = vld [vmem:[%s2367_s1 + $0x84] ss:$8 sps:$4 sm:$0xff]   ;;  %v1651_v34 = vld [vmem:[%s2367_s1 + $0x80] ss:$8 sps:$4 sm:$0xff]  }
   0xc   :  { %1101 = vmatpush1.bf16.msra.mxu0 %v1616_v11  ;;  %996 = vmatprep.subr.bf16.mxu1 %v1617_v12  ;;  %v1646_v31 = vld [vmem:[%s2367_s1 + $0x270] ss:$8 sps:$4 sm:$0xff]   ;;  %v1649_v33 = vld [vmem:[%s2367_s1 + $0x284] ss:$8 sps:$4 sm:$0xff]   ;;  %v1652_v35 = vld [vmem:[%s2367_s1 + $0x280] ss:$8 sps:$4 sm:$0xff]  }
   0xd   :  { %1102 = vmatprep.subr.bf16.mxu0 %v1619_v13  ;;  %v1653_v36 = vld [vmem:[%s2367_s1 + $0x94] ss:$8 sps:$4 sm:$0xff]   ;;  %v1657_v38 = vld [vmem:[%s2367_s1 + $0x90] ss:$8 sps:$4 sm:$0xff]   ;;  %v1659_v40 = vld [vmem:[%s2367_s1 + $0xa4] ss:$8 sps:$4 sm:$0xff]  }
   0xe   :  { %v1655_v37 = vld [vmem:[%s2367_s1 + $0x294] ss:$8 sps:$4 sm:$0xff]   ;;  %v1658_v39 = vld [vmem:[%s2367_s1 + $0x290] ss:$8 sps:$4 sm:$0xff]   ;;  %v1661_v41 = vld [vmem:[%s2367_s1 + $0x2a4] ss:$8 sps:$4 sm:$0xff]  }
   0xf   :  { %997 = vmatpush1.bf16.msra.mxu1 %v1621_v14  ;;  %v1663_v42 = vld [vmem:[%s2367_s1 + $0xa0] ss:$8 sps:$4 sm:$0xff]   ;;  %v1665_v44 = vld [vmem:[%s2367_s1 + $0xb4] ss:$8 sps:$4 sm:$0xff]   ;;  %v1669_v46 = vld [vmem:[%s2367_s1 + $0xb0] ss:$8 sps:$4 sm:$0xff]  }
  0x10   :  { %1103 = vmatpush1.bf16.msra.mxu0 %v1622_v15  ;;  %998 = vmatprep.subr.bf16.mxu1 %v1623_v16  ;;  %v1664_v43 = vld [vmem:[%s2367_s1 + $0x2a0] ss:$8 sps:$4 sm:$0xff]   ;;  %v1667_v45 = vld [vmem:[%s2367_s1 + $0x2b4] ss:$8 sps:$4 sm:$0xff]   ;;  %v1670_v47 = vld [vmem:[%s2367_s1 + $0x2b0] ss:$8 sps:$4 sm:$0xff]  }
  0x11   :  { %1104 = vmatprep.subr.bf16.mxu0 %v1625_v17  ;;  %v1697_v48 = vld [vmem:[%s2368_s0 + $0x4] ss:$36 sps:$4 sm:$0xff]   ;;  %v1703_v51 = vld [vmem:[%s2368_s0 + $0x14] ss:$36 sps:$4 sm:$0xff]  }
  0x12   :  { %v1671_v49 = vld [vmem:[%s2367_s1 + $0xc4] ss:$8 sps:$4 sm:$0xff]   ;;  %1022 = vmatprep.mubr.bf16.mxu1 %v1697_v48  ;;  %v1675_v52 = vld [vmem:[%s2367_s1 + $0xc0] ss:$8 sps:$4 sm:$0xff]   ;;  %v1677_v54 = vld [vmem:[%s2367_s1 + $0xd4] ss:$8 sps:$4 sm:$0xff]   ;;  %1128 = vmatprep.mubr.bf16.mxu0 %v1703_v51 }
  0x13   :  { %999 = vmatpush1.bf16.msra.mxu1 %v1627_v18  ;;  %v1673_v50 = vld [vmem:[%s2367_s1 + $0x2c4] ss:$8 sps:$4 sm:$0xff]   ;;  %v1676_v53 = vld [vmem:[%s2367_s1 + $0x2c0] ss:$8 sps:$4 sm:$0xff]   ;;  %v1679_v55 = vld [vmem:[%s2367_s1 + $0x2d4] ss:$8 sps:$4 sm:$0xff]  }
  0x14   :  { %1105 = vmatpush1.bf16.msra.mxu0 %v1628_v19  ;;  %1000 = vmatprep.subr.bf16.mxu1 %v1629_v20  ;;  %v1681_v56 = vld [vmem:[%s2367_s1 + $0xd0] ss:$8 sps:$4 sm:$0xff]   ;;  %v1683_v58 = vld [vmem:[%s2367_s1 + $0xe4] ss:$8 sps:$4 sm:$0xff]   ;;  %v1687_v60 = vld [vmem:[%s2367_s1 + $0xe0] ss:$8 sps:$4 sm:$0xff]  }
  0x15   :  { %1106 = vmatprep.subr.bf16.mxu0 %v1631_v21  ;;  %v1682_v57 = vld [vmem:[%s2367_s1 + $0x2d0] ss:$8 sps:$4 sm:$0xff]   ;;  %v1685_v59 = vld [vmem:[%s2367_s1 + $0x2e4] ss:$8 sps:$4 sm:$0xff]   ;;  %v1688_v61 = vld [vmem:[%s2367_s1 + $0x2e0] ss:$8 sps:$4 sm:$0xff]  }
  0x16   :  { %v1689_v62 = vld [vmem:[%s2367_s1 + $0xf4] ss:$8 sps:$4 sm:$0xff]   ;;  %v1693_v0 = vld [vmem:[%s2367_s1 + $0xf0] ss:$8 sps:$4 sm:$0xff]   ;;  %v1700_v2 = vld [vmem:[%s2367_s1 + $0x104] ss:$8 sps:$4 sm:$0xff]  }
  0x17   :  { %1001 = vmatpush1.bf16.msra.mxu1 %v1633_v22  ;;  %v1691_v63 = vld [vmem:[%s2367_s1 + $0x2f4] ss:$8 sps:$4 sm:$0xff]   ;;  %v1694_v1 = vld [vmem:[%s2367_s1 + $0x2f0] ss:$8 sps:$4 sm:$0xff]   ;;  %v1706_v3 = vld [vmem:[%s2367_s1 + $0x304] ss:$8 sps:$4 sm:$0xff]  }
  0x18   :  { %1107 = vmatpush1.bf16.msra.mxu0 %v1634_v23  ;;  %1002 = vmatprep.subr.bf16.mxu1 %v1635_v24  ;;  %v1695_v4 = vld [vmem:[%s2368_s0] ss:$36 sps:$4 sm:$0xff]   ;;  %v1701_v6 = vld [vmem:[%s2368_s0 + $0x10] ss:$36 sps:$4 sm:$0xff]  }
  0x19   :  { %1108 = vmatprep.subr.bf16.mxu0 %v1637_v25  ;;  %v1698_v5 = vld [vmem:[%s2367_s1 + $0x100] ss:$8 sps:$4 sm:$0xff]   ;;  %v1709_v8 = vld [vmem:[%s2367_s1 + $0x114] ss:$8 sps:$4 sm:$0xff]   ;;  %v1707_v10 = vld [vmem:[%s2367_s1 + $0x110] ss:$8 sps:$4 sm:$0xff]  }
  0x1a   :  { %v1704_v7 = vld [vmem:[%s2367_s1 + $0x300] ss:$8 sps:$4 sm:$0xff]   ;;  %v1712_v9 = vld [vmem:[%s2367_s1 + $0x314] ss:$8 sps:$4 sm:$0xff]   ;;  %v1710_v11 = vld [vmem:[%s2367_s1 + $0x310] ss:$8 sps:$4 sm:$0xff]  }
  0x1b   :  { %1003 = vmatpush1.bf16.msra.mxu1 %v1639_v26  ;;  %v1715_v12 = vld [vmem:[%s2367_s1 + $0x124] ss:$8 sps:$4 sm:$0xff]   ;;  %v1713_v14 = vld [vmem:[%s2367_s1 + $0x120] ss:$8 sps:$4 sm:$0xff]   ;;  %v1721_v16 = vld [vmem:[%s2367_s1 + $0x134] ss:$8 sps:$4 sm:$0xff]  }
  0x1c   :  { %1109 = vmatpush1.bf16.msra.mxu0 %v1640_v27  ;;  %1004 = vmatprep.subr.bf16.mxu1 %v1641_v28  ;;  %v1718_v13 = vld [vmem:[%s2367_s1 + $0x324] ss:$8 sps:$4 sm:$0xff]   ;;  %v1716_v15 = vld [vmem:[%s2367_s1 + $0x320] ss:$8 sps:$4 sm:$0xff]   ;;  %v1724_v17 = vld [vmem:[%s2367_s1 + $0x334] ss:$8 sps:$4 sm:$0xff]  }
  0x1d   :  { %1110 = vmatprep.subr.bf16.mxu0 %v1643_v29  ;;  %v1719_v18 = vld [vmem:[%s2367_s1 + $0x130] ss:$8 sps:$4 sm:$0xff]   ;;  %v1727_v20 = vld [vmem:[%s2367_s1 + $0x144] ss:$8 sps:$4 sm:$0xff]   ;;  %v1725_v22 = vld [vmem:[%s2367_s1 + $0x140] ss:$8 sps:$4 sm:$0xff]  }
  0x1e   :  { %v1722_v19 = vld [vmem:[%s2367_s1 + $0x330] ss:$8 sps:$4 sm:$0xff]   ;;  %v1730_v21 = vld [vmem:[%s2367_s1 + $0x344] ss:$8 sps:$4 sm:$0xff]   ;;  %v1728_v23 = vld [vmem:[%s2367_s1 + $0x340] ss:$8 sps:$4 sm:$0xff]  }
  0x1f   :  { %1005 = vmatpush1.bf16.msra.mxu1 %v1645_v30  ;;  %v1733_v24 = vld [vmem:[%s2367_s1 + $0x154] ss:$8 sps:$4 sm:$0xff]   ;;  %v1731_v26 = vld [vmem:[%s2367_s1 + $0x150] ss:$8 sps:$4 sm:$0xff]   ;;  %v1739_v28 = vld [vmem:[%s2367_s1 + $0x164] ss:$8 sps:$4 sm:$0xff]  }
  0x20   :  { %1111 = vmatpush1.bf16.msra.mxu0 %v1646_v31  ;;  %1006 = vmatprep.subr.bf16.mxu1 %v1647_v32  ;;  %v1736_v25 = vld [vmem:[%s2367_s1 + $0x354] ss:$8 sps:$4 sm:$0xff]   ;;  %v1734_v27 = vld [vmem:[%s2367_s1 + $0x350] ss:$8 sps:$4 sm:$0xff]   ;;  %v1789_v31 = vld [vmem:[%s2368_s0 + $0x48] ss:$36 sps:$4 sm:$0xff]  }
  0x21   :  { %1112 = vmatprep.subr.bf16.mxu0 %v1649_v33  ;;  %v1785_v29 = vld [vmem:[%s2368_s0 + $0x4c] ss:$36 sps:$4 sm:$0xff]   ;;  %v1787_v30 = vld [vmem:[%s2368_s0 + $0x5c] ss:$36 sps:$4 sm:$0xff]  }
  0x22   :  { %v1742_v32 = vld [vmem:[%s2367_s1 + $0x364] ss:$8 sps:$4 sm:$0xff]   ;;  %v1793_v33 = vld [vmem:[%s2368_s0 + $0x58] ss:$36 sps:$4 sm:$0xff]  }
  0x23   :  { %1007 = vmatpush1.bf16.msra.mxu1 %v1651_v34  ;;  %v1737_v34 = vld [vmem:[%s2367_s1 + $0x160] ss:$8 sps:$4 sm:$0xff]   ;;  %v1755_v48 = vld [vmem:[%s2367_s1 + $0x190] ss:$8 sps:$4 sm:$0xff]   ;;  %v1766_v51 = vld [vmem:[%s2367_s1 + $0x3a4] ss:$8 sps:$4 sm:$0xff]  }
  0x24   :  { %1113 = vmatpush1.bf16.msra.mxu0 %v1652_v35  ;;  %1008 = vmatprep.subr.bf16.mxu1 %v1653_v36  ;;  %v1740_v35 = vld [vmem:[%s2367_s1 + $0x360] ss:$8 sps:$4 sm:$0xff]   ;;  %v1745_v36 = vld [vmem:[%s2367_s1 + $0x174] ss:$8 sps:$4 sm:$0xff]  }
  0x25   :  { %1114 = vmatprep.subr.bf16.mxu0 %v1655_v37  ;;  %v1748_v37 = vld [vmem:[%s2367_s1 + $0x374] ss:$8 sps:$4 sm:$0xff]  }
  0x27   :  { %1009 = vmatpush1.bf16.msra.mxu1 %v1657_v38  ;;  %v1743_v38 = vld [vmem:[%s2367_s1 + $0x170] ss:$8 sps:$4 sm:$0xff]  }
  0x28   :  { %1115 = vmatpush1.bf16.msra.mxu0 %v1658_v39  ;;  %1010 = vmatprep.subr.bf16.mxu1 %v1659_v40  ;;  %v1746_v39 = vld [vmem:[%s2367_s1 + $0x370] ss:$8 sps:$4 sm:$0xff]   ;;  %v1751_v40 = vld [vmem:[%s2367_s1 + $0x184] ss:$8 sps:$4 sm:$0xff]  }
  0x29   :  { %1116 = vmatprep.subr.bf16.mxu0 %v1661_v41  ;;  %v1805_v41 = vld [vmem:[%s2368_s0 + $0xc] ss:$36 sps:$4 sm:$0xff]  }
  0x2b   :  { %1011 = vmatpush1.bf16.msra.mxu1 %v1663_v42  ;;  %v1754_v42 = vld [vmem:[%s2367_s1 + $0x384] ss:$8 sps:$4 sm:$0xff]  }
  0x2c   :  { %1117 = vmatpush1.bf16.msra.mxu0 %v1664_v43  ;;  %1012 = vmatprep.subr.bf16.mxu1 %v1665_v44  ;;  %v1808_v43 = vld [vmem:[%s2368_s0 + $0x1c] ss:$36 sps:$4 sm:$0xff]  }
  0x2d   :  { %1118 = vmatprep.subr.bf16.mxu0 %v1667_v45  ;;  %v1749_v44 = vld [vmem:[%s2367_s1 + $0x180] ss:$8 sps:$4 sm:$0xff]  }
  0x2e   :  { %v1752_v45 = vld [vmem:[%s2367_s1 + $0x380] ss:$8 sps:$4 sm:$0xff]  }
  0x2f   :  { %1013 = vmatpush1.bf16.msra.mxu1 %v1669_v46  ;;  %v1757_v46 = vld [vmem:[%s2367_s1 + $0x194] ss:$8 sps:$4 sm:$0xff]  }
  0x30   :  { %1119 = vmatpush1.bf16.msra.mxu0 %v1670_v47  ;;  %1014 = vmatprep.subr.bf16.mxu1 %v1671_v49  ;;  %v1760_v47 = vld [vmem:[%s2367_s1 + $0x394] ss:$8 sps:$4 sm:$0xff]   ;;  %v1758_v49 = vld [vmem:[%s2367_s1 + $0x390] ss:$8 sps:$4 sm:$0xff]  }
  0x31   :  { %1120 = vmatprep.subr.bf16.mxu0 %v1673_v50  ;;  %v1763_v50 = vld [vmem:[%s2367_s1 + $0x1a4] ss:$8 sps:$4 sm:$0xff]  }
  0x33   :  { %1015 = vmatpush1.bf16.msra.mxu1 %v1675_v52  ;;  %v1761_v52 = vld [vmem:[%s2367_s1 + $0x1a0] ss:$8 sps:$4 sm:$0xff]  }
  0x34   :  { %1121 = vmatpush1.bf16.msra.mxu0 %v1676_v53  ;;  %1016 = vmatprep.subr.bf16.mxu1 %v1677_v54  ;;  %v1764_v53 = vld [vmem:[%s2367_s1 + $0x3a0] ss:$8 sps:$4 sm:$0xff]   ;;  %v1769_v54 = vld [vmem:[%s2367_s1 + $0x1b4] ss:$8 sps:$4 sm:$0xff]  }
  0x35   :  { %1122 = vmatprep.subr.bf16.mxu0 %v1679_v55  ;;  %v1772_v55 = vld [vmem:[%s2367_s1 + $0x3b4] ss:$8 sps:$4 sm:$0xff]  }
  0x37   :  { %1017 = vmatpush1.bf16.msra.mxu1 %v1681_v56  ;;  %v1767_v56 = vld [vmem:[%s2367_s1 + $0x1b0] ss:$8 sps:$4 sm:$0xff]  }
  0x38   :  { %1123 = vmatpush1.bf16.msra.mxu0 %v1682_v57  ;;  %1018 = vmatprep.subr.bf16.mxu1 %v1683_v58  ;;  %v1770_v57 = vld [vmem:[%s2367_s1 + $0x3b0] ss:$8 sps:$4 sm:$0xff]   ;;  %v1775_v58 = vld [vmem:[%s2367_s1 + $0x1c4] ss:$8 sps:$4 sm:$0xff]  }
  0x39   :  { %1124 = vmatprep.subr.bf16.mxu0 %v1685_v59  ;;  %v1778_v59 = vld [vmem:[%s2367_s1 + $0x3c4] ss:$8 sps:$4 sm:$0xff]  }
  0x3b   :  { %1019 = vmatpush1.bf16.msra.mxu1 %v1687_v60  ;;  %v1773_v60 = vld [vmem:[%s2367_s1 + $0x1c0] ss:$8 sps:$4 sm:$0xff]  }
  0x3c   :  { %1125 = vmatpush1.bf16.msra.mxu0 %v1688_v61  ;;  %1020 = vmatprep.subr.bf16.mxu1 %v1689_v62  ;;  %v1776_v61 = vld [vmem:[%s2367_s1 + $0x3c0] ss:$8 sps:$4 sm:$0xff]   ;;  %v1781_v62 = vld [vmem:[%s2367_s1 + $0x1d4] ss:$8 sps:$4 sm:$0xff]  }
  0x3d   :  { %1126 = vmatprep.subr.bf16.mxu0 %v1691_v63  ;;  %v1784_v63 = vld [vmem:[%s2367_s1 + $0x3d4] ss:$8 sps:$4 sm:$0xff]  }
  0x3f   :  { %1021 = vmatpush1.bf16.msra.mxu1 %v1693_v0  ;;  %v1779_v0 = vld [vmem:[%s2367_s1 + $0x1d0] ss:$8 sps:$4 sm:$0xff]  }
  0x40   :  { %1127 = vmatpush1.bf16.msra.mxu0 %v1694_v1  ;;  %1043 = vmatprep.subr.bf16.mxu1 %v1700_v2  ;;  %v1782_v1 = vld [vmem:[%s2367_s1 + $0x3d0] ss:$8 sps:$4 sm:$0xff]   ;;  %v1792_v2 = vld [vmem:[%s2367_s1 + $0x1e4] ss:$8 sps:$4 sm:$0xff]  }
  0x41   :  { %1149 = vmatprep.subr.bf16.mxu0 %v1706_v3  ;;  %v1796_v3 = vld [vmem:[%s2367_s1 + $0x3e4] ss:$8 sps:$4 sm:$0xff]  }
  0x42   :  { %1023 = vmatmul.mubr.bf16.vlgmr.msra.gmra.mrb[0].mxu1 %v1695_v4  ;;  %v1790_v4 = vld [vmem:[%s2367_s1 + $0x1e0] ss:$8 sps:$4 sm:$0xff]  }
  0x43   :  { %1129 = vmatmul.mubr.bf16.vlgmr.msra.gmra.mrb[0].mxu0 %v1701_v6  ;;  %1044 = vmatpush1.bf16.msra.mxu1 %v1698_v5  ;;  %v1794_v5 = vld [vmem:[%s2367_s1 + $0x3e0] ss:$8 sps:$4 sm:$0xff]   ;;  %v1799_v6 = vld [vmem:[%s2367_s1 + $0x1f4] ss:$8 sps:$4 sm:$0xff]  }
  0x44   :  { %1150 = vmatpush1.bf16.msra.mxu0 %v1704_v7  ;;  %1045 = vmatprep.subr.bf16.mxu1 %v1709_v8  ;;  %v1802_v7 = vld [vmem:[%s2367_s1 + $0x3f4] ss:$8 sps:$4 sm:$0xff]   ;;  %v1797_v8 = vld [vmem:[%s2367_s1 + $0x1f0] ss:$8 sps:$4 sm:$0xff]  }
  0x45   :  { %1151 = vmatprep.subr.bf16.mxu0 %v1712_v9  ;;  %1032 = vmatprep.mubr.bf16.mxu1 %v1785_v29  ;;  %v1800_v9 = vld [vmem:[%s2367_s1 + $0x3f0] ss:$8 sps:$4 sm:$0xff]   ;;  %v1835_v29 = vld [vmem:[%s2367_s1 + $0x464] ss:$8 sps:$4 sm:$0xff]  }
  0x46   :  { %1138 = vmatprep.mubr.bf16.mxu0 %v1787_v30  ;;  %v1833_v30 = vld [vmem:[%s2367_s1 + $0x460] ss:$8 sps:$4 sm:$0xff]  }
  0x47   :  { %1046 = vmatpush1.bf16.msra.mxu1 %v1707_v10  ;;  %v1811_v10 = vld [vmem:[%s2367_s1 + $0x404] ss:$8 sps:$4 sm:$0xff]  }
  0x48   :  { %1152 = vmatpush1.bf16.msra.mxu0 %v1710_v11  ;;  %1047 = vmatprep.subr.bf16.mxu1 %v1715_v12  ;;  %v1803_v11 = vld [vmem:[%s2368_s0 + $0x8] ss:$36 sps:$4 sm:$0xff]   ;;  %v1806_v12 = vld [vmem:[%s2368_s0 + $0x18] ss:$36 sps:$4 sm:$0xff]  }
  0x49   :  { %1153 = vmatprep.subr.bf16.mxu0 %v1718_v13  ;;  %v1809_v13 = vld [vmem:[%s2367_s1 + $0x400] ss:$8 sps:$4 sm:$0xff]  }
  0x4a   :  { %1033 = vmatmul.mubr.bf16.gmra.mrb[4].mxu1 %v1789_v31  ;;  %v1838_v31 = vld [vmem:[%s2367_s1 + $0x474] ss:$8 sps:$4 sm:$0xff]  }
  0x4b   :  { %1048 = vmatpush1.bf16.msra.mxu1 %v1713_v14  ;;  %1139 = vmatmul.mubr.bf16.gmra.mrb[4].mxu0 %v1793_v33  ;;  %v1814_v14 = vld [vmem:[%s2367_s1 + $0x414] ss:$8 sps:$4 sm:$0xff]   ;;  %v1839_v33 = vld [vmem:[%s2368_s0 + $0x20] ss:$36 sps:$4 sm:$0xff]  }
  0x4c   :  { %1154 = vmatpush1.bf16.msra.mxu0 %v1716_v15  ;;  %1049 = vmatprep.subr.bf16.mxu1 %v1721_v16  ;;  %v1815_v15 = vld [vmem:[%s2368_s0 + $0x54] ss:$36 sps:$4 sm:$0xff]   ;;  %v1817_v16 = vld [vmem:[%s2368_s0 + $0x64] ss:$36 sps:$4 sm:$0xff]  }
  0x4d   :  { %1155 = vmatprep.subr.bf16.mxu0 %v1724_v17  ;;  %1075 = vmatprep.mubr.bf16.mxu1 %v1805_v41  ;;  %v1812_v17 = vld [vmem:[%s2367_s1 + $0x410] ss:$8 sps:$4 sm:$0xff]  }
  0x4e   :  { %1181 = vmatprep.mubr.bf16.mxu0 %v1808_v43 }
  0x4f   :  { %1050 = vmatpush1.bf16.msra.mxu1 %v1719_v18  ;;  %v1823_v18 = vld [vmem:[%s2367_s1 + $0x424] ss:$8 sps:$4 sm:$0xff]  }
  0x50   :  { %1156 = vmatpush1.bf16.msra.mxu0 %v1722_v19  ;;  %1051 = vmatprep.subr.bf16.mxu1 %v1727_v20  ;;  %v1819_v19 = vld [vmem:[%s2368_s0 + $0x50] ss:$36 sps:$4 sm:$0xff]   ;;  %v1820_v20 = vld [vmem:[%s2368_s0 + $0x60] ss:$36 sps:$4 sm:$0xff]  }
  0x51   :  { %1157 = vmatprep.subr.bf16.mxu0 %v1730_v21  ;;  %v1821_v21 = vld [vmem:[%s2367_s1 + $0x420] ss:$8 sps:$4 sm:$0xff]  }
  0x53   :  { %1052 = vmatpush1.bf16.msra.mxu1 %v1725_v22  ;;  %v1826_v22 = vld [vmem:[%s2367_s1 + $0x434] ss:$8 sps:$4 sm:$0xff]  }
  0x54   :  { %1158 = vmatpush1.bf16.msra.mxu0 %v1728_v23  ;;  %1053 = vmatprep.subr.bf16.mxu1 %v1733_v24  ;;  %v1824_v23 = vld [vmem:[%s2367_s1 + $0x430] ss:$8 sps:$4 sm:$0xff]   ;;  %v1829_v24 = vld [vmem:[%s2367_s1 + $0x444] ss:$8 sps:$4 sm:$0xff]  }
  0x55   :  { %1159 = vmatprep.subr.bf16.mxu0 %v1736_v25  ;;  %v1841_v25 = vmov 0  }
  0x57   :  { %1054 = vmatpush1.bf16.msra.mxu1 %v1731_v26  ;;  %v1827_v26 = vld [vmem:[%s2367_s1 + $0x440] ss:$8 sps:$4 sm:$0xff]  }
  0x58   :  { %1160 = vmatpush1.bf16.msra.mxu0 %v1734_v27  ;;  %1055 = vmatprep.subr.bf16.mxu1 %v1739_v28  ;;  %v1832_v27 = vld [vmem:[%s2367_s1 + $0x454] ss:$8 sps:$4 sm:$0xff]   ;;  %v1830_v28 = vld [vmem:[%s2367_s1 + $0x450] ss:$8 sps:$4 sm:$0xff]  }
  0x59   :  { %1161 = vmatprep.subr.bf16.mxu0 %v1742_v32  ;;  %v1836_v32 = vld [vmem:[%s2367_s1 + $0x470] ss:$8 sps:$4 sm:$0xff]  }
  0x5b   :  { %1056 = vmatpush1.bf16.msra.mxu1 %v1737_v34  ;;  %v1840_v34 = vld [vmem:[%s2368_s0 + $0x68] ss:$36 sps:$4 sm:$0xff]  }
  0x5c   :  { %1162 = vmatpush1.bf16.msra.mxu0 %v1740_v35  ;;  %1057 = vmatprep.subr.bf16.mxu1 %v1745_v36 }
  0x5d   :  { %1163 = vmatprep.subr.bf16.mxu0 %v1748_v37 }
  0x5f   :  { %1058 = vmatpush1.bf16.msra.mxu1 %v1743_v38 }
  0x60   :  { %1164 = vmatpush1.bf16.msra.mxu0 %v1746_v39  ;;  %1059 = vmatprep.subr.bf16.mxu1 %v1751_v40 }
  0x61   :  { %1165 = vmatprep.subr.bf16.mxu0 %v1754_v42 }
  0x63   :  { %1060 = vmatpush1.bf16.msra.mxu1 %v1749_v44 }
  0x64   :  { %1166 = vmatpush1.bf16.msra.mxu0 %v1752_v45  ;;  %1061 = vmatprep.subr.bf16.mxu1 %v1757_v46 }
  0x65   :  { %1167 = vmatprep.subr.bf16.mxu0 %v1760_v47 }
  0x67   :  { %1062 = vmatpush1.bf16.msra.mxu1 %v1755_v48 }
  0x68   :  { %1168 = vmatpush1.bf16.msra.mxu0 %v1758_v49  ;;  %1063 = vmatprep.subr.bf16.mxu1 %v1763_v50 }
  0x69   :  { %1169 = vmatprep.subr.bf16.mxu0 %v1766_v51 }
  0x6b   :  { %1064 = vmatpush1.bf16.msra.mxu1 %v1761_v52 }
  0x6c   :  { %1170 = vmatpush1.bf16.msra.mxu0 %v1764_v53  ;;  %1065 = vmatprep.subr.bf16.mxu1 %v1769_v54 }
  0x6d   :  { %1171 = vmatprep.subr.bf16.mxu0 %v1772_v55 }
  0x6f   :  { %1066 = vmatpush1.bf16.msra.mxu1 %v1767_v56 }
  0x70   :  { %1172 = vmatpush1.bf16.msra.mxu0 %v1770_v57  ;;  %1067 = vmatprep.subr.bf16.mxu1 %v1775_v58 }
  0x71   :  { %1173 = vmatprep.subr.bf16.mxu0 %v1778_v59 }
  0x73   :  { %1068 = vmatpush1.bf16.msra.mxu1 %v1773_v60 }
  0x74   :  { %1174 = vmatpush1.bf16.msra.mxu0 %v1776_v61  ;;  %1069 = vmatprep.subr.bf16.mxu1 %v1781_v62 }
  0x75   :  { %1175 = vmatprep.subr.bf16.mxu0 %v1784_v63 }
  0x77   :  { %1070 = vmatpush1.bf16.msra.mxu1 %v1779_v0 }
  0x78   :  { %1176 = vmatpush1.bf16.msra.mxu0 %v1782_v1  ;;  %1071 = vmatprep.subr.bf16.mxu1 %v1792_v2 }
  0x79   :  { %1177 = vmatprep.subr.bf16.mxu0 %v1796_v3 }
  0x7b   :  { %1072 = vmatpush1.bf16.msra.mxu1 %v1790_v4 }
  0x7c   :  { %1178 = vmatpush1.bf16.msra.mxu0 %v1794_v5  ;;  %1073 = vmatprep.subr.bf16.mxu1 %v1799_v6 }
  0x7d   :  { %1179 = vmatprep.subr.bf16.mxu0 %v1802_v7 }
  0x7f   :  { %1074 = vmatpush1.bf16.msra.mxu1 %v1797_v8 }
  0x80   :  { %1180 = vmatpush1.bf16.msra.mxu0 %v1800_v9  ;;  %1549 = vmatprep.subr.bf16.mxu1 %v1811_v10 }
  0x81   :  { %1202 = vmatprep.subr.bf16.mxu0 %v1811_v10 }
  0x82   :  { %1076 = vmatmul.mubr.bf16.vlgmr.msra.gmra.mrb[0].mxu1 %v1803_v11 }
  0x83   :  { %1182 = vmatmul.mubr.bf16.vlgmr.msra.gmra.mrb[0].mxu0 %v1806_v12  ;;  %1557 = vmatpush1.bf16.msra.mxu1 %v1809_v13 }
  0x84   :  { %1203 = vmatpush1.bf16.msra.mxu0 %v1809_v13  ;;  %1550 = vmatprep.subr.bf16.mxu1 %v1814_v14 }
  0x85   :  { %1204 = vmatprep.subr.bf16.mxu0 %v1814_v14  ;;  %1085 = vmatprep.mubr.bf16.mxu1 %v1815_v15 }
  0x86   :  { %1191 = vmatprep.mubr.bf16.mxu0 %v1817_v16 }
  0x87   :  { %1558 = vmatpush1.bf16.msra.mxu1 %v1812_v17 }
  0x88   :  { %1205 = vmatpush1.bf16.msra.mxu0 %v1812_v17  ;;  %1551 = vmatprep.subr.bf16.mxu1 %v1823_v18 }
  0x89   :  { %1206 = vmatprep.subr.bf16.mxu0 %v1823_v18 }
  0x8a   :  { %1086 = vmatmul.mubr.bf16.gmra.mrb[4].mxu1 %v1819_v19 }
  0x8b   :  { %1192 = vmatmul.mubr.bf16.gmra.mrb[4].mxu0 %v1820_v20  ;;  %1559 = vmatpush1.bf16.msra.mxu1 %v1821_v21 }
  0x8c   :  { %1207 = vmatpush1.bf16.msra.mxu0 %v1821_v21  ;;  %1552 = vmatprep.subr.bf16.mxu1 %v1826_v22 }
  0x8d   :  { %1208 = vmatprep.subr.bf16.mxu0 %v1826_v22  ;;  %1234 = vmatprep.mubr.bf16.mxu0 %v1841_v25 }
  0x8e   :  { %1244 = vmatprep.mubr.bf16.mxu1 %v1841_v25 }
  0x8f   :  { %1560 = vmatpush1.bf16.msra.mxu1 %v1824_v23 }
  0x90   :  { %1209 = vmatpush1.bf16.msra.mxu0 %v1824_v23  ;;  %1553 = vmatprep.subr.bf16.mxu1 %v1829_v24 }
  0x91   :  { %1210 = vmatprep.subr.bf16.mxu0 %v1829_v24 }
  0x93   :  { %1561 = vmatpush1.bf16.msra.mxu1 %v1827_v26 }
  0x94   :  { %1211 = vmatpush1.bf16.msra.mxu0 %v1827_v26  ;;  %1554 = vmatprep.subr.bf16.mxu1 %v1832_v27 }
  0x95   :  { %1212 = vmatprep.subr.bf16.mxu0 %v1832_v27 }
  0x97   :  { %1562 = vmatpush1.bf16.msra.mxu1 %v1830_v28 }
  0x98   :  { %1213 = vmatpush1.bf16.msra.mxu0 %v1830_v28  ;;  %1555 = vmatprep.subr.bf16.mxu1 %v1835_v29 }
  0x99   :  { %1214 = vmatprep.subr.bf16.mxu0 %v1835_v29 }
  0x9b   :  { %1563 = vmatpush1.bf16.msra.mxu1 %v1833_v30 }
  0x9c   :  { %1215 = vmatpush1.bf16.msra.mxu0 %v1833_v30  ;;  %1556 = vmatprep.subr.bf16.mxu1 %v1838_v31  ;;  %v1842_v30 = vmov 1966171168  }
  0x9d   :  { %1216 = vmatprep.subr.bf16.mxu0 %v1838_v31  ;;  %v1305_v31 = vunpack.c.l.s4 %v1842_v30 }
  0x9f   :  { %1564 = vmatpush1.bf16.msra.mxu1 %v1836_v32 }
  0xa0   :  { %1217 = vmatpush1.bf16.msra.mxu0 %v1836_v32 }
  0xa2   :  { %1245 = vmatmul.mubr.bf16.vlgmr.msra.gmra.mrb[8].mxu1 %v1840_v34 }
  0xa3   :  { %1235 = vmatmul.mubr.bf16.vlgmr.msra.gmra.mrb[0].mxu0 %v1839_v33 }
 0x155   :  { %v1077_v35 = vpop.f32.mrb[0].mxu1 }
 0x156   :  { %v1079_v36 = vpop.f32.mrb[1].mxu1 }
 0x157   :  { %v1081_v37 = vpop.f32.mrb[2].mxu1 }
 0x158   :  { %v1083_v38 = vpop.f32.mrb[3].mxu1 }
 0x15d   :  { %v1087_v39 = vpop.f32.mrb[4].mxu1 }
 0x15e   :  { %v1193_v40 = vpop.f32.mrb[4].mxu0  ;;  %v1089_v42 = vpop.f32.mrb[5].mxu1 }
 0x15f   :  { %v1569_v41 = vadd.f32 %v1193_v40, %v1087_v39  ;;  %v1195_v43 = vpop.f32.mrb[5].mxu0  ;;  %v1091_v45 = vpop.f32.mrb[6].mxu1 }
 0x160   :  { %v1571_v44 = vadd.f32 %v1195_v43, %v1089_v42  ;;  %v1197_v46 = vpop.f32.mrb[6].mxu0  ;;  %v1093_v48 = vpop.f32.mrb[7].mxu1 }
 0x161   :  { %v1573_v47 = vadd.f32 %v1197_v46, %v1091_v45  ;;  %v1199_v49 = vpop.f32.mrb[7].mxu0 }
 0x162   :  { %v1575_v50 = vadd.f32 %v1199_v49, %v1093_v48 }
 0x175   :  { %v1246_v52 = vpop.f32.mrb[8].mxu1 }
 0x176   :  { %v1236_v51 = vpop.f32.mrb[0].mxu0  ;;  %v1570_v54 = vadd.f32 %v1569_v41, %v1246_v52  ;;  %v1248_v56 = vpop.f32.mrb[9].mxu1  ;;  %v1306_v41 = vunpack.c.0.s8 %v1305_v31 }
 0x177   :  { %v1565_v53 = vadd.f32 %v1236_v51, %v1077_v35  ;;  %v1238_v55 = vpop.f32.mrb[1].mxu0  ;;  %v1572_v58 = vadd.f32 %v1571_v44, %v1248_v56  ;;  %v1250_v60 = vpop.f32.mrb[10].mxu1 }
 0x178   :  { %v1566_v57 = vadd.f32 %v1238_v55, %v1079_v36  ;;  %v1240_v59 = vpop.f32.mrb[2].mxu0  ;;  %v1574_v62 = vadd.f32 %v1573_v47, %v1250_v60  ;;  %v1252_v0 = vpop.f32.mrb[11].mxu1  ;;  %v1328_v7 = vmul.f32 %v1570_v54, %v1570_v54  ;;  %v1307_v36 = vlaneseq }
 0x179   :  { %v1567_v61 = vadd.f32 %v1240_v59, %v1081_v37  ;;  %v1242_v63 = vpop.f32.mrb[3].mxu0  ;;  %v1547_v2 = vpack.c.bf16 %v1572_v58, %v1570_v54  ;;  %v1324_v3 = vmul.f32 %v1565_v53, %v1565_v53  ;;  %v1576_v8 = vadd.f32 %v1575_v50, %v1252_v0 }
 0x17a   :  { %v1545_v1 = vpack.c.bf16 %v1566_v57, %v1565_v53  ;;  %v1568_v6 = vadd.f32 %v1242_v63, %v1083_v38  ;;  %v1325_v13 = vmul.f32 %v1566_v57, %v1566_v57  ;;  %v1330_v17 = vmul.f32 %v1574_v62, %v1574_v62 }
 0x17b   :  { %v1283_v4 = vadd.f32 %v1567_v61, %v1565_v53  ;;  %v1326_v5 = vmul.f32 %v1567_v61, %v1567_v61  ;;  %1281 = vst [vmem:[%s2369_s2 + $0x10] sm:$0xff] %v1547_v2  ;;  %v1548_v15 = vpack.c.bf16 %v1576_v8, %v1574_v62  ;;  %v1329_v20 = vmul.f32 %v1572_v58, %v1572_v58 }
 0x17c   :  { %1279 = vst [vmem:[%s2369_s2] sm:$0xff] %v1545_v1  ;;  %v1546_v11 = vpack.c.bf16 %v1568_v6, %v1567_v61  ;;  %v1292_v12 = vadd.f32 %v1568_v6, %v1566_v57  ;;  %v1327_v14 = vmul.f32 %v1568_v6, %v1568_v6  ;;  %v1331_v25 = vmul.f32 %v1576_v8, %v1576_v8 }
 0x17d   :  { %v1332_v9 = vadd.f32 %v1326_v5, %v1324_v3  ;;  %v1284_v10 = vadd.f32 %v1570_v54, %v1283_v4  ;;  %1282 = vst [vmem:[%s2369_s2 + $0x18] sm:$0xff] %v1548_v15  ;;  %v1308_v46 = vshrl.u32 %v1307_v36, 7  ;;  %vm1321_vm0 = vcmp.lt.s32.totalorder %v1307_v36, 256 }
 0x17e   :  { %1280 = vst [vmem:[%s2369_s2 + $0x8] sm:$0xff] %v1546_v11  ;;  %v1293_v19 = vadd.f32 %v1572_v58, %v1292_v12  ;;  %v1341_v21 = vadd.f32 %v1327_v14, %v1325_v13 }
 0x17f   :  { %v1285_v16 = vadd.f32 %v1574_v62, %v1284_v10  ;;  %v1333_v18 = vadd.f32 %v1332_v9, %v1328_v7  ;;  %v1309_v53 = vsub.s32 %v1306_v41, %v1308_v46 }
 0x180   :  { %v1294_v24 = vadd.f32 %v1576_v8, %v1293_v19  ;;  %v1342_v26 = vadd.f32 %v1341_v21, %v1329_v20 }
 0x181   :  { %v1286_v22 = vrot.slane %v1285_v16, 4  ;;  %v1334_v23 = vadd.f32 %v1333_v18, %v1330_v17 }
 0x182   :  { %v1295_v29 = vrot.slane %v1294_v24, 4  ;;  %v1343_v32 = vadd.f32 %v1342_v26, %v1331_v25 }
 0x183   :  { %v1287_v27 = vadd.f32 %v1286_v22, %v1285_v16  ;;  %v1335_v28 = vrot.slane %v1334_v23, 4 }
 0x184   :  { %v1296_v35 = vadd.f32 %v1295_v29, %v1294_v24  ;;  %v1344_v37 = vrot.slane %v1343_v32, 4 }
 0x185   :  { %v1288_v33 = vrot.slane %v1287_v27, 2  ;;  %v1336_v34 = vadd.f32 %v1335_v28, %v1334_v23 }
 0x186   :  { %v1297_v40 = vrot.slane %v1296_v35, 2  ;;  %v1345_v42 = vadd.f32 %v1344_v37, %v1343_v32 }
 0x187   :  { %v1289_v38 = vadd.f32 %v1288_v33, %v1287_v27  ;;  %v1337_v39 = vrot.slane %v1336_v34, 2 }
 0x188   :  { %v1298_v45 = vadd.f32 %v1297_v40, %v1296_v35  ;;  %v1346_v47 = vrot.slane %v1345_v42, 2 }
 0x189   :  { %v1290_v43 = vrot.slane %v1289_v38, 1  ;;  %v1338_v44 = vadd.f32 %v1337_v39, %v1336_v34 }
 0x18a   :  { %v1299_v50 = vrot.slane %v1298_v45, 1  ;;  %v1347_v51 = vadd.f32 %v1346_v47, %v1345_v42 }
 0x18b   :  { %v1291_v48 = vadd.f32 %v1290_v43, %v1289_v38  ;;  %v1339_v49 = vrot.slane %v1338_v44, 1 }
 0x18c   :  { %v1300_v52 = vadd.f32 %v1299_v50, %v1298_v45  ;;  %v1348_v55 = vrot.slane %v1347_v51, 1 }
 0x18d   :  { %v1340_v54 = vadd.f32 %v1339_v49, %v1338_v44 }
 0x18e   :  { %v1303_v56 = vcombine.low %v1291_v48, %v1300_v52  ;;  %v1349_v57 = vadd.f32 %v1348_v55, %v1347_v51 }
 0x190   :  { %v1310_v58 = vrot.slane %v1303_v56, %v1309_v53  ;;  %v1352_v59 = vcombine.low %v1340_v54, %v1349_v57 }
 0x192   :  { %v1317_v60 = vrot.slane %v1310_v58, %v1309_v53  ;;  %v1359_v61 = vrot.slane %v1352_v59, %v1309_v53 }
 0x194   :  { %1323 = vst.msk [vmem:[%s2370_s3] ss:$2 sm:$0x3] %vm1321_vm0, %v1317_v60  ;;  %v1366_v62 = vrot.slane %v1359_v61, %v1309_v53 }
 0x196   :  { %1544 = vst.msk [vmem:[%s2370_s3 + $0x1] ss:$2 sm:$0x3] %vm1321_vm0, %v1366_v62 }

// kernel: _lambda_.36
= control target key start
LH: loop header
LB: loop body
LE: loop exit
PB: predicated region body
PF: predicated region fallthrough
CT: control target
= control target key end

     0   :  { %s265_s0 = inlined_call_operand.vmem [shape: bf16[32,128], index: 0, kind: input, shape index: {}]   ;;  %s266_s1 = inlined_call_operand.vmem [shape: f32[2,128], index: 1, kind: input, shape index: {}]   ;;  %s267_s2 = inlined_call_operand.vmem [shape: bf16[32,256], index: 2, kind: input, shape index: {}]   ;;  %s268_s3 = inlined_call_operand.vmem [shape: f32[2,128], index: 3, kind: input, shape index: {}]   ;;  %s269_s4 = inlined_call_operand.vmem [shape: bf16[32,128], index: 4, kind: output, shape index: {}]  }
   0x1   :  { %v159_v0 = vld [vmem:[%s267_s2 + $0x4] sm:$0xf]  ;;  %v160_v1 = vld [vmem:[%s267_s2 + $0xc] sm:$0xf]  ;;  %v161_v2 = vld [vmem:[%s267_s2 + $0x14] sm:$0xf] }
   0x2   :  { %32 = vst [vmem:[#allocation2] sm:$0xf] %v159_v0  ;;  %34 = vst [vmem:[#allocation2 + $0x4] sm:$0xf] %v160_v1  ;;  %v162_v3 = vld [vmem:[%s267_s2 + $0x1c] sm:$0xf] }
   0x3   :  { %36 = vst [vmem:[#allocation2 + $0x8] sm:$0xf] %v161_v2  ;;  %v176_v4 = vld [vmem:[%s265_s0] sm:$0xff]   ;;  %38 = vst [vmem:[#allocation2 + $0xc] sm:$0xf] %v162_v3  ;;  %v201_v8 = vld [vmem:[%s265_s0 + $0x8] sm:$0xff]  }
   0x4   :  { %v177_v5 = vunpack.c.l.bf16 %v176_v4  ;;  %v178_v6 = vunpack.c.h.bf16 %v176_v4  ;;  %v163_v7 = vld [vmem:[%s266_s1] ss:$0 sm:$0xff]  ;;  %v181_v9 = vunpack.c.l.bf16 %v201_v8  ;;  %v182_v10 = vunpack.c.h.bf16 %v201_v8  ;;  %v164_v13 = vld [vmem:[%s266_s1 + $0x1] ss:$0 sm:$0xff] }
   0x5   :  { %v165_v17 = vld [vmem:[%s268_s3] ss:$0 sm:$0xff]  ;;  %v166_v29 = vld [vmem:[%s268_s3 + $0x1] ss:$0 sm:$0xff] }
   0x6   :  { %v84_v11 = vmul.f32 %v177_v5, %v163_v7  ;;  %v85_v12 = vmul.f32 %v178_v6, %v163_v7  ;;  %v86_v14 = vmul.f32 %v181_v9, %v163_v7  ;;  %v87_v15 = vmul.f32 %v182_v10, %v163_v7 }
   0x8   :  { %v93_v18 = vadd.f32 %v164_v13, %v84_v11  ;;  %v94_v19 = vadd.f32 %v164_v13, %v85_v12  ;;  %v95_v23 = vadd.f32 %v164_v13, %v86_v14  ;;  %v96_v24 = vadd.f32 %v164_v13, %v87_v15 }
   0x9   :  { %v184_v16 = vld [vmem:[#allocation2] sm:$0xff]  }
   0xa   :  { %v185_v20 = vunpack.c.l.bf16 %v184_v16  ;;  %v186_v21 = vunpack.c.h.bf16 %v184_v16  ;;  %v202_v22 = vld [vmem:[#allocation2 + $0x8] sm:$0xff]  }
   0xb   :  { %v189_v25 = vunpack.c.l.bf16 %v202_v22  ;;  %v190_v26 = vunpack.c.h.bf16 %v202_v22 }
   0xc   :  { %v110_v27 = vmul.f32 %v185_v20, %v165_v17  ;;  %v111_v28 = vmul.f32 %v186_v21, %v165_v17 }
   0xd   :  { %v112_v30 = vmul.f32 %v189_v25, %v165_v17  ;;  %v113_v31 = vmul.f32 %v190_v26, %v165_v17 }
   0xe   :  { %v114_v32 = vadd.f32 %v110_v27, %v93_v18  ;;  %v115_v33 = vadd.f32 %v111_v28, %v94_v19 }
   0xf   :  { %v116_v34 = vadd.f32 %v112_v30, %v95_v23  ;;  %v117_v35 = vadd.f32 %v113_v31, %v96_v24 }
  0x10   :  { %v123_v36 = vadd.f32 %v166_v29, %v114_v32  ;;  %v124_v37 = vadd.f32 %v166_v29, %v115_v33 }
  0x11   :  { %v125_v38 = vadd.f32 %v166_v29, %v116_v34  ;;  %v126_v39 = vadd.f32 %v166_v29, %v117_v35 }
  0x12   :  { %v127_v40 = vmax.f32 %v123_v36, 0.0  ;;  %v128_v41 = vmax.f32 %v124_v37, 0.0 }
  0x13   :  { %v129_v42 = vmax.f32 %v125_v38, 0.0  ;;  %v130_v43 = vmax.f32 %v126_v39, 0.0 }
  0x14   :  { %v194_v44 = vpack.c.bf16 %v128_v41, %v127_v40 }
  0x15   :  { %v199_v45 = vpack.c.bf16 %v130_v43, %v129_v42 }
  0x16   :  { %195 = vst [vmem:[%s269_s4] sm:$0xff] %v194_v44  }
  0x17   :  { %203 = vst [vmem:[%s269_s4 + $0x8] sm:$0xff] %v199_v45  }

// kernel: _lambda_.35
= control target key start
LH: loop header
LB: loop body
LE: loop exit
PB: predicated region body
PF: predicated region fallthrough
CT: control target
= control target key end

     0   :  { %s1650_s1 = inlined_call_operand.vmem [shape: bf16[1152,128], index: 1, kind: input, shape index: {}]   ;;  %s1651_s0 = inlined_call_operand.vmem [shape: bf16[32,1152], index: 0, kind: input, shape index: {}]   ;;  %s1652_s2 = inlined_call_operand.vmem [shape: bf16[32,128], index: 2, kind: output, shape index: {0}]   ;;  %s1653_s3 = inlined_call_operand.vmem [shape: f32[1,2,128], index: 3, kind: output, shape index: {1}]  }
   0x1   :  { %v1250_v0 = vld [vmem:[%s1650_s1 + $0x40] sm:$0xff]   ;;  %v1254_v4 = vld [vmem:[%s1650_s1 + $0x48] sm:$0xff]   ;;  %v1258_v8 = vld [vmem:[%s1650_s1 + $0x50] sm:$0xff]  }
   0x2   :  { %v1251_v1 = vld [vmem:[%s1650_s1 + $0xc0] sm:$0xff]   ;;  %1108 = vmatprep.subr.bf16.mxu0 %v1250_v0  ;;  %v1255_v5 = vld [vmem:[%s1650_s1 + $0xc8] sm:$0xff]   ;;  %v1259_v9 = vld [vmem:[%s1650_s1 + $0xd0] sm:$0xff]  }
   0x3   :  { %v1252_v2 = vld [vmem:[%s1650_s1] sm:$0xff]   ;;  %1136 = vmatprep.subr.bf16.mxu1 %v1251_v1  ;;  %v1256_v6 = vld [vmem:[%s1650_s1 + $0x8] sm:$0xff]   ;;  %v1260_v10 = vld [vmem:[%s1650_s1 + $0x10] sm:$0xff]  }
   0x4   :  { %v1253_v3 = vld [vmem:[%s1650_s1 + $0x80] sm:$0xff]   ;;  %1109 = vmatpush3.bf16.msra.mxu0 %v1252_v2  ;;  %v1257_v7 = vld [vmem:[%s1650_s1 + $0x88] sm:$0xff]   ;;  %v1261_v11 = vld [vmem:[%s1650_s1 + $0x90] sm:$0xff]  }
   0x5   :  { %1137 = vmatpush3.bf16.msra.mxu1 %v1253_v3  ;;  %1110 = vmatprep.subr.bf16.mxu0 %v1254_v4  ;;  %v1262_v12 = vld [vmem:[%s1650_s1 + $0x58] sm:$0xff]   ;;  %v1266_v16 = vld [vmem:[%s1650_s1 + $0x60] sm:$0xff]   ;;  %v1270_v20 = vld [vmem:[%s1650_s1 + $0x68] sm:$0xff]  }
   0x6   :  { %1138 = vmatprep.subr.bf16.mxu1 %v1255_v5  ;;  %v1263_v13 = vld [vmem:[%s1650_s1 + $0xd8] sm:$0xff]   ;;  %v1267_v17 = vld [vmem:[%s1650_s1 + $0xe0] sm:$0xff]   ;;  %v1271_v21 = vld [vmem:[%s1650_s1 + $0xe8] sm:$0xff]  }
   0x7   :  { %v1264_v14 = vld [vmem:[%s1650_s1 + $0x18] sm:$0xff]   ;;  %v1268_v18 = vld [vmem:[%s1650_s1 + $0x20] sm:$0xff]   ;;  %v1272_v22 = vld [vmem:[%s1650_s1 + $0x28] sm:$0xff]  }
   0x8   :  { %1111 = vmatpush3.bf16.msra.mxu0 %v1256_v6  ;;  %v1265_v15 = vld [vmem:[%s1650_s1 + $0x98] sm:$0xff]   ;;  %v1269_v19 = vld [vmem:[%s1650_s1 + $0xa0] sm:$0xff]   ;;  %v1273_v23 = vld [vmem:[%s1650_s1 + $0xa8] sm:$0xff]  }
   0x9   :  { %1139 = vmatpush3.bf16.msra.mxu1 %v1257_v7  ;;  %1112 = vmatprep.subr.bf16.mxu0 %v1258_v8  ;;  %v1274_v24 = vld [vmem:[%s1650_s1 + $0x70] sm:$0xff]   ;;  %v1278_v28 = vld [vmem:[%s1650_s1 + $0x78] sm:$0xff]   ;;  %v1282_v32 = vld [vmem:[%s1651_s0] ss:$36 sps:$4 sm:$0xff]  }
   0xa   :  { %1140 = vmatprep.subr.bf16.mxu1 %v1259_v9  ;;  %v1275_v25 = vld [vmem:[%s1650_s1 + $0xf0] sm:$0xff]   ;;  %v1279_v29 = vld [vmem:[%s1650_s1 + $0xf8] sm:$0xff]   ;;  %v1284_v33 = vld [vmem:[%s1651_s0 + $0x4] ss:$36 sps:$4 sm:$0xff]  }
   0xb   :  { %v1276_v26 = vld [vmem:[%s1650_s1 + $0x30] sm:$0xff]   ;;  %v1280_v30 = vld [vmem:[%s1650_s1 + $0x38] sm:$0xff]   ;;  %v1285_v34 = vld [vmem:[%s1651_s0 + $0x8] ss:$36 sps:$4 sm:$0xff]   ;;  %734 = vmatprep.mubr.bf16.mxu0 %v1284_v33 }
   0xc   :  { %1113 = vmatpush3.bf16.msra.mxu0 %v1260_v10  ;;  %v1277_v27 = vld [vmem:[%s1650_s1 + $0xb0] sm:$0xff]   ;;  %v1281_v31 = vld [vmem:[%s1650_s1 + $0xb8] sm:$0xff]   ;;  %v1288_v36 = vld [vmem:[%s1650_s1 + $0x140] sm:$0xff]  }
   0xd   :  { %1141 = vmatpush3.bf16.msra.mxu1 %v1261_v11  ;;  %1114 = vmatprep.subr.bf16.mxu0 %v1262_v12  ;;  %v1287_v35 = vld [vmem:[%s1651_s0 + $0xc] ss:$36 sps:$4 sm:$0xff]   ;;  %v1289_v37 = vld [vmem:[%s1650_s1 + $0x100] sm:$0xff]   ;;  %v1300_v48 = vld [vmem:[%s1650_s1 + $0x158] sm:$0xff]  }
   0xe   :  { %1142 = vmatprep.subr.bf16.mxu1 %v1263_v13  ;;  %783 = vmatprep.mubr.bf16.mxu1 %v1287_v35  ;;  %v1290_v38 = vld [vmem:[%s1650_s1 + $0x1c0] sm:$0xff]   ;;  %v1292_v40 = vld [vmem:[%s1650_s1 + $0x148] sm:$0xff]   ;;  %v1296_v44 = vld [vmem:[%s1650_s1 + $0x150] sm:$0xff]  }
   0xf   :  { %v1291_v39 = vld [vmem:[%s1650_s1 + $0x180] sm:$0xff]   ;;  %v1293_v41 = vld [vmem:[%s1650_s1 + $0x108] sm:$0xff]   ;;  %v1297_v45 = vld [vmem:[%s1650_s1 + $0x110] sm:$0xff]  }
  0x10   :  { %1115 = vmatpush3.bf16.msra.mxu0 %v1264_v14  ;;  %v1294_v42 = vld [vmem:[%s1650_s1 + $0x1c8] sm:$0xff]   ;;  %v1298_v46 = vld [vmem:[%s1650_s1 + $0x1d0] sm:$0xff]   ;;  %v1301_v49 = vld [vmem:[%s1650_s1 + $0x118] sm:$0xff]  }
  0x11   :  { %1143 = vmatpush3.bf16.msra.mxu1 %v1265_v15  ;;  %1116 = vmatprep.subr.bf16.mxu0 %v1266_v16  ;;  %v1295_v43 = vld [vmem:[%s1650_s1 + $0x188] sm:$0xff]   ;;  %v1299_v47 = vld [vmem:[%s1650_s1 + $0x190] sm:$0xff]   ;;  %v1302_v50 = vld [vmem:[%s1650_s1 + $0x1d8] sm:$0xff]  }
  0x12   :  { %1144 = vmatprep.subr.bf16.mxu1 %v1267_v17  ;;  %v1303_v51 = vld [vmem:[%s1650_s1 + $0x198] sm:$0xff]   ;;  %v1304_v52 = vld [vmem:[%s1650_s1 + $0x160] sm:$0xff]   ;;  %v1308_v56 = vld [vmem:[%s1650_s1 + $0x168] sm:$0xff]  }
  0x13   :  { %v1305_v53 = vld [vmem:[%s1650_s1 + $0x120] sm:$0xff]   ;;  %v1309_v57 = vld [vmem:[%s1651_s0 + $0x4c] ss:$36 sps:$4 sm:$0xff]   ;;  %v1311_v58 = vld [vmem:[%s1651_s0 + $0x54] ss:$36 sps:$4 sm:$0xff]  }
  0x14   :  { %1117 = vmatpush3.bf16.msra.mxu0 %v1268_v18  ;;  %v1306_v54 = vld [vmem:[%s1650_s1 + $0x1e0] sm:$0xff]   ;;  %v1313_v59 = vld [vmem:[%s1650_s1 + $0x128] sm:$0xff]   ;;  %v1315_v61 = vld [vmem:[%s1651_s0 + $0x50] ss:$36 sps:$4 sm:$0xff]  }
  0x15   :  { %1145 = vmatpush3.bf16.msra.mxu1 %v1269_v19  ;;  %1118 = vmatprep.subr.bf16.mxu0 %v1270_v20  ;;  %v1307_v55 = vld [vmem:[%s1650_s1 + $0x1a0] sm:$0xff]   ;;  %v1314_v60 = vld [vmem:[%s1651_s0 + $0x48] ss:$36 sps:$4 sm:$0xff]   ;;  %v1318_v0 = vld [vmem:[%s1650_s1 + $0x170] sm:$0xff]  }
  0x16   :  { %1146 = vmatprep.subr.bf16.mxu1 %v1271_v21  ;;  %v1316_v62 = vld [vmem:[%s1650_s1 + $0x1e8] sm:$0xff]   ;;  %v1319_v1 = vld [vmem:[%s1650_s1 + $0x130] sm:$0xff]   ;;  %v1322_v4 = vld [vmem:[%s1650_s1 + $0x178] sm:$0xff]  }
  0x17   :  { %v1317_v63 = vld [vmem:[%s1650_s1 + $0x1a8] sm:$0xff]   ;;  %v1320_v2 = vld [vmem:[%s1650_s1 + $0x1f0] sm:$0xff]   ;;  %v1323_v5 = vld [vmem:[%s1650_s1 + $0x138] sm:$0xff]  }
  0x18   :  { %1119 = vmatpush3.bf16.msra.mxu0 %v1272_v22  ;;  %v1321_v3 = vld [vmem:[%s1650_s1 + $0x1b0] sm:$0xff]   ;;  %v1324_v6 = vld [vmem:[%s1650_s1 + $0x1f8] sm:$0xff]   ;;  %v1329_v10 = vld [vmem:[%s1650_s1 + $0x200] sm:$0xff]  }
  0x19   :  { %1147 = vmatpush3.bf16.msra.mxu1 %v1273_v23  ;;  %1120 = vmatprep.subr.bf16.mxu0 %v1274_v24  ;;  %v1325_v7 = vld [vmem:[%s1651_s0 + $0x10] ss:$36 sps:$4 sm:$0xff]   ;;  %v1328_v9 = vld [vmem:[%s1650_s1 + $0x1b8] sm:$0xff]   ;;  %v1333_v13 = vld [vmem:[%s1650_s1 + $0x208] sm:$0xff]  }
  0x1a   :  { %1148 = vmatprep.subr.bf16.mxu1 %v1275_v25  ;;  %v1327_v8 = vld [vmem:[%s1651_s0 + $0x14] ss:$36 sps:$4 sm:$0xff]   ;;  %v1332_v12 = vld [vmem:[%s1651_s0 + $0x1c] ss:$36 sps:$4 sm:$0xff]   ;;  %v1338_v17 = vld [vmem:[%s1651_s0 + $0x64] ss:$36 sps:$4 sm:$0xff]  }
  0x1b   :  { %v1330_v11 = vld [vmem:[%s1651_s0 + $0x18] ss:$36 sps:$4 sm:$0xff]   ;;  %v1337_v16 = vld [vmem:[%s1650_s1 + $0x210] sm:$0xff]   ;;  %v1340_v18 = vld [vmem:[%s1651_s0 + $0x60] ss:$36 sps:$4 sm:$0xff]  }
  0x1c   :  { %1121 = vmatpush3.bf16.msra.mxu0 %v1276_v26  ;;  %v1334_v14 = vld [vmem:[%s1651_s0 + $0x5c] ss:$36 sps:$4 sm:$0xff]   ;;  %v1343_v22 = vld [vmem:[%s1650_s1 + $0x228] sm:$0xff]   ;;  %v1344_v23 = vld [vmem:[%s1650_s1 + $0x230] sm:$0xff]  }
  0x1d   :  { %1149 = vmatpush3.bf16.msra.mxu1 %v1277_v27  ;;  %1122 = vmatprep.subr.bf16.mxu0 %v1278_v28  ;;  %v1336_v15 = vld [vmem:[%s1651_s0 + $0x58] ss:$36 sps:$4 sm:$0xff]   ;;  %v1342_v20 = vld [vmem:[%s1650_s1 + $0x220] sm:$0xff]   ;;  %v1347_v25 = vld [vmem:[%s1651_s0 + $0x68] ss:$36 sps:$4 sm:$0xff]  }
  0x1e   :  { %1150 = vmatprep.subr.bf16.mxu1 %v1279_v29  ;;  %v1341_v19 = vld [vmem:[%s1650_s1 + $0x218] sm:$0xff]   ;;  %v1346_v21 = vld [vmem:[%s1651_s0 + $0x20] ss:$36 sps:$4 sm:$0xff]  }
  0x1f   :  { %v1345_v24 = vld [vmem:[%s1650_s1 + $0x238] sm:$0xff]  }
  0x20   :  { %1123 = vmatpush3.bf16.msra.mxu0 %v1280_v30 }
  0x21   :  { %1151 = vmatpush3.bf16.msra.mxu1 %v1281_v31  ;;  %1164 = vmatprep.subr.bf16.mxu0 %v1288_v36 }
  0x22   :  { %1192 = vmatprep.subr.bf16.mxu1 %v1290_v38 }
  0x23   :  { %735 = vmatmul.mubr.bf16.vlgmr.msra.gmra.mrb[0].mxu0 %v1282_v32 }
  0x24   :  { %784 = vmatmul.mubr.bf16.vlgmr.msra.gmra.mrb[0].mxu1 %v1285_v34  ;;  %1165 = vmatpush3.bf16.msra.mxu0 %v1289_v37 }
  0x25   :  { %1193 = vmatpush3.bf16.msra.mxu1 %v1291_v39  ;;  %1166 = vmatprep.subr.bf16.mxu0 %v1292_v40 }
  0x26   :  { %1194 = vmatprep.subr.bf16.mxu1 %v1294_v42  ;;  %742 = vmatprep.mubr.bf16.mxu0 %v1309_v57 }
  0x27   :  { %791 = vmatprep.mubr.bf16.mxu1 %v1311_v58 }
  0x28   :  { %1167 = vmatpush3.bf16.msra.mxu0 %v1293_v41 }
  0x29   :  { %1195 = vmatpush3.bf16.msra.mxu1 %v1295_v43  ;;  %1168 = vmatprep.subr.bf16.mxu0 %v1296_v44 }
  0x2a   :  { %1196 = vmatprep.subr.bf16.mxu1 %v1298_v46 }
  0x2b   :  { %743 = vmatmul.mubr.bf16.gmra.mrb[4].mxu0 %v1314_v60 }
  0x2c   :  { %1169 = vmatpush3.bf16.msra.mxu0 %v1297_v45  ;;  %792 = vmatmul.mubr.bf16.gmra.mrb[4].mxu1 %v1315_v61 }
  0x2d   :  { %1197 = vmatpush3.bf16.msra.mxu1 %v1299_v47  ;;  %1170 = vmatprep.subr.bf16.mxu0 %v1300_v48 }
  0x2e   :  { %1198 = vmatprep.subr.bf16.mxu1 %v1302_v50  ;;  %832 = vmatprep.mubr.bf16.mxu0 %v1327_v8 }
  0x2f   :  { %881 = vmatprep.mubr.bf16.mxu1 %v1332_v12 }
  0x30   :  { %1171 = vmatpush3.bf16.msra.mxu0 %v1301_v49 }
  0x31   :  { %1199 = vmatpush3.bf16.msra.mxu1 %v1303_v51  ;;  %1172 = vmatprep.subr.bf16.mxu0 %v1304_v52 }
  0x32   :  { %1200 = vmatprep.subr.bf16.mxu1 %v1306_v54 }
  0x34   :  { %1173 = vmatpush3.bf16.msra.mxu0 %v1305_v53 }
  0x35   :  { %1201 = vmatpush3.bf16.msra.mxu1 %v1307_v55  ;;  %1174 = vmatprep.subr.bf16.mxu0 %v1308_v56 }
  0x36   :  { %1202 = vmatprep.subr.bf16.mxu1 %v1316_v62 }
  0x38   :  { %1175 = vmatpush3.bf16.msra.mxu0 %v1313_v59 }
  0x39   :  { %1203 = vmatpush3.bf16.msra.mxu1 %v1317_v63  ;;  %1176 = vmatprep.subr.bf16.mxu0 %v1318_v0 }
  0x3a   :  { %1204 = vmatprep.subr.bf16.mxu1 %v1320_v2 }
  0x3c   :  { %1177 = vmatpush3.bf16.msra.mxu0 %v1319_v1 }
  0x3d   :  { %1205 = vmatpush3.bf16.msra.mxu1 %v1321_v3  ;;  %1178 = vmatprep.subr.bf16.mxu0 %v1322_v4 }
  0x3e   :  { %1206 = vmatprep.subr.bf16.mxu1 %v1324_v6 }
  0x40   :  { %1179 = vmatpush3.bf16.msra.mxu0 %v1323_v5 }
  0x41   :  { %1207 = vmatpush3.bf16.msra.mxu1 %v1328_v9  ;;  %1230 = vmatprep.subr.bf16.mxu0 %v1329_v10 }
  0x43   :  { %833 = vmatmul.mubr.bf16.vlgmr.msra.gmra.mrb[8].mxu0 %v1325_v7 }
  0x44   :  { %1231 = vmatpush3.bf16.msra.mxu0 %v1329_v10  ;;  %882 = vmatmul.mubr.bf16.vlgmr.msra.gmra.mrb[8].mxu1 %v1330_v11 }
  0x45   :  { %1232 = vmatprep.subr.bf16.mxu0 %v1333_v13  ;;  %840 = vmatprep.mubr.bf16.mxu0 %v1334_v14 }
  0x46   :  { %889 = vmatprep.mubr.bf16.mxu1 %v1338_v17 }
  0x48   :  { %1233 = vmatpush3.bf16.msra.mxu0 %v1333_v13 }
  0x49   :  { %1234 = vmatprep.subr.bf16.mxu0 %v1337_v16 }
  0x4b   :  { %841 = vmatmul.mubr.bf16.gmra.mrb[12].mxu0 %v1336_v15 }
  0x4c   :  { %1235 = vmatpush3.bf16.msra.mxu0 %v1337_v16  ;;  %890 = vmatmul.mubr.bf16.gmra.mrb[12].mxu1 %v1340_v18 }
  0x4d   :  { %1236 = vmatprep.subr.bf16.mxu0 %v1341_v19  ;;  %1246 = vmatprep.mubr.bf16.mxu0 %v1346_v21 }
  0x50   :  { %1237 = vmatpush3.bf16.msra.mxu0 %v1341_v19 }
  0x51   :  { %1238 = vmatprep.subr.bf16.mxu0 %v1342_v20 }
  0x54   :  { %1239 = vmatpush3.bf16.msra.mxu0 %v1342_v20 }
  0x55   :  { %1240 = vmatprep.subr.bf16.mxu0 %v1343_v22 }
  0x58   :  { %1241 = vmatpush3.bf16.msra.mxu0 %v1343_v22 }
  0x59   :  { %1242 = vmatprep.subr.bf16.mxu0 %v1344_v23 }
  0x5c   :  { %1243 = vmatpush3.bf16.msra.mxu0 %v1344_v23 }
  0x5d   :  { %1244 = vmatprep.subr.bf16.mxu0 %v1345_v24 }
  0x60   :  { %1245 = vmatpush3.bf16.msra.mxu0 %v1345_v24 }
  0x63   :  { %1247 = vmatmul.mubr.bf16.vlgmr.msra.gmra.mrb[16].mxu0 %v1347_v25 }
  0xf6   :  { %v1124_v26 = vpop.f32.mrb[0].mxu0 }
  0xf7   :  { %v1152_v27 = vpop.f32.mrb[0].mxu1  ;;  %v1125_v28 = vpop.f32.mrb[1].mxu0 }
  0xf8   :  { %v1126_v29 = vadd.f32 %v1125_v28, %v1124_v26  ;;  %v1153_v30 = vpop.f32.mrb[1].mxu1  ;;  %v1127_v31 = vpop.f32.mrb[2].mxu0 }
  0xf9   :  { %v1154_v32 = vadd.f32 %v1153_v30, %v1152_v27  ;;  %v1155_v33 = vpop.f32.mrb[2].mxu1  ;;  %v1128_v34 = vpop.f32.mrb[3].mxu0 }
  0xfa   :  { %v1129_v35 = vadd.f32 %v1128_v34, %v1127_v31  ;;  %v1156_v36 = vpop.f32.mrb[3].mxu1 }
  0xfb   :  { %v786_v37 = vadd.f32 %v1154_v32, %v1126_v29  ;;  %v1157_v38 = vadd.f32 %v1156_v36, %v1155_v33 }
  0xfd   :  { %v789_v39 = vadd.f32 %v1157_v38, %v1129_v35 }
  0xfe   :  { %v1130_v40 = vpop.f32.mrb[4].mxu0 }
  0xff   :  { %v1158_v41 = vpop.f32.mrb[4].mxu1  ;;  %v1131_v42 = vpop.f32.mrb[5].mxu0 }
 0x100   :  { %v1159_v43 = vpop.f32.mrb[5].mxu1  ;;  %v1132_v44 = vadd.f32 %v1131_v42, %v1130_v40  ;;  %v1133_v46 = vpop.f32.mrb[6].mxu0 }
 0x101   :  { %v1160_v45 = vadd.f32 %v1159_v43, %v1158_v41  ;;  %v1161_v47 = vpop.f32.mrb[6].mxu1  ;;  %v1134_v48 = vpop.f32.mrb[7].mxu0 }
 0x102   :  { %v1162_v49 = vpop.f32.mrb[7].mxu1  ;;  %v1135_v51 = vadd.f32 %v1134_v48, %v1133_v46 }
 0x103   :  { %v794_v50 = vadd.f32 %v1160_v45, %v1132_v44  ;;  %v1163_v52 = vadd.f32 %v1162_v49, %v1161_v47 }
 0x105   :  { %v797_v53 = vadd.f32 %v1163_v52, %v1135_v51 }
 0x116   :  { %v1180_v54 = vpop.f32.mrb[8].mxu0 }
 0x117   :  { %v1181_v55 = vpop.f32.mrb[9].mxu0  ;;  %v1208_v58 = vpop.f32.mrb[8].mxu1 }
 0x118   :  { %v1182_v56 = vadd.f32 %v1181_v55, %v1180_v54  ;;  %v1183_v57 = vpop.f32.mrb[10].mxu0  ;;  %v1209_v62 = vpop.f32.mrb[9].mxu1 }
 0x119   :  { %v1184_v59 = vpop.f32.mrb[11].mxu0  ;;  %v1210_v63 = vadd.f32 %v1209_v62, %v1208_v58  ;;  %v1211_v0 = vpop.f32.mrb[10].mxu1 }
 0x11a   :  { %v835_v60 = vadd.f32 %v1182_v56, %v786_v37  ;;  %v1185_v61 = vadd.f32 %v1184_v59, %v1183_v57  ;;  %v1212_v2 = vpop.f32.mrb[11].mxu1 }
 0x11b   :  { %v1213_v3 = vadd.f32 %v1212_v2, %v1211_v0 }
 0x11c   :  { %v838_v1 = vadd.f32 %v1185_v61, %v789_v39  ;;  %v884_v4 = vadd.f32 %v1210_v63, %v835_v60 }
 0x11e   :  { %v1186_v5 = vpop.f32.mrb[12].mxu0  ;;  %v887_v7 = vadd.f32 %v1213_v3, %v838_v1 }
 0x11f   :  { %v1187_v6 = vpop.f32.mrb[13].mxu0  ;;  %v1214_v10 = vpop.f32.mrb[12].mxu1 }
 0x120   :  { %v1188_v8 = vadd.f32 %v1187_v6, %v1186_v5  ;;  %v1189_v9 = vpop.f32.mrb[14].mxu0  ;;  %v1215_v14 = vpop.f32.mrb[13].mxu1 }
 0x121   :  { %v1190_v11 = vpop.f32.mrb[15].mxu0  ;;  %v1216_v15 = vadd.f32 %v1215_v14, %v1214_v10  ;;  %v1217_v16 = vpop.f32.mrb[14].mxu1 }
 0x122   :  { %v843_v12 = vadd.f32 %v1188_v8, %v794_v50  ;;  %v1191_v13 = vadd.f32 %v1190_v11, %v1189_v9  ;;  %v1218_v18 = vpop.f32.mrb[15].mxu1 }
 0x123   :  { %v1219_v19 = vadd.f32 %v1218_v18, %v1217_v16 }
 0x124   :  { %v846_v17 = vadd.f32 %v1191_v13, %v797_v53  ;;  %v892_v20 = vadd.f32 %v1216_v15, %v843_v12 }
 0x126   :  { %v895_v21 = vadd.f32 %v1219_v19, %v846_v17 }
 0x136   :  { %v1248_v22 = vpop.f32.mrb[16].mxu0 }
 0x137   :  { %v941_v23 = vadd.f32 %v1248_v22, %v892_v20  ;;  %v932_v24 = vpop.f32.mrb[17].mxu0 }
 0x138   :  { %v933_v25 = vadd.f32 %v932_v24, %v884_v4  ;;  %v1249_v26 = vpop.f32.mrb[18].mxu0 }
 0x139   :  { %v944_v27 = vadd.f32 %v1249_v26, %v895_v21  ;;  %v935_v28 = vpop.f32.mrb[19].mxu0  ;;  %v979_v35 = vmul.f32 %v941_v23, %v941_v23 }
 0x13a   :  { %v936_v29 = vadd.f32 %v935_v28, %v887_v7  ;;  %v977_v31 = vmul.f32 %v933_v25, %v933_v25 }
 0x13b   :  { %v1105_v30 = vpack.c.bf16 %v944_v27, %v941_v23  ;;  %v980_v38 = vmul.f32 %v944_v27, %v944_v27 }
 0x13c   :  { %v1100_v32 = vpack.c.bf16 %v936_v29, %v933_v25  ;;  %v967_v33 = vadd.f32 %v936_v29, %v933_v25  ;;  %v978_v34 = vmul.f32 %v936_v29, %v936_v29 }
 0x13d   :  { %1107 = vst [vmem:[%s1652_s2 + $0x8] sm:$0xff] %v1105_v30  }
 0x13e   :  { %1101 = vst [vmem:[%s1652_s2] sm:$0xff] %v1100_v32   ;;  %v968_v36 = vadd.f32 %v967_v33, %v941_v23  ;;  %v981_v37 = vadd.f32 %v978_v34, %v977_v31 }
 0x140   :  { %v969_v39 = vadd.f32 %v968_v36, %v944_v27  ;;  %v982_v40 = vadd.f32 %v981_v37, %v979_v35 }
 0x142   :  { %v970_v41 = vrot.slane %v969_v39, 4  ;;  %v983_v42 = vadd.f32 %v982_v40, %v980_v38 }
 0x144   :  { %v971_v43 = vadd.f32 %v970_v41, %v969_v39  ;;  %v984_v44 = vrot.slane %v983_v42, 4 }
 0x146   :  { %v972_v45 = vrot.slane %v971_v43, 2  ;;  %v985_v46 = vadd.f32 %v984_v44, %v983_v42 }
 0x148   :  { %v973_v47 = vadd.f32 %v972_v45, %v971_v43  ;;  %v986_v48 = vrot.slane %v985_v46, 2 }
 0x14a   :  { %v974_v49 = vrot.slane %v973_v47, 1  ;;  %v987_v50 = vadd.f32 %v986_v48, %v985_v46 }
 0x14c   :  { %v975_v51 = vadd.f32 %v974_v49, %v973_v47  ;;  %v988_v52 = vrot.slane %v987_v50, 1 }
 0x14e   :  { %976 = vst [vmem:[%s1653_s3] sm:$0x1] %v975_v51  ;;  %v989_v53 = vadd.f32 %v988_v52, %v987_v50 }
 0x150   :  { %990 = vst [vmem:[%s1653_s3 + $0x1] sm:$0x1] %v989_v53 }

// kernel: _lambda_.38
= control target key start
LH: loop header
LB: loop body
LE: loop exit
PB: predicated region body
PF: predicated region fallthrough
CT: control target
= control target key end

     0   :  { %s61_s0 = inlined_call_operand.vmem [shape: bf16[8,256], index: 0, kind: input, shape index: {}]   ;;  %s62_s1 = inlined_call_operand.vmem [shape: f32[2,128], index: 1, kind: input, shape index: {}]   ;;  %s63_s2 = inlined_call_operand.vmem [shape: bf16[8,128], index: 2, kind: output, shape index: {}]  }
   0x1   :  { %v11_v0 = vld [vmem:[%s61_s0] sm:$0xf] }
   0x2   :  { %v32_v1 = vld [vmem:[%s62_s1] ss:$0 sm:$0xff]  ;;  %v12_v2 = vunpack.c.l.bf16 %v11_v0  ;;  %v33_v3 = vld [vmem:[%s62_s1 + $0x1] ss:$0 sm:$0xff] }
   0x4   :  { %v18_v4 = vmul.f32 %v32_v1, %v12_v2 }
   0x6   :  { %v24_v5 = vadd.f32 %v33_v3, %v18_v4 }
   0x8   :  { %v25_v6 = vmax.f32 %v24_v5, 0.0 }
   0xa   :  { %v26_v7 = vpack.c.bf16 %v25_v6, %v25_v6 }
   0xc   :  { %27 = vst [vmem:[%s63_s2] sm:$0xf] %v26_v7 }

// kernel: _lambda_.37
= control target key start
LH: loop header
LB: loop body
LE: loop exit
PB: predicated region body
PF: predicated region fallthrough
CT: control target
= control target key end

     0   :  { %s2093_s1 = inlined_call_operand.vmem [shape: bf16[1152,256], index: 1, kind: input, shape index: {}]   ;;  %s2094_s0 = inlined_call_operand.vmem [shape: bf16[8,1152], index: 0, kind: input, shape index: {}]   ;;  %s2095_s2 = inlined_call_operand.vmem [shape: bf16[8,256], index: 2, kind: output, shape index: {0}]   ;;  %s2096_s3 = inlined_call_operand.vmem [shape: f32[1,2,256], index: 3, kind: output, shape index: {1}]  }
   0x1   :  { %v1378_v0 = vld [vmem:[%s2093_s1 + $0x4] ss:$8 sps:$4 sm:$0xff]   ;;  %v1382_v2 = vld [vmem:[%s2093_s1] ss:$8 sps:$4 sm:$0xff]   ;;  %v1384_v4 = vld [vmem:[%s2093_s1 + $0x14] ss:$8 sps:$4 sm:$0xff]  }
   0x2   :  { %v1380_v1 = vld [vmem:[%s2093_s1 + $0x204] ss:$8 sps:$4 sm:$0xff]   ;;  %915 = vmatprep.subr.bf16.mxu1 %v1378_v0  ;;  %v1383_v3 = vld [vmem:[%s2093_s1 + $0x200] ss:$8 sps:$4 sm:$0xff]   ;;  %v1386_v5 = vld [vmem:[%s2093_s1 + $0x214] ss:$8 sps:$4 sm:$0xff]  }
   0x3   :  { %997 = vmatprep.subr.bf16.mxu0 %v1380_v1  ;;  %916 = vmatpush1.bf16.msra.mxu1 %v1382_v2  ;;  %v1388_v6 = vld [vmem:[%s2093_s1 + $0x10] ss:$8 sps:$4 sm:$0xff]   ;;  %v1390_v8 = vld [vmem:[%s2093_s1 + $0x24] ss:$8 sps:$4 sm:$0xff]   ;;  %v1394_v10 = vld [vmem:[%s2093_s1 + $0x20] ss:$8 sps:$4 sm:$0xff]  }
   0x4   :  { %998 = vmatpush1.bf16.msra.mxu0 %v1383_v3  ;;  %917 = vmatprep.subr.bf16.mxu1 %v1384_v4  ;;  %v1389_v7 = vld [vmem:[%s2093_s1 + $0x210] ss:$8 sps:$4 sm:$0xff]   ;;  %v1392_v9 = vld [vmem:[%s2093_s1 + $0x224] ss:$8 sps:$4 sm:$0xff]   ;;  %v1395_v11 = vld [vmem:[%s2093_s1 + $0x220] ss:$8 sps:$4 sm:$0xff]  }
   0x5   :  { %999 = vmatprep.subr.bf16.mxu0 %v1386_v5  ;;  %v1396_v12 = vld [vmem:[%s2093_s1 + $0x34] ss:$8 sps:$4 sm:$0xff]   ;;  %v1400_v14 = vld [vmem:[%s2093_s1 + $0x30] ss:$8 sps:$4 sm:$0xff]   ;;  %v1402_v16 = vld [vmem:[%s2093_s1 + $0x44] ss:$8 sps:$4 sm:$0xff]  }
   0x6   :  { %v1398_v13 = vld [vmem:[%s2093_s1 + $0x234] ss:$8 sps:$4 sm:$0xff]   ;;  %v1401_v15 = vld [vmem:[%s2093_s1 + $0x230] ss:$8 sps:$4 sm:$0xff]   ;;  %v1404_v17 = vld [vmem:[%s2093_s1 + $0x244] ss:$8 sps:$4 sm:$0xff]  }
   0x7   :  { %918 = vmatpush1.bf16.msra.mxu1 %v1388_v6  ;;  %v1406_v18 = vld [vmem:[%s2093_s1 + $0x40] ss:$8 sps:$4 sm:$0xff]   ;;  %v1408_v20 = vld [vmem:[%s2093_s1 + $0x54] ss:$8 sps:$4 sm:$0xff]   ;;  %v1412_v22 = vld [vmem:[%s2093_s1 + $0x50] ss:$8 sps:$4 sm:$0xff]  }
   0x8   :  { %1000 = vmatpush1.bf16.msra.mxu0 %v1389_v7  ;;  %919 = vmatprep.subr.bf16.mxu1 %v1390_v8  ;;  %v1407_v19 = vld [vmem:[%s2093_s1 + $0x240] ss:$8 sps:$4 sm:$0xff]   ;;  %v1410_v21 = vld [vmem:[%s2093_s1 + $0x254] ss:$8 sps:$4 sm:$0xff]   ;;  %v1413_v23 = vld [vmem:[%s2093_s1 + $0x250] ss:$8 sps:$4 sm:$0xff]  }
   0x9   :  { %1001 = vmatprep.subr.bf16.mxu0 %v1392_v9  ;;  %v1414_v24 = vld [vmem:[%s2093_s1 + $0x64] ss:$8 sps:$4 sm:$0xff]   ;;  %v1418_v26 = vld [vmem:[%s2093_s1 + $0x60] ss:$8 sps:$4 sm:$0xff]   ;;  %v1420_v28 = vld [vmem:[%s2093_s1 + $0x74] ss:$8 sps:$4 sm:$0xff]  }
   0xa   :  { %v1416_v25 = vld [vmem:[%s2093_s1 + $0x264] ss:$8 sps:$4 sm:$0xff]   ;;  %v1419_v27 = vld [vmem:[%s2093_s1 + $0x260] ss:$8 sps:$4 sm:$0xff]   ;;  %v1422_v29 = vld [vmem:[%s2093_s1 + $0x274] ss:$8 sps:$4 sm:$0xff]  }
   0xb   :  { %920 = vmatpush1.bf16.msra.mxu1 %v1394_v10  ;;  %v1424_v30 = vld [vmem:[%s2093_s1 + $0x70] ss:$8 sps:$4 sm:$0xff]   ;;  %v1426_v32 = vld [vmem:[%s2093_s1 + $0x84] ss:$8 sps:$4 sm:$0xff]   ;;  %v1430_v34 = vld [vmem:[%s2093_s1 + $0x80] ss:$8 sps:$4 sm:$0xff]  }
   0xc   :  { %1002 = vmatpush1.bf16.msra.mxu0 %v1395_v11  ;;  %921 = vmatprep.subr.bf16.mxu1 %v1396_v12  ;;  %v1425_v31 = vld [vmem:[%s2093_s1 + $0x270] ss:$8 sps:$4 sm:$0xff]   ;;  %v1428_v33 = vld [vmem:[%s2093_s1 + $0x284] ss:$8 sps:$4 sm:$0xff]   ;;  %v1431_v35 = vld [vmem:[%s2093_s1 + $0x280] ss:$8 sps:$4 sm:$0xff]  }
   0xd   :  { %1003 = vmatprep.subr.bf16.mxu0 %v1398_v13  ;;  %v1432_v36 = vld [vmem:[%s2093_s1 + $0x94] ss:$8 sps:$4 sm:$0xff]   ;;  %v1436_v38 = vld [vmem:[%s2093_s1 + $0x90] ss:$8 sps:$4 sm:$0xff]   ;;  %v1438_v40 = vld [vmem:[%s2093_s1 + $0xa4] ss:$8 sps:$4 sm:$0xff]  }
   0xe   :  { %v1434_v37 = vld [vmem:[%s2093_s1 + $0x294] ss:$8 sps:$4 sm:$0xff]   ;;  %v1437_v39 = vld [vmem:[%s2093_s1 + $0x290] ss:$8 sps:$4 sm:$0xff]   ;;  %v1440_v41 = vld [vmem:[%s2093_s1 + $0x2a4] ss:$8 sps:$4 sm:$0xff]  }
   0xf   :  { %922 = vmatpush1.bf16.msra.mxu1 %v1400_v14  ;;  %v1442_v42 = vld [vmem:[%s2093_s1 + $0xa0] ss:$8 sps:$4 sm:$0xff]   ;;  %v1444_v44 = vld [vmem:[%s2093_s1 + $0xb4] ss:$8 sps:$4 sm:$0xff]   ;;  %v1448_v47 = vld [vmem:[%s2093_s1 + $0xb0] ss:$8 sps:$4 sm:$0xff]  }
  0x10   :  { %1004 = vmatpush1.bf16.msra.mxu0 %v1401_v15  ;;  %923 = vmatprep.subr.bf16.mxu1 %v1402_v16  ;;  %v1443_v43 = vld [vmem:[%s2093_s1 + $0x2a0] ss:$8 sps:$4 sm:$0xff]   ;;  %v1446_v45 = vld [vmem:[%s2093_s1 + $0x2b4] ss:$8 sps:$4 sm:$0xff]   ;;  %v1449_v49 = vld [vmem:[%s2093_s1 + $0x2b0] ss:$8 sps:$4 sm:$0xff]  }
  0x11   :  { %1005 = vmatprep.subr.bf16.mxu0 %v1404_v17  ;;  %v14_v46 = vld [vmem:[%s2094_s0] sm:$0xff]  ;;  %v16_v50 = vld [vmem:[%s2094_s0 + $0x10] sm:$0xff] }
  0x12   :  { %v1207_v48 = vcombine.high %v14_v46, %v14_v46  ;;  %v1450_v51 = vld [vmem:[%s2093_s1 + $0xc4] ss:$8 sps:$4 sm:$0xff]   ;;  %v1211_v53 = vcombine.high %v16_v50, %v16_v50  ;;  %v1454_v54 = vld [vmem:[%s2093_s1 + $0xc0] ss:$8 sps:$4 sm:$0xff]   ;;  %v1456_v56 = vld [vmem:[%s2093_s1 + $0xd4] ss:$8 sps:$4 sm:$0xff]   ;;  %v1206_v6 = vcombine.low %v14_v46, %v14_v46  ;;  %v1210_v7 = vcombine.low %v16_v50, %v16_v50 }
  0x13   :  { %924 = vmatpush1.bf16.msra.mxu1 %v1406_v18  ;;  %v1452_v52 = vld [vmem:[%s2093_s1 + $0x2c4] ss:$8 sps:$4 sm:$0xff]   ;;  %v1455_v55 = vld [vmem:[%s2093_s1 + $0x2c0] ss:$8 sps:$4 sm:$0xff]   ;;  %v1458_v57 = vld [vmem:[%s2093_s1 + $0x2d4] ss:$8 sps:$4 sm:$0xff]  }
  0x14   :  { %1006 = vmatpush1.bf16.msra.mxu0 %v1407_v19  ;;  %925 = vmatprep.subr.bf16.mxu1 %v1408_v20  ;;  %v1460_v58 = vld [vmem:[%s2093_s1 + $0xd0] ss:$8 sps:$4 sm:$0xff]   ;;  %v1462_v60 = vld [vmem:[%s2093_s1 + $0xe4] ss:$8 sps:$4 sm:$0xff]   ;;  %v1466_v62 = vld [vmem:[%s2093_s1 + $0xe0] ss:$8 sps:$4 sm:$0xff]  }
  0x15   :  { %1007 = vmatprep.subr.bf16.mxu0 %v1410_v21  ;;  %947 = vmatprep.mubr.bf16.mxu1 %v1207_v48  ;;  %v1461_v59 = vld [vmem:[%s2093_s1 + $0x2d0] ss:$8 sps:$4 sm:$0xff]   ;;  %v1464_v61 = vld [vmem:[%s2093_s1 + $0x2e4] ss:$8 sps:$4 sm:$0xff]   ;;  %v1467_v63 = vld [vmem:[%s2093_s1 + $0x2e0] ss:$8 sps:$4 sm:$0xff]  }
  0x16   :  { %1029 = vmatprep.mubr.bf16.mxu0 %v1211_v53  ;;  %v1468_v0 = vld [vmem:[%s2093_s1 + $0xf4] ss:$8 sps:$4 sm:$0xff]   ;;  %v1472_v2 = vld [vmem:[%s2093_s1 + $0xf0] ss:$8 sps:$4 sm:$0xff]   ;;  %v1478_v4 = vld [vmem:[%s2093_s1 + $0x104] ss:$8 sps:$4 sm:$0xff]  }
  0x17   :  { %926 = vmatpush1.bf16.msra.mxu1 %v1412_v22  ;;  %v1470_v1 = vld [vmem:[%s2093_s1 + $0x2f4] ss:$8 sps:$4 sm:$0xff]   ;;  %v1473_v3 = vld [vmem:[%s2093_s1 + $0x2f0] ss:$8 sps:$4 sm:$0xff]   ;;  %v1483_v5 = vld [vmem:[%s2093_s1 + $0x304] ss:$8 sps:$4 sm:$0xff]  }
  0x18   :  { %1008 = vmatpush1.bf16.msra.mxu0 %v1413_v23  ;;  %927 = vmatprep.subr.bf16.mxu1 %v1414_v24  ;;  %v1476_v8 = vld [vmem:[%s2093_s1 + $0x100] ss:$8 sps:$4 sm:$0xff]   ;;  %v1486_v10 = vld [vmem:[%s2093_s1 + $0x114] ss:$8 sps:$4 sm:$0xff]   ;;  %v1484_v12 = vld [vmem:[%s2093_s1 + $0x110] ss:$8 sps:$4 sm:$0xff]  }
  0x19   :  { %1009 = vmatprep.subr.bf16.mxu0 %v1416_v25  ;;  %v1481_v9 = vld [vmem:[%s2093_s1 + $0x300] ss:$8 sps:$4 sm:$0xff]   ;;  %v1489_v11 = vld [vmem:[%s2093_s1 + $0x314] ss:$8 sps:$4 sm:$0xff]   ;;  %v1487_v13 = vld [vmem:[%s2093_s1 + $0x310] ss:$8 sps:$4 sm:$0xff]  }
  0x1a   :  { %v1492_v14 = vld [vmem:[%s2093_s1 + $0x124] ss:$8 sps:$4 sm:$0xff]   ;;  %v1490_v16 = vld [vmem:[%s2093_s1 + $0x120] ss:$8 sps:$4 sm:$0xff]   ;;  %v1498_v18 = vld [vmem:[%s2093_s1 + $0x134] ss:$8 sps:$4 sm:$0xff]  }
  0x1b   :  { %928 = vmatpush1.bf16.msra.mxu1 %v1418_v26  ;;  %v1495_v15 = vld [vmem:[%s2093_s1 + $0x324] ss:$8 sps:$4 sm:$0xff]   ;;  %v1493_v17 = vld [vmem:[%s2093_s1 + $0x320] ss:$8 sps:$4 sm:$0xff]   ;;  %v1501_v19 = vld [vmem:[%s2093_s1 + $0x334] ss:$8 sps:$4 sm:$0xff]  }
  0x1c   :  { %1010 = vmatpush1.bf16.msra.mxu0 %v1419_v27  ;;  %929 = vmatprep.subr.bf16.mxu1 %v1420_v28  ;;  %v1496_v20 = vld [vmem:[%s2093_s1 + $0x130] ss:$8 sps:$4 sm:$0xff]   ;;  %v1504_v22 = vld [vmem:[%s2093_s1 + $0x144] ss:$8 sps:$4 sm:$0xff]   ;;  %v1502_v24 = vld [vmem:[%s2093_s1 + $0x140] ss:$8 sps:$4 sm:$0xff]  }
  0x1d   :  { %1011 = vmatprep.subr.bf16.mxu0 %v1422_v29  ;;  %v1499_v21 = vld [vmem:[%s2093_s1 + $0x330] ss:$8 sps:$4 sm:$0xff]   ;;  %v1507_v23 = vld [vmem:[%s2093_s1 + $0x344] ss:$8 sps:$4 sm:$0xff]   ;;  %v1505_v25 = vld [vmem:[%s2093_s1 + $0x340] ss:$8 sps:$4 sm:$0xff]  }
  0x1e   :  { %v1510_v26 = vld [vmem:[%s2093_s1 + $0x154] ss:$8 sps:$4 sm:$0xff]   ;;  %v1508_v28 = vld [vmem:[%s2093_s1 + $0x150] ss:$8 sps:$4 sm:$0xff]   ;;  %v1540_v50 = vld [vmem:[%s2093_s1 + $0x1a4] ss:$8 sps:$4 sm:$0xff]  }
  0x1f   :  { %930 = vmatpush1.bf16.msra.mxu1 %v1424_v30  ;;  %v1513_v27 = vld [vmem:[%s2093_s1 + $0x354] ss:$8 sps:$4 sm:$0xff]   ;;  %v1511_v29 = vld [vmem:[%s2093_s1 + $0x350] ss:$8 sps:$4 sm:$0xff]   ;;  %v1516_v30 = vld [vmem:[%s2093_s1 + $0x164] ss:$8 sps:$4 sm:$0xff]  }
  0x20   :  { %1012 = vmatpush1.bf16.msra.mxu0 %v1425_v31  ;;  %931 = vmatprep.subr.bf16.mxu1 %v1426_v32  ;;  %v1519_v31 = vld [vmem:[%s2093_s1 + $0x364] ss:$8 sps:$4 sm:$0xff]   ;;  %v1534_v46 = vld [vmem:[%s2093_s1 + $0x194] ss:$8 sps:$4 sm:$0xff]   ;;  %v1532_v48 = vld [vmem:[%s2093_s1 + $0x190] ss:$8 sps:$4 sm:$0xff]  }
  0x21   :  { %1013 = vmatprep.subr.bf16.mxu0 %v1428_v33  ;;  %v1904_v32 = vld [vmem:[%s2094_s0 + $0x8] sm:$0xff]  ;;  %v1909_v33 = vld [vmem:[%s2094_s0 + $0x18] sm:$0xff] }
  0x22   :  { %v1541_v53 = vld [vmem:[%s2093_s1 + $0x3a0] ss:$8 sps:$4 sm:$0xff]  }
  0x23   :  { %932 = vmatpush1.bf16.msra.mxu1 %v1430_v34  ;;  %v1514_v34 = vld [vmem:[%s2093_s1 + $0x160] ss:$8 sps:$4 sm:$0xff]  }
  0x24   :  { %1014 = vmatpush1.bf16.msra.mxu0 %v1431_v35  ;;  %933 = vmatprep.subr.bf16.mxu1 %v1432_v36  ;;  %v1517_v35 = vld [vmem:[%s2093_s1 + $0x360] ss:$8 sps:$4 sm:$0xff]   ;;  %v1209_v36 = vcombine.high %v1904_v32, %v1904_v32 }
  0x25   :  { %1015 = vmatprep.subr.bf16.mxu0 %v1434_v37  ;;  %v1213_v37 = vcombine.high %v1909_v33, %v1909_v33 }
  0x27   :  { %934 = vmatpush1.bf16.msra.mxu1 %v1436_v38  ;;  %v1522_v38 = vld [vmem:[%s2093_s1 + $0x174] ss:$8 sps:$4 sm:$0xff]  }
  0x28   :  { %1016 = vmatpush1.bf16.msra.mxu0 %v1437_v39  ;;  %935 = vmatprep.subr.bf16.mxu1 %v1438_v40  ;;  %v1525_v39 = vld [vmem:[%s2093_s1 + $0x374] ss:$8 sps:$4 sm:$0xff]   ;;  %v1520_v40 = vld [vmem:[%s2093_s1 + $0x170] ss:$8 sps:$4 sm:$0xff]  }
  0x29   :  { %1017 = vmatprep.subr.bf16.mxu0 %v1440_v41  ;;  %v1523_v41 = vld [vmem:[%s2093_s1 + $0x370] ss:$8 sps:$4 sm:$0xff]  }
  0x2b   :  { %936 = vmatpush1.bf16.msra.mxu1 %v1442_v42  ;;  %v1528_v42 = vld [vmem:[%s2093_s1 + $0x184] ss:$8 sps:$4 sm:$0xff]  }
  0x2c   :  { %1018 = vmatpush1.bf16.msra.mxu0 %v1443_v43  ;;  %937 = vmatprep.subr.bf16.mxu1 %v1444_v44  ;;  %v1531_v43 = vld [vmem:[%s2093_s1 + $0x384] ss:$8 sps:$4 sm:$0xff]   ;;  %v1526_v44 = vld [vmem:[%s2093_s1 + $0x180] ss:$8 sps:$4 sm:$0xff]  }
  0x2d   :  { %1019 = vmatprep.subr.bf16.mxu0 %v1446_v45  ;;  %v1529_v45 = vld [vmem:[%s2093_s1 + $0x380] ss:$8 sps:$4 sm:$0xff]  }
  0x2f   :  { %938 = vmatpush1.bf16.msra.mxu1 %v1448_v47  ;;  %v1537_v47 = vld [vmem:[%s2093_s1 + $0x394] ss:$8 sps:$4 sm:$0xff]  }
  0x30   :  { %1020 = vmatpush1.bf16.msra.mxu0 %v1449_v49  ;;  %939 = vmatprep.subr.bf16.mxu1 %v1450_v51  ;;  %v1535_v49 = vld [vmem:[%s2093_s1 + $0x390] ss:$8 sps:$4 sm:$0xff]   ;;  %v1543_v51 = vld [vmem:[%s2093_s1 + $0x3a4] ss:$8 sps:$4 sm:$0xff]  }
  0x31   :  { %1021 = vmatprep.subr.bf16.mxu0 %v1452_v52  ;;  %v1538_v52 = vld [vmem:[%s2093_s1 + $0x1a0] ss:$8 sps:$4 sm:$0xff]  }
  0x33   :  { %940 = vmatpush1.bf16.msra.mxu1 %v1454_v54  ;;  %v1546_v54 = vld [vmem:[%s2093_s1 + $0x1b4] ss:$8 sps:$4 sm:$0xff]  }
  0x34   :  { %1022 = vmatpush1.bf16.msra.mxu0 %v1455_v55  ;;  %941 = vmatprep.subr.bf16.mxu1 %v1456_v56  ;;  %v1549_v55 = vld [vmem:[%s2093_s1 + $0x3b4] ss:$8 sps:$4 sm:$0xff]   ;;  %v1544_v56 = vld [vmem:[%s2093_s1 + $0x1b0] ss:$8 sps:$4 sm:$0xff]  }
  0x35   :  { %1023 = vmatprep.subr.bf16.mxu0 %v1458_v57  ;;  %v1547_v57 = vld [vmem:[%s2093_s1 + $0x3b0] ss:$8 sps:$4 sm:$0xff]  }
  0x37   :  { %942 = vmatpush1.bf16.msra.mxu1 %v1460_v58  ;;  %v1552_v58 = vld [vmem:[%s2093_s1 + $0x1c4] ss:$8 sps:$4 sm:$0xff]  }
  0x38   :  { %1024 = vmatpush1.bf16.msra.mxu0 %v1461_v59  ;;  %943 = vmatprep.subr.bf16.mxu1 %v1462_v60  ;;  %v1555_v59 = vld [vmem:[%s2093_s1 + $0x3c4] ss:$8 sps:$4 sm:$0xff]   ;;  %v1550_v60 = vld [vmem:[%s2093_s1 + $0x1c0] ss:$8 sps:$4 sm:$0xff]  }
  0x39   :  { %1025 = vmatprep.subr.bf16.mxu0 %v1464_v61  ;;  %v1553_v61 = vld [vmem:[%s2093_s1 + $0x3c0] ss:$8 sps:$4 sm:$0xff]  }
  0x3b   :  { %944 = vmatpush1.bf16.msra.mxu1 %v1466_v62  ;;  %v1558_v62 = vld [vmem:[%s2093_s1 + $0x1d4] ss:$8 sps:$4 sm:$0xff]  }
  0x3c   :  { %1026 = vmatpush1.bf16.msra.mxu0 %v1467_v63  ;;  %945 = vmatprep.subr.bf16.mxu1 %v1468_v0  ;;  %v1561_v63 = vld [vmem:[%s2093_s1 + $0x3d4] ss:$8 sps:$4 sm:$0xff]   ;;  %v1556_v0 = vld [vmem:[%s2093_s1 + $0x1d0] ss:$8 sps:$4 sm:$0xff]  }
  0x3d   :  { %1027 = vmatprep.subr.bf16.mxu0 %v1470_v1  ;;  %v1559_v1 = vld [vmem:[%s2093_s1 + $0x3d0] ss:$8 sps:$4 sm:$0xff]  }
  0x3f   :  { %946 = vmatpush1.bf16.msra.mxu1 %v1472_v2  ;;  %v1564_v2 = vld [vmem:[%s2093_s1 + $0x1e4] ss:$8 sps:$4 sm:$0xff]  }
  0x40   :  { %1028 = vmatpush1.bf16.msra.mxu0 %v1473_v3  ;;  %956 = vmatprep.subr.bf16.mxu1 %v1478_v4  ;;  %v1567_v3 = vld [vmem:[%s2093_s1 + $0x3e4] ss:$8 sps:$4 sm:$0xff]   ;;  %v1562_v4 = vld [vmem:[%s2093_s1 + $0x1e0] ss:$8 sps:$4 sm:$0xff]  }
  0x41   :  { %1038 = vmatprep.subr.bf16.mxu0 %v1483_v5  ;;  %v1565_v5 = vld [vmem:[%s2093_s1 + $0x3e0] ss:$8 sps:$4 sm:$0xff]  }
  0x42   :  { %948 = vmatmul.mubr.bf16.vlgmr.msra.gmra.mrb[0].mxu1 %v1206_v6  ;;  %v1570_v6 = vld [vmem:[%s2093_s1 + $0x1f4] ss:$8 sps:$4 sm:$0xff]  }
  0x43   :  { %1030 = vmatmul.mubr.bf16.vlgmr.msra.gmra.mrb[0].mxu0 %v1210_v7  ;;  %957 = vmatpush1.bf16.msra.mxu1 %v1476_v8  ;;  %v1573_v7 = vld [vmem:[%s2093_s1 + $0x3f4] ss:$8 sps:$4 sm:$0xff]   ;;  %v1568_v8 = vld [vmem:[%s2093_s1 + $0x1f0] ss:$8 sps:$4 sm:$0xff]  }
  0x44   :  { %1039 = vmatpush1.bf16.msra.mxu0 %v1481_v9  ;;  %958 = vmatprep.subr.bf16.mxu1 %v1486_v10  ;;  %v1571_v9 = vld [vmem:[%s2093_s1 + $0x3f0] ss:$8 sps:$4 sm:$0xff]   ;;  %v1580_v10 = vld [vmem:[%s2093_s1 + $0x404] ss:$8 sps:$4 sm:$0xff]  }
  0x45   :  { %1040 = vmatprep.subr.bf16.mxu0 %v1489_v11  ;;  %988 = vmatprep.mubr.bf16.mxu1 %v1209_v36  ;;  %v1208_v11 = vcombine.low %v1904_v32, %v1904_v32 }
  0x46   :  { %1070 = vmatprep.mubr.bf16.mxu0 %v1213_v37 }
  0x47   :  { %959 = vmatpush1.bf16.msra.mxu1 %v1484_v12  ;;  %v1212_v12 = vcombine.low %v1909_v33, %v1909_v33 }
  0x48   :  { %1041 = vmatpush1.bf16.msra.mxu0 %v1487_v13  ;;  %960 = vmatprep.subr.bf16.mxu1 %v1492_v14  ;;  %v1578_v13 = vld [vmem:[%s2093_s1 + $0x400] ss:$8 sps:$4 sm:$0xff]   ;;  %v1583_v14 = vld [vmem:[%s2093_s1 + $0x414] ss:$8 sps:$4 sm:$0xff]  }
  0x49   :  { %1042 = vmatprep.subr.bf16.mxu0 %v1495_v15  ;;  %v1581_v15 = vld [vmem:[%s2093_s1 + $0x410] ss:$8 sps:$4 sm:$0xff]  }
  0x4b   :  { %961 = vmatpush1.bf16.msra.mxu1 %v1490_v16  ;;  %v1603_v16 = vmov 0  }
  0x4c   :  { %1043 = vmatpush1.bf16.msra.mxu0 %v1493_v17  ;;  %962 = vmatprep.subr.bf16.mxu1 %v1498_v18  ;;  %v1586_v17 = vld [vmem:[%s2093_s1 + $0x424] ss:$8 sps:$4 sm:$0xff]   ;;  %v1584_v18 = vld [vmem:[%s2093_s1 + $0x420] ss:$8 sps:$4 sm:$0xff]  }
  0x4d   :  { %1044 = vmatprep.subr.bf16.mxu0 %v1501_v19  ;;  %v1589_v19 = vld [vmem:[%s2093_s1 + $0x434] ss:$8 sps:$4 sm:$0xff]  }
  0x4f   :  { %963 = vmatpush1.bf16.msra.mxu1 %v1496_v20  ;;  %v1587_v20 = vld [vmem:[%s2093_s1 + $0x430] ss:$8 sps:$4 sm:$0xff]  }
  0x50   :  { %1045 = vmatpush1.bf16.msra.mxu0 %v1499_v21  ;;  %964 = vmatprep.subr.bf16.mxu1 %v1504_v22  ;;  %v1592_v21 = vld [vmem:[%s2093_s1 + $0x444] ss:$8 sps:$4 sm:$0xff]   ;;  %v1590_v22 = vld [vmem:[%s2093_s1 + $0x440] ss:$8 sps:$4 sm:$0xff]  }
  0x51   :  { %1046 = vmatprep.subr.bf16.mxu0 %v1507_v23  ;;  %v1595_v23 = vld [vmem:[%s2093_s1 + $0x454] ss:$8 sps:$4 sm:$0xff]  }
  0x53   :  { %965 = vmatpush1.bf16.msra.mxu1 %v1502_v24  ;;  %v1593_v24 = vld [vmem:[%s2093_s1 + $0x450] ss:$8 sps:$4 sm:$0xff]  }
  0x54   :  { %1047 = vmatpush1.bf16.msra.mxu0 %v1505_v25  ;;  %966 = vmatprep.subr.bf16.mxu1 %v1510_v26  ;;  %v1598_v25 = vld [vmem:[%s2093_s1 + $0x464] ss:$8 sps:$4 sm:$0xff]   ;;  %v1596_v26 = vld [vmem:[%s2093_s1 + $0x460] ss:$8 sps:$4 sm:$0xff]  }
  0x55   :  { %1048 = vmatprep.subr.bf16.mxu0 %v1513_v27  ;;  %v1601_v27 = vld [vmem:[%s2093_s1 + $0x474] ss:$8 sps:$4 sm:$0xff]  }
  0x57   :  { %967 = vmatpush1.bf16.msra.mxu1 %v1508_v28  ;;  %v1599_v28 = vld [vmem:[%s2093_s1 + $0x470] ss:$8 sps:$4 sm:$0xff]  }
  0x58   :  { %1049 = vmatpush1.bf16.msra.mxu0 %v1511_v29  ;;  %968 = vmatprep.subr.bf16.mxu1 %v1516_v30  ;;  %v1602_v29 = vld [vmem:[%s2094_s0 + $0x20] ss:$0 sps:$4 sm:$0xff]  }
  0x59   :  { %1050 = vmatprep.subr.bf16.mxu0 %v1519_v31 }
  0x5b   :  { %969 = vmatpush1.bf16.msra.mxu1 %v1514_v34 }
  0x5c   :  { %1051 = vmatpush1.bf16.msra.mxu0 %v1517_v35  ;;  %970 = vmatprep.subr.bf16.mxu1 %v1522_v38 }
  0x5d   :  { %1052 = vmatprep.subr.bf16.mxu0 %v1525_v39 }
  0x5f   :  { %971 = vmatpush1.bf16.msra.mxu1 %v1520_v40 }
  0x60   :  { %1053 = vmatpush1.bf16.msra.mxu0 %v1523_v41  ;;  %972 = vmatprep.subr.bf16.mxu1 %v1528_v42 }
  0x61   :  { %1054 = vmatprep.subr.bf16.mxu0 %v1531_v43 }
  0x63   :  { %973 = vmatpush1.bf16.msra.mxu1 %v1526_v44 }
  0x64   :  { %1055 = vmatpush1.bf16.msra.mxu0 %v1529_v45  ;;  %974 = vmatprep.subr.bf16.mxu1 %v1534_v46 }
  0x65   :  { %1056 = vmatprep.subr.bf16.mxu0 %v1537_v47 }
  0x67   :  { %975 = vmatpush1.bf16.msra.mxu1 %v1532_v48  ;;  %v1604_v48 = vmov 1966171168  }
  0x68   :  { %1057 = vmatpush1.bf16.msra.mxu0 %v1535_v49  ;;  %976 = vmatprep.subr.bf16.mxu1 %v1540_v50  ;;  %v1145_v49 = vunpack.c.l.s4 %v1604_v48  ;;  %v1147_v50 = vlaneseq }
  0x69   :  { %1058 = vmatprep.subr.bf16.mxu0 %v1543_v51 }
  0x6a   :  { %vm1161_vm0 = vcmp.lt.s32.totalorder %v1147_v50, 256 }
  0x6b   :  { %977 = vmatpush1.bf16.msra.mxu1 %v1538_v52 }
  0x6c   :  { %1059 = vmatpush1.bf16.msra.mxu0 %v1541_v53  ;;  %978 = vmatprep.subr.bf16.mxu1 %v1546_v54 }
  0x6d   :  { %1060 = vmatprep.subr.bf16.mxu0 %v1549_v55 }
  0x6f   :  { %979 = vmatpush1.bf16.msra.mxu1 %v1544_v56 }
  0x70   :  { %1061 = vmatpush1.bf16.msra.mxu0 %v1547_v57  ;;  %980 = vmatprep.subr.bf16.mxu1 %v1552_v58 }
  0x71   :  { %1062 = vmatprep.subr.bf16.mxu0 %v1555_v59  ;;  %v1146_v59 = vunpack.c.0.s8 %v1145_v49 }
  0x73   :  { %981 = vmatpush1.bf16.msra.mxu1 %v1550_v60  ;;  %v1148_v60 = vshrl.u32 %v1147_v50, 7 }
  0x74   :  { %1063 = vmatpush1.bf16.msra.mxu0 %v1553_v61  ;;  %982 = vmatprep.subr.bf16.mxu1 %v1558_v62 }
  0x75   :  { %1064 = vmatprep.subr.bf16.mxu0 %v1561_v63 }
  0x77   :  { %983 = vmatpush1.bf16.msra.mxu1 %v1556_v0 }
  0x78   :  { %1065 = vmatpush1.bf16.msra.mxu0 %v1559_v1  ;;  %984 = vmatprep.subr.bf16.mxu1 %v1564_v2 }
  0x79   :  { %1066 = vmatprep.subr.bf16.mxu0 %v1567_v3 }
  0x7b   :  { %985 = vmatpush1.bf16.msra.mxu1 %v1562_v4 }
  0x7c   :  { %1067 = vmatpush1.bf16.msra.mxu0 %v1565_v5  ;;  %986 = vmatprep.subr.bf16.mxu1 %v1570_v6  ;;  %v1149_v5 = vsub.s32 %v1146_v59, %v1148_v60 }
  0x7d   :  { %1068 = vmatprep.subr.bf16.mxu0 %v1573_v7 }
  0x7f   :  { %987 = vmatpush1.bf16.msra.mxu1 %v1568_v8 }
  0x80   :  { %1069 = vmatpush1.bf16.msra.mxu0 %v1571_v9 }
  0x81   :  { %1079 = vmatprep.subr.bf16.mxu0 %v1580_v10 }
  0x82   :  { %989 = vmatmul.mubr.bf16.vlgmr.msra.gmra.mrb[0].mxu1 %v1208_v11 }
  0x83   :  { %1071 = vmatmul.mubr.bf16.vlgmr.msra.gmra.mrb[0].mxu0 %v1212_v12 }
  0x84   :  { %1080 = vmatpush1.bf16.msra.mxu0 %v1578_v13  ;;  %1111 = vmatprep.mubr.bf16.mxu0 %v1603_v16 }
  0x85   :  { %1081 = vmatprep.subr.bf16.mxu0 %v1583_v14 }
  0x88   :  { %1082 = vmatpush1.bf16.msra.mxu0 %v1581_v15 }
  0x89   :  { %1083 = vmatprep.subr.bf16.mxu0 %v1586_v17 }
  0x8c   :  { %1084 = vmatpush1.bf16.msra.mxu0 %v1584_v18 }
  0x8d   :  { %1085 = vmatprep.subr.bf16.mxu0 %v1589_v19 }
  0x90   :  { %1086 = vmatpush1.bf16.msra.mxu0 %v1587_v20 }
  0x91   :  { %1087 = vmatprep.subr.bf16.mxu0 %v1592_v21 }
  0x94   :  { %1088 = vmatpush1.bf16.msra.mxu0 %v1590_v22 }
  0x95   :  { %1089 = vmatprep.subr.bf16.mxu0 %v1595_v23 }
  0x98   :  { %1090 = vmatpush1.bf16.msra.mxu0 %v1593_v24 }
  0x99   :  { %1091 = vmatprep.subr.bf16.mxu0 %v1598_v25 }
  0x9c   :  { %1092 = vmatpush1.bf16.msra.mxu0 %v1596_v26 }
  0x9d   :  { %1093 = vmatprep.subr.bf16.mxu0 %v1601_v27 }
  0xa0   :  { %1094 = vmatpush1.bf16.msra.mxu0 %v1599_v28 }
  0xa3   :  { %1112 = vmatmul.mubr.bf16.vlgmr.msra.gmra.mrb[0].mxu0 %v1602_v29 }
 0x155   :  { %v990_v30 = vpop.f32.mrb[0].mxu1 }
 0x156   :  { %v992_v31 = vpop.f32.mrb[1].mxu1 }
 0x157   :  { %v994_v32 = vpop.f32.mrb[2].mxu1 }
 0x158   :  { %v995_v33 = vpop.f32.mrb[3].mxu1 }
 0x176   :  { %v1113_v34 = vpop.f32.mrb[0].mxu0 }
 0x177   :  { %v1362_v35 = vadd.f32 %v1113_v34, %v990_v30  ;;  %v1115_v36 = vpop.f32.mrb[1].mxu0 }
 0x178   :  { %v1363_v37 = vadd.f32 %v1115_v36, %v992_v31  ;;  %v1117_v38 = vpop.f32.mrb[2].mxu0 }
 0x179   :  { %v1129_v39 = vrot.slane %v1362_v35, 4  ;;  %v1164_v40 = vmul.f32 %v1362_v35, %v1362_v35  ;;  %v1118_v41 = vpop.f32.mrb[3].mxu0 }
 0x17a   :  { %v1361_v42 = vpack.c.bf16 %v1363_v37, %v1362_v35  ;;  %v1135_v43 = vrot.slane %v1363_v37, 4  ;;  %v1165_v44 = vmul.f32 %v1363_v37, %v1363_v37 }
 0x17b   :  { %v1130_v45 = vadd.f32 %v1362_v35, %v1129_v39  ;;  %v1166_v46 = vrot.slane %v1164_v40, 4 }
 0x17c   :  { %1128 = vst [vmem:[%s2095_s2] sm:$0xff] %v1361_v42  ;;  %v1136_v47 = vadd.f32 %v1363_v37, %v1135_v43  ;;  %v1172_v51 = vrot.slane %v1165_v44, 4 }
 0x17d   :  { %v1131_v52 = vrot.slane %v1130_v45, 2  ;;  %v1167_v53 = vadd.f32 %v1166_v46, %v1164_v40 }
 0x17e   :  { %v1137_v54 = vrot.slane %v1136_v47, 2  ;;  %v1173_v55 = vadd.f32 %v1172_v51, %v1165_v44 }
 0x17f   :  { %v1132_v56 = vadd.f32 %v1131_v52, %v1130_v45  ;;  %v1168_v57 = vrot.slane %v1167_v53, 2 }
 0x180   :  { %v1138_v58 = vadd.f32 %v1137_v54, %v1136_v47  ;;  %v1174_v61 = vrot.slane %v1173_v55, 2 }
 0x181   :  { %v1133_v62 = vrot.slane %v1132_v56, 1  ;;  %v1169_v63 = vadd.f32 %v1168_v57, %v1167_v53 }
 0x182   :  { %v1139_v0 = vrot.slane %v1138_v58, 1  ;;  %v1175_v1 = vadd.f32 %v1174_v61, %v1173_v55 }
 0x183   :  { %v1134_v2 = vadd.f32 %v1133_v62, %v1132_v56  ;;  %v1170_v3 = vrot.slane %v1169_v63, 1 }
 0x184   :  { %v1140_v4 = vadd.f32 %v1139_v0, %v1138_v58  ;;  %v1176_v6 = vrot.slane %v1175_v1, 1 }
 0x185   :  { %v1171_v7 = vadd.f32 %v1170_v3, %v1169_v63 }
 0x186   :  { %v1143_v8 = vcombine.low %v1134_v2, %v1140_v4  ;;  %v1177_v9 = vadd.f32 %v1176_v6, %v1175_v1 }
 0x188   :  { %v1150_v10 = vrot.slane %v1143_v8, %v1149_v5  ;;  %v1180_v11 = vcombine.low %v1171_v7, %v1177_v9 }
 0x18a   :  { %v1157_v12 = vrot.slane %v1150_v10, %v1149_v5  ;;  %v1187_v13 = vrot.slane %v1180_v11, %v1149_v5 }
 0x18c   :  { %1163 = vst.msk [vmem:[%s2096_s3] ss:$2 sm:$0x3] %vm1161_vm0, %v1157_v12  ;;  %v1194_v14 = vrot.slane %v1187_v13, %v1149_v5 }
 0x18e   :  { %1360 = vst.msk [vmem:[%s2096_s3 + $0x1] ss:$2 sm:$0x3] %vm1161_vm0, %v1194_v14 }

// kernel: _lambda_.40
= control target key start
LH: loop header
LB: loop body
LE: loop exit
PB: predicated region body
PF: predicated region fallthrough
CT: control target
= control target key end

     0   :  { %s107_s0 = inlined_call_operand.vmem [shape: bf16[8,128], index: 0, kind: input, shape index: {}]   ;;  %s108_s1 = inlined_call_operand.vmem [shape: f32[2,128], index: 1, kind: input, shape index: {}]   ;;  %s109_s2 = inlined_call_operand.vmem [shape: bf16[8,256], index: 2, kind: input, shape index: {}]   ;;  %s110_s3 = inlined_call_operand.vmem [shape: f32[2,128], index: 3, kind: input, shape index: {}]   ;;  %s111_s4 = inlined_call_operand.vmem [shape: bf16[8,128], index: 4, kind: output, shape index: {}]  }
   0x1   :  { %v20_v0 = vld [vmem:[%s107_s0] sm:$0xf]  ;;  %v58_v3 = vld [vmem:[%s109_s2 + $0x4] sm:$0xf] }
   0x2   :  { %v56_v1 = vld [vmem:[%s108_s1] ss:$0 sm:$0xff]  ;;  %v21_v2 = vunpack.c.l.bf16 %v20_v0  ;;  %v57_v5 = vld [vmem:[%s108_s1 + $0x1] ss:$0 sm:$0xff]  ;;  %v35_v6 = vunpack.c.l.bf16 %v58_v3 }
   0x3   :  { %v59_v4 = vld [vmem:[%s110_s3] ss:$0 sm:$0xff]  ;;  %v60_v10 = vld [vmem:[%s110_s3 + $0x1] ss:$0 sm:$0xff] }
   0x4   :  { %v27_v7 = vmul.f32 %v56_v1, %v21_v2  ;;  %v41_v8 = vmul.f32 %v59_v4, %v35_v6 }
   0x6   :  { %v33_v9 = vadd.f32 %v57_v5, %v27_v7 }
   0x8   :  { %v42_v11 = vadd.f32 %v41_v8, %v33_v9 }
   0xa   :  { %v48_v12 = vadd.f32 %v60_v10, %v42_v11 }
   0xc   :  { %v49_v13 = vmax.f32 %v48_v12, 0.0 }
   0xe   :  { %v50_v14 = vpack.c.bf16 %v49_v13, %v49_v13 }
  0x10   :  { %51 = vst [vmem:[%s111_s4] sm:$0xf] %v50_v14 }

// kernel: _lambda_.46
= control target key start
LH: loop header
LB: loop body
LE: loop exit
PB: predicated region body
PF: predicated region fallthrough
CT: control target
= control target key end

     0   :  { %s61_s0 = inlined_call_operand.vmem [shape: bf16[8,128], index: 0, kind: input, shape index: {}]   ;;  %s62_s1 = inlined_call_operand.vmem [shape: f32[2,128], index: 1, kind: input, shape index: {}]   ;;  %s63_s2 = inlined_call_operand.vmem [shape: bf16[8,128], index: 2, kind: output, shape index: {}]  }
   0x1   :  { %v11_v0 = vld [vmem:[%s61_s0] sm:$0xf] }
   0x2   :  { %v32_v1 = vld [vmem:[%s62_s1] ss:$0 sm:$0xff]  ;;  %v12_v2 = vunpack.c.l.bf16 %v11_v0  ;;  %v33_v3 = vld [vmem:[%s62_s1 + $0x1] ss:$0 sm:$0xff] }
   0x4   :  { %v18_v4 = vmul.f32 %v32_v1, %v12_v2 }
   0x6   :  { %v24_v5 = vadd.f32 %v33_v3, %v18_v4 }
   0x8   :  { %v25_v6 = vmax.f32 %v24_v5, 0.0 }
   0xa   :  { %v26_v7 = vpack.c.bf16 %v25_v6, %v25_v6 }
   0xc   :  { %27 = vst [vmem:[%s63_s2] sm:$0xf] %v26_v7 }

// kernel: _lambda_.48
= control target key start
LH: loop header
LB: loop body
LE: loop exit
PB: predicated region body
PF: predicated region fallthrough
CT: control target
= control target key end

     0   :  { %s75_s0 = inlined_call_operand.vmem [shape: bf16[8,128], index: 0, kind: input, shape index: {}]   ;;  %s76_s1 = inlined_call_operand.vmem [shape: f32[2,128], index: 1, kind: input, shape index: {}]   ;;  %s77_s2 = inlined_call_operand.vmem [shape: bf16[8,128], index: 2, kind: input, shape index: {}]   ;;  %s78_s3 = inlined_call_operand.vmem [shape: bf16[8,128], index: 3, kind: output, shape index: {}]  }
   0x1   :  { %v14_v0 = vld [vmem:[%s75_s0] sm:$0xf] }
   0x2   :  { %v38_v1 = vld [vmem:[%s76_s1] ss:$0 sm:$0xff]  ;;  %v15_v2 = vunpack.c.l.bf16 %v14_v0  ;;  %v39_v4 = vld [vmem:[%s76_s1 + $0x1] ss:$0 sm:$0xff] }
   0x3   :  { %v28_v3 = vld [vmem:[%s77_s2] sm:$0xf] }
   0x4   :  { %v21_v5 = vmul.f32 %v38_v1, %v15_v2  ;;  %v29_v6 = vunpack.c.l.bf16 %v28_v3 }
   0x6   :  { %v27_v7 = vadd.f32 %v39_v4, %v21_v5 }
   0x8   :  { %v30_v8 = vadd.f32 %v29_v6, %v27_v7 }
   0xa   :  { %v31_v9 = vmax.f32 %v30_v8, 0.0 }
   0xc   :  { %v32_v10 = vpack.c.bf16 %v31_v9, %v31_v9 }
   0xe   :  { %33 = vst [vmem:[%s78_s3] sm:$0xf] %v32_v10 }

// kernel: _lambda_.39
= control target key start
LH: loop header
LB: loop body
LE: loop exit
PB: predicated region body
PF: predicated region fallthrough
CT: control target
= control target key end

     0   :  { %vm1134_vm0 = vmmov 0   ;;  %s1395_s1 = inlined_call_operand.vmem [shape: bf16[1152,128], index: 1, kind: input, shape index: {}]   ;;  %s1396_s0 = inlined_call_operand.vmem [shape: bf16[8,1152], index: 0, kind: input, shape index: {}]   ;;  %s1397_s2 = inlined_call_operand.vmem [shape: bf16[8,128], index: 2, kind: output, shape index: {0}]   ;;  %s1398_s3 = inlined_call_operand.vmem [shape: f32[1,2,128], index: 3, kind: output, shape index: {1}]  }
   0x1   :  { %v1052_v0 = vld [vmem:[%s1395_s1 + $0x40] sm:$0xff]   ;;  %v1056_v4 = vld [vmem:[%s1395_s1 + $0x48] sm:$0xff]   ;;  %v1060_v8 = vld [vmem:[%s1395_s1 + $0x50] sm:$0xff]  }
   0x2   :  { %v1053_v1 = vld [vmem:[%s1395_s1 + $0xc0] sm:$0xff]   ;;  %933 = vmatprep.subr.bf16.mxu0 %v1052_v0  ;;  %v1057_v5 = vld [vmem:[%s1395_s1 + $0xc8] sm:$0xff]   ;;  %v1061_v9 = vld [vmem:[%s1395_s1 + $0xd0] sm:$0xff]  }
   0x3   :  { %v1054_v2 = vld [vmem:[%s1395_s1] sm:$0xff]   ;;  %955 = vmatprep.subr.bf16.mxu1 %v1053_v1  ;;  %v1058_v6 = vld [vmem:[%s1395_s1 + $0x8] sm:$0xff]   ;;  %v1062_v10 = vld [vmem:[%s1395_s1 + $0x10] sm:$0xff]  }
   0x4   :  { %v1055_v3 = vld [vmem:[%s1395_s1 + $0x80] sm:$0xff]   ;;  %934 = vmatpush3.bf16.msra.mxu0 %v1054_v2  ;;  %v1059_v7 = vld [vmem:[%s1395_s1 + $0x88] sm:$0xff]   ;;  %v1063_v11 = vld [vmem:[%s1395_s1 + $0x90] sm:$0xff]  }
   0x5   :  { %956 = vmatpush3.bf16.msra.mxu1 %v1055_v3  ;;  %935 = vmatprep.subr.bf16.mxu0 %v1056_v4  ;;  %v1064_v12 = vld [vmem:[%s1395_s1 + $0x58] sm:$0xff]   ;;  %v1068_v16 = vld [vmem:[%s1395_s1 + $0x60] sm:$0xff]   ;;  %v1072_v20 = vld [vmem:[%s1395_s1 + $0x68] sm:$0xff]  }
   0x6   :  { %957 = vmatprep.subr.bf16.mxu1 %v1057_v5  ;;  %v1065_v13 = vld [vmem:[%s1395_s1 + $0xd8] sm:$0xff]   ;;  %v1069_v17 = vld [vmem:[%s1395_s1 + $0xe0] sm:$0xff]   ;;  %v1073_v21 = vld [vmem:[%s1395_s1 + $0xe8] sm:$0xff]  }
   0x7   :  { %v1066_v14 = vld [vmem:[%s1395_s1 + $0x18] sm:$0xff]   ;;  %v1070_v18 = vld [vmem:[%s1395_s1 + $0x20] sm:$0xff]   ;;  %v1074_v22 = vld [vmem:[%s1395_s1 + $0x28] sm:$0xff]  }
   0x8   :  { %936 = vmatpush3.bf16.msra.mxu0 %v1058_v6  ;;  %v1067_v15 = vld [vmem:[%s1395_s1 + $0x98] sm:$0xff]   ;;  %v1071_v19 = vld [vmem:[%s1395_s1 + $0xa0] sm:$0xff]   ;;  %v1075_v23 = vld [vmem:[%s1395_s1 + $0xa8] sm:$0xff]  }
   0x9   :  { %958 = vmatpush3.bf16.msra.mxu1 %v1059_v7  ;;  %937 = vmatprep.subr.bf16.mxu0 %v1060_v8  ;;  %v1076_v24 = vld [vmem:[%s1395_s1 + $0x70] sm:$0xff]   ;;  %v1080_v28 = vld [vmem:[%s1395_s1 + $0x78] sm:$0xff]   ;;  %v14_v32 = vld [vmem:[%s1396_s0] sm:$0xff] }
   0xa   :  { %959 = vmatprep.subr.bf16.mxu1 %v1061_v9  ;;  %v1077_v25 = vld [vmem:[%s1395_s1 + $0xf0] sm:$0xff]   ;;  %v1081_v29 = vld [vmem:[%s1395_s1 + $0xf8] sm:$0xff]   ;;  %v15_v33 = vld [vmem:[%s1396_s0 + $0x8] sm:$0xff]  ;;  %v852_v34 = vcombine.low %v14_v32, %v14_v32  ;;  %v853_v35 = vcombine.high %v14_v32, %v14_v32 }
   0xb   :  { %v1078_v26 = vld [vmem:[%s1395_s1 + $0x30] sm:$0xff]   ;;  %v1082_v30 = vld [vmem:[%s1395_s1 + $0x38] sm:$0xff]   ;;  %v854_v36 = vcombine.low %v15_v33, %v15_v33  ;;  %v855_v37 = vcombine.high %v15_v33, %v15_v33  ;;  %v1088_v38 = vld [vmem:[%s1395_s1 + $0x140] sm:$0xff]  }
   0xc   :  { %938 = vmatpush3.bf16.msra.mxu0 %v1062_v10  ;;  %v1079_v27 = vld [vmem:[%s1395_s1 + $0xb0] sm:$0xff]   ;;  %v1083_v31 = vld [vmem:[%s1395_s1 + $0xb8] sm:$0xff]   ;;  %v1089_v39 = vld [vmem:[%s1395_s1 + $0x100] sm:$0xff]   ;;  %659 = vmatprep.mubr.bf16.mxu0 %v853_v35 }
   0xd   :  { %960 = vmatpush3.bf16.msra.mxu1 %v1063_v11  ;;  %939 = vmatprep.subr.bf16.mxu0 %v1064_v12  ;;  %v1090_v40 = vld [vmem:[%s1395_s1 + $0x1c0] sm:$0xff]   ;;  %v1092_v42 = vld [vmem:[%s1395_s1 + $0x148] sm:$0xff]   ;;  %v1096_v46 = vld [vmem:[%s1395_s1 + $0x150] sm:$0xff]  }
   0xe   :  { %961 = vmatprep.subr.bf16.mxu1 %v1065_v13  ;;  %699 = vmatprep.mubr.bf16.mxu1 %v855_v37  ;;  %v1091_v41 = vld [vmem:[%s1395_s1 + $0x180] sm:$0xff]   ;;  %v1093_v43 = vld [vmem:[%s1395_s1 + $0x108] sm:$0xff]   ;;  %v1097_v47 = vld [vmem:[%s1395_s1 + $0x110] sm:$0xff]   ;;  %v1133_v13 = vmov 0.0  }
   0xf   :  { %v1094_v44 = vld [vmem:[%s1395_s1 + $0x1c8] sm:$0xff]   ;;  %v1098_v48 = vld [vmem:[%s1395_s1 + $0x1d0] sm:$0xff]   ;;  %v1100_v50 = vld [vmem:[%s1395_s1 + $0x158] sm:$0xff]  }
  0x10   :  { %940 = vmatpush3.bf16.msra.mxu0 %v1066_v14  ;;  %v1095_v45 = vld [vmem:[%s1395_s1 + $0x188] sm:$0xff]   ;;  %v1099_v49 = vld [vmem:[%s1395_s1 + $0x190] sm:$0xff]   ;;  %v1101_v51 = vld [vmem:[%s1395_s1 + $0x118] sm:$0xff]  }
  0x11   :  { %962 = vmatpush3.bf16.msra.mxu1 %v1067_v15  ;;  %941 = vmatprep.subr.bf16.mxu0 %v1068_v16  ;;  %v1102_v52 = vld [vmem:[%s1395_s1 + $0x1d8] sm:$0xff]   ;;  %v1104_v54 = vld [vmem:[%s1395_s1 + $0x160] sm:$0xff]   ;;  %v1108_v58 = vld [vmem:[%s1395_s1 + $0x168] sm:$0xff]  }
  0x12   :  { %963 = vmatprep.subr.bf16.mxu1 %v1069_v17  ;;  %v1103_v53 = vld [vmem:[%s1395_s1 + $0x198] sm:$0xff]   ;;  %v1105_v55 = vld [vmem:[%s1395_s1 + $0x120] sm:$0xff]   ;;  %v1109_v59 = vld [vmem:[%s1395_s1 + $0x128] sm:$0xff]  }
  0x13   :  { %v1106_v56 = vld [vmem:[%s1395_s1 + $0x1e0] sm:$0xff]   ;;  %v1110_v60 = vld [vmem:[%s1395_s1 + $0x1e8] sm:$0xff]   ;;  %v1112_v62 = vld [vmem:[%s1395_s1 + $0x170] sm:$0xff]  }
  0x14   :  { %942 = vmatpush3.bf16.msra.mxu0 %v1070_v18  ;;  %v1107_v57 = vld [vmem:[%s1395_s1 + $0x1a0] sm:$0xff]   ;;  %v1111_v61 = vld [vmem:[%s1395_s1 + $0x1a8] sm:$0xff]   ;;  %v1113_v63 = vld [vmem:[%s1395_s1 + $0x130] sm:$0xff]  }
  0x15   :  { %964 = vmatpush3.bf16.msra.mxu1 %v1071_v19  ;;  %943 = vmatprep.subr.bf16.mxu0 %v1072_v20  ;;  %v1114_v0 = vld [vmem:[%s1395_s1 + $0x1f0] sm:$0xff]   ;;  %v1116_v2 = vld [vmem:[%s1395_s1 + $0x178] sm:$0xff]   ;;  %v1124_v12 = vld [vmem:[%s1395_s1 + $0x200] sm:$0xff]  }
  0x16   :  { %965 = vmatprep.subr.bf16.mxu1 %v1073_v21  ;;  %v1115_v1 = vld [vmem:[%s1395_s1 + $0x1b0] sm:$0xff]   ;;  %v1117_v3 = vld [vmem:[%s1395_s1 + $0x138] sm:$0xff]   ;;  %v1125_v14 = vld [vmem:[%s1395_s1 + $0x208] sm:$0xff]  }
  0x17   :  { %v1118_v4 = vld [vmem:[%s1395_s1 + $0x1f8] sm:$0xff]   ;;  %v16_v5 = vld [vmem:[%s1396_s0 + $0x10] sm:$0xff]  ;;  %v1128_v17 = vld [vmem:[%s1395_s1 + $0x220] sm:$0xff]  }
  0x18   :  { %944 = vmatpush3.bf16.msra.mxu0 %v1074_v22  ;;  %v857_v6 = vcombine.high %v16_v5, %v16_v5  ;;  %v1121_v7 = vld [vmem:[%s1395_s1 + $0x1b8] sm:$0xff]   ;;  %v856_v8 = vcombine.low %v16_v5, %v16_v5  ;;  %v1126_v15 = vld [vmem:[%s1395_s1 + $0x210] sm:$0xff]   ;;  %v1129_v18 = vld [vmem:[%s1395_s1 + $0x228] sm:$0xff]  }
  0x19   :  { %966 = vmatpush3.bf16.msra.mxu1 %v1075_v23  ;;  %945 = vmatprep.subr.bf16.mxu0 %v1076_v24  ;;  %v17_v9 = vld [vmem:[%s1396_s0 + $0x18] sm:$0xff]  ;;  %v1130_v19 = vld [vmem:[%s1395_s1 + $0x230] sm:$0xff]   ;;  %v1132_v21 = vld [vmem:[%s1396_s0 + $0x20] ss:$0 sps:$4 sm:$0xff]  }
  0x1a   :  { %967 = vmatprep.subr.bf16.mxu1 %v1077_v25  ;;  %v858_v10 = vcombine.low %v17_v9, %v17_v9  ;;  %v859_v11 = vcombine.high %v17_v9, %v17_v9  ;;  %v1127_v16 = vld [vmem:[%s1395_s1 + $0x218] sm:$0xff]  }
  0x1b   :  { %v1131_v20 = vld [vmem:[%s1395_s1 + $0x238] sm:$0xff]  }
  0x1c   :  { %946 = vmatpush3.bf16.msra.mxu0 %v1078_v26 }
  0x1d   :  { %968 = vmatpush3.bf16.msra.mxu1 %v1079_v27  ;;  %947 = vmatprep.subr.bf16.mxu0 %v1080_v28 }
  0x1e   :  { %969 = vmatprep.subr.bf16.mxu1 %v1081_v29 }
  0x20   :  { %948 = vmatpush3.bf16.msra.mxu0 %v1082_v30 }
  0x21   :  { %970 = vmatpush3.bf16.msra.mxu1 %v1083_v31  ;;  %977 = vmatprep.subr.bf16.mxu0 %v1088_v38 }
  0x22   :  { %999 = vmatprep.subr.bf16.mxu1 %v1090_v40 }
  0x23   :  { %660 = vmatmul.mubr.bf16.vlgmr.msra.gmra.mrb[0].mxu0 %v852_v34 }
  0x24   :  { %700 = vmatmul.mubr.bf16.vlgmr.msra.gmra.mrb[0].mxu1 %v854_v36  ;;  %978 = vmatpush3.bf16.msra.mxu0 %v1089_v39 }
  0x25   :  { %1000 = vmatpush3.bf16.msra.mxu1 %v1091_v41  ;;  %979 = vmatprep.subr.bf16.mxu0 %v1092_v42 }
  0x26   :  { %1001 = vmatprep.subr.bf16.mxu1 %v1094_v44  ;;  %739 = vmatprep.mubr.bf16.mxu0 %v857_v6 }
  0x27   :  { %779 = vmatprep.mubr.bf16.mxu1 %v859_v11 }
  0x28   :  { %980 = vmatpush3.bf16.msra.mxu0 %v1093_v43 }
  0x29   :  { %1002 = vmatpush3.bf16.msra.mxu1 %v1095_v45  ;;  %981 = vmatprep.subr.bf16.mxu0 %v1096_v46 }
  0x2a   :  { %1003 = vmatprep.subr.bf16.mxu1 %v1098_v48 }
  0x2c   :  { %982 = vmatpush3.bf16.msra.mxu0 %v1097_v47 }
  0x2d   :  { %1004 = vmatpush3.bf16.msra.mxu1 %v1099_v49  ;;  %983 = vmatprep.subr.bf16.mxu0 %v1100_v50 }
  0x2e   :  { %1005 = vmatprep.subr.bf16.mxu1 %v1102_v52 }
  0x30   :  { %984 = vmatpush3.bf16.msra.mxu0 %v1101_v51 }
  0x31   :  { %1006 = vmatpush3.bf16.msra.mxu1 %v1103_v53  ;;  %985 = vmatprep.subr.bf16.mxu0 %v1104_v54 }
  0x32   :  { %1007 = vmatprep.subr.bf16.mxu1 %v1106_v56 }
  0x34   :  { %986 = vmatpush3.bf16.msra.mxu0 %v1105_v55 }
  0x35   :  { %1008 = vmatpush3.bf16.msra.mxu1 %v1107_v57  ;;  %987 = vmatprep.subr.bf16.mxu0 %v1108_v58 }
  0x36   :  { %1009 = vmatprep.subr.bf16.mxu1 %v1110_v60 }
  0x38   :  { %988 = vmatpush3.bf16.msra.mxu0 %v1109_v59 }
  0x39   :  { %1010 = vmatpush3.bf16.msra.mxu1 %v1111_v61  ;;  %989 = vmatprep.subr.bf16.mxu0 %v1112_v62 }
  0x3a   :  { %1011 = vmatprep.subr.bf16.mxu1 %v1114_v0 }
  0x3c   :  { %990 = vmatpush3.bf16.msra.mxu0 %v1113_v63 }
  0x3d   :  { %1012 = vmatpush3.bf16.msra.mxu1 %v1115_v1  ;;  %991 = vmatprep.subr.bf16.mxu0 %v1116_v2 }
  0x3e   :  { %1013 = vmatprep.subr.bf16.mxu1 %v1118_v4 }
  0x40   :  { %992 = vmatpush3.bf16.msra.mxu0 %v1117_v3 }
  0x41   :  { %1014 = vmatpush3.bf16.msra.mxu1 %v1121_v7  ;;  %1030 = vmatprep.subr.bf16.mxu0 %v1133_v13 }
  0x43   :  { %740 = vmatmul.mubr.bf16.vlgmr.msra.gmra.mrb[4].mxu0 %v856_v8 }
  0x44   :  { %1031 = vmatpush3.bf16.msra.mxu0 %v1124_v12  ;;  %780 = vmatmul.mubr.bf16.vlgmr.msra.gmra.mrb[4].mxu1 %v858_v10 }
  0x45   :  { %1032 = vmatprep.subr.bf16.mxu0 %v1133_v13  ;;  %1046 = vmatprep.mubr.msk.bf16.mxu0 %vm1134_vm0, %v1133_v13 }
  0x48   :  { %1033 = vmatpush3.bf16.msra.mxu0 %v1125_v14 }
  0x49   :  { %1034 = vmatprep.subr.bf16.mxu0 %v1133_v13 }
  0x4c   :  { %1035 = vmatpush3.bf16.msra.mxu0 %v1126_v15 }
  0x4d   :  { %1036 = vmatprep.subr.bf16.mxu0 %v1133_v13 }
  0x50   :  { %1037 = vmatpush3.bf16.msra.mxu0 %v1127_v16 }
  0x51   :  { %1038 = vmatprep.subr.bf16.mxu0 %v1133_v13 }
  0x54   :  { %1039 = vmatpush3.bf16.msra.mxu0 %v1128_v17 }
  0x55   :  { %1040 = vmatprep.subr.bf16.mxu0 %v1133_v13 }
  0x58   :  { %1041 = vmatpush3.bf16.msra.mxu0 %v1129_v18 }
  0x59   :  { %1042 = vmatprep.subr.bf16.mxu0 %v1133_v13 }
  0x5c   :  { %1043 = vmatpush3.bf16.msra.mxu0 %v1130_v19 }
  0x5d   :  { %1044 = vmatprep.subr.bf16.mxu0 %v1133_v13 }
  0x60   :  { %1045 = vmatpush3.bf16.msra.mxu0 %v1131_v20 }
  0x63   :  { %1047 = vmatmul.mubr.bf16.vlgmr.msra.gmra.mrb[8].mxu0 %v1132_v21 }
  0xf6   :  { %v949_v22 = vpop.f32.mrb[0].mxu0 }
  0xf7   :  { %v971_v23 = vpop.f32.mrb[0].mxu1  ;;  %v950_v24 = vpop.f32.mrb[1].mxu0 }
  0xf8   :  { %v972_v25 = vpop.f32.mrb[1].mxu1  ;;  %v951_v26 = vadd.f32 %v950_v24, %v949_v22  ;;  %v952_v28 = vpop.f32.mrb[2].mxu0 }
  0xf9   :  { %v973_v27 = vadd.f32 %v972_v25, %v971_v23  ;;  %v974_v29 = vpop.f32.mrb[2].mxu1  ;;  %v953_v30 = vpop.f32.mrb[3].mxu0 }
  0xfa   :  { %v975_v31 = vpop.f32.mrb[3].mxu1 }
  0xfb   :  { %v702_v32 = vadd.f32 %v973_v27, %v951_v26 }
 0x116   :  { %v993_v33 = vpop.f32.mrb[4].mxu0 }
 0x117   :  { %v994_v34 = vpop.f32.mrb[5].mxu0  ;;  %v1015_v35 = vpop.f32.mrb[4].mxu1 }
 0x118   :  { %v995_v36 = vadd.f32 %v994_v34, %v993_v33  ;;  %v996_v37 = vpop.f32.mrb[6].mxu0  ;;  %v1016_v38 = vpop.f32.mrb[5].mxu1 }
 0x119   :  { %v997_v39 = vpop.f32.mrb[7].mxu0  ;;  %v1017_v40 = vadd.f32 %v1016_v38, %v1015_v35  ;;  %v1018_v41 = vpop.f32.mrb[6].mxu1 }
 0x11a   :  { %v742_v42 = vadd.f32 %v995_v36, %v702_v32  ;;  %v1019_v43 = vpop.f32.mrb[7].mxu1 }
 0x11c   :  { %v782_v44 = vadd.f32 %v1017_v40, %v742_v42 }
 0x136   :  { %v821_v45 = vpop.f32.mrb[8].mxu0 }
 0x137   :  { %v822_v46 = vadd.f32 %v821_v45, %v782_v44  ;;  %v1048_v47 = vpop.f32.mrb[9].mxu0 }
 0x138   :  { %v824_v48 = vpop.f32.mrb[10].mxu0 }
 0x139   :  { %v827_v49 = vpack.c.bf16 %v822_v46, %v822_v46  ;;  %v829_v50 = vrot.slane %v822_v46, 4  ;;  %v836_v51 = vmul.f32 %v822_v46, %v822_v46  ;;  %v1049_v52 = vpop.f32.mrb[11].mxu0 }
 0x13b   :  { %828 = vst [vmem:[%s1397_s2] sm:$0xf] %v827_v49  ;;  %v830_v53 = vadd.f32 %v829_v50, %v822_v46  ;;  %v837_v54 = vrot.slane %v836_v51, 4 }
 0x13d   :  { %v831_v55 = vrot.slane %v830_v53, 2  ;;  %v838_v56 = vadd.f32 %v837_v54, %v836_v51 }
 0x13f   :  { %v832_v57 = vadd.f32 %v831_v55, %v830_v53  ;;  %v839_v58 = vrot.slane %v838_v56, 2 }
 0x141   :  { %v833_v59 = vrot.slane %v832_v57, 1  ;;  %v840_v60 = vadd.f32 %v839_v58, %v838_v56 }
 0x143   :  { %v834_v61 = vadd.f32 %v833_v59, %v832_v57  ;;  %v841_v62 = vrot.slane %v840_v60, 1 }
 0x145   :  { %835 = vst [vmem:[%s1398_s3] sm:$0x1] %v834_v61  ;;  %v842_v63 = vadd.f32 %v841_v62, %v840_v60 }
 0x147   :  { %843 = vst [vmem:[%s1398_s3 + $0x1] sm:$0x1] %v842_v63 }

// kernel: _lambda_.53
= control target key start
LH: loop header
LB: loop body
LE: loop exit
PB: predicated region body
PF: predicated region fallthrough
CT: control target
= control target key end

     0   :  { %v265_v3 = vmov 0.0|0.0   ;;  %v266_v6 = vmov 0.0   ;;  %vm267_vm0 = vmmov 0   ;;  %vm25_vm1 = vcmask 1043456   ;;  %s366_s0 = inlined_call_operand.vmem [shape: bf16[2,4,128], index: 0, kind: input, shape index: {}]   ;;  %s367_s1 = inlined_call_operand.vmem [shape: f32[128,128], index: 1, kind: input, shape index: {}]   ;;  %s368_s2 = inlined_call_operand.vmem [shape: f32[1,128], index: 2, kind: input, shape index: {}]   ;;  %s369_s3 = inlined_call_operand.hbm [shape: f32[2,128], index: 3, kind: output, shape index: {}]  }
   0x1   :  { %v52_v0 = vld [vmem:[%s367_s1] sm:$0xff]  ;;  %v53_v1 = vld [vmem:[%s367_s1 + $0x8] sm:$0xff]  ;;  %v54_v2 = vld [vmem:[%s367_s1 + $0x10] sm:$0xff]  ;;  %213 = vmatprep.subr.bf16.mxu0 %v265_v3  ;;  %19 = vst [vmem:[#allocation2] sm:$0x3] %v266_v6  ;;  %210 = vmatprep.mubr.msk.f32.mxu0 %vm267_vm0, %v266_v6 }
   0x2   :  { %v214_v4 = vpack.c.bf16 %v53_v1, %v52_v0  ;;  %v55_v5 = vld [vmem:[%s367_s1 + $0x18] sm:$0xff]  ;;  %v56_v8 = vld [vmem:[%s367_s1 + $0x20] sm:$0xff]  ;;  %v57_v9 = vld [vmem:[%s367_s1 + $0x28] sm:$0xff] }
   0x3   :  { %v217_v7 = vpack.c.bf16 %v55_v5, %v54_v2  ;;  %v21_v10 = vld [vmem:[%s366_s0] sm:$0x3]  ;;  %v22_v11 = vld [vmem:[%s366_s0 + $0x2] sm:$0x3] }
   0x4   :  { %215 = vmatpush3.bf16.msra.mxu0 %v214_v4  ;;  %v23_v12 = vunpack.c.l.bf16 %v21_v10  ;;  %v24_v13 = vunpack.c.l.bf16 %v22_v11 }
   0x5   :  { %216 = vmatprep.subr.bf16.mxu0 %v265_v3 }
   0x6   :  { %8 = vsyncpa [#allocation4], 0  ;;  %v220_v14 = vpack.c.bf16 %v57_v9, %v56_v8  ;;  %v58_v15 = vld [vmem:[%s367_s1 + $0x30] sm:$0xff]  ;;  %v59_v16 = vld [vmem:[%s367_s1 + $0x38] sm:$0xff]  ;;  %v26_v17 = vsel %vm25_vm1, %v23_v12, 0.0  ;;  %v33_v18 = vsel %vm25_vm1, %v24_v13, 0.0 }
   0x7   :  { %v27_v19 = vrot.slane %v26_v17, 4  ;;  %v34_v20 = vrot.slane %v33_v18, 4  ;;  %v223_v21 = vpack.c.bf16 %v59_v16, %v58_v15  ;;  %v60_v24 = vld [vmem:[%s367_s1 + $0x40] sm:$0xff]  ;;  %v61_v25 = vld [vmem:[%s367_s1 + $0x48] sm:$0xff]  ;;  %v62_v31 = vld [vmem:[%s367_s1 + $0x50] sm:$0xff]  ;;  %vm42_vm2 = vcmask 1041409  }
   0x8   :  { %218 = vmatpush3.bf16.msra.mxu0 %v217_v7  ;;  %v226_v28 = vpack.c.bf16 %v61_v25, %v60_v24  ;;  %v63_v32 = vld [vmem:[%s367_s1 + $0x58] sm:$0xff]  ;;  %v20_v36 = vld [vmem:[#allocation2] sm:$0x3]  ;;  %v65_v40 = vld [vmem:[%s367_s1 + $0x68] sm:$0xff]  ;;  %s268_s22 = smov [#allocation3]  }
   0x9   :  { %219 = vmatprep.subr.bf16.mxu0 %v265_v3  ;;  %v28_v22 = vadd.f32 %v27_v19, %v26_v17  ;;  %v35_v23 = vadd.f32 %v34_v20, %v33_v18  ;;  %v229_v35 = vpack.c.bf16 %v63_v32, %v62_v31  ;;  %v64_v39 = vld [vmem:[%s367_s1 + $0x60] sm:$0xff]  ;;  %v66_v44 = vld [vmem:[%s367_s1 + $0x70] sm:$0xff]  ;;  %v67_v45 = vld [vmem:[%s367_s1 + $0x78] sm:$0xff]  ;;  %s152_s23 = sshll.u32 %s268_s22, 4  ;;  %s153_s23 = int_to_ptr.vmem [resolvable:$true] %s152_s23 }
   0xa   :  { %v232_v43 = vpack.c.bf16 %v65_v40, %v64_v39  ;;  %v235_v46 = vpack.c.bf16 %v67_v45, %v66_v44  ;;  %v160_v49 = vld [vmem:[%s368_s2] ss:$0 sm:$0xff]  ;;  %s241_s1 = scalar_lea.vmem %s153_s23, 32  ;;  %p246_p1 = scmp.lt.s32.totalorder %s153_s23, %s153_s23 }
   0xb   :  { %v29_v26 = vrot.slane %v28_v22, 2  ;;  %v36_v27 = vrot.slane %v35_v23, 2  ;;  %p242_p0 = scmp.ne.s32.totalorder %s153_s23, %s241_s1  ;;  %p247_p2 = scmp.lt.s32.totalorder %s241_s1, %s241_s1 }
   0xc   :  { %221 = vmatpush3.bf16.msra.mxu0 %v220_v14 }
   0xd   :  { %222 = vmatprep.subr.bf16.mxu0 %v265_v3  ;;  %v30_v29 = vadd.f32 %v29_v26, %v28_v22  ;;  %v37_v30 = vadd.f32 %v36_v27, %v35_v23  ;;  %p248_p3 = por %p247_p2, %p246_p1 }
   0xf   :  { %v31_v33 = vrot.slane %v30_v29, 1  ;;  %v38_v34 = vrot.slane %v37_v30, 1  ;;  %p249_p4 = pnand %p248_p3, %p242_p0 }
  0x10   :  { %224 = vmatpush3.bf16.msra.mxu0 %v223_v21 }
  0x11   :  { %225 = vmatprep.subr.bf16.mxu0 %v265_v3  ;;  %v32_v37 = vadd.f32 %v31_v33, %v30_v29  ;;  %v39_v38 = vadd.f32 %v38_v34, %v37_v30 }
  0x13   :  { %v43_v41 = vsel %vm42_vm2, %v39_v38, %v32_v37 }
  0x14   :  { %227 = vmatpush3.bf16.msra.mxu0 %v226_v28  ;;  %v45_v42 = vadd.f32 %v43_v41, %v20_v36 }
  0x15   :  { %228 = vmatprep.subr.bf16.mxu0 %v265_v3 }
  0x16   :  { %46 = vst [vmem:[#allocation2] sm:$0x3] %v45_v42 }
  0x18   :  { %230 = vmatpush3.bf16.msra.mxu0 %v229_v35 }
  0x19   :  { %231 = vmatprep.subr.bf16.mxu0 %v265_v3 }
  0x1c   :  { %233 = vmatpush3.bf16.msra.mxu0 %v232_v43 }
  0x1d   :  { %234 = vmatprep.subr.bf16.mxu0 %v265_v3  ;;  %v50_v47 = vld [vmem:[#allocation2] sm:$0x3] }
  0x1e   :  { %v51_v48 = vmul.f32 0.25, %v50_v47 }
  0x20   :  { %236 = vmatpush3.bf16.msra.mxu0 %v235_v46 }
  0x23   :  { %211 = vmatmul.mubr.f32.vlgmr.msra.gmra.mrb[0].mxu0 %v51_v48 }
  0xf6   :  { %v141_v50 = vpop.f32.mrb[0].mxu0 }
  0xf7   :  { %v142_v51 = vadd.f32 %v160_v49, %v141_v50  ;;  %v212_v52 = vpop.f32.mrb[1].mxu0 }
  0xf9   :  { %145 = vst [vmem:[#allocation3] sm:$0x3] %v142_v51 }
  0xfa   :  { %252 = shalt.err (!%p249_p4)
}
  0xfb   :  { %s253_s26 = scalar_lea.hbm %s369_s3, 32 }
  0xfc   :  { %p254_p5 = scmp.ne.s32.totalorder %s369_s3, %s253_s26  ;;  %p257_p6 = scmp.lt.u32.totalorder %s253_s26, %s369_s3 }
  0xfe   :  { %p259_p7 = pnand %p257_p6, %p254_p5 }
 0x100   :  { %262 = shalt.err (!%p259_p7)
}
 0x101   :  { %155 = dma.vmem_to_hbm [thread:$0]  %s153_s23, 32, %s369_s3, [#allocation4]  }
 0x102   :  { %263 = dma.done.wait [#allocation4], 32  }
 0x103   :  { %264 = vsyncadd [#allocation4], 4294967264 }
 0x104   :  { %159 = vsyncpa [#allocation4], 1 }

</bundles_post_ra>
